<compile_context>
chip_gen: v7x
topology: tpu7x:2x2x1
jax: 0.10.0
libtpu: 0.0.40
codegen_flags: <defaults>
</compile_context>

<pallas_src>
import functools

import jax
import jax.numpy as jnp
from jax.experimental import pallas as pl
from jax.experimental.pallas import tpu as pltpu


# ---------------------------------------------------------------------------
# Kernel 1: y = act(x @ w + b), single K block (used for both convs).
# ---------------------------------------------------------------------------
def _mm_bias_act_kernel(x_ref, w_ref, b_ref, o_ref, *, relu):
    y = jnp.dot(x_ref[...], w_ref[...], preferred_element_type=jnp.float32)
    y = y + b_ref[...]
    if relu:
        y = jnp.maximum(y, 0.0)
    o_ref[...] = y.astype(o_ref.dtype)


def _pick_m_tiling(M, *, tile_cap=1024, tile_lo=256, full_cap=2048):
    """Return (m_tile, padded_M).  Preference order:
       (a) M small enough -> one full-M tile (no pad, no per-step overhead),
       (b) largest divisor of M in [tile_lo, tile_cap] that's a multiple of 8
           (no pad copy; >=2 grid steps so v7x can megacore-shard),
       (c) full M if it still fits comfortably in VMEM,
       (d) tile_cap with a padded M (rare fallback)."""
    if M <= tile_cap:
        return M, M
    d = (tile_cap // 8) * 8
    while d >= tile_lo:
        if M % d == 0:
            return d, M
        d -= 8
    if M <= full_cap:
        return M, M
    tile = (tile_cap // 8) * 8
    mp = ((M + tile - 1) // tile) * tile
    return tile, mp


def matmul_bias_act(x, w, b, *, relu, out_dtype=jnp.float32):
    """y = act(x @ w + b).  x:(M,K), w:(K,N), b:(N,).  bf16 operands on the
    MXU, f32 accumulate.  M is tiled on a 'parallel' grid axis; K is a single
    block (K <= 288 for these convs)."""
    M, K = x.shape
    Kw, N = w.shape
    assert K == Kw and b.shape == (N,)

    x = x.astype(jnp.bfloat16)
    w = w.astype(jnp.bfloat16)
    b2 = b.reshape(1, N).astype(jnp.float32)

    m_tile, mp = _pick_m_tiling(M)
    if mp != M:  # fallback only; tiles are chosen to divide M for these shapes
        x = jnp.pad(x, ((0, mp - M), (0, 0)))
    nm = mp // m_tile

    out = pl.pallas_call(
        functools.partial(_mm_bias_act_kernel, relu=relu),
        out_shape=jax.ShapeDtypeStruct((mp, N), out_dtype),
        grid_spec=pltpu.PrefetchScalarGridSpec(
            num_scalar_prefetch=0,
            grid=(nm,),
            in_specs=[
                pl.BlockSpec((m_tile, K), lambda i: (i, 0)),
                pl.BlockSpec((K, N), lambda i: (0, 0)),
                pl.BlockSpec((1, N), lambda i: (0, 0)),
            ],
            out_specs=pl.BlockSpec((m_tile, N), lambda i: (i, 0)),
        ),
        compiler_params=pltpu.CompilerParams(
            dimension_semantics=("parallel",)),
    )(x, w, b2)

    if mp != M:
        out = out[:M]
    return out


# ---------------------------------------------------------------------------
# Kernel 2: fused fc1 (K-tiled) + relu + fc2 + bias in one pallas_call.
# ---------------------------------------------------------------------------
def _fused_fc_kernel(x_ref, w1_ref, b1_ref, w2_ref, b2_ref, o_ref, acc_ref):
    k = pl.program_id(1)  # grid = (m_tiles, k_tiles); K reduction innermost

    @pl.when(k == 0)
    def _():
        acc_ref[...] = jnp.zeros_like(acc_ref)

    acc_ref[...] += jnp.dot(x_ref[...], w1_ref[...],
                            preferred_element_type=jnp.float32)

    @pl.when(k == pl.num_programs(1) - 1)
    def _():
        h = jnp.maximum(acc_ref[...] + b1_ref[...], 0.0).astype(jnp.bfloat16)
        y = jnp.dot(h, w2_ref[...], preferred_element_type=jnp.float32)
        o_ref[...] = (y + b2_ref[...]).astype(o_ref.dtype)


def fused_fc(x, w1, b1, w2, b2, *, out_dtype=jnp.float32):
    """relu(x @ w1 + b1) @ w2 + b2.
    x:(M,K) with K=36864; w1:(K,128); w2:(128,128) (N pre-padded from 10).
    The fc1 reduction is K-tiled (weight-DMA bound); the tiny fc2 matmul runs
    inside the k==last epilogue on the already-resident (M,128) accumulator."""
    M, K = x.shape
    _, N1 = w1.shape
    _, N2 = w2.shape
    x = x.astype(jnp.bfloat16)

    # Big K tile at small batch (pure weight DMA); smaller at large batch so
    # the double-buffered x tile stays bounded.
    k_tile = 18432 if M <= 64 else 9216
    if k_tile >= K:
        k_tile = K
    assert K % k_tile == 0
    nk = K // k_tile

    if M <= 256:
        m_tile, mp = M, M
    else:
        m_tile = 256
        mp = ((M + m_tile - 1) // m_tile) * m_tile
        if mp != M:
            x = jnp.pad(x, ((0, mp - M), (0, 0)))
    nm = mp // m_tile

    b1r = b1.reshape(1, N1).astype(jnp.float32)
    b2r = b2.reshape(1, N2).astype(jnp.float32)

    out = pl.pallas_call(
        _fused_fc_kernel,
        out_shape=jax.ShapeDtypeStruct((mp, N2), out_dtype),
        grid_spec=pltpu.PrefetchScalarGridSpec(
            num_scalar_prefetch=0,
            grid=(nm, nk),
            in_specs=[
                pl.BlockSpec((m_tile, k_tile), lambda i, k: (i, k)),
                pl.BlockSpec((k_tile, N1), lambda i, k: (k, 0)),
                pl.BlockSpec((1, N1), lambda i, k: (0, 0)),
                pl.BlockSpec((N1, N2), lambda i, k: (0, 0)),
                pl.BlockSpec((1, N2), lambda i, k: (0, 0)),
            ],
            out_specs=pl.BlockSpec((m_tile, N2), lambda i, k: (i, 0)),
            scratch_shapes=[pltpu.VMEM((m_tile, N1), jnp.float32)],
        ),
        compiler_params=pltpu.CompilerParams(
            dimension_semantics=("parallel", "arbitrary"),
            # Explicit limit: 2x4.5 MiB weight buffers + x/acc/out fit easily,
            # but v5e's scoped default is only 16 MiB -> be explicit.
            vmem_limit_bytes=32 * 1024 * 1024),
    )(x, w1.astype(jnp.bfloat16), b1r, w2.astype(jnp.bfloat16), b2r)

    if mp != M:
        out = out[:M]
    return out


# ---------------------------------------------------------------------------
# Glue: im2col for 3x3 valid conv (NHWC), flatten order = (kh, kw, cin).
# ---------------------------------------------------------------------------
def im2col3x3(x_nhwc, k_pad=0):
    B, H, W, C = x_nhwc.shape
    OH, OW = H - 2, W - 2
    cols = [x_nhwc[:, kh:kh + OH, kw:kw + OW, :]
            for kh in range(3) for kw in range(3)]
    patches = jnp.stack(cols, axis=3)              # (B, OH, OW, 9, C)
    mat = patches.reshape(B * OH * OW, 9 * C)
    if k_pad:
        mat = jnp.pad(mat, ((0, 0), (0, k_pad)))
    return mat, (B, OH, OW)


# ---------------------------------------------------------------------------
# Parameters: PyTorch-shaped init + one-time layout / dtype preprocessing.
# ---------------------------------------------------------------------------
def init_params(key):
    ks = jax.random.split(key, 8)
    return {
        "conv1_w": 0.1 * jax.random.normal(ks[0], (32, 1, 3, 3), jnp.float32),
        "conv1_b": 0.1 * jax.random.normal(ks[1], (32,), jnp.float32),
        "conv2_w": 0.05 * jax.random.normal(ks[2], (64, 32, 3, 3), jnp.float32),
        "conv2_b": 0.1 * jax.random.normal(ks[3], (64,), jnp.float32),
        "fc1_w": 0.01 * jax.random.normal(ks[4], (128, 64 * 24 * 24), jnp.float32),
        "fc1_b": 0.1 * jax.random.normal(ks[5], (128,), jnp.float32),
        "fc2_w": 0.1 * jax.random.normal(ks[6], (10, 128), jnp.float32),
        "fc2_b": 0.1 * jax.random.normal(ks[7], (10,), jnp.float32),
    }


def prepare_params(p):
    """One-time: transpose/permute/pad/cast weights into kernel-ready layout."""
    def pad2d(a, rows, cols):
        r, c = a.shape
        return jnp.pad(a, ((0, rows - r), (0, cols - c)))

    # conv weights: (Cout, Cin, 3, 3) -> (KH, KW, Cin, Cout) -> (9*Cin, Cout),
    # matching im2col's (kh, kw, cin) flatten order.
    w1 = jnp.transpose(p["conv1_w"], (2, 3, 1, 0)).reshape(9, 32)
    w1 = pad2d(w1, 16, 128).astype(jnp.bfloat16)          # K 9->16, N 32->128
    b1 = jnp.pad(p["conv1_b"], (0, 128 - 32)).astype(jnp.float32)

    w2 = jnp.transpose(p["conv2_w"], (2, 3, 1, 0)).reshape(9 * 32, 64)
    w2 = w2.astype(jnp.bfloat16)
    b2 = p["conv2_b"].astype(jnp.float32)

    # fc1: PyTorch flatten is NCHW (c,h,w) order; permute the weight K axis to
    # (h,w,c) so the NHWC activation flattens directly (no per-call transpose).
    wf1 = p["fc1_w"].reshape(128, 64, 24, 24)             # (out, c, h, w)
    wf1 = jnp.transpose(wf1, (2, 3, 1, 0)).reshape(24 * 24 * 64, 128)
    wf1 = wf1.astype(jnp.bfloat16)
    bf1 = p["fc1_b"].astype(jnp.float32)

    wf2 = pad2d(p["fc2_w"].T, 128, 128).astype(jnp.bfloat16)   # N 10 -> 128
    bf2 = jnp.pad(p["fc2_b"], (0, 128 - 10)).astype(jnp.float32)

    return {
        "conv1_w": w1, "conv1_b": b1,
        "conv2_w": w2, "conv2_b": b2,
        "fc1_w": wf1, "fc1_b": bf1,
        "fc2_w": wf2, "fc2_b": bf2,
    }


# ---------------------------------------------------------------------------
# Forward pass (mirrors CNN.forward exactly; jit'ed at the call site).
# ---------------------------------------------------------------------------
def cnn_forward(prep, x_nchw):
    B = x_nchw.shape[0]
    x = jnp.transpose(x_nchw, (0, 2, 3, 1)).astype(jnp.bfloat16)   # NHWC

    # conv1 + relu: (B,28,28,1) -> (B,26,26,32); K padded 9->16, N 32->128.
    # At B=2, M=1352 -> one full-M tile (no pad copy, single grid step).
    cols, _ = im2col3x3(x, k_pad=7)
    y = matmul_bias_act(cols, prep["conv1_w"], prep["conv1_b"],
                        relu=True, out_dtype=jnp.bfloat16)
    x = y[:, :32].reshape(B, 26, 26, 32)

    # conv2 + relu: (B,26,26,32) -> (B,24,24,64); K=288, N=64.
    # At B=2, M=1152 -> m_tile=576, nm=2 (even split for v7x megacore).
    cols, _ = im2col3x3(x)
    y = matmul_bias_act(cols, prep["conv2_w"], prep["conv2_b"],
                        relu=True, out_dtype=jnp.bfloat16)
    x = y.reshape(B, 24, 24, 64)

    # fc1 + relu + fc2 in ONE pallas_call (fc2's N pre-padded 10 -> 128).
    x = x.reshape(B, 24 * 24 * 64)
    y = fused_fc(x, prep["fc1_w"], prep["fc1_b"],
                 prep["fc2_w"], prep["fc2_b"], out_dtype=jnp.float32)
    return y[:, :10]


if __name__ == "__main__":
    key = jax.random.PRNGKey(0)
    pkey, xkey = jax.random.split(key)
    params = init_params(pkey)
    prep = prepare_params(params)          # one-time weight layout/dtype prep

    # MNIST-like input implied by fc1 (64*24*24): batch=2, 1x28x28.
    x = jax.random.normal(xkey, (2, 1, 28, 28), jnp.float32)

    fwd = jax.jit(cnn_forward)
    out = jax.block_until_ready(fwd(prep, x))
    assert out.shape == (2, 10) and out.dtype == jnp.float32
    print("KERNEL_OK")
</pallas_src>

<mosaic_0001>
module attributes {stable_mosaic.version = 11 : i64} {
  func.func @_mm_bias_act_kernel(%arg0: i32, %arg1: memref<1352x16xbf16, #tpu.memory_space<vmem>>, %arg2: memref<16x128xbf16, #tpu.memory_space<vmem>>, %arg3: memref<1x128xf32, #tpu.memory_space<vmem>>, %arg4: memref<1352x128xbf16, #tpu.memory_space<vmem>>) attributes {dimension_semantics = [#tpu.dimension_semantics<parallel>], iteration_bounds = array<i64: 1>, scalar_prefetch = 0 : i64, scratch_operands = 0 : i64, tpu.core_type = #tpu.core_type<tc>, window_params = [{transform_indices = @transform_0, window_bounds = array<i64: 1352, 16>}, {pipeline_mode = #tpu.pipeline_mode<synchronous>, transform_indices = @transform_1, window_bounds = array<i64: 16, 128>}, {pipeline_mode = #tpu.pipeline_mode<synchronous>, transform_indices = @transform_2, window_bounds = array<i64: 1, 128>}, {transform_indices = @transform_3, window_bounds = array<i64: 1352, 128>}]} {
    %c0 = arith.constant 0 : index
    %c0_0 = arith.constant 0 : index
    %0 = vector.load %arg1[%c0, %c0_0] : memref<1352x16xbf16, #tpu.memory_space<vmem>>, vector<1352x16xbf16>
    %c0_1 = arith.constant 0 : index
    %c0_2 = arith.constant 0 : index
    %1 = vector.load %arg2[%c0_1, %c0_2] : memref<16x128xbf16, #tpu.memory_space<vmem>>, vector<16x128xbf16>
    %cst = arith.constant dense<0.000000e+00> : vector<1352x128xf32>
    %2 = tpu.matmul %0, %1, %cst {dimension_numbers = #tpu.dot_dimension_numbers<[1], [0], [0], [1], [0, 0, 1, 1], [], []>} : vector<1352x16xbf16>, vector<16x128xbf16>, vector<1352x128xf32> -> vector<1352x128xf32>
    %c0_3 = arith.constant 0 : index
    %c0_4 = arith.constant 0 : index
    %3 = vector.load %arg3[%c0_3, %c0_4] : memref<1x128xf32, #tpu.memory_space<vmem>>, vector<1x128xf32>
    %4 = vector.broadcast %3 : vector<1x128xf32> to vector<1352x128xf32>
    %5 = arith.addf %2, %4 : vector<1352x128xf32>
    %cst_5 = arith.constant 0.000000e+00 : f32
    %6 = vector.broadcast %cst_5 : f32 to vector<1352x128xf32>
    %7 = arith.maximumf %5, %6 : vector<1352x128xf32>
    %8 = arith.truncf %7 : vector<1352x128xf32> to vector<1352x128xbf16>
    %c0_6 = arith.constant 0 : index
    %c0_7 = arith.constant 0 : index
    %9 = vector.load %arg4[%c0_6, %c0_7] : memref<1352x128xbf16, #tpu.memory_space<vmem>>, vector<1352x128xbf16>
    tpu.vector_store %arg4[%c0_6, %c0_7], %8 {strides = array<i32>} : memref<1352x128xbf16, #tpu.memory_space<vmem>>, vector<1352x128xbf16>,
    return
  }
  func.func @transform_0(%arg0: i32) -> (i32, i32) {
    %c0_i32 = arith.constant 0 : i32
    %c0_i32_0 = arith.constant 0 : i32
    return %arg0, %c0_i32 : i32, i32
  }
  func.func @transform_1(%arg0: i32) -> (i32, i32) {
    %c0_i32 = arith.constant 0 : i32
    %c0_i32_0 = arith.constant 0 : i32
    %c0_i32_1 = arith.constant 0 : i32
    return %c0_i32, %c0_i32_0 : i32, i32
  }
  func.func @transform_2(%arg0: i32) -> (i32, i32) {
    %c0_i32 = arith.constant 0 : i32
    %c0_i32_0 = arith.constant 0 : i32
    %c0_i32_1 = arith.constant 0 : i32
    return %c0_i32, %c0_i32_0 : i32, i32
  }
  func.func @transform_3(%arg0: i32) -> (i32, i32) {
    %c0_i32 = arith.constant 0 : i32
    %c0_i32_0 = arith.constant 0 : i32
    return %arg0, %c0_i32 : i32, i32
  }
}

module attributes {stable_mosaic.version = 11 : i64} {
  func.func @_mm_bias_act_kernel(%arg0: i32, %arg1: memref<576x288xbf16, #tpu.memory_space<vmem>>, %arg2: memref<288x64xbf16, #tpu.memory_space<vmem>>, %arg3: memref<1x64xf32, #tpu.memory_space<vmem>>, %arg4: memref<576x64xbf16, #tpu.memory_space<vmem>>) attributes {dimension_semantics = [#tpu.dimension_semantics<parallel>], iteration_bounds = array<i64: 2>, scalar_prefetch = 0 : i64, scratch_operands = 0 : i64, tpu.core_type = #tpu.core_type<tc>, window_params = [{transform_indices = @transform_0, window_bounds = array<i64: 576, 288>}, {pipeline_mode = #tpu.pipeline_mode<synchronous>, transform_indices = @transform_1, window_bounds = array<i64: 288, 64>}, {pipeline_mode = #tpu.pipeline_mode<synchronous>, transform_indices = @transform_2, window_bounds = array<i64: 1, 64>}, {transform_indices = @transform_3, window_bounds = array<i64: 576, 64>}]} {
    %c0 = arith.constant 0 : index
    %c0_0 = arith.constant 0 : index
    %0 = vector.load %arg1[%c0, %c0_0] : memref<576x288xbf16, #tpu.memory_space<vmem>>, vector<576x288xbf16>
    %c0_1 = arith.constant 0 : index
    %c0_2 = arith.constant 0 : index
    %1 = vector.load %arg2[%c0_1, %c0_2] : memref<288x64xbf16, #tpu.memory_space<vmem>>, vector<288x64xbf16>
    %cst = arith.constant dense<0.000000e+00> : vector<576x64xf32>
    %2 = tpu.matmul %0, %1, %cst {dimension_numbers = #tpu.dot_dimension_numbers<[1], [0], [0], [1], [0, 0, 1, 1], [], []>} : vector<576x288xbf16>, vector<288x64xbf16>, vector<576x64xf32> -> vector<576x64xf32>
    %c0_3 = arith.constant 0 : index
    %c0_4 = arith.constant 0 : index
    %3 = vector.load %arg3[%c0_3, %c0_4] : memref<1x64xf32, #tpu.memory_space<vmem>>, vector<1x64xf32>
    %4 = vector.broadcast %3 : vector<1x64xf32> to vector<576x64xf32>
    %5 = arith.addf %2, %4 : vector<576x64xf32>
    %cst_5 = arith.constant 0.000000e+00 : f32
    %6 = vector.broadcast %cst_5 : f32 to vector<576x64xf32>
    %7 = arith.maximumf %5, %6 : vector<576x64xf32>
    %8 = arith.truncf %7 : vector<576x64xf32> to vector<576x64xbf16>
    %c0_6 = arith.constant 0 : index
    %c0_7 = arith.constant 0 : index
    %9 = vector.load %arg4[%c0_6, %c0_7] : memref<576x64xbf16, #tpu.memory_space<vmem>>, vector<576x64xbf16>
    tpu.vector_store %arg4[%c0_6, %c0_7], %8 {strides = array<i32>} : memref<576x64xbf16, #tpu.memory_space<vmem>>, vector<576x64xbf16>,
    return
  }
  func.func @transform_0(%arg0: i32) -> (i32, i32) {
    %c0_i32 = arith.constant 0 : i32
    %c0_i32_0 = arith.constant 0 : i32
    return %arg0, %c0_i32 : i32, i32
  }
  func.func @transform_1(%arg0: i32) -> (i32, i32) {
    %c0_i32 = arith.constant 0 : i32
    %c0_i32_0 = arith.constant 0 : i32
    %c0_i32_1 = arith.constant 0 : i32
    return %c0_i32, %c0_i32_0 : i32, i32
  }
  func.func @transform_2(%arg0: i32) -> (i32, i32) {
    %c0_i32 = arith.constant 0 : i32
    %c0_i32_0 = arith.constant 0 : i32
    %c0_i32_1 = arith.constant 0 : i32
    return %c0_i32, %c0_i32_0 : i32, i32
  }
  func.func @transform_3(%arg0: i32) -> (i32, i32) {
    %c0_i32 = arith.constant 0 : i32
    %c0_i32_0 = arith.constant 0 : i32
    return %arg0, %c0_i32 : i32, i32
  }
}

module attributes {stable_mosaic.version = 11 : i64} {
  func.func @_fused_fc_kernel(%arg0: i32, %arg1: i32, %arg2: memref<2x18432xbf16, #tpu.memory_space<vmem>>, %arg3: memref<18432x128xbf16, #tpu.memory_space<vmem>>, %arg4: memref<1x128xf32, #tpu.memory_space<vmem>>, %arg5: memref<128x128xbf16, #tpu.memory_space<vmem>>, %arg6: memref<1x128xf32, #tpu.memory_space<vmem>>, %arg7: memref<2x128xf32, #tpu.memory_space<vmem>>, %arg8: memref<2x128xf32, #tpu.memory_space<vmem>>) attributes {dimension_semantics = [#tpu.dimension_semantics<parallel>, #tpu.dimension_semantics<arbitrary>], iteration_bounds = array<i64: 1, 2>, scalar_prefetch = 0 : i64, scratch_operands = 1 : i64, tpu.core_type = #tpu.core_type<tc>, window_params = [{transform_indices = @transform_0, window_bounds = array<i64: 2, 18432>}, {transform_indices = @transform_1, window_bounds = array<i64: 18432, 128>}, {pipeline_mode = #tpu.pipeline_mode<synchronous>, transform_indices = @transform_2, window_bounds = array<i64: 1, 128>}, {pipeline_mode = #tpu.pipeline_mode<synchronous>, transform_indices = @transform_3, window_bounds = array<i64: 128, 128>}, {pipeline_mode = #tpu.pipeline_mode<synchronous>, transform_indices = @transform_4, window_bounds = array<i64: 1, 128>}, {transform_indices = @transform_5, window_bounds = array<i64: 2, 128>}]} {
    %c0_i32 = arith.constant 0 : i32
    %0 = arith.cmpi eq, %arg1, %c0_i32 : i32
    %1 = arith.extui %0 : i1 to i32
    %c0_i32_0 = arith.constant 0 : i32
    %2 = arith.cmpi ne, %1, %c0_i32_0 : i32
    scf.if %2 {
      %cst_9 = arith.constant 0.000000e+00 : f32
      %12 = vector.broadcast %cst_9 : f32 to vector<2x128xf32>
      %c0_10 = arith.constant 0 : index
      %c0_11 = arith.constant 0 : index
      %13 = vector.load %arg8[%c0_10, %c0_11] : memref<2x128xf32, #tpu.memory_space<vmem>>, vector<2x128xf32>
      tpu.vector_store %arg8[%c0_10, %c0_11], %12 {strides = array<i32>} : memref<2x128xf32, #tpu.memory_space<vmem>>, vector<2x128xf32>,
    } else {
    }
    %c0 = arith.constant 0 : index
    %c0_1 = arith.constant 0 : index
    %3 = vector.load %arg8[%c0, %c0_1] : memref<2x128xf32, #tpu.memory_space<vmem>>, vector<2x128xf32>
    %c0_2 = arith.constant 0 : index
    %c0_3 = arith.constant 0 : index
    %4 = vector.load %arg2[%c0_2, %c0_3] : memref<2x18432xbf16, #tpu.memory_space<vmem>>, vector<2x18432xbf16>
    %c0_4 = arith.constant 0 : index
    %c0_5 = arith.constant 0 : index
    %5 = vector.load %arg3[%c0_4, %c0_5] : memref<18432x128xbf16, #tpu.memory_space<vmem>>, vector<18432x128xbf16>
    %cst = arith.constant dense<0.000000e+00> : vector<2x128xf32>
    %6 = tpu.matmul %4, %5, %cst {dimension_numbers = #tpu.dot_dimension_numbers<[1], [0], [0], [1], [0, 0, 1, 1], [], []>} : vector<2x18432xbf16>, vector<18432x128xbf16>, vector<2x128xf32> -> vector<2x128xf32>
    %7 = arith.addf %3, %6 : vector<2x128xf32>
    %c0_6 = arith.constant 0 : index
    %c0_7 = arith.constant 0 : index
    %8 = vector.load %arg8[%c0_6, %c0_7] : memref<2x128xf32, #tpu.memory_space<vmem>>, vector<2x128xf32>
    tpu.vector_store %arg8[%c0_6, %c0_7], %7 {strides = array<i32>} : memref<2x128xf32, #tpu.memory_space<vmem>>, vector<2x128xf32>,
    %c1_i32 = arith.constant 1 : i32
    %9 = arith.cmpi eq, %arg1, %c1_i32 : i32
    %10 = arith.extui %9 : i1 to i32
    %c0_i32_8 = arith.constant 0 : i32
    %11 = arith.cmpi ne, %10, %c0_i32_8 : i32
    scf.if %11 {
      %c0_9 = arith.constant 0 : index
      %c0_10 = arith.constant 0 : index
      %12 = vector.load %arg8[%c0_9, %c0_10] : memref<2x128xf32, #tpu.memory_space<vmem>>, vector<2x128xf32>
      %c0_11 = arith.constant 0 : index
      %c0_12 = arith.constant 0 : index
      %13 = vector.load %arg4[%c0_11, %c0_12] : memref<1x128xf32, #tpu.memory_space<vmem>>, vector<1x128xf32>
      %14 = vector.broadcast %13 : vector<1x128xf32> to vector<2x128xf32>
      %15 = arith.addf %12, %14 : vector<2x128xf32>
      %cst_13 = arith.constant 0.000000e+00 : f32
      %16 = vector.broadcast %cst_13 : f32 to vector<2x128xf32>
      %17 = arith.maximumf %15, %16 : vector<2x128xf32>
      %18 = arith.truncf %17 : vector<2x128xf32> to vector<2x128xbf16>
      %c0_14 = arith.constant 0 : index
      %c0_15 = arith.constant 0 : index
      %19 = vector.load %arg5[%c0_14, %c0_15] : memref<128x128xbf16, #tpu.memory_space<vmem>>, vector<128x128xbf16>
      %cst_16 = arith.constant dense<0.000000e+00> : vector<2x128xf32>
      %20 = tpu.matmul %18, %19, %cst_16 {dimension_numbers = #tpu.dot_dimension_numbers<[1], [0], [0], [1], [0, 0, 1, 1], [], []>} : vector<2x128xbf16>, vector<128x128xbf16>, vector<2x128xf32> -> vector<2x128xf32>
      %c0_17 = arith.constant 0 : index
      %c0_18 = arith.constant 0 : index
      %21 = vector.load %arg6[%c0_17, %c0_18] : memref<1x128xf32, #tpu.memory_space<vmem>>, vector<1x128xf32>
      %22 = vector.broadcast %21 : vector<1x128xf32> to vector<2x128xf32>
      %23 = arith.addf %20, %22 : vector<2x128xf32>
      %c0_19 = arith.constant 0 : index
      %c0_20 = arith.constant 0 : index
      %24 = vector.load %arg7[%c0_19, %c0_20] : memref<2x128xf32, #tpu.memory_space<vmem>>, vector<2x128xf32>
      tpu.vector_store %arg7[%c0_19, %c0_20], %23 {strides = array<i32>} : memref<2x128xf32, #tpu.memory_space<vmem>>, vector<2x128xf32>,
    } else {
    }
    return
  }
  func.func @transform_0(%arg0: i32, %arg1: i32) -> (i32, i32) {
    %c0_i32 = arith.constant 0 : i32
    return %arg0, %arg1 : i32, i32
  }
  func.func @transform_1(%arg0: i32, %arg1: i32) -> (i32, i32) {
    %c0_i32 = arith.constant 0 : i32
    %c0_i32_0 = arith.constant 0 : i32
    return %arg1, %c0_i32 : i32, i32
  }
  func.func @transform_2(%arg0: i32, %arg1: i32) -> (i32, i32) {
    %c0_i32 = arith.constant 0 : i32
    %c0_i32_0 = arith.constant 0 : i32
    %c0_i32_1 = arith.constant 0 : i32
    return %c0_i32, %c0_i32_0 : i32, i32
  }
  func.func @transform_3(%arg0: i32, %arg1: i32) -> (i32, i32) {
    %c0_i32 = arith.constant 0 : i32
    %c0_i32_0 = arith.constant 0 : i32
    %c0_i32_1 = arith.constant 0 : i32
    return %c0_i32, %c0_i32_0 : i32, i32
  }
  func.func @transform_4(%arg0: i32, %arg1: i32) -> (i32, i32) {
    %c0_i32 = arith.constant 0 : i32
    %c0_i32_0 = arith.constant 0 : i32
    %c0_i32_1 = arith.constant 0 : i32
    return %c0_i32, %c0_i32_0 : i32, i32
  }
  func.func @transform_5(%arg0: i32, %arg1: i32) -> (i32, i32) {
    %c0_i32 = arith.constant 0 : i32
    %c0_i32_0 = arith.constant 0 : i32
    return %arg0, %c0_i32 : i32, i32
  }
}

</mosaic_0001>

<bundles_post_ra>
// kernel: cnn_forward.3
= control target key start
LH: loop header
LB: loop body
LE: loop exit
PB: predicated region body
PF: predicated region fallthrough
CT: control target
= control target key end

     0   :  { %8 = vsyncpa [#allocation3], 0  ;;  %s5211_s0 = inlined_call_operand.vmem [shape: bf16[1352,16], index: 0, kind: input, shape index: {}]   ;;  %s5212_s1 = inlined_call_operand.hbm [shape: bf16[16,128], index: 1, kind: input, shape index: {}]   ;;  %s5213_s2 = inlined_call_operand.hbm [shape: f32[1,128], index: 2, kind: input, shape index: {}]   ;;  %s5214_s3 = inlined_call_operand.vmem [shape: bf16[1352,128], index: 3, kind: output, shape index: {}]  }
   0x1   :  { %9 = vsyncpa [#allocation5], 0  ;;  %s4221_s12 = smov [#allocation2]   ;;  %s4173_s16 = scalar_lea.hbm %s5212_s1, 128 }
   0x2   :  { %s17_s13 = sshll.u32 %s4221_s12, 4  ;;  %p4174_p0 = scmp.ne.s32.totalorder %s5212_s1, %s4173_s16  ;;  %s18_s13 = int_to_ptr.vmem [resolvable:$true] %s17_s13 }
   0x3   :  { %p4177_p1 = scmp.lt.u32.totalorder %s4173_s16, %s5212_s1 }
   0x5   :  { %p4179_p2 = pnand %p4177_p1, %p4174_p0 }
   0x7   :  { %4182 = shalt.err (!%p4179_p2)
}
   0x8   :  { %s4183_s21 = scalar_lea.vmem %s18_s13, 128  ;;  %p4188_p4 = scmp.lt.s32.totalorder %s18_s13, %s18_s13 }
   0x9   :  { %p4184_p3 = scmp.ne.s32.totalorder %s18_s13, %s4183_s21  ;;  %p4189_p5 = scmp.lt.s32.totalorder %s4183_s21, %s4183_s21 }
   0xb   :  { %p4190_p6 = por %p4189_p5, %p4188_p4 }
   0xd   :  { %p4191_p7 = pnand %p4190_p6, %p4184_p3 }
   0xf   :  { %4194 = shalt.err (!%p4191_p7)
}
  0x10   :  { %s4222_s22 = smov 64   ;;  %s4223_s23 = smov 4  }
  0x11   :  { %23 = dma.hbm_to_vmem [thread:$0]  %s5212_s1, 128, %s18_s13, [#allocation3], %s4222_s22, %s4222_s22, %s4223_s23  }
  0x12   :  { %s4224_s26 = smov [#allocation4]   ;;  %s4195_s30 = scalar_lea.hbm %s5213_s2, 16 }
  0x13   :  { %s30_s27 = sshll.u32 %s4224_s26, 4  ;;  %p4196_p8 = scmp.ne.s32.totalorder %s5213_s2, %s4195_s30  ;;  %s31_s27 = int_to_ptr.vmem [resolvable:$true] %s30_s27 }
  0x14   :  { %p4199_p9 = scmp.lt.u32.totalorder %s4195_s30, %s5213_s2 }
  0x16   :  { %p4201_p10 = pnand %p4199_p9, %p4196_p8 }
  0x18   :  { %4204 = shalt.err (!%p4201_p10)
}
  0x19   :  { %s4205_s8 = scalar_lea.vmem %s31_s27, 16  ;;  %s4209_s1 = scalar_lea.vmem %s31_s27, 32 }
  0x1a   :  { %p4206_p11 = scmp.ne.s32.totalorder %s31_s27, %s4205_s8  ;;  %p4210_p12 = scmp.lt.s32.totalorder %s31_s27, %s31_s27 }
  0x1b   :  { %p4211_p13 = scmp.lt.s32.totalorder %s4209_s1, %s4205_s8 }
  0x1d   :  { %p4212_p0 = por %p4211_p13, %p4210_p12 }
  0x1f   :  { %p4213_p1 = pnand %p4212_p0, %p4206_p11 }
  0x21   :  { %4216 = shalt.err (!%p4213_p1)
}
  0x22   :  { %33 = dma.hbm_to_vmem [thread:$0]  %s5213_s2, 16, %s31_s27, [#allocation5]  }
  0x23   :  { %4217 = dma.done.wait [#allocation3], 128  }
  0x24   :  { %4218 = vsyncadd [#allocation3], 4294967168 }
  0x25   :  { %4219 = dma.done.wait [#allocation5], 16  }
  0x26   :  { %4220 = vsyncadd [#allocation5], 4294967280  ;;  %v4225_v0 = vmov 0.0   ;;  %vm4226_vm0 = vmmov 0   ;;  %v4086_v1 = vld [vmem:[#allocation2] sm:$0xff]   ;;  %vm648_vm1 = vcmask 130048  }
  0x27   :  { %3736 = vmatprep.subr.bf16.mxu0 %v4225_v0  ;;  %3738 = vmatprep.mubr.msk.bf16.mxu0 %vm4226_vm0, %v4225_v0  ;;  %v4087_v2 = vld [vmem:[%s5211_s0] sm:$0xff]   ;;  %v4088_v3 = vld [vmem:[%s5211_s0 + $0x158] sm:$0xff]   ;;  %v4089_v4 = vld [vmem:[%s5211_s0 + $0x8] sm:$0xff]  }
  0x28   :  { %4078 = vmatprep.subr.bf16.mxu1 %v4225_v0  ;;  %3910 = vmatprep.mubr.msk.bf16.mxu1 %vm4226_vm0, %v4225_v0  ;;  %v4090_v5 = vld [vmem:[%s5211_s0 + $0x160] sm:$0xff]   ;;  %v4091_v6 = vld [vmem:[%s5211_s0 + $0x10] sm:$0xff]   ;;  %v4092_v7 = vld [vmem:[%s5211_s0 + $0x168] sm:$0xff]  }
  0x29   :  { %3737 = vmatpush3.bf16.msra.mxu0 %v4086_v1  ;;  %4079 = vmatpush3.bf16.msra.mxu1 %v4086_v1  ;;  %v4093_v8 = vld [vmem:[%s5211_s0 + $0x18] sm:$0xff]   ;;  %v4094_v9 = vld [vmem:[%s5211_s0 + $0x170] sm:$0xff]   ;;  %v4095_v10 = vld [vmem:[%s5211_s0 + $0x20] sm:$0xff]  }
  0x2a   :  { %v4096_v11 = vld [vmem:[%s5211_s0 + $0x178] sm:$0xff]   ;;  %v4097_v12 = vld [vmem:[%s5211_s0 + $0x28] sm:$0xff]   ;;  %v4098_v13 = vld [vmem:[%s5211_s0 + $0x180] sm:$0xff]  }
  0x2b   :  { %v4099_v14 = vld [vmem:[%s5211_s0 + $0x30] sm:$0xff]   ;;  %v4100_v15 = vld [vmem:[%s5211_s0 + $0x188] sm:$0xff]   ;;  %v4101_v16 = vld [vmem:[%s5211_s0 + $0x38] sm:$0xff]  }
  0x2c   :  { %3739 = vmatmul.mubr.msk.bf16.vlgmr.msra.gmra.mrb[0].mxu0 %vm648_vm1, %v4087_v2  ;;  %3911 = vmatmul.mubr.msk.bf16.vlgmr.msra.gmra.mrb[0].mxu1 %vm648_vm1, %v4088_v3  ;;  %v4102_v17 = vld [vmem:[%s5211_s0 + $0x190] sm:$0xff]   ;;  %v4103_v18 = vld [vmem:[%s5211_s0 + $0x40] sm:$0xff]   ;;  %v4104_v19 = vld [vmem:[%s5211_s0 + $0x198] sm:$0xff]  }
  0x2d   :  { %3742 = vmatprep.mubr.msk.bf16.mxu0 %vm4226_vm0, %v4225_v0  ;;  %3914 = vmatprep.mubr.msk.bf16.mxu1 %vm4226_vm0, %v4225_v0  ;;  %v4105_v20 = vld [vmem:[%s5211_s0 + $0x48] sm:$0xff]   ;;  %v4106_v21 = vld [vmem:[%s5211_s0 + $0x1a0] sm:$0xff]   ;;  %v4107_v22 = vld [vmem:[%s5211_s0 + $0x50] sm:$0xff]  }
  0x2e   :  { %v4108_v23 = vld [vmem:[%s5211_s0 + $0x1a8] sm:$0xff]   ;;  %v4109_v24 = vld [vmem:[%s5211_s0 + $0x58] sm:$0xff]   ;;  %v4110_v25 = vld [vmem:[%s5211_s0 + $0x1b0] sm:$0xff]  }
  0x2f   :  { %v4111_v26 = vld [vmem:[%s5211_s0 + $0x60] sm:$0xff]   ;;  %v4112_v27 = vld [vmem:[%s5211_s0 + $0x1b8] sm:$0xff]   ;;  %v4113_v28 = vld [vmem:[%s5211_s0 + $0x68] sm:$0xff]  }
  0x30   :  { %v4114_v29 = vld [vmem:[%s5211_s0 + $0x1c0] sm:$0xff]   ;;  %v4115_v30 = vld [vmem:[%s5211_s0 + $0x70] sm:$0xff]   ;;  %v4116_v31 = vld [vmem:[%s5211_s0 + $0x1c8] sm:$0xff]  }
  0x31   :  { %v4117_v32 = vld [vmem:[%s5211_s0 + $0x78] sm:$0xff]   ;;  %v4118_v33 = vld [vmem:[%s5211_s0 + $0x1d0] sm:$0xff]   ;;  %v4119_v34 = vld [vmem:[%s5211_s0 + $0x80] sm:$0xff]  }
  0x32   :  { %v4120_v35 = vld [vmem:[%s5211_s0 + $0x1d8] sm:$0xff]   ;;  %v4121_v36 = vld [vmem:[%s5211_s0 + $0x88] sm:$0xff]   ;;  %v4122_v37 = vld [vmem:[%s5211_s0 + $0x1e0] sm:$0xff]  }
  0x33   :  { %v4123_v38 = vld [vmem:[%s5211_s0 + $0x90] sm:$0xff]   ;;  %v4124_v39 = vld [vmem:[%s5211_s0 + $0x1e8] sm:$0xff]   ;;  %v4125_v40 = vld [vmem:[%s5211_s0 + $0x98] sm:$0xff]  }
  0x34   :  { %3743 = vmatmul.mubr.msk.bf16.gmra.mrb[4].mxu0 %vm648_vm1, %v4089_v4  ;;  %3915 = vmatmul.mubr.msk.bf16.gmra.mrb[4].mxu1 %vm648_vm1, %v4090_v5  ;;  %v4126_v41 = vld [vmem:[%s5211_s0 + $0x1f0] sm:$0xff]   ;;  %v4127_v42 = vld [vmem:[%s5211_s0 + $0xa0] sm:$0xff]   ;;  %v4128_v43 = vld [vmem:[%s5211_s0 + $0x1f8] sm:$0xff]  }
  0x35   :  { %3746 = vmatprep.mubr.msk.bf16.mxu0 %vm4226_vm0, %v4225_v0  ;;  %3918 = vmatprep.mubr.msk.bf16.mxu1 %vm4226_vm0, %v4225_v0  ;;  %v4129_v44 = vld [vmem:[%s5211_s0 + $0xa8] sm:$0xff]   ;;  %v4130_v45 = vld [vmem:[%s5211_s0 + $0x200] sm:$0xff]   ;;  %v4131_v46 = vld [vmem:[%s5211_s0 + $0xb0] sm:$0xff]  }
  0x36   :  { %v4132_v47 = vld [vmem:[%s5211_s0 + $0x208] sm:$0xff]   ;;  %v4133_v48 = vld [vmem:[%s5211_s0 + $0xb8] sm:$0xff]   ;;  %v4134_v49 = vld [vmem:[%s5211_s0 + $0x210] sm:$0xff]  }
  0x37   :  { %v4135_v50 = vld [vmem:[%s5211_s0 + $0xc0] sm:$0xff]   ;;  %v4136_v51 = vld [vmem:[%s5211_s0 + $0x218] sm:$0xff]   ;;  %v4137_v52 = vld [vmem:[%s5211_s0 + $0xc8] sm:$0xff]  }
  0x38   :  { %v4138_v53 = vld [vmem:[%s5211_s0 + $0x220] sm:$0xff]   ;;  %v4139_v54 = vld [vmem:[%s5211_s0 + $0xd0] sm:$0xff]   ;;  %v4140_v55 = vld [vmem:[%s5211_s0 + $0x228] sm:$0xff]  }
  0x39   :  { %v4597_v56 = vld [vmem:[#allocation4] ss:$0 sm:$0xff]  ;;  %v4141_v61 = vld [vmem:[%s5211_s0 + $0xd8] sm:$0xff]   ;;  %v4142_v1 = vld [vmem:[%s5211_s0 + $0x230] sm:$0xff]  }
  0x3c   :  { %3747 = vmatmul.mubr.msk.bf16.gmra.mrb[8].mxu0 %vm648_vm1, %v4091_v6  ;;  %3919 = vmatmul.mubr.msk.bf16.gmra.mrb[8].mxu1 %vm648_vm1, %v4092_v7 }
  0x3d   :  { %3750 = vmatprep.mubr.msk.bf16.mxu0 %vm4226_vm0, %v4225_v0  ;;  %3922 = vmatprep.mubr.msk.bf16.mxu1 %vm4226_vm0, %v4225_v0 }
  0x44   :  { %3751 = vmatmul.mubr.msk.bf16.gmra.mrb[12].mxu0 %vm648_vm1, %v4093_v8  ;;  %3923 = vmatmul.mubr.msk.bf16.gmra.mrb[12].mxu1 %vm648_vm1, %v4094_v9 }
  0x45   :  { %3754 = vmatprep.mubr.msk.bf16.mxu0 %vm4226_vm0, %v4225_v0  ;;  %3926 = vmatprep.mubr.msk.bf16.mxu1 %vm4226_vm0, %v4225_v0 }
  0x4c   :  { %3755 = vmatmul.mubr.msk.bf16.gmra.mrb[16].mxu0 %vm648_vm1, %v4095_v10  ;;  %3927 = vmatmul.mubr.msk.bf16.gmra.mrb[16].mxu1 %vm648_vm1, %v4096_v11 }
  0x4d   :  { %3758 = vmatprep.mubr.msk.bf16.mxu0 %vm4226_vm0, %v4225_v0  ;;  %3930 = vmatprep.mubr.msk.bf16.mxu1 %vm4226_vm0, %v4225_v0 }
  0x54   :  { %3759 = vmatmul.mubr.msk.bf16.gmra.mrb[20].mxu0 %vm648_vm1, %v4097_v12  ;;  %3931 = vmatmul.mubr.msk.bf16.gmra.mrb[20].mxu1 %vm648_vm1, %v4098_v13 }
  0x55   :  { %3762 = vmatprep.mubr.msk.bf16.mxu0 %vm4226_vm0, %v4225_v0  ;;  %3934 = vmatprep.mubr.msk.bf16.mxu1 %vm4226_vm0, %v4225_v0 }
  0x5c   :  { %3763 = vmatmul.mubr.msk.bf16.gmra.mrb[24].mxu0 %vm648_vm1, %v4099_v14  ;;  %3935 = vmatmul.mubr.msk.bf16.gmra.mrb[24].mxu1 %vm648_vm1, %v4100_v15 }
  0x5d   :  { %3766 = vmatprep.mubr.msk.bf16.mxu0 %vm4226_vm0, %v4225_v0  ;;  %3938 = vmatprep.mubr.msk.bf16.mxu1 %vm4226_vm0, %v4225_v0 }
  0x64   :  { %3767 = vmatmul.mubr.msk.bf16.gmra.mrb[28].mxu0 %vm648_vm1, %v4101_v16  ;;  %3939 = vmatmul.mubr.msk.bf16.gmra.mrb[28].mxu1 %vm648_vm1, %v4102_v17 }
  0x65   :  { %3770 = vmatprep.mubr.msk.bf16.mxu0 %vm4226_vm0, %v4225_v0  ;;  %3942 = vmatprep.mubr.msk.bf16.mxu1 %vm4226_vm0, %v4225_v0 }
  0x6c   :  { %3771 = vmatmul.mubr.msk.bf16.gmra.mrb[32].mxu0 %vm648_vm1, %v4103_v18  ;;  %3943 = vmatmul.mubr.msk.bf16.gmra.mrb[32].mxu1 %vm648_vm1, %v4104_v19  ;;  %v4143_v18 = vld [vmem:[%s5211_s0 + $0xe0] sm:$0xff]  }
  0x6d   :  { %3774 = vmatprep.mubr.msk.bf16.mxu0 %vm4226_vm0, %v4225_v0  ;;  %3946 = vmatprep.mubr.msk.bf16.mxu1 %vm4226_vm0, %v4225_v0 }
  0x74   :  { %3775 = vmatmul.mubr.msk.bf16.gmra.mrb[36].mxu0 %vm648_vm1, %v4105_v20  ;;  %3947 = vmatmul.mubr.msk.bf16.gmra.mrb[36].mxu1 %vm648_vm1, %v4106_v21  ;;  %v4144_v21 = vld [vmem:[%s5211_s0 + $0x238] sm:$0xff]  }
  0x75   :  { %3778 = vmatprep.mubr.msk.bf16.mxu0 %vm4226_vm0, %v4225_v0  ;;  %3950 = vmatprep.mubr.msk.bf16.mxu1 %vm4226_vm0, %v4225_v0 }
  0x7c   :  { %3779 = vmatmul.mubr.msk.bf16.gmra.mrb[40].mxu0 %vm648_vm1, %v4107_v22  ;;  %3951 = vmatmul.mubr.msk.bf16.gmra.mrb[40].mxu1 %vm648_vm1, %v4108_v23 }
  0x7d   :  { %3782 = vmatprep.mubr.msk.bf16.mxu0 %vm4226_vm0, %v4225_v0  ;;  %3954 = vmatprep.mubr.msk.bf16.mxu1 %vm4226_vm0, %v4225_v0 }
  0x84   :  { %3783 = vmatmul.mubr.msk.bf16.gmra.mrb[44].mxu0 %vm648_vm1, %v4109_v24  ;;  %3955 = vmatmul.mubr.msk.bf16.gmra.mrb[44].mxu1 %vm648_vm1, %v4110_v25 }
  0x85   :  { %3786 = vmatprep.mubr.msk.bf16.mxu0 %vm4226_vm0, %v4225_v0  ;;  %3958 = vmatprep.mubr.msk.bf16.mxu1 %vm4226_vm0, %v4225_v0 }
  0x8c   :  { %3787 = vmatmul.mubr.msk.bf16.gmra.mrb[48].mxu0 %vm648_vm1, %v4111_v26  ;;  %3959 = vmatmul.mubr.msk.bf16.gmra.mrb[48].mxu1 %vm648_vm1, %v4112_v27 }
  0x8d   :  { %3790 = vmatprep.mubr.msk.bf16.mxu0 %vm4226_vm0, %v4225_v0  ;;  %3962 = vmatprep.mubr.msk.bf16.mxu1 %vm4226_vm0, %v4225_v0 }
  0x94   :  { %3791 = vmatmul.mubr.msk.bf16.gmra.mrb[52].mxu0 %vm648_vm1, %v4113_v28  ;;  %3963 = vmatmul.mubr.msk.bf16.gmra.mrb[52].mxu1 %vm648_vm1, %v4114_v29 }
  0x95   :  { %3794 = vmatprep.mubr.msk.bf16.mxu0 %vm4226_vm0, %v4225_v0  ;;  %3966 = vmatprep.mubr.msk.bf16.mxu1 %vm4226_vm0, %v4225_v0 }
  0x9c   :  { %3795 = vmatmul.mubr.msk.bf16.gmra.mrb[56].mxu0 %vm648_vm1, %v4115_v30  ;;  %3967 = vmatmul.mubr.msk.bf16.gmra.mrb[56].mxu1 %vm648_vm1, %v4116_v31 }
  0x9d   :  { %3798 = vmatprep.mubr.msk.bf16.mxu0 %vm4226_vm0, %v4225_v0  ;;  %3970 = vmatprep.mubr.msk.bf16.mxu1 %vm4226_vm0, %v4225_v0 }
  0xa4   :  { %3799 = vmatmul.mubr.msk.bf16.gmra.mrb[60].mxu0 %vm648_vm1, %v4117_v32  ;;  %3971 = vmatmul.mubr.msk.bf16.gmra.mrb[60].mxu1 %vm648_vm1, %v4118_v33 }
  0xa5   :  { %3802 = vmatprep.mubr.msk.bf16.mxu0 %vm4226_vm0, %v4225_v0  ;;  %3974 = vmatprep.mubr.msk.bf16.mxu1 %vm4226_vm0, %v4225_v0 }
  0xac   :  { %3803 = vmatmul.mubr.msk.bf16.gmra.mrb[64].mxu0 %vm648_vm1, %v4119_v34  ;;  %3975 = vmatmul.mubr.msk.bf16.gmra.mrb[64].mxu1 %vm648_vm1, %v4120_v35 }
  0xad   :  { %3806 = vmatprep.mubr.msk.bf16.mxu0 %vm4226_vm0, %v4225_v0  ;;  %3978 = vmatprep.mubr.msk.bf16.mxu1 %vm4226_vm0, %v4225_v0 }
  0xb4   :  { %3807 = vmatmul.mubr.msk.bf16.gmra.mrb[68].mxu0 %vm648_vm1, %v4121_v36  ;;  %3979 = vmatmul.mubr.msk.bf16.gmra.mrb[68].mxu1 %vm648_vm1, %v4122_v37 }
  0xb5   :  { %3810 = vmatprep.mubr.msk.bf16.mxu0 %vm4226_vm0, %v4225_v0  ;;  %3982 = vmatprep.mubr.msk.bf16.mxu1 %vm4226_vm0, %v4225_v0 }
  0xbc   :  { %3811 = vmatmul.mubr.msk.bf16.gmra.mrb[72].mxu0 %vm648_vm1, %v4123_v38  ;;  %3983 = vmatmul.mubr.msk.bf16.gmra.mrb[72].mxu1 %vm648_vm1, %v4124_v39  ;;  %v4145_v38 = vld [vmem:[%s5211_s0 + $0xe8] sm:$0xff]  }
  0xbd   :  { %3814 = vmatprep.mubr.msk.bf16.mxu0 %vm4226_vm0, %v4225_v0  ;;  %3986 = vmatprep.mubr.msk.bf16.mxu1 %vm4226_vm0, %v4225_v0 }
  0xc4   :  { %3815 = vmatmul.mubr.msk.bf16.gmra.mrb[76].mxu0 %vm648_vm1, %v4125_v40  ;;  %3987 = vmatmul.mubr.msk.bf16.gmra.mrb[76].mxu1 %vm648_vm1, %v4126_v41  ;;  %v4146_v41 = vld [vmem:[%s5211_s0 + $0x240] sm:$0xff]  }
  0xc5   :  { %3818 = vmatprep.mubr.msk.bf16.mxu0 %vm4226_vm0, %v4225_v0  ;;  %3990 = vmatprep.mubr.msk.bf16.mxu1 %vm4226_vm0, %v4225_v0 }
  0xcc   :  { %3819 = vmatmul.mubr.msk.bf16.gmra.mrb[80].mxu0 %vm648_vm1, %v4127_v42  ;;  %3991 = vmatmul.mubr.msk.bf16.gmra.mrb[80].mxu1 %vm648_vm1, %v4128_v43 }
  0xcd   :  { %3822 = vmatprep.mubr.msk.bf16.mxu0 %vm4226_vm0, %v4225_v0  ;;  %3994 = vmatprep.mubr.msk.bf16.mxu1 %vm4226_vm0, %v4225_v0 }
  0xd4   :  { %3823 = vmatmul.mubr.msk.bf16.gmra.mrb[84].mxu0 %vm648_vm1, %v4129_v44  ;;  %3995 = vmatmul.mubr.msk.bf16.gmra.mrb[84].mxu1 %vm648_vm1, %v4130_v45 }
  0xd5   :  { %3826 = vmatprep.mubr.msk.bf16.mxu0 %vm4226_vm0, %v4225_v0  ;;  %3998 = vmatprep.mubr.msk.bf16.mxu1 %vm4226_vm0, %v4225_v0 }
  0xdc   :  { %3827 = vmatmul.mubr.msk.bf16.gmra.mrb[88].mxu0 %vm648_vm1, %v4131_v46  ;;  %3999 = vmatmul.mubr.msk.bf16.gmra.mrb[88].mxu1 %vm648_vm1, %v4132_v47 }
  0xdd   :  { %3830 = vmatprep.mubr.msk.bf16.mxu0 %vm4226_vm0, %v4225_v0  ;;  %4002 = vmatprep.mubr.msk.bf16.mxu1 %vm4226_vm0, %v4225_v0 }
  0xe4   :  { %3831 = vmatmul.mubr.msk.bf16.gmra.mrb[92].mxu0 %vm648_vm1, %v4133_v48  ;;  %4003 = vmatmul.mubr.msk.bf16.gmra.mrb[92].mxu1 %vm648_vm1, %v4134_v49 }
  0xe5   :  { %3834 = vmatprep.mubr.msk.bf16.mxu0 %vm4226_vm0, %v4225_v0  ;;  %4006 = vmatprep.mubr.msk.bf16.mxu1 %vm4226_vm0, %v4225_v0 }
  0xec   :  { %3835 = vmatmul.mubr.msk.bf16.gmra.mrb[96].mxu0 %vm648_vm1, %v4135_v50  ;;  %4007 = vmatmul.mubr.msk.bf16.gmra.mrb[96].mxu1 %vm648_vm1, %v4136_v51 }
  0xed   :  { %3838 = vmatprep.mubr.msk.bf16.mxu0 %vm4226_vm0, %v4225_v0  ;;  %4010 = vmatprep.mubr.msk.bf16.mxu1 %vm4226_vm0, %v4225_v0 }
  0xf4   :  { %3839 = vmatmul.mubr.msk.bf16.gmra.mrb[100].mxu0 %vm648_vm1, %v4137_v52  ;;  %4011 = vmatmul.mubr.msk.bf16.gmra.mrb[100].mxu1 %vm648_vm1, %v4138_v53 }
  0xf5   :  { %3842 = vmatprep.mubr.msk.bf16.mxu0 %vm4226_vm0, %v4225_v0  ;;  %4014 = vmatprep.mubr.msk.bf16.mxu1 %vm4226_vm0, %v4225_v0 }
  0xfc   :  { %3843 = vmatmul.mubr.msk.bf16.gmra.mrb[104].mxu0 %vm648_vm1, %v4139_v54  ;;  %4015 = vmatmul.mubr.msk.bf16.gmra.mrb[104].mxu1 %vm648_vm1, %v4140_v55 }
  0xfd   :  { %3846 = vmatprep.mubr.msk.bf16.mxu0 %vm4226_vm0, %v4225_v0  ;;  %4018 = vmatprep.mubr.msk.bf16.mxu1 %vm4226_vm0, %v4225_v0 }
  0xff   :  { %v938_v57 = vpop.f32.mrb[0].mxu0  ;;  %v1282_v58 = vpop.f32.mrb[0].mxu1 }
 0x100   :  { %v939_v59 = vadd.f32 %v4597_v56, %v938_v57  ;;  %v3740_v60 = vpop.f32.mrb[1].mxu0  ;;  %v1283_v62 = vadd.f32 %v4597_v56, %v1282_v58  ;;  %v3912_v63 = vpop.f32.mrb[1].mxu1 }
 0x101   :  { %v941_v2 = vpop.f32.mrb[2].mxu0  ;;  %v1285_v3 = vpop.f32.mrb[2].mxu1 }
 0x102   :  { %v942_v4 = vadd.f32 %v4597_v56, %v941_v2  ;;  %v3741_v5 = vpop.f32.mrb[3].mxu0  ;;  %v1702_v6 = vmax.f32 %v1283_v62, 0.0  ;;  %v1286_v7 = vadd.f32 %v4597_v56, %v1285_v3  ;;  %v3913_v8 = vpop.f32.mrb[3].mxu1  ;;  %v1616_v9 = vmax.f32 %v939_v59, 0.0  ;;  %v4147_v59 = vld [vmem:[%s5211_s0 + $0xf0] sm:$0xff]   ;;  %v4148_v62 = vld [vmem:[%s5211_s0 + $0x248] sm:$0xff]  }
 0x104   :  { %v1617_v10 = vmax.f32 %v942_v4, 0.0  ;;  %3847 = vmatmul.mubr.msk.bf16.gmra.mrb[108].mxu0 %vm648_vm1, %v4141_v61  ;;  %v1703_v11 = vmax.f32 %v1286_v7, 0.0  ;;  %4019 = vmatmul.mubr.msk.bf16.gmra.mrb[108].mxu1 %vm648_vm1, %v4142_v1 }
 0x105   :  { %3850 = vmatprep.mubr.msk.bf16.mxu0 %vm4226_vm0, %v4225_v0  ;;  %4022 = vmatprep.mubr.msk.bf16.mxu1 %vm4226_vm0, %v4225_v0 }
 0x106   :  { %v3150_v12 = vpack.c.bf16 %v1617_v10, %v1616_v9  ;;  %v3365_v13 = vpack.c.bf16 %v1703_v11, %v1702_v6 }
 0x107   :  { %v946_v14 = vpop.f32.mrb[4].mxu0  ;;  %v1290_v15 = vpop.f32.mrb[4].mxu1 }
 0x108   :  { %3151 = vst [vmem:[%s5214_s3] sm:$0xff] %v3150_v12   ;;  %v947_v16 = vadd.f32 %v4597_v56, %v946_v14  ;;  %v3744_v17 = vpop.f32.mrb[5].mxu0  ;;  %3609 = vst [vmem:[%s5214_s3 + $0x158] sm:$0xff] %v3365_v13   ;;  %v1291_v19 = vadd.f32 %v4597_v56, %v1290_v15  ;;  %v3916_v20 = vpop.f32.mrb[5].mxu1 }
 0x109   :  { %v949_v22 = vpop.f32.mrb[6].mxu0  ;;  %v1293_v23 = vpop.f32.mrb[6].mxu1 }
 0x10a   :  { %v950_v24 = vadd.f32 %v4597_v56, %v949_v22  ;;  %v3745_v25 = vpop.f32.mrb[7].mxu0  ;;  %v1704_v26 = vmax.f32 %v1291_v19, 0.0  ;;  %v1294_v27 = vadd.f32 %v4597_v56, %v1293_v23  ;;  %v3917_v28 = vpop.f32.mrb[7].mxu1  ;;  %v1618_v29 = vmax.f32 %v947_v16, 0.0  ;;  %v4149_v16 = vld [vmem:[%s5211_s0 + $0xf8] sm:$0xff]   ;;  %v4150_v19 = vld [vmem:[%s5211_s0 + $0x250] sm:$0xff]  }
 0x10c   :  { %v1619_v30 = vmax.f32 %v950_v24, 0.0  ;;  %3851 = vmatmul.mubr.msk.bf16.gmra.mrb[112].mxu0 %vm648_vm1, %v4143_v18  ;;  %v1705_v31 = vmax.f32 %v1294_v27, 0.0  ;;  %4023 = vmatmul.mubr.msk.bf16.gmra.mrb[112].mxu1 %vm648_vm1, %v4144_v21 }
 0x10d   :  { %3854 = vmatprep.mubr.msk.bf16.mxu0 %vm4226_vm0, %v4225_v0  ;;  %4026 = vmatprep.mubr.msk.bf16.mxu1 %vm4226_vm0, %v4225_v0 }
 0x10e   :  { %v3155_v32 = vpack.c.bf16 %v1619_v30, %v1618_v29  ;;  %v3370_v33 = vpack.c.bf16 %v1705_v31, %v1704_v26 }
 0x10f   :  { %v954_v34 = vpop.f32.mrb[8].mxu0  ;;  %v1298_v35 = vpop.f32.mrb[8].mxu1 }
 0x110   :  { %3567 = vst [vmem:[%s5214_s3 + $0x8] sm:$0xff] %v3155_v32   ;;  %v955_v36 = vadd.f32 %v4597_v56, %v954_v34  ;;  %v3748_v37 = vpop.f32.mrb[9].mxu0  ;;  %3610 = vst [vmem:[%s5214_s3 + $0x160] sm:$0xff] %v3370_v33   ;;  %v1299_v39 = vadd.f32 %v4597_v56, %v1298_v35  ;;  %v3920_v40 = vpop.f32.mrb[9].mxu1 }
 0x111   :  { %v957_v42 = vpop.f32.mrb[10].mxu0  ;;  %v1301_v43 = vpop.f32.mrb[10].mxu1 }
 0x112   :  { %v958_v44 = vadd.f32 %v4597_v56, %v957_v42  ;;  %v3749_v45 = vpop.f32.mrb[11].mxu0  ;;  %v1706_v46 = vmax.f32 %v1299_v39, 0.0  ;;  %v1302_v47 = vadd.f32 %v4597_v56, %v1301_v43  ;;  %v3921_v48 = vpop.f32.mrb[11].mxu1  ;;  %v1620_v49 = vmax.f32 %v955_v36, 0.0  ;;  %v4151_v36 = vld [vmem:[%s5211_s0 + $0x100] sm:$0xff]   ;;  %v4152_v39 = vld [vmem:[%s5211_s0 + $0x258] sm:$0xff]  }
 0x114   :  { %v1621_v50 = vmax.f32 %v958_v44, 0.0  ;;  %3855 = vmatmul.mubr.msk.bf16.gmra.mrb[116].mxu0 %vm648_vm1, %v4145_v38  ;;  %v1707_v51 = vmax.f32 %v1302_v47, 0.0  ;;  %4027 = vmatmul.mubr.msk.bf16.gmra.mrb[116].mxu1 %vm648_vm1, %v4146_v41 }
 0x115   :  { %3858 = vmatprep.mubr.msk.bf16.mxu0 %vm4226_vm0, %v4225_v0  ;;  %4030 = vmatprep.mubr.msk.bf16.mxu1 %vm4226_vm0, %v4225_v0 }
 0x116   :  { %v3160_v52 = vpack.c.bf16 %v1621_v50, %v1620_v49  ;;  %v3375_v53 = vpack.c.bf16 %v1707_v51, %v1706_v46 }
 0x117   :  { %v962_v54 = vpop.f32.mrb[12].mxu0  ;;  %v1306_v55 = vpop.f32.mrb[12].mxu1 }
 0x118   :  { %3568 = vst [vmem:[%s5214_s3 + $0x10] sm:$0xff] %v3160_v52   ;;  %v963_v57 = vadd.f32 %v4597_v56, %v962_v54  ;;  %v3752_v58 = vpop.f32.mrb[13].mxu0  ;;  %3611 = vst [vmem:[%s5214_s3 + $0x168] sm:$0xff] %v3375_v53   ;;  %v1307_v60 = vadd.f32 %v4597_v56, %v1306_v55  ;;  %v3924_v61 = vpop.f32.mrb[13].mxu1 }
 0x119   :  { %v965_v63 = vpop.f32.mrb[14].mxu0  ;;  %v1309_v1 = vpop.f32.mrb[14].mxu1 }
 0x11a   :  { %v966_v2 = vadd.f32 %v4597_v56, %v965_v63  ;;  %v3753_v3 = vpop.f32.mrb[15].mxu0  ;;  %v1708_v4 = vmax.f32 %v1307_v60, 0.0  ;;  %v1310_v5 = vadd.f32 %v4597_v56, %v1309_v1  ;;  %v3925_v6 = vpop.f32.mrb[15].mxu1  ;;  %v1622_v7 = vmax.f32 %v963_v57, 0.0  ;;  %v4153_v57 = vld [vmem:[%s5211_s0 + $0x108] sm:$0xff]   ;;  %v4154_v60 = vld [vmem:[%s5211_s0 + $0x260] sm:$0xff]  }
 0x11c   :  { %v1623_v8 = vmax.f32 %v966_v2, 0.0  ;;  %3859 = vmatmul.mubr.msk.bf16.gmra.mrb[120].mxu0 %vm648_vm1, %v4147_v59  ;;  %v1709_v9 = vmax.f32 %v1310_v5, 0.0  ;;  %4031 = vmatmul.mubr.msk.bf16.gmra.mrb[120].mxu1 %vm648_vm1, %v4148_v62 }
 0x11d   :  { %3862 = vmatprep.mubr.msk.bf16.mxu0 %vm4226_vm0, %v4225_v0  ;;  %4034 = vmatprep.mubr.msk.bf16.mxu1 %vm4226_vm0, %v4225_v0 }
 0x11e   :  { %v3165_v10 = vpack.c.bf16 %v1623_v8, %v1622_v7  ;;  %v3380_v11 = vpack.c.bf16 %v1709_v9, %v1708_v4 }
 0x11f   :  { %v970_v12 = vpop.f32.mrb[16].mxu0  ;;  %v1314_v13 = vpop.f32.mrb[16].mxu1 }
 0x120   :  { %3569 = vst [vmem:[%s5214_s3 + $0x18] sm:$0xff] %v3165_v10   ;;  %v971_v14 = vadd.f32 %v4597_v56, %v970_v12  ;;  %v3756_v15 = vpop.f32.mrb[17].mxu0  ;;  %3612 = vst [vmem:[%s5214_s3 + $0x170] sm:$0xff] %v3380_v11   ;;  %v1315_v17 = vadd.f32 %v4597_v56, %v1314_v13  ;;  %v3928_v18 = vpop.f32.mrb[17].mxu1 }
 0x121   :  { %v973_v20 = vpop.f32.mrb[18].mxu0  ;;  %v1317_v21 = vpop.f32.mrb[18].mxu1 }
 0x122   :  { %v974_v22 = vadd.f32 %v4597_v56, %v973_v20  ;;  %v3757_v23 = vpop.f32.mrb[19].mxu0  ;;  %v1710_v24 = vmax.f32 %v1315_v17, 0.0  ;;  %v1318_v25 = vadd.f32 %v4597_v56, %v1317_v21  ;;  %v3929_v26 = vpop.f32.mrb[19].mxu1  ;;  %v1624_v27 = vmax.f32 %v971_v14, 0.0  ;;  %v4155_v14 = vld [vmem:[%s5211_s0 + $0x110] sm:$0xff]   ;;  %v4156_v17 = vld [vmem:[%s5211_s0 + $0x268] sm:$0xff]  }
 0x124   :  { %v1625_v28 = vmax.f32 %v974_v22, 0.0  ;;  %3863 = vmatmul.mubr.msk.bf16.gmra.mrb[124].mxu0 %vm648_vm1, %v4149_v16  ;;  %v1711_v29 = vmax.f32 %v1318_v25, 0.0  ;;  %4035 = vmatmul.mubr.msk.bf16.gmra.mrb[124].mxu1 %vm648_vm1, %v4150_v19 }
 0x125   :  { %3866 = vmatprep.mubr.msk.bf16.mxu0 %vm4226_vm0, %v4225_v0  ;;  %4038 = vmatprep.mubr.msk.bf16.mxu1 %vm4226_vm0, %v4225_v0 }
 0x126   :  { %v3170_v30 = vpack.c.bf16 %v1625_v28, %v1624_v27  ;;  %v3385_v31 = vpack.c.bf16 %v1711_v29, %v1710_v24 }
 0x127   :  { %v978_v32 = vpop.f32.mrb[20].mxu0  ;;  %v1322_v33 = vpop.f32.mrb[20].mxu1 }
 0x128   :  { %3570 = vst [vmem:[%s5214_s3 + $0x20] sm:$0xff] %v3170_v30   ;;  %v979_v34 = vadd.f32 %v4597_v56, %v978_v32  ;;  %v3760_v35 = vpop.f32.mrb[21].mxu0  ;;  %3613 = vst [vmem:[%s5214_s3 + $0x178] sm:$0xff] %v3385_v31   ;;  %v1323_v37 = vadd.f32 %v4597_v56, %v1322_v33  ;;  %v3932_v38 = vpop.f32.mrb[21].mxu1 }
 0x129   :  { %v981_v40 = vpop.f32.mrb[22].mxu0  ;;  %v1325_v41 = vpop.f32.mrb[22].mxu1 }
 0x12a   :  { %v982_v42 = vadd.f32 %v4597_v56, %v981_v40  ;;  %v3761_v43 = vpop.f32.mrb[23].mxu0  ;;  %v1712_v44 = vmax.f32 %v1323_v37, 0.0  ;;  %v1326_v45 = vadd.f32 %v4597_v56, %v1325_v41  ;;  %v3933_v46 = vpop.f32.mrb[23].mxu1  ;;  %v1626_v47 = vmax.f32 %v979_v34, 0.0  ;;  %v4157_v34 = vld [vmem:[%s5211_s0 + $0x118] sm:$0xff]   ;;  %v4158_v37 = vld [vmem:[%s5211_s0 + $0x270] sm:$0xff]  }
 0x12c   :  { %v1627_v48 = vmax.f32 %v982_v42, 0.0  ;;  %3867 = vmatmul.mubr.msk.bf16.gmra.mrb[128].mxu0 %vm648_vm1, %v4151_v36  ;;  %v1713_v49 = vmax.f32 %v1326_v45, 0.0  ;;  %4039 = vmatmul.mubr.msk.bf16.gmra.mrb[128].mxu1 %vm648_vm1, %v4152_v39 }
 0x12d   :  { %3870 = vmatprep.mubr.msk.bf16.mxu0 %vm4226_vm0, %v4225_v0  ;;  %4042 = vmatprep.mubr.msk.bf16.mxu1 %vm4226_vm0, %v4225_v0 }
 0x12e   :  { %v3175_v50 = vpack.c.bf16 %v1627_v48, %v1626_v47  ;;  %v3390_v51 = vpack.c.bf16 %v1713_v49, %v1712_v44 }
 0x12f   :  { %v986_v52 = vpop.f32.mrb[24].mxu0  ;;  %v1330_v53 = vpop.f32.mrb[24].mxu1 }
 0x130   :  { %3571 = vst [vmem:[%s5214_s3 + $0x28] sm:$0xff] %v3175_v50   ;;  %v987_v54 = vadd.f32 %v4597_v56, %v986_v52  ;;  %v3764_v55 = vpop.f32.mrb[25].mxu0  ;;  %3614 = vst [vmem:[%s5214_s3 + $0x180] sm:$0xff] %v3390_v51   ;;  %v1331_v58 = vadd.f32 %v4597_v56, %v1330_v53  ;;  %v3936_v59 = vpop.f32.mrb[25].mxu1 }
 0x131   :  { %v989_v61 = vpop.f32.mrb[26].mxu0  ;;  %v1333_v62 = vpop.f32.mrb[26].mxu1 }
 0x132   :  { %v990_v63 = vadd.f32 %v4597_v56, %v989_v61  ;;  %v3765_v1 = vpop.f32.mrb[27].mxu0  ;;  %v1714_v2 = vmax.f32 %v1331_v58, 0.0  ;;  %v1334_v3 = vadd.f32 %v4597_v56, %v1333_v62  ;;  %v3937_v4 = vpop.f32.mrb[27].mxu1  ;;  %v1628_v5 = vmax.f32 %v987_v54, 0.0  ;;  %v4159_v54 = vld [vmem:[%s5211_s0 + $0x120] sm:$0xff]   ;;  %v4160_v58 = vld [vmem:[%s5211_s0 + $0x278] sm:$0xff]  }
 0x134   :  { %v1629_v6 = vmax.f32 %v990_v63, 0.0  ;;  %3871 = vmatmul.mubr.msk.bf16.gmra.mrb[132].mxu0 %vm648_vm1, %v4153_v57  ;;  %v1715_v7 = vmax.f32 %v1334_v3, 0.0  ;;  %4043 = vmatmul.mubr.msk.bf16.gmra.mrb[132].mxu1 %vm648_vm1, %v4154_v60 }
 0x135   :  { %3874 = vmatprep.mubr.msk.bf16.mxu0 %vm4226_vm0, %v4225_v0  ;;  %4046 = vmatprep.mubr.msk.bf16.mxu1 %vm4226_vm0, %v4225_v0 }
 0x136   :  { %v3180_v8 = vpack.c.bf16 %v1629_v6, %v1628_v5  ;;  %v3395_v9 = vpack.c.bf16 %v1715_v7, %v1714_v2 }
 0x137   :  { %v994_v10 = vpop.f32.mrb[28].mxu0  ;;  %v1338_v11 = vpop.f32.mrb[28].mxu1 }
 0x138   :  { %3572 = vst [vmem:[%s5214_s3 + $0x30] sm:$0xff] %v3180_v8   ;;  %v995_v12 = vadd.f32 %v4597_v56, %v994_v10  ;;  %v3768_v13 = vpop.f32.mrb[29].mxu0  ;;  %3615 = vst [vmem:[%s5214_s3 + $0x188] sm:$0xff] %v3395_v9   ;;  %v1339_v15 = vadd.f32 %v4597_v56, %v1338_v11  ;;  %v3940_v16 = vpop.f32.mrb[29].mxu1 }
 0x139   :  { %v997_v18 = vpop.f32.mrb[30].mxu0  ;;  %v1341_v19 = vpop.f32.mrb[30].mxu1 }
 0x13a   :  { %v998_v20 = vadd.f32 %v4597_v56, %v997_v18  ;;  %v3769_v21 = vpop.f32.mrb[31].mxu0  ;;  %v1716_v22 = vmax.f32 %v1339_v15, 0.0  ;;  %v1342_v23 = vadd.f32 %v4597_v56, %v1341_v19  ;;  %v3941_v24 = vpop.f32.mrb[31].mxu1  ;;  %v1630_v25 = vmax.f32 %v995_v12, 0.0  ;;  %v4161_v12 = vld [vmem:[%s5211_s0 + $0x128] sm:$0xff]   ;;  %v4162_v15 = vld [vmem:[%s5211_s0 + $0x280] sm:$0xff]  }
 0x13c   :  { %v1631_v26 = vmax.f32 %v998_v20, 0.0  ;;  %3875 = vmatmul.mubr.msk.bf16.gmra.mrb[136].mxu0 %vm648_vm1, %v4155_v14  ;;  %v1717_v27 = vmax.f32 %v1342_v23, 0.0  ;;  %4047 = vmatmul.mubr.msk.bf16.gmra.mrb[136].mxu1 %vm648_vm1, %v4156_v17 }
 0x13d   :  { %3878 = vmatprep.mubr.msk.bf16.mxu0 %vm4226_vm0, %v4225_v0  ;;  %4050 = vmatprep.mubr.msk.bf16.mxu1 %vm4226_vm0, %v4225_v0 }
 0x13e   :  { %v3185_v28 = vpack.c.bf16 %v1631_v26, %v1630_v25  ;;  %v3400_v29 = vpack.c.bf16 %v1717_v27, %v1716_v22 }
 0x13f   :  { %v1002_v30 = vpop.f32.mrb[32].mxu0  ;;  %v1346_v31 = vpop.f32.mrb[32].mxu1 }
 0x140   :  { %3573 = vst [vmem:[%s5214_s3 + $0x38] sm:$0xff] %v3185_v28   ;;  %v1003_v32 = vadd.f32 %v4597_v56, %v1002_v30  ;;  %v3772_v33 = vpop.f32.mrb[33].mxu0  ;;  %3616 = vst [vmem:[%s5214_s3 + $0x190] sm:$0xff] %v3400_v29   ;;  %v1347_v35 = vadd.f32 %v4597_v56, %v1346_v31  ;;  %v3944_v36 = vpop.f32.mrb[33].mxu1 }
 0x141   :  { %v1005_v38 = vpop.f32.mrb[34].mxu0  ;;  %v1349_v39 = vpop.f32.mrb[34].mxu1 }
 0x142   :  { %v1006_v40 = vadd.f32 %v4597_v56, %v1005_v38  ;;  %v3773_v41 = vpop.f32.mrb[35].mxu0  ;;  %v1718_v42 = vmax.f32 %v1347_v35, 0.0  ;;  %v1350_v43 = vadd.f32 %v4597_v56, %v1349_v39  ;;  %v3945_v44 = vpop.f32.mrb[35].mxu1  ;;  %v1632_v45 = vmax.f32 %v1003_v32, 0.0  ;;  %v4163_v32 = vld [vmem:[%s5211_s0 + $0x130] sm:$0xff]   ;;  %v4164_v35 = vld [vmem:[%s5211_s0 + $0x288] sm:$0xff]  }
 0x144   :  { %v1633_v46 = vmax.f32 %v1006_v40, 0.0  ;;  %3879 = vmatmul.mubr.msk.bf16.gmra.mrb[140].mxu0 %vm648_vm1, %v4157_v34  ;;  %v1719_v47 = vmax.f32 %v1350_v43, 0.0  ;;  %4051 = vmatmul.mubr.msk.bf16.gmra.mrb[140].mxu1 %vm648_vm1, %v4158_v37 }
 0x145   :  { %3882 = vmatprep.mubr.msk.bf16.mxu0 %vm4226_vm0, %v4225_v0  ;;  %4054 = vmatprep.mubr.msk.bf16.mxu1 %vm4226_vm0, %v4225_v0 }
 0x146   :  { %v3190_v48 = vpack.c.bf16 %v1633_v46, %v1632_v45  ;;  %v3405_v49 = vpack.c.bf16 %v1719_v47, %v1718_v42 }
 0x147   :  { %v1010_v50 = vpop.f32.mrb[36].mxu0  ;;  %v1354_v51 = vpop.f32.mrb[36].mxu1 }
 0x148   :  { %3574 = vst [vmem:[%s5214_s3 + $0x40] sm:$0xff] %v3190_v48   ;;  %v1011_v52 = vadd.f32 %v4597_v56, %v1010_v50  ;;  %v3776_v53 = vpop.f32.mrb[37].mxu0  ;;  %3617 = vst [vmem:[%s5214_s3 + $0x198] sm:$0xff] %v3405_v49   ;;  %v1355_v55 = vadd.f32 %v4597_v56, %v1354_v51  ;;  %v3948_v57 = vpop.f32.mrb[37].mxu1 }
 0x149   :  { %v1013_v59 = vpop.f32.mrb[38].mxu0  ;;  %v1357_v60 = vpop.f32.mrb[38].mxu1 }
 0x14a   :  { %v1014_v61 = vadd.f32 %v4597_v56, %v1013_v59  ;;  %v3777_v62 = vpop.f32.mrb[39].mxu0  ;;  %v1720_v63 = vmax.f32 %v1355_v55, 0.0  ;;  %v1358_v1 = vadd.f32 %v4597_v56, %v1357_v60  ;;  %v3949_v2 = vpop.f32.mrb[39].mxu1  ;;  %v1634_v3 = vmax.f32 %v1011_v52, 0.0  ;;  %v4165_v52 = vld [vmem:[%s5211_s0 + $0x138] sm:$0xff]   ;;  %v4166_v55 = vld [vmem:[%s5211_s0 + $0x290] sm:$0xff]  }
 0x14c   :  { %v1635_v4 = vmax.f32 %v1014_v61, 0.0  ;;  %3883 = vmatmul.mubr.msk.bf16.gmra.mrb[144].mxu0 %vm648_vm1, %v4159_v54  ;;  %v1721_v5 = vmax.f32 %v1358_v1, 0.0  ;;  %4055 = vmatmul.mubr.msk.bf16.gmra.mrb[144].mxu1 %vm648_vm1, %v4160_v58 }
 0x14d   :  { %3886 = vmatprep.mubr.msk.bf16.mxu0 %vm4226_vm0, %v4225_v0  ;;  %4058 = vmatprep.mubr.msk.bf16.mxu1 %vm4226_vm0, %v4225_v0 }
 0x14e   :  { %v3195_v6 = vpack.c.bf16 %v1635_v4, %v1634_v3  ;;  %v3410_v7 = vpack.c.bf16 %v1721_v5, %v1720_v63 }
 0x14f   :  { %v1018_v8 = vpop.f32.mrb[40].mxu0  ;;  %v1362_v9 = vpop.f32.mrb[40].mxu1 }
 0x150   :  { %3575 = vst [vmem:[%s5214_s3 + $0x48] sm:$0xff] %v3195_v6   ;;  %v1019_v10 = vadd.f32 %v4597_v56, %v1018_v8  ;;  %v3780_v11 = vpop.f32.mrb[41].mxu0  ;;  %3618 = vst [vmem:[%s5214_s3 + $0x1a0] sm:$0xff] %v3410_v7   ;;  %v1363_v13 = vadd.f32 %v4597_v56, %v1362_v9  ;;  %v3952_v14 = vpop.f32.mrb[41].mxu1 }
 0x151   :  { %v1021_v16 = vpop.f32.mrb[42].mxu0  ;;  %v1365_v17 = vpop.f32.mrb[42].mxu1 }
 0x152   :  { %v1022_v18 = vadd.f32 %v4597_v56, %v1021_v16  ;;  %v3781_v19 = vpop.f32.mrb[43].mxu0  ;;  %v1722_v20 = vmax.f32 %v1363_v13, 0.0  ;;  %v1366_v21 = vadd.f32 %v4597_v56, %v1365_v17  ;;  %v3953_v22 = vpop.f32.mrb[43].mxu1  ;;  %v1636_v23 = vmax.f32 %v1019_v10, 0.0  ;;  %v4167_v10 = vld [vmem:[%s5211_s0 + $0x140] sm:$0xff]   ;;  %v4168_v13 = vld [vmem:[%s5211_s0 + $0x298] sm:$0xff]  }
 0x154   :  { %v1637_v24 = vmax.f32 %v1022_v18, 0.0  ;;  %3887 = vmatmul.mubr.msk.bf16.gmra.mrb[148].mxu0 %vm648_vm1, %v4161_v12  ;;  %v1723_v25 = vmax.f32 %v1366_v21, 0.0  ;;  %4059 = vmatmul.mubr.msk.bf16.gmra.mrb[148].mxu1 %vm648_vm1, %v4162_v15 }
 0x155   :  { %3890 = vmatprep.mubr.msk.bf16.mxu0 %vm4226_vm0, %v4225_v0  ;;  %4062 = vmatprep.mubr.msk.bf16.mxu1 %vm4226_vm0, %v4225_v0 }
 0x156   :  { %v3200_v26 = vpack.c.bf16 %v1637_v24, %v1636_v23  ;;  %v3415_v27 = vpack.c.bf16 %v1723_v25, %v1722_v20 }
 0x157   :  { %v1026_v28 = vpop.f32.mrb[44].mxu0  ;;  %v1370_v29 = vpop.f32.mrb[44].mxu1 }
 0x158   :  { %3576 = vst [vmem:[%s5214_s3 + $0x50] sm:$0xff] %v3200_v26   ;;  %v1027_v30 = vadd.f32 %v4597_v56, %v1026_v28  ;;  %v3784_v31 = vpop.f32.mrb[45].mxu0  ;;  %3619 = vst [vmem:[%s5214_s3 + $0x1a8] sm:$0xff] %v3415_v27   ;;  %v1371_v33 = vadd.f32 %v4597_v56, %v1370_v29  ;;  %v3956_v34 = vpop.f32.mrb[45].mxu1 }
 0x159   :  { %v1029_v36 = vpop.f32.mrb[46].mxu0  ;;  %v1373_v37 = vpop.f32.mrb[46].mxu1 }
 0x15a   :  { %v1030_v38 = vadd.f32 %v4597_v56, %v1029_v36  ;;  %v3785_v39 = vpop.f32.mrb[47].mxu0  ;;  %v1724_v40 = vmax.f32 %v1371_v33, 0.0  ;;  %v1374_v41 = vadd.f32 %v4597_v56, %v1373_v37  ;;  %v3957_v42 = vpop.f32.mrb[47].mxu1  ;;  %v1638_v43 = vmax.f32 %v1027_v30, 0.0  ;;  %v4169_v30 = vld [vmem:[%s5211_s0 + $0x148] sm:$0xff]  }
 0x15b   :  { %v4170_v33 = vld [vmem:[%s5211_s0 + $0x2a0] ss:$0 sps:$4 sm:$0xff]  }
 0x15c   :  { %v1639_v44 = vmax.f32 %v1030_v38, 0.0  ;;  %3891 = vmatmul.mubr.msk.bf16.gmra.mrb[152].mxu0 %vm648_vm1, %v4163_v32  ;;  %v1725_v45 = vmax.f32 %v1374_v41, 0.0  ;;  %4063 = vmatmul.mubr.msk.bf16.gmra.mrb[152].mxu1 %vm648_vm1, %v4164_v35 }
 0x15d   :  { %3894 = vmatprep.mubr.msk.bf16.mxu0 %vm4226_vm0, %v4225_v0  ;;  %4066 = vmatprep.mubr.msk.bf16.mxu1 %vm4226_vm0, %v4225_v0 }
 0x15e   :  { %v3205_v46 = vpack.c.bf16 %v1639_v44, %v1638_v43  ;;  %v3420_v47 = vpack.c.bf16 %v1725_v45, %v1724_v40 }
 0x15f   :  { %v1034_v48 = vpop.f32.mrb[48].mxu0  ;;  %v1378_v49 = vpop.f32.mrb[48].mxu1 }
 0x160   :  { %3577 = vst [vmem:[%s5214_s3 + $0x58] sm:$0xff] %v3205_v46   ;;  %v1035_v50 = vadd.f32 %v4597_v56, %v1034_v48  ;;  %v3788_v51 = vpop.f32.mrb[49].mxu0  ;;  %3620 = vst [vmem:[%s5214_s3 + $0x1b0] sm:$0xff] %v3420_v47   ;;  %v1379_v53 = vadd.f32 %v4597_v56, %v1378_v49  ;;  %v3960_v54 = vpop.f32.mrb[49].mxu1 }
 0x161   :  { %v1037_v57 = vpop.f32.mrb[50].mxu0  ;;  %v1381_v58 = vpop.f32.mrb[50].mxu1 }
 0x162   :  { %v1038_v59 = vadd.f32 %v4597_v56, %v1037_v57  ;;  %v3789_v60 = vpop.f32.mrb[51].mxu0  ;;  %v1726_v61 = vmax.f32 %v1379_v53, 0.0  ;;  %v1382_v62 = vadd.f32 %v4597_v56, %v1381_v58  ;;  %v3961_v63 = vpop.f32.mrb[51].mxu1  ;;  %v1640_v1 = vmax.f32 %v1035_v50, 0.0  ;;  %v4171_v50 = vld [vmem:[%s5211_s0 + $0x150] sm:$0xff]  }
 0x164   :  { %v1641_v2 = vmax.f32 %v1038_v59, 0.0  ;;  %3895 = vmatmul.mubr.msk.bf16.gmra.mrb[156].mxu0 %vm648_vm1, %v4165_v52  ;;  %v1727_v3 = vmax.f32 %v1382_v62, 0.0  ;;  %4067 = vmatmul.mubr.msk.bf16.gmra.mrb[156].mxu1 %vm648_vm1, %v4166_v55 }
 0x165   :  { %3898 = vmatprep.mubr.msk.bf16.mxu0 %vm4226_vm0, %v4225_v0  ;;  %4070 = vmatprep.mubr.msk.bf16.mxu1 %vm4226_vm0, %v4225_v0 }
 0x166   :  { %v3210_v4 = vpack.c.bf16 %v1641_v2, %v1640_v1  ;;  %v3425_v5 = vpack.c.bf16 %v1727_v3, %v1726_v61 }
 0x167   :  { %v1042_v6 = vpop.f32.mrb[52].mxu0  ;;  %v1386_v7 = vpop.f32.mrb[52].mxu1 }
 0x168   :  { %3578 = vst [vmem:[%s5214_s3 + $0x60] sm:$0xff] %v3210_v4   ;;  %v1043_v8 = vadd.f32 %v4597_v56, %v1042_v6  ;;  %v3792_v9 = vpop.f32.mrb[53].mxu0  ;;  %3621 = vst [vmem:[%s5214_s3 + $0x1b8] sm:$0xff] %v3425_v5   ;;  %v1387_v11 = vadd.f32 %v4597_v56, %v1386_v7  ;;  %v3964_v12 = vpop.f32.mrb[53].mxu1 }
 0x169   :  { %v1045_v14 = vpop.f32.mrb[54].mxu0  ;;  %v1389_v15 = vpop.f32.mrb[54].mxu1 }
 0x16a   :  { %v1046_v16 = vadd.f32 %v4597_v56, %v1045_v14  ;;  %v3793_v17 = vpop.f32.mrb[55].mxu0  ;;  %v1728_v18 = vmax.f32 %v1387_v11, 0.0  ;;  %v1390_v19 = vadd.f32 %v4597_v56, %v1389_v15  ;;  %v3965_v20 = vpop.f32.mrb[55].mxu1  ;;  %v1642_v21 = vmax.f32 %v1043_v8, 0.0 }
 0x16c   :  { %v1643_v22 = vmax.f32 %v1046_v16, 0.0  ;;  %3899 = vmatmul.mubr.msk.bf16.gmra.mrb[160].mxu0 %vm648_vm1, %v4167_v10  ;;  %v1729_v23 = vmax.f32 %v1390_v19, 0.0  ;;  %4071 = vmatmul.mubr.msk.bf16.gmra.mrb[160].mxu1 %vm648_vm1, %v4168_v13 }
 0x16d   :  { %3902 = vmatprep.mubr.msk.bf16.mxu0 %vm4226_vm0, %v4225_v0  ;;  %4074 = vmatprep.mubr.msk.bf16.mxu1 %vm4226_vm0, %v4225_v0 }
 0x16e   :  { %v3215_v24 = vpack.c.bf16 %v1643_v22, %v1642_v21  ;;  %v3430_v25 = vpack.c.bf16 %v1729_v23, %v1728_v18 }
 0x16f   :  { %v1050_v26 = vpop.f32.mrb[56].mxu0  ;;  %v1394_v27 = vpop.f32.mrb[56].mxu1 }
 0x170   :  { %3579 = vst [vmem:[%s5214_s3 + $0x68] sm:$0xff] %v3215_v24   ;;  %v1051_v28 = vadd.f32 %v4597_v56, %v1050_v26  ;;  %v3796_v29 = vpop.f32.mrb[57].mxu0  ;;  %3622 = vst [vmem:[%s5214_s3 + $0x1c0] sm:$0xff] %v3430_v25   ;;  %v1395_v31 = vadd.f32 %v4597_v56, %v1394_v27  ;;  %v3968_v32 = vpop.f32.mrb[57].mxu1 }
 0x171   :  { %v1053_v34 = vpop.f32.mrb[58].mxu0  ;;  %v1397_v35 = vpop.f32.mrb[58].mxu1 }
 0x172   :  { %v1054_v36 = vadd.f32 %v4597_v56, %v1053_v34  ;;  %v3797_v37 = vpop.f32.mrb[59].mxu0  ;;  %v1730_v38 = vmax.f32 %v1395_v31, 0.0  ;;  %v1398_v39 = vadd.f32 %v4597_v56, %v1397_v35  ;;  %v3969_v40 = vpop.f32.mrb[59].mxu1  ;;  %v1644_v41 = vmax.f32 %v1051_v28, 0.0 }
 0x174   :  { %v1645_v42 = vmax.f32 %v1054_v36, 0.0  ;;  %3903 = vmatmul.mubr.msk.bf16.gmra.mrb[164].mxu0 %vm648_vm1, %v4169_v30  ;;  %v1731_v43 = vmax.f32 %v1398_v39, 0.0  ;;  %4075 = vmatmul.mubr.msk.bf16.gmra.mrb[164].mxu1 %vm648_vm1, %v4170_v33 }
 0x175   :  { %3906 = vmatprep.mubr.msk.bf16.mxu0 %vm4226_vm0, %v4225_v0 }
 0x176   :  { %v3220_v44 = vpack.c.bf16 %v1645_v42, %v1644_v41  ;;  %v3435_v45 = vpack.c.bf16 %v1731_v43, %v1730_v38 }
 0x177   :  { %v1058_v46 = vpop.f32.mrb[60].mxu0  ;;  %v1402_v47 = vpop.f32.mrb[60].mxu1 }
 0x178   :  { %3580 = vst [vmem:[%s5214_s3 + $0x70] sm:$0xff] %v3220_v44   ;;  %v1059_v48 = vadd.f32 %v4597_v56, %v1058_v46  ;;  %v3800_v49 = vpop.f32.mrb[61].mxu0  ;;  %3623 = vst [vmem:[%s5214_s3 + $0x1c8] sm:$0xff] %v3435_v45   ;;  %v1403_v0 = vadd.f32 %v4597_v56, %v1402_v47  ;;  %v3972_v51 = vpop.f32.mrb[61].mxu1 }
 0x179   :  { %v1061_v52 = vpop.f32.mrb[62].mxu0  ;;  %v1405_v53 = vpop.f32.mrb[62].mxu1 }
 0x17a   :  { %v1062_v54 = vadd.f32 %v4597_v56, %v1061_v52  ;;  %v3801_v55 = vpop.f32.mrb[63].mxu0  ;;  %v1732_v57 = vmax.f32 %v1403_v0, 0.0  ;;  %v1406_v58 = vadd.f32 %v4597_v56, %v1405_v53  ;;  %v3973_v59 = vpop.f32.mrb[63].mxu1  ;;  %v1646_v60 = vmax.f32 %v1059_v48, 0.0 }
 0x17c   :  { %v1647_v61 = vmax.f32 %v1062_v54, 0.0  ;;  %3907 = vmatmul.mubr.msk.bf16.gmra.mrb[168].mxu0 %vm648_vm1, %v4171_v50  ;;  %v1733_v62 = vmax.f32 %v1406_v58, 0.0 }
 0x17e   :  { %v3225_v63 = vpack.c.bf16 %v1647_v61, %v1646_v60  ;;  %v3440_v1 = vpack.c.bf16 %v1733_v62, %v1732_v57 }
 0x17f   :  { %v1066_v2 = vpop.f32.mrb[64].mxu0  ;;  %v1410_v3 = vpop.f32.mrb[64].mxu1 }
 0x180   :  { %3581 = vst [vmem:[%s5214_s3 + $0x78] sm:$0xff] %v3225_v63   ;;  %v1067_v4 = vadd.f32 %v4597_v56, %v1066_v2  ;;  %v3804_v5 = vpop.f32.mrb[65].mxu0  ;;  %3624 = vst [vmem:[%s5214_s3 + $0x1d0] sm:$0xff] %v3440_v1   ;;  %v1411_v6 = vadd.f32 %v4597_v56, %v1410_v3  ;;  %v3976_v7 = vpop.f32.mrb[65].mxu1 }
 0x181   :  { %v1069_v8 = vpop.f32.mrb[66].mxu0  ;;  %v1413_v9 = vpop.f32.mrb[66].mxu1 }
 0x182   :  { %v1070_v10 = vadd.f32 %v4597_v56, %v1069_v8  ;;  %v3805_v11 = vpop.f32.mrb[67].mxu0  ;;  %v1734_v12 = vmax.f32 %v1411_v6, 0.0  ;;  %v1414_v13 = vadd.f32 %v4597_v56, %v1413_v9  ;;  %v3977_v14 = vpop.f32.mrb[67].mxu1  ;;  %v1648_v15 = vmax.f32 %v1067_v4, 0.0 }
 0x184   :  { %v1649_v16 = vmax.f32 %v1070_v10, 0.0  ;;  %v1735_v17 = vmax.f32 %v1414_v13, 0.0 }
 0x186   :  { %v3230_v18 = vpack.c.bf16 %v1649_v16, %v1648_v15  ;;  %v3445_v19 = vpack.c.bf16 %v1735_v17, %v1734_v12 }
 0x187   :  { %v1074_v20 = vpop.f32.mrb[68].mxu0  ;;  %v1418_v21 = vpop.f32.mrb[68].mxu1 }
 0x188   :  { %3582 = vst [vmem:[%s5214_s3 + $0x80] sm:$0xff] %v3230_v18   ;;  %v1075_v22 = vadd.f32 %v4597_v56, %v1074_v20  ;;  %v3808_v23 = vpop.f32.mrb[69].mxu0  ;;  %3625 = vst [vmem:[%s5214_s3 + $0x1d8] sm:$0xff] %v3445_v19   ;;  %v1419_v24 = vadd.f32 %v4597_v56, %v1418_v21  ;;  %v3980_v25 = vpop.f32.mrb[69].mxu1 }
 0x189   :  { %v1077_v26 = vpop.f32.mrb[70].mxu0  ;;  %v1421_v27 = vpop.f32.mrb[70].mxu1 }
 0x18a   :  { %v1078_v28 = vadd.f32 %v4597_v56, %v1077_v26  ;;  %v3809_v29 = vpop.f32.mrb[71].mxu0  ;;  %v1736_v30 = vmax.f32 %v1419_v24, 0.0  ;;  %v1422_v31 = vadd.f32 %v4597_v56, %v1421_v27  ;;  %v3981_v32 = vpop.f32.mrb[71].mxu1  ;;  %v1650_v33 = vmax.f32 %v1075_v22, 0.0 }
 0x18c   :  { %v1651_v34 = vmax.f32 %v1078_v28, 0.0  ;;  %v1737_v35 = vmax.f32 %v1422_v31, 0.0  ;;  %v4992_v31 = vld [vmem:[#allocation4] ss:$0 sm:$0xff] }
 0x18e   :  { %v3235_v36 = vpack.c.bf16 %v1651_v34, %v1650_v33  ;;  %v3450_v37 = vpack.c.bf16 %v1737_v35, %v1736_v30 }
 0x18f   :  { %v1082_v38 = vpop.f32.mrb[72].mxu0  ;;  %v1426_v39 = vpop.f32.mrb[72].mxu1 }
 0x190   :  { %3583 = vst [vmem:[%s5214_s3 + $0x88] sm:$0xff] %v3235_v36   ;;  %v1083_v40 = vadd.f32 %v4597_v56, %v1082_v38  ;;  %v3812_v41 = vpop.f32.mrb[73].mxu0  ;;  %3626 = vst [vmem:[%s5214_s3 + $0x1e0] sm:$0xff] %v3450_v37   ;;  %v1427_v42 = vadd.f32 %v4597_v56, %v1426_v39  ;;  %v3984_v43 = vpop.f32.mrb[73].mxu1 }
 0x191   :  { %v1085_v44 = vpop.f32.mrb[74].mxu0  ;;  %v1429_v45 = vpop.f32.mrb[74].mxu1 }
 0x192   :  { %v1086_v46 = vadd.f32 %v4597_v56, %v1085_v44  ;;  %v3813_v47 = vpop.f32.mrb[75].mxu0  ;;  %v1738_v48 = vmax.f32 %v1427_v42, 0.0  ;;  %v1430_v49 = vadd.f32 %v4597_v56, %v1429_v45  ;;  %v3985_v50 = vpop.f32.mrb[75].mxu1  ;;  %v1652_v0 = vmax.f32 %v1083_v40, 0.0 }
 0x194   :  { %v1653_v51 = vmax.f32 %v1086_v46, 0.0  ;;  %v1739_v52 = vmax.f32 %v1430_v49, 0.0 }
 0x196   :  { %v3240_v53 = vpack.c.bf16 %v1653_v51, %v1652_v0  ;;  %v3455_v54 = vpack.c.bf16 %v1739_v52, %v1738_v48 }
 0x197   :  { %v1090_v55 = vpop.f32.mrb[76].mxu0  ;;  %v1434_v57 = vpop.f32.mrb[76].mxu1 }
 0x198   :  { %3584 = vst [vmem:[%s5214_s3 + $0x90] sm:$0xff] %v3240_v53   ;;  %v1091_v58 = vadd.f32 %v4597_v56, %v1090_v55  ;;  %v3816_v59 = vpop.f32.mrb[77].mxu0  ;;  %3627 = vst [vmem:[%s5214_s3 + $0x1e8] sm:$0xff] %v3455_v54   ;;  %v1435_v60 = vadd.f32 %v4597_v56, %v1434_v57  ;;  %v3988_v61 = vpop.f32.mrb[77].mxu1 }
 0x199   :  { %v1093_v62 = vpop.f32.mrb[78].mxu0  ;;  %v1437_v63 = vpop.f32.mrb[78].mxu1 }
 0x19a   :  { %v1094_v1 = vadd.f32 %v4597_v56, %v1093_v62  ;;  %v3817_v2 = vpop.f32.mrb[79].mxu0  ;;  %v1740_v3 = vmax.f32 %v1435_v60, 0.0  ;;  %v1438_v4 = vadd.f32 %v4597_v56, %v1437_v63  ;;  %v3989_v5 = vpop.f32.mrb[79].mxu1  ;;  %v1654_v6 = vmax.f32 %v1091_v58, 0.0 }
 0x19c   :  { %v1655_v7 = vmax.f32 %v1094_v1, 0.0  ;;  %v1741_v8 = vmax.f32 %v1438_v4, 0.0 }
 0x19e   :  { %v3245_v9 = vpack.c.bf16 %v1655_v7, %v1654_v6  ;;  %v3460_v10 = vpack.c.bf16 %v1741_v8, %v1740_v3 }
 0x19f   :  { %v1098_v11 = vpop.f32.mrb[80].mxu0  ;;  %v1442_v12 = vpop.f32.mrb[80].mxu1 }
 0x1a0   :  { %3585 = vst [vmem:[%s5214_s3 + $0x98] sm:$0xff] %v3245_v9   ;;  %v1099_v13 = vadd.f32 %v4597_v56, %v1098_v11  ;;  %v3820_v14 = vpop.f32.mrb[81].mxu0  ;;  %3628 = vst [vmem:[%s5214_s3 + $0x1f0] sm:$0xff] %v3460_v10   ;;  %v1443_v15 = vadd.f32 %v4597_v56, %v1442_v12  ;;  %v3992_v16 = vpop.f32.mrb[81].mxu1 }
 0x1a1   :  { %v1101_v17 = vpop.f32.mrb[82].mxu0  ;;  %v1445_v18 = vpop.f32.mrb[82].mxu1 }
 0x1a2   :  { %v1102_v19 = vadd.f32 %v4597_v56, %v1101_v17  ;;  %v3821_v20 = vpop.f32.mrb[83].mxu0  ;;  %v1742_v21 = vmax.f32 %v1443_v15, 0.0  ;;  %v1446_v22 = vadd.f32 %v4597_v56, %v1445_v18  ;;  %v3993_v23 = vpop.f32.mrb[83].mxu1  ;;  %v1656_v24 = vmax.f32 %v1099_v13, 0.0 }
 0x1a4   :  { %v1657_v25 = vmax.f32 %v1102_v19, 0.0  ;;  %v1743_v26 = vmax.f32 %v1446_v22, 0.0 }
 0x1a6   :  { %v3250_v27 = vpack.c.bf16 %v1657_v25, %v1656_v24  ;;  %v3465_v28 = vpack.c.bf16 %v1743_v26, %v1742_v21 }
 0x1a7   :  { %v1106_v29 = vpop.f32.mrb[84].mxu0  ;;  %v1450_v30 = vpop.f32.mrb[84].mxu1 }
 0x1a8   :  { %3586 = vst [vmem:[%s5214_s3 + $0xa0] sm:$0xff] %v3250_v27   ;;  %v1107_v32 = vadd.f32 %v4992_v31, %v1106_v29  ;;  %v3824_v33 = vpop.f32.mrb[85].mxu0  ;;  %3629 = vst [vmem:[%s5214_s3 + $0x1f8] sm:$0xff] %v3465_v28   ;;  %v1451_v56 = vadd.f32 %v4992_v31, %v1450_v30  ;;  %v3996_v34 = vpop.f32.mrb[85].mxu1 }
 0x1a9   :  { %v1109_v35 = vpop.f32.mrb[86].mxu0  ;;  %v1453_v36 = vpop.f32.mrb[86].mxu1 }
 0x1aa   :  { %v1110_v37 = vadd.f32 %v4992_v31, %v1109_v35  ;;  %v3825_v38 = vpop.f32.mrb[87].mxu0  ;;  %v1744_v39 = vmax.f32 %v1451_v56, 0.0  ;;  %v1454_v40 = vadd.f32 %v4992_v31, %v1453_v36  ;;  %v3997_v41 = vpop.f32.mrb[87].mxu1  ;;  %v1658_v42 = vmax.f32 %v1107_v32, 0.0 }
 0x1ac   :  { %v1659_v43 = vmax.f32 %v1110_v37, 0.0  ;;  %v1745_v44 = vmax.f32 %v1454_v40, 0.0 }
 0x1ae   :  { %v3255_v45 = vpack.c.bf16 %v1659_v43, %v1658_v42  ;;  %v3470_v46 = vpack.c.bf16 %v1745_v44, %v1744_v39 }
 0x1af   :  { %v1114_v47 = vpop.f32.mrb[88].mxu0  ;;  %v1458_v48 = vpop.f32.mrb[88].mxu1 }
 0x1b0   :  { %3587 = vst [vmem:[%s5214_s3 + $0xa8] sm:$0xff] %v3255_v45   ;;  %v1115_v49 = vadd.f32 %v4992_v31, %v1114_v47  ;;  %v3828_v50 = vpop.f32.mrb[89].mxu0  ;;  %3630 = vst [vmem:[%s5214_s3 + $0x200] sm:$0xff] %v3470_v46   ;;  %v1459_v0 = vadd.f32 %v4992_v31, %v1458_v48  ;;  %v4000_v51 = vpop.f32.mrb[89].mxu1 }
 0x1b1   :  { %v1117_v52 = vpop.f32.mrb[90].mxu0  ;;  %v1461_v53 = vpop.f32.mrb[90].mxu1 }
 0x1b2   :  { %v1118_v54 = vadd.f32 %v4992_v31, %v1117_v52  ;;  %v3829_v55 = vpop.f32.mrb[91].mxu0  ;;  %v1746_v57 = vmax.f32 %v1459_v0, 0.0  ;;  %v1462_v58 = vadd.f32 %v4992_v31, %v1461_v53  ;;  %v4001_v59 = vpop.f32.mrb[91].mxu1  ;;  %v1660_v60 = vmax.f32 %v1115_v49, 0.0 }
 0x1b4   :  { %v1661_v61 = vmax.f32 %v1118_v54, 0.0  ;;  %v1747_v62 = vmax.f32 %v1462_v58, 0.0 }
 0x1b6   :  { %v3260_v63 = vpack.c.bf16 %v1661_v61, %v1660_v60  ;;  %v3475_v1 = vpack.c.bf16 %v1747_v62, %v1746_v57 }
 0x1b7   :  { %v1122_v2 = vpop.f32.mrb[92].mxu0  ;;  %v1466_v3 = vpop.f32.mrb[92].mxu1 }
 0x1b8   :  { %3588 = vst [vmem:[%s5214_s3 + $0xb0] sm:$0xff] %v3260_v63   ;;  %v1123_v4 = vadd.f32 %v4992_v31, %v1122_v2  ;;  %v3832_v5 = vpop.f32.mrb[93].mxu0  ;;  %3631 = vst [vmem:[%s5214_s3 + $0x208] sm:$0xff] %v3475_v1   ;;  %v1467_v6 = vadd.f32 %v4992_v31, %v1466_v3  ;;  %v4004_v7 = vpop.f32.mrb[93].mxu1 }
 0x1b9   :  { %v1125_v8 = vpop.f32.mrb[94].mxu0  ;;  %v1469_v9 = vpop.f32.mrb[94].mxu1 }
 0x1ba   :  { %v1126_v10 = vadd.f32 %v4992_v31, %v1125_v8  ;;  %v3833_v11 = vpop.f32.mrb[95].mxu0  ;;  %v1748_v12 = vmax.f32 %v1467_v6, 0.0  ;;  %v1470_v13 = vadd.f32 %v4992_v31, %v1469_v9  ;;  %v4005_v14 = vpop.f32.mrb[95].mxu1  ;;  %v1662_v15 = vmax.f32 %v1123_v4, 0.0 }
 0x1bc   :  { %v1663_v16 = vmax.f32 %v1126_v10, 0.0  ;;  %v1749_v17 = vmax.f32 %v1470_v13, 0.0 }
 0x1be   :  { %v3265_v18 = vpack.c.bf16 %v1663_v16, %v1662_v15  ;;  %v3480_v19 = vpack.c.bf16 %v1749_v17, %v1748_v12 }
 0x1bf   :  { %v1130_v20 = vpop.f32.mrb[96].mxu0  ;;  %v1474_v21 = vpop.f32.mrb[96].mxu1 }
 0x1c0   :  { %3589 = vst [vmem:[%s5214_s3 + $0xb8] sm:$0xff] %v3265_v18   ;;  %v1131_v22 = vadd.f32 %v4992_v31, %v1130_v20  ;;  %v3836_v23 = vpop.f32.mrb[97].mxu0  ;;  %3632 = vst [vmem:[%s5214_s3 + $0x210] sm:$0xff] %v3480_v19   ;;  %v1475_v24 = vadd.f32 %v4992_v31, %v1474_v21  ;;  %v4008_v25 = vpop.f32.mrb[97].mxu1 }
 0x1c1   :  { %v1133_v26 = vpop.f32.mrb[98].mxu0  ;;  %v1477_v27 = vpop.f32.mrb[98].mxu1 }
 0x1c2   :  { %v1134_v28 = vadd.f32 %v4992_v31, %v1133_v26  ;;  %v3837_v29 = vpop.f32.mrb[99].mxu0  ;;  %v1750_v30 = vmax.f32 %v1475_v24, 0.0  ;;  %v1478_v32 = vadd.f32 %v4992_v31, %v1477_v27  ;;  %v4009_v33 = vpop.f32.mrb[99].mxu1  ;;  %v1664_v56 = vmax.f32 %v1131_v22, 0.0 }
 0x1c4   :  { %v1665_v34 = vmax.f32 %v1134_v28, 0.0  ;;  %v1751_v35 = vmax.f32 %v1478_v32, 0.0 }
 0x1c6   :  { %v3270_v36 = vpack.c.bf16 %v1665_v34, %v1664_v56  ;;  %v3485_v37 = vpack.c.bf16 %v1751_v35, %v1750_v30 }
 0x1c7   :  { %v1138_v38 = vpop.f32.mrb[100].mxu0  ;;  %v1482_v39 = vpop.f32.mrb[100].mxu1 }
 0x1c8   :  { %3590 = vst [vmem:[%s5214_s3 + $0xc0] sm:$0xff] %v3270_v36   ;;  %v1139_v40 = vadd.f32 %v4992_v31, %v1138_v38  ;;  %v3840_v41 = vpop.f32.mrb[101].mxu0  ;;  %3633 = vst [vmem:[%s5214_s3 + $0x218] sm:$0xff] %v3485_v37   ;;  %v1483_v42 = vadd.f32 %v4992_v31, %v1482_v39  ;;  %v4012_v43 = vpop.f32.mrb[101].mxu1 }
 0x1c9   :  { %v1141_v44 = vpop.f32.mrb[102].mxu0  ;;  %v1485_v45 = vpop.f32.mrb[102].mxu1 }
 0x1ca   :  { %v1142_v46 = vadd.f32 %v4992_v31, %v1141_v44  ;;  %v3841_v47 = vpop.f32.mrb[103].mxu0  ;;  %v1752_v48 = vmax.f32 %v1483_v42, 0.0  ;;  %v1486_v49 = vadd.f32 %v4992_v31, %v1485_v45  ;;  %v4013_v50 = vpop.f32.mrb[103].mxu1  ;;  %v1666_v0 = vmax.f32 %v1139_v40, 0.0 }
 0x1cc   :  { %v1667_v51 = vmax.f32 %v1142_v46, 0.0  ;;  %v1753_v52 = vmax.f32 %v1486_v49, 0.0 }
 0x1ce   :  { %v3275_v53 = vpack.c.bf16 %v1667_v51, %v1666_v0  ;;  %v3490_v54 = vpack.c.bf16 %v1753_v52, %v1752_v48 }
 0x1cf   :  { %v1146_v55 = vpop.f32.mrb[104].mxu0  ;;  %v1490_v57 = vpop.f32.mrb[104].mxu1 }
 0x1d0   :  { %3591 = vst [vmem:[%s5214_s3 + $0xc8] sm:$0xff] %v3275_v53   ;;  %v1147_v58 = vadd.f32 %v4992_v31, %v1146_v55  ;;  %v3844_v59 = vpop.f32.mrb[105].mxu0  ;;  %3634 = vst [vmem:[%s5214_s3 + $0x220] sm:$0xff] %v3490_v54   ;;  %v1491_v60 = vadd.f32 %v4992_v31, %v1490_v57  ;;  %v4016_v61 = vpop.f32.mrb[105].mxu1 }
 0x1d1   :  { %v1149_v62 = vpop.f32.mrb[106].mxu0  ;;  %v1493_v63 = vpop.f32.mrb[106].mxu1 }
 0x1d2   :  { %v1150_v1 = vadd.f32 %v4992_v31, %v1149_v62  ;;  %v3845_v2 = vpop.f32.mrb[107].mxu0  ;;  %v1754_v3 = vmax.f32 %v1491_v60, 0.0  ;;  %v1494_v4 = vadd.f32 %v4992_v31, %v1493_v63  ;;  %v4017_v5 = vpop.f32.mrb[107].mxu1  ;;  %v1668_v6 = vmax.f32 %v1147_v58, 0.0 }
 0x1d4   :  { %v1669_v7 = vmax.f32 %v1150_v1, 0.0  ;;  %v1755_v8 = vmax.f32 %v1494_v4, 0.0 }
 0x1d6   :  { %v3280_v9 = vpack.c.bf16 %v1669_v7, %v1668_v6  ;;  %v3495_v10 = vpack.c.bf16 %v1755_v8, %v1754_v3 }
 0x1d7   :  { %v1154_v11 = vpop.f32.mrb[108].mxu0  ;;  %v1498_v12 = vpop.f32.mrb[108].mxu1 }
 0x1d8   :  { %3592 = vst [vmem:[%s5214_s3 + $0xd0] sm:$0xff] %v3280_v9   ;;  %v1155_v13 = vadd.f32 %v4992_v31, %v1154_v11  ;;  %v3848_v14 = vpop.f32.mrb[109].mxu0  ;;  %3635 = vst [vmem:[%s5214_s3 + $0x228] sm:$0xff] %v3495_v10   ;;  %v1499_v15 = vadd.f32 %v4992_v31, %v1498_v12  ;;  %v4020_v16 = vpop.f32.mrb[109].mxu1 }
 0x1d9   :  { %v1157_v17 = vpop.f32.mrb[110].mxu0  ;;  %v1501_v18 = vpop.f32.mrb[110].mxu1 }
 0x1da   :  { %v1158_v19 = vadd.f32 %v4992_v31, %v1157_v17  ;;  %v3849_v20 = vpop.f32.mrb[111].mxu0  ;;  %v1756_v21 = vmax.f32 %v1499_v15, 0.0  ;;  %v1502_v22 = vadd.f32 %v4992_v31, %v1501_v18  ;;  %v4021_v23 = vpop.f32.mrb[111].mxu1  ;;  %v1670_v24 = vmax.f32 %v1155_v13, 0.0 }
 0x1dc   :  { %v1671_v25 = vmax.f32 %v1158_v19, 0.0  ;;  %v1757_v26 = vmax.f32 %v1502_v22, 0.0 }
 0x1de   :  { %v3285_v27 = vpack.c.bf16 %v1671_v25, %v1670_v24  ;;  %v3500_v28 = vpack.c.bf16 %v1757_v26, %v1756_v21 }
 0x1df   :  { %v1162_v29 = vpop.f32.mrb[112].mxu0  ;;  %v1506_v30 = vpop.f32.mrb[112].mxu1 }
 0x1e0   :  { %3593 = vst [vmem:[%s5214_s3 + $0xd8] sm:$0xff] %v3285_v27   ;;  %v1163_v32 = vadd.f32 %v4992_v31, %v1162_v29  ;;  %v3852_v33 = vpop.f32.mrb[113].mxu0  ;;  %3636 = vst [vmem:[%s5214_s3 + $0x230] sm:$0xff] %v3500_v28   ;;  %v1507_v56 = vadd.f32 %v4992_v31, %v1506_v30  ;;  %v4024_v34 = vpop.f32.mrb[113].mxu1 }
 0x1e1   :  { %v1165_v35 = vpop.f32.mrb[114].mxu0  ;;  %v1509_v36 = vpop.f32.mrb[114].mxu1 }
 0x1e2   :  { %v1166_v37 = vadd.f32 %v4992_v31, %v1165_v35  ;;  %v3853_v38 = vpop.f32.mrb[115].mxu0  ;;  %v1758_v39 = vmax.f32 %v1507_v56, 0.0  ;;  %v1510_v40 = vadd.f32 %v4992_v31, %v1509_v36  ;;  %v4025_v41 = vpop.f32.mrb[115].mxu1  ;;  %v1672_v42 = vmax.f32 %v1163_v32, 0.0 }
 0x1e4   :  { %v1673_v43 = vmax.f32 %v1166_v37, 0.0  ;;  %v1759_v44 = vmax.f32 %v1510_v40, 0.0 }
 0x1e6   :  { %v3290_v45 = vpack.c.bf16 %v1673_v43, %v1672_v42  ;;  %v3505_v46 = vpack.c.bf16 %v1759_v44, %v1758_v39 }
 0x1e7   :  { %v1170_v47 = vpop.f32.mrb[116].mxu0  ;;  %v1514_v48 = vpop.f32.mrb[116].mxu1 }
 0x1e8   :  { %3594 = vst [vmem:[%s5214_s3 + $0xe0] sm:$0xff] %v3290_v45   ;;  %v1171_v49 = vadd.f32 %v4992_v31, %v1170_v47  ;;  %v3856_v50 = vpop.f32.mrb[117].mxu0  ;;  %3637 = vst [vmem:[%s5214_s3 + $0x238] sm:$0xff] %v3505_v46   ;;  %v1515_v0 = vadd.f32 %v4992_v31, %v1514_v48  ;;  %v4028_v51 = vpop.f32.mrb[117].mxu1 }
 0x1e9   :  { %v1173_v52 = vpop.f32.mrb[118].mxu0  ;;  %v1517_v53 = vpop.f32.mrb[118].mxu1 }
 0x1ea   :  { %v1174_v54 = vadd.f32 %v4992_v31, %v1173_v52  ;;  %v3857_v55 = vpop.f32.mrb[119].mxu0  ;;  %v1760_v57 = vmax.f32 %v1515_v0, 0.0  ;;  %v1518_v58 = vadd.f32 %v4992_v31, %v1517_v53  ;;  %v4029_v59 = vpop.f32.mrb[119].mxu1  ;;  %v1674_v60 = vmax.f32 %v1171_v49, 0.0 }
 0x1ec   :  { %v1675_v61 = vmax.f32 %v1174_v54, 0.0  ;;  %v1761_v62 = vmax.f32 %v1518_v58, 0.0 }
 0x1ee   :  { %v3295_v63 = vpack.c.bf16 %v1675_v61, %v1674_v60  ;;  %v3510_v1 = vpack.c.bf16 %v1761_v62, %v1760_v57 }
 0x1ef   :  { %v1178_v2 = vpop.f32.mrb[120].mxu0  ;;  %v1522_v3 = vpop.f32.mrb[120].mxu1 }
 0x1f0   :  { %3595 = vst [vmem:[%s5214_s3 + $0xe8] sm:$0xff] %v3295_v63   ;;  %v1179_v4 = vadd.f32 %v4992_v31, %v1178_v2  ;;  %v3860_v5 = vpop.f32.mrb[121].mxu0  ;;  %3638 = vst [vmem:[%s5214_s3 + $0x240] sm:$0xff] %v3510_v1   ;;  %v1523_v6 = vadd.f32 %v4992_v31, %v1522_v3  ;;  %v4032_v7 = vpop.f32.mrb[121].mxu1 }
 0x1f1   :  { %v1181_v8 = vpop.f32.mrb[122].mxu0  ;;  %v1525_v9 = vpop.f32.mrb[122].mxu1 }
 0x1f2   :  { %v1182_v10 = vadd.f32 %v4992_v31, %v1181_v8  ;;  %v3861_v11 = vpop.f32.mrb[123].mxu0  ;;  %v1762_v12 = vmax.f32 %v1523_v6, 0.0  ;;  %v1526_v13 = vadd.f32 %v4992_v31, %v1525_v9  ;;  %v4033_v14 = vpop.f32.mrb[123].mxu1  ;;  %v1676_v15 = vmax.f32 %v1179_v4, 0.0 }
 0x1f4   :  { %v1677_v16 = vmax.f32 %v1182_v10, 0.0  ;;  %v1763_v17 = vmax.f32 %v1526_v13, 0.0 }
 0x1f6   :  { %v3300_v18 = vpack.c.bf16 %v1677_v16, %v1676_v15  ;;  %v3515_v19 = vpack.c.bf16 %v1763_v17, %v1762_v12 }
 0x1f7   :  { %v1186_v20 = vpop.f32.mrb[124].mxu0  ;;  %v1530_v21 = vpop.f32.mrb[124].mxu1 }
 0x1f8   :  { %3596 = vst [vmem:[%s5214_s3 + $0xf0] sm:$0xff] %v3300_v18   ;;  %v1187_v22 = vadd.f32 %v4992_v31, %v1186_v20  ;;  %v3864_v23 = vpop.f32.mrb[125].mxu0  ;;  %3639 = vst [vmem:[%s5214_s3 + $0x248] sm:$0xff] %v3515_v19   ;;  %v1531_v24 = vadd.f32 %v4992_v31, %v1530_v21  ;;  %v4036_v25 = vpop.f32.mrb[125].mxu1 }
 0x1f9   :  { %v1189_v26 = vpop.f32.mrb[126].mxu0  ;;  %v1533_v27 = vpop.f32.mrb[126].mxu1 }
 0x1fa   :  { %v1190_v28 = vadd.f32 %v4992_v31, %v1189_v26  ;;  %v3865_v29 = vpop.f32.mrb[127].mxu0  ;;  %v1764_v30 = vmax.f32 %v1531_v24, 0.0  ;;  %v1534_v32 = vadd.f32 %v4992_v31, %v1533_v27  ;;  %v4037_v33 = vpop.f32.mrb[127].mxu1  ;;  %v1678_v56 = vmax.f32 %v1187_v22, 0.0 }
 0x1fc   :  { %v1679_v34 = vmax.f32 %v1190_v28, 0.0  ;;  %v1765_v35 = vmax.f32 %v1534_v32, 0.0 }
 0x1fe   :  { %v3305_v36 = vpack.c.bf16 %v1679_v34, %v1678_v56  ;;  %v3520_v37 = vpack.c.bf16 %v1765_v35, %v1764_v30 }
 0x1ff   :  { %v1194_v38 = vpop.f32.mrb[128].mxu0  ;;  %v1538_v39 = vpop.f32.mrb[128].mxu1 }
 0x200   :  { %3597 = vst [vmem:[%s5214_s3 + $0xf8] sm:$0xff] %v3305_v36   ;;  %v1195_v40 = vadd.f32 %v4992_v31, %v1194_v38  ;;  %v3868_v41 = vpop.f32.mrb[129].mxu0  ;;  %3640 = vst [vmem:[%s5214_s3 + $0x250] sm:$0xff] %v3520_v37   ;;  %v1539_v42 = vadd.f32 %v4992_v31, %v1538_v39  ;;  %v4040_v43 = vpop.f32.mrb[129].mxu1 }
 0x201   :  { %v1197_v44 = vpop.f32.mrb[130].mxu0  ;;  %v1541_v45 = vpop.f32.mrb[130].mxu1 }
 0x202   :  { %v1198_v46 = vadd.f32 %v4992_v31, %v1197_v44  ;;  %v3869_v47 = vpop.f32.mrb[131].mxu0  ;;  %v1766_v48 = vmax.f32 %v1539_v42, 0.0  ;;  %v1542_v49 = vadd.f32 %v4992_v31, %v1541_v45  ;;  %v4041_v50 = vpop.f32.mrb[131].mxu1  ;;  %v1680_v0 = vmax.f32 %v1195_v40, 0.0 }
 0x204   :  { %v1681_v51 = vmax.f32 %v1198_v46, 0.0  ;;  %v1767_v52 = vmax.f32 %v1542_v49, 0.0 }
 0x206   :  { %v3310_v53 = vpack.c.bf16 %v1681_v51, %v1680_v0  ;;  %v3525_v54 = vpack.c.bf16 %v1767_v52, %v1766_v48 }
 0x207   :  { %v1202_v55 = vpop.f32.mrb[132].mxu0  ;;  %v1546_v57 = vpop.f32.mrb[132].mxu1 }
 0x208   :  { %3598 = vst [vmem:[%s5214_s3 + $0x100] sm:$0xff] %v3310_v53   ;;  %v1203_v58 = vadd.f32 %v4992_v31, %v1202_v55  ;;  %v3872_v59 = vpop.f32.mrb[133].mxu0  ;;  %3641 = vst [vmem:[%s5214_s3 + $0x258] sm:$0xff] %v3525_v54   ;;  %v1547_v60 = vadd.f32 %v4992_v31, %v1546_v57  ;;  %v4044_v61 = vpop.f32.mrb[133].mxu1 }
 0x209   :  { %v1205_v62 = vpop.f32.mrb[134].mxu0  ;;  %v1549_v63 = vpop.f32.mrb[134].mxu1 }
 0x20a   :  { %v1206_v1 = vadd.f32 %v4992_v31, %v1205_v62  ;;  %v3873_v2 = vpop.f32.mrb[135].mxu0  ;;  %v1768_v3 = vmax.f32 %v1547_v60, 0.0  ;;  %v1550_v4 = vadd.f32 %v4992_v31, %v1549_v63  ;;  %v4045_v5 = vpop.f32.mrb[135].mxu1  ;;  %v1682_v6 = vmax.f32 %v1203_v58, 0.0 }
 0x20c   :  { %v1683_v7 = vmax.f32 %v1206_v1, 0.0  ;;  %v1769_v8 = vmax.f32 %v1550_v4, 0.0 }
 0x20e   :  { %v3315_v9 = vpack.c.bf16 %v1683_v7, %v1682_v6  ;;  %v3530_v10 = vpack.c.bf16 %v1769_v8, %v1768_v3 }
 0x20f   :  { %v1210_v11 = vpop.f32.mrb[136].mxu0  ;;  %v1554_v12 = vpop.f32.mrb[136].mxu1 }
 0x210   :  { %3599 = vst [vmem:[%s5214_s3 + $0x108] sm:$0xff] %v3315_v9   ;;  %v1211_v13 = vadd.f32 %v4992_v31, %v1210_v11  ;;  %v3876_v14 = vpop.f32.mrb[137].mxu0  ;;  %3642 = vst [vmem:[%s5214_s3 + $0x260] sm:$0xff] %v3530_v10   ;;  %v1555_v15 = vadd.f32 %v4992_v31, %v1554_v12  ;;  %v4048_v16 = vpop.f32.mrb[137].mxu1 }
 0x211   :  { %v1213_v17 = vpop.f32.mrb[138].mxu0  ;;  %v1557_v18 = vpop.f32.mrb[138].mxu1 }
 0x212   :  { %v1214_v19 = vadd.f32 %v4992_v31, %v1213_v17  ;;  %v3877_v20 = vpop.f32.mrb[139].mxu0  ;;  %v1770_v21 = vmax.f32 %v1555_v15, 0.0  ;;  %v1558_v22 = vadd.f32 %v4992_v31, %v1557_v18  ;;  %v4049_v23 = vpop.f32.mrb[139].mxu1  ;;  %v1684_v24 = vmax.f32 %v1211_v13, 0.0 }
 0x214   :  { %v1685_v25 = vmax.f32 %v1214_v19, 0.0  ;;  %v1771_v26 = vmax.f32 %v1558_v22, 0.0 }
 0x216   :  { %v3320_v27 = vpack.c.bf16 %v1685_v25, %v1684_v24  ;;  %v3535_v28 = vpack.c.bf16 %v1771_v26, %v1770_v21 }
 0x217   :  { %v1218_v29 = vpop.f32.mrb[140].mxu0  ;;  %v1562_v30 = vpop.f32.mrb[140].mxu1 }
 0x218   :  { %3600 = vst [vmem:[%s5214_s3 + $0x110] sm:$0xff] %v3320_v27   ;;  %v1219_v32 = vadd.f32 %v4992_v31, %v1218_v29  ;;  %v3880_v33 = vpop.f32.mrb[141].mxu0  ;;  %3643 = vst [vmem:[%s5214_s3 + $0x268] sm:$0xff] %v3535_v28   ;;  %v1563_v56 = vadd.f32 %v4992_v31, %v1562_v30  ;;  %v4052_v34 = vpop.f32.mrb[141].mxu1 }
 0x219   :  { %v1221_v35 = vpop.f32.mrb[142].mxu0  ;;  %v1565_v36 = vpop.f32.mrb[142].mxu1 }
 0x21a   :  { %v1222_v37 = vadd.f32 %v4992_v31, %v1221_v35  ;;  %v3881_v38 = vpop.f32.mrb[143].mxu0  ;;  %v1772_v39 = vmax.f32 %v1563_v56, 0.0  ;;  %v1566_v40 = vadd.f32 %v4992_v31, %v1565_v36  ;;  %v4053_v41 = vpop.f32.mrb[143].mxu1  ;;  %v1686_v42 = vmax.f32 %v1219_v32, 0.0 }
 0x21c   :  { %v1687_v43 = vmax.f32 %v1222_v37, 0.0  ;;  %v1773_v44 = vmax.f32 %v1566_v40, 0.0 }
 0x21e   :  { %v3325_v45 = vpack.c.bf16 %v1687_v43, %v1686_v42  ;;  %v3540_v46 = vpack.c.bf16 %v1773_v44, %v1772_v39 }
 0x21f   :  { %v1226_v47 = vpop.f32.mrb[144].mxu0  ;;  %v1570_v48 = vpop.f32.mrb[144].mxu1 }
 0x220   :  { %3601 = vst [vmem:[%s5214_s3 + $0x118] sm:$0xff] %v3325_v45   ;;  %v1227_v49 = vadd.f32 %v4992_v31, %v1226_v47  ;;  %v3884_v50 = vpop.f32.mrb[145].mxu0  ;;  %3644 = vst [vmem:[%s5214_s3 + $0x270] sm:$0xff] %v3540_v46   ;;  %v1571_v0 = vadd.f32 %v4992_v31, %v1570_v48  ;;  %v4056_v51 = vpop.f32.mrb[145].mxu1 }
 0x221   :  { %v1229_v52 = vpop.f32.mrb[146].mxu0  ;;  %v1573_v53 = vpop.f32.mrb[146].mxu1 }
 0x222   :  { %v1230_v54 = vadd.f32 %v4992_v31, %v1229_v52  ;;  %v3885_v55 = vpop.f32.mrb[147].mxu0  ;;  %v1774_v57 = vmax.f32 %v1571_v0, 0.0  ;;  %v1574_v58 = vadd.f32 %v4992_v31, %v1573_v53  ;;  %v4057_v59 = vpop.f32.mrb[147].mxu1  ;;  %v1688_v60 = vmax.f32 %v1227_v49, 0.0 }
 0x224   :  { %v1689_v61 = vmax.f32 %v1230_v54, 0.0  ;;  %v1775_v62 = vmax.f32 %v1574_v58, 0.0 }
 0x226   :  { %v3330_v63 = vpack.c.bf16 %v1689_v61, %v1688_v60  ;;  %v3545_v1 = vpack.c.bf16 %v1775_v62, %v1774_v57 }
 0x227   :  { %v1234_v2 = vpop.f32.mrb[148].mxu0  ;;  %v1578_v3 = vpop.f32.mrb[148].mxu1 }
 0x228   :  { %3602 = vst [vmem:[%s5214_s3 + $0x120] sm:$0xff] %v3330_v63   ;;  %v1235_v4 = vadd.f32 %v4992_v31, %v1234_v2  ;;  %v3888_v5 = vpop.f32.mrb[149].mxu0  ;;  %3645 = vst [vmem:[%s5214_s3 + $0x278] sm:$0xff] %v3545_v1   ;;  %v1579_v6 = vadd.f32 %v4992_v31, %v1578_v3  ;;  %v4060_v7 = vpop.f32.mrb[149].mxu1 }
 0x229   :  { %v1237_v8 = vpop.f32.mrb[150].mxu0  ;;  %v1581_v9 = vpop.f32.mrb[150].mxu1 }
 0x22a   :  { %v1238_v10 = vadd.f32 %v4992_v31, %v1237_v8  ;;  %v3889_v11 = vpop.f32.mrb[151].mxu0  ;;  %v1776_v12 = vmax.f32 %v1579_v6, 0.0  ;;  %v1582_v13 = vadd.f32 %v4992_v31, %v1581_v9  ;;  %v4061_v14 = vpop.f32.mrb[151].mxu1  ;;  %v1690_v15 = vmax.f32 %v1235_v4, 0.0 }
 0x22c   :  { %v1691_v16 = vmax.f32 %v1238_v10, 0.0  ;;  %v1777_v17 = vmax.f32 %v1582_v13, 0.0 }
 0x22e   :  { %v3335_v18 = vpack.c.bf16 %v1691_v16, %v1690_v15  ;;  %v3550_v19 = vpack.c.bf16 %v1777_v17, %v1776_v12 }
 0x22f   :  { %v1242_v20 = vpop.f32.mrb[152].mxu0  ;;  %v1586_v21 = vpop.f32.mrb[152].mxu1 }
 0x230   :  { %3603 = vst [vmem:[%s5214_s3 + $0x128] sm:$0xff] %v3335_v18   ;;  %v1243_v22 = vadd.f32 %v4992_v31, %v1242_v20  ;;  %v3892_v23 = vpop.f32.mrb[153].mxu0  ;;  %3646 = vst [vmem:[%s5214_s3 + $0x280] sm:$0xff] %v3550_v19   ;;  %v1587_v24 = vadd.f32 %v4992_v31, %v1586_v21  ;;  %v4064_v25 = vpop.f32.mrb[153].mxu1 }
 0x231   :  { %v1245_v26 = vpop.f32.mrb[154].mxu0  ;;  %v1589_v27 = vpop.f32.mrb[154].mxu1 }
 0x232   :  { %v1246_v28 = vadd.f32 %v4992_v31, %v1245_v26  ;;  %v3893_v29 = vpop.f32.mrb[155].mxu0  ;;  %v1778_v30 = vmax.f32 %v1587_v24, 0.0  ;;  %v1590_v32 = vadd.f32 %v4992_v31, %v1589_v27  ;;  %v4065_v33 = vpop.f32.mrb[155].mxu1  ;;  %v1692_v56 = vmax.f32 %v1243_v22, 0.0 }
 0x234   :  { %v1693_v34 = vmax.f32 %v1246_v28, 0.0  ;;  %v1779_v35 = vmax.f32 %v1590_v32, 0.0 }
 0x236   :  { %v3340_v36 = vpack.c.bf16 %v1693_v34, %v1692_v56  ;;  %v3555_v37 = vpack.c.bf16 %v1779_v35, %v1778_v30 }
 0x237   :  { %v1250_v38 = vpop.f32.mrb[156].mxu0  ;;  %v1594_v39 = vpop.f32.mrb[156].mxu1 }
 0x238   :  { %3604 = vst [vmem:[%s5214_s3 + $0x130] sm:$0xff] %v3340_v36   ;;  %v1251_v40 = vadd.f32 %v4992_v31, %v1250_v38  ;;  %v3896_v41 = vpop.f32.mrb[157].mxu0  ;;  %3647 = vst [vmem:[%s5214_s3 + $0x288] sm:$0xff] %v3555_v37   ;;  %v1595_v42 = vadd.f32 %v4992_v31, %v1594_v39  ;;  %v4068_v43 = vpop.f32.mrb[157].mxu1 }
 0x239   :  { %v1253_v44 = vpop.f32.mrb[158].mxu0  ;;  %v1597_v45 = vpop.f32.mrb[158].mxu1 }
 0x23a   :  { %v1254_v46 = vadd.f32 %v4992_v31, %v1253_v44  ;;  %v3897_v47 = vpop.f32.mrb[159].mxu0  ;;  %v1780_v48 = vmax.f32 %v1595_v42, 0.0  ;;  %v1598_v49 = vadd.f32 %v4992_v31, %v1597_v45  ;;  %v4069_v50 = vpop.f32.mrb[159].mxu1  ;;  %v1694_v0 = vmax.f32 %v1251_v40, 0.0 }
 0x23c   :  { %v1695_v51 = vmax.f32 %v1254_v46, 0.0  ;;  %v1781_v52 = vmax.f32 %v1598_v49, 0.0 }
 0x23e   :  { %v3345_v53 = vpack.c.bf16 %v1695_v51, %v1694_v0  ;;  %v3560_v54 = vpack.c.bf16 %v1781_v52, %v1780_v48 }
 0x23f   :  { %v1258_v55 = vpop.f32.mrb[160].mxu0  ;;  %v1602_v57 = vpop.f32.mrb[160].mxu1 }
 0x240   :  { %3605 = vst [vmem:[%s5214_s3 + $0x138] sm:$0xff] %v3345_v53   ;;  %v1259_v58 = vadd.f32 %v4992_v31, %v1258_v55  ;;  %v3900_v59 = vpop.f32.mrb[161].mxu0  ;;  %3648 = vst [vmem:[%s5214_s3 + $0x290] sm:$0xff] %v3560_v54   ;;  %v1603_v60 = vadd.f32 %v4992_v31, %v1602_v57  ;;  %v4072_v61 = vpop.f32.mrb[161].mxu1 }
 0x241   :  { %v1261_v62 = vpop.f32.mrb[162].mxu0  ;;  %v1605_v63 = vpop.f32.mrb[162].mxu1 }
 0x242   :  { %v1262_v1 = vadd.f32 %v4992_v31, %v1261_v62  ;;  %v3901_v2 = vpop.f32.mrb[163].mxu0  ;;  %v1782_v3 = vmax.f32 %v1603_v60, 0.0  ;;  %v1606_v4 = vadd.f32 %v4992_v31, %v1605_v63  ;;  %v4073_v5 = vpop.f32.mrb[163].mxu1  ;;  %v1696_v6 = vmax.f32 %v1259_v58, 0.0 }
 0x244   :  { %v1697_v7 = vmax.f32 %v1262_v1, 0.0  ;;  %v1783_v8 = vmax.f32 %v1606_v4, 0.0 }
 0x246   :  { %v3350_v9 = vpack.c.bf16 %v1697_v7, %v1696_v6  ;;  %v3565_v10 = vpack.c.bf16 %v1783_v8, %v1782_v3 }
 0x247   :  { %v1266_v11 = vpop.f32.mrb[164].mxu0  ;;  %v1610_v12 = vpop.f32.mrb[164].mxu1 }
 0x248   :  { %3606 = vst [vmem:[%s5214_s3 + $0x140] sm:$0xff] %v3350_v9   ;;  %v1267_v13 = vadd.f32 %v4992_v31, %v1266_v11  ;;  %v3904_v14 = vpop.f32.mrb[165].mxu0  ;;  %3649 = vst [vmem:[%s5214_s3 + $0x298] sm:$0xff] %v3565_v10   ;;  %v1611_v15 = vadd.f32 %v4992_v31, %v1610_v12  ;;  %v4076_v16 = vpop.f32.mrb[165].mxu1 }
 0x249   :  { %v1269_v17 = vpop.f32.mrb[166].mxu0  ;;  %v1613_v18 = vpop.f32.mrb[166].mxu1 }
 0x24a   :  { %v1270_v19 = vadd.f32 %v4992_v31, %v1269_v17  ;;  %v3905_v20 = vpop.f32.mrb[167].mxu0  ;;  %v1784_v21 = vmax.f32 %v1611_v15, 0.0  ;;  %v4077_v22 = vpop.f32.mrb[167].mxu1  ;;  %v1698_v23 = vmax.f32 %v1267_v13, 0.0 }
 0x24c   :  { %v1699_v24 = vmax.f32 %v1270_v19, 0.0  ;;  %v3146_v25 = vpack.c.bf16 %v1784_v21, %v1784_v21 }
 0x24e   :  { %v3355_v26 = vpack.c.bf16 %v1699_v24, %v1698_v23  ;;  %2630 = vst [vmem:[%s5214_s3 + $0x2a0] sm:$0xf] %v3146_v25 }
 0x24f   :  { %v1274_v27 = vpop.f32.mrb[168].mxu0 }
 0x250   :  { %3607 = vst [vmem:[%s5214_s3 + $0x148] sm:$0xff] %v3355_v26   ;;  %v1275_v28 = vadd.f32 %v4992_v31, %v1274_v27  ;;  %v3908_v29 = vpop.f32.mrb[169].mxu0 }
 0x251   :  { %v1277_v30 = vpop.f32.mrb[170].mxu0 }
 0x252   :  { %v1278_v32 = vadd.f32 %v4992_v31, %v1277_v30  ;;  %v3909_v33 = vpop.f32.mrb[171].mxu0  ;;  %v1700_v56 = vmax.f32 %v1275_v28, 0.0 }
 0x254   :  { %v1701_v34 = vmax.f32 %v1278_v32, 0.0 }
 0x256   :  { %v3360_v35 = vpack.c.bf16 %v1701_v34, %v1700_v56 }
 0x258   :  { %3608 = vst [vmem:[%s5214_s3 + $0x150] sm:$0xff] %v3360_v35  }
 0x259   :  { %2635 = vsyncpa [#allocation3], 1 }
 0x25a   :  { %2636 = vsyncpa [#allocation5], 1 }

// kernel: cnn_forward.4
= control target key start
LH: loop header
LB: loop body
LE: loop exit
PB: predicated region body
PF: predicated region fallthrough
CT: control target
= control target key end

     0   :  { %s2916_s12 = smov 0   ;;  %s3548_s0 = inlined_call_operand.vmem [shape: bf16[1152,288], index: 0, kind: input, shape index: {}]   ;;  %s3549_s1 = inlined_call_operand.vmem [shape: bf16[288,64], index: 1, kind: input, shape index: {}]   ;;  %s3550_s2 = inlined_call_operand.vmem [shape: f32[1,64], index: 2, kind: input, shape index: {}]   ;;  %s3551_s3 = inlined_call_operand.vmem [shape: bf16[1152,64], index: 3, kind: output, shape index: {}]  }
   0x1 LB: > { %s2253_s13 = sadd.s32 4294967295, %s2893_s12   ;;  %p2257_p0 = scmp.ge.s32.totalorder %s2893_s12, 1  ;;  %s2893_s12 = sphi %s2916_s12, %s13_s12  }
   0x2   : > { %p139_p1 = scmp.lt.s32.totalorder %s2893_s12, 3 }
   0x4   : > { %p140_p2 = pnand %p2257_p0, %p139_p1 }
   0x5   : > { %v2725_v0 = vld [vmem:[%s3549_s1] sm:$0xff] (!%p140_p2)   ;;  %v2895_v1 = vmov (!%p140_p2), 0   ;;  %s164_s16 = smul.u32 (!%p140_p2), 72, %s2253_s13  ;;  %v2726_v2 = vld [vmem:[%s3549_s1 + $0x8] sm:$0xff] (!%p140_p2)   ;;  %v2727_v3 = vld [vmem:[%s3549_s1 + $0x10] sm:$0xff] (!%p140_p2)   ;;  %vm1013_vm0 = vcmask (!%p140_p2), 261120  }
   0x6   : > { %143 = sbr.rel (%p140_p2) target bundleno = 501 (0x1f5), region = 32  ;;  %1122 = vmatprep.subr.bf16.mxu0 (!%p140_p2), %v2895_v1  ;;  %2683 = vmatprep.subr.bf16.mxu1 (!%p140_p2), %v2895_v1  ;;  %v2728_v4 = vld [vmem:[%s3549_s1 + $0x18] sm:$0xff] (!%p140_p2)   ;;  %v2729_v5 = vld [vmem:[%s3549_s1 + $0x20] sm:$0xff] (!%p140_p2)   ;;  %v2730_v7 = vld [vmem:[%s3549_s1 + $0x28] sm:$0xff] (!%p140_p2)   ;;  %vm2124_vm1 = vcmask (!%p140_p2), 519168  }
   0x7   : > { %1123 = vmatpush1.bf16.msra.mxu0 (!%p140_p2), %v2725_v0  ;;  %2699 = vmatpush1.bf16.msra.mxu1 (!%p140_p2), %v2725_v0  ;;  %p165_p3 = scmp.lt.s32.totalorder (!%p140_p2), %s164_s16, 143  ;;  %v2731_v9 = vld [vmem:[%s3549_s1 + $0x30] sm:$0xff] (!%p140_p2)   ;;  %v2732_v10 = vld [vmem:[%s3549_s1 + $0x38] sm:$0xff] (!%p140_p2)   ;;  %v2733_v11 = vld [vmem:[%s3549_s1 + $0x40] sm:$0xff] (!%p140_p2)  }
   0x8   : > { %1124 = vmatprep.subr.bf16.mxu0 (!%p140_p2), %v2895_v1  ;;  %2684 = vmatprep.subr.bf16.mxu1 (!%p140_p2), %v2895_v1  ;;  %v2734_v12 = vld [vmem:[%s3549_s1 + $0x48] sm:$0xff] (!%p140_p2)   ;;  %v2735_v13 = vld [vmem:[%s3549_s1 + $0x50] sm:$0xff] (!%p140_p2)   ;;  %v2736_v14 = vld [vmem:[%s3549_s1 + $0x58] sm:$0xff] (!%p140_p2)  }
   0x9   : > { %v2737_v15 = vld [vmem:[%s3549_s1 + $0x60] sm:$0xff] (!%p140_p2)   ;;  %v2738_v16 = vld [vmem:[%s3549_s1 + $0x68] sm:$0xff] (!%p140_p2)   ;;  %v2739_v17 = vld [vmem:[%s3549_s1 + $0x70] sm:$0xff] (!%p140_p2)  }
   0xa   : > { %v2740_v18 = vld [vmem:[%s3549_s1 + $0x78] sm:$0xff] (!%p140_p2)   ;;  %v2747_v19 = vld [vmem:[%s3549_s1 + $0x80] sm:$0xff] (!%p140_p2)   ;;  %v2772_v24 = vld [vmem:[%s3549_s1 + $0x88] sm:$0xff] (!%p140_p2)  }
   0xb   : > { %1125 = vmatpush1.bf16.msra.mxu0 (!%p140_p2), %v2726_v2  ;;  %2700 = vmatpush1.bf16.msra.mxu1 (!%p140_p2), %v2726_v2 }
   0xc   : > { %1126 = vmatprep.subr.bf16.mxu0 (!%p140_p2), %v2895_v1  ;;  %2685 = vmatprep.subr.bf16.mxu1 (!%p140_p2), %v2895_v1 }
   0xd   : > { %s3553_s16 = smov (!%p165_p3, %s164_s16), 143 }
   0xe   : > { %s2715_s23 = smul.u32 12, %s3553_s16  ;;  %s2259_s5 = sshll.u32 %s3553_s16, 2 }
   0xf   : > { %1127 = vmatpush1.bf16.msra.mxu0 %v2727_v3  ;;  %2701 = vmatpush1.bf16.msra.mxu1 %v2727_v3  ;;  %s3255_s8 = scalar_lea.vmem %s3551_s3, %s2259_s5 }
  0x10   : > { %1128 = vmatprep.subr.bf16.mxu0 %v2895_v1  ;;  %2686 = vmatprep.subr.bf16.mxu1 %v2895_v1  ;;  %s2953_s28 = scalar_lea.vmem %s3548_s0, %s2715_s23 }
  0x11   : > { %v2743_v6 = vld [vmem:[%s2953_s28 + $0x4] ss:$12 sps:$4 sm:$0xff]   ;;  %v2746_v8 = vld [vmem:[%s2953_s28 + $0x28c] ss:$12 sps:$4 sm:$0xff]   ;;  %v2744_v21 = vld [vmem:[%s2953_s28 + $0x288] ss:$12 sps:$4 sm:$0xff]  }
  0x12   : > { %1154 = vmatprep.mubr.bf16.mxu0 %v2743_v6  ;;  %1370 = vmatprep.mubr.bf16.mxu1 %v2746_v8  ;;  %v2741_v20 = vld [vmem:[%s2953_s28] ss:$12 sps:$4 sm:$0xff]   ;;  %v2748_v22 = vld [vmem:[%s2953_s28 + $0x1c] ss:$12 sps:$4 sm:$0xff]   ;;  %v2750_v23 = vld [vmem:[%s2953_s28 + $0x2a4] ss:$12 sps:$4 sm:$0xff]  }
  0x13   : > { %1129 = vmatpush1.bf16.msra.mxu0 %v2728_v4  ;;  %2702 = vmatpush1.bf16.msra.mxu1 %v2728_v4  ;;  %v2752_v25 = vld [vmem:[%s2953_s28 + $0x18] ss:$12 sps:$4 sm:$0xff]   ;;  %v2753_v26 = vld [vmem:[%s2953_s28 + $0x2a0] ss:$12 sps:$4 sm:$0xff]   ;;  %v2756_v28 = vld [vmem:[%s2953_s28 + $0x2bc] ss:$12 sps:$4 sm:$0xff]  }
  0x14   : > { %1130 = vmatprep.subr.bf16.mxu0 %v2895_v1  ;;  %2687 = vmatprep.subr.bf16.mxu1 %v2895_v1  ;;  %v2754_v27 = vld [vmem:[%s2953_s28 + $0x34] ss:$12 sps:$4 sm:$0xff]   ;;  %v2758_v29 = vld [vmem:[%s2953_s28 + $0x30] ss:$12 sps:$4 sm:$0xff]   ;;  %v2759_v30 = vld [vmem:[%s2953_s28 + $0x2b8] ss:$12 sps:$4 sm:$0xff]  }
  0x15   : > { %v2760_v31 = vld [vmem:[%s2953_s28 + $0x4c] ss:$12 sps:$4 sm:$0xff]   ;;  %v2762_v32 = vld [vmem:[%s2953_s28 + $0x2d4] ss:$12 sps:$4 sm:$0xff]   ;;  %v2765_v34 = vld [vmem:[%s2953_s28 + $0x2d0] ss:$12 sps:$4 sm:$0xff]  }
  0x16   : > { %v2764_v33 = vld [vmem:[%s2953_s28 + $0x48] ss:$12 sps:$4 sm:$0xff]   ;;  %v2766_v35 = vld [vmem:[%s2953_s28 + $0x64] ss:$12 sps:$4 sm:$0xff]   ;;  %v2768_v36 = vld [vmem:[%s2953_s28 + $0x2ec] ss:$12 sps:$4 sm:$0xff]  }
  0x17   : > { %1131 = vmatpush1.bf16.msra.mxu0 %v2729_v5  ;;  %2703 = vmatpush1.bf16.msra.mxu1 %v2729_v5  ;;  %v2770_v37 = vld [vmem:[%s2953_s28 + $0x60] ss:$12 sps:$4 sm:$0xff]   ;;  %v2771_v38 = vld [vmem:[%s2953_s28 + $0x2e8] ss:$12 sps:$4 sm:$0xff]   ;;  %v2775_v40 = vld [vmem:[%s2953_s28 + $0x304] ss:$12 sps:$4 sm:$0xff]  }
  0x18   : > { %1132 = vmatprep.subr.bf16.mxu0 %v2895_v1  ;;  %2688 = vmatprep.subr.bf16.mxu1 %v2895_v1  ;;  %v2773_v39 = vld [vmem:[%s2953_s28 + $0x7c] ss:$12 sps:$4 sm:$0xff]   ;;  %v2777_v41 = vld [vmem:[%s2953_s28 + $0x78] ss:$12 sps:$4 sm:$0xff]   ;;  %v2778_v42 = vld [vmem:[%s2953_s28 + $0x300] ss:$12 sps:$4 sm:$0xff]  }
  0x19   : > { %v2779_v43 = vld [vmem:[%s2953_s28 + $0x94] ss:$12 sps:$4 sm:$0xff]   ;;  %v2781_v44 = vld [vmem:[%s2953_s28 + $0x31c] ss:$12 sps:$4 sm:$0xff]   ;;  %v2784_v46 = vld [vmem:[%s2953_s28 + $0x318] ss:$12 sps:$4 sm:$0xff]  }
  0x1a   : > { %v2783_v45 = vld [vmem:[%s2953_s28 + $0x90] ss:$12 sps:$4 sm:$0xff]   ;;  %v2785_v47 = vld [vmem:[%s2953_s28 + $0xac] ss:$12 sps:$4 sm:$0xff]   ;;  %v2787_v48 = vld [vmem:[%s2953_s28 + $0x334] ss:$12 sps:$4 sm:$0xff]  }
  0x1b   : > { %1133 = vmatpush1.bf16.msra.mxu0 %v2730_v7  ;;  %2704 = vmatpush1.bf16.msra.mxu1 %v2730_v7  ;;  %v2789_v49 = vld [vmem:[%s2953_s28 + $0xa8] ss:$12 sps:$4 sm:$0xff]   ;;  %v2790_v50 = vld [vmem:[%s2953_s28 + $0x330] ss:$12 sps:$4 sm:$0xff]   ;;  %v2793_v52 = vld [vmem:[%s2953_s28 + $0x34c] ss:$12 sps:$4 sm:$0xff]  }
  0x1c   : > { %1134 = vmatprep.subr.bf16.mxu0 %v2895_v1  ;;  %2689 = vmatprep.subr.bf16.mxu1 %v2895_v1  ;;  %v2791_v51 = vld [vmem:[%s2953_s28 + $0xc4] ss:$12 sps:$4 sm:$0xff]   ;;  %v2795_v53 = vld [vmem:[%s2953_s28 + $0xc0] ss:$12 sps:$4 sm:$0xff]   ;;  %v2796_v54 = vld [vmem:[%s2953_s28 + $0x348] ss:$12 sps:$4 sm:$0xff]  }
  0x1d   : > { %v2797_v55 = vld [vmem:[%s2953_s28 + $0xdc] ss:$12 sps:$4 sm:$0xff]   ;;  %v2800_v57 = vld [vmem:[%s2953_s28 + $0xd8] ss:$12 sps:$4 sm:$0xff]   ;;  %v2801_v58 = vld [vmem:[%s2953_s28 + $0x20] ss:$12 sps:$4 sm:$0xff]  }
  0x1e   : > { %v2799_v56 = vld [vmem:[%s2953_s28 + $0x8] ss:$12 sps:$4 sm:$0xff]   ;;  %v2804_v60 = vld [vmem:[%s2953_s28 + $0x38] ss:$12 sps:$4 sm:$0xff]   ;;  %v2805_v61 = vld [vmem:[%s2953_s28 + $0xf0] ss:$12 sps:$4 sm:$0xff]  }
  0x1f   : > { %1135 = vmatpush1.bf16.msra.mxu0 %v2731_v9  ;;  %2705 = vmatpush1.bf16.msra.mxu1 %v2731_v9  ;;  %v2802_v59 = vld [vmem:[%s2953_s28 + $0xf4] ss:$12 sps:$4 sm:$0xff]   ;;  %v2806_v62 = vld [vmem:[%s2953_s28 + $0x50] ss:$12 sps:$4 sm:$0xff]   ;;  %v2807_v63 = vld [vmem:[%s2953_s28 + $0x10c] ss:$12 sps:$4 sm:$0xff]  }
  0x20   : > { %1136 = vmatprep.subr.bf16.mxu0 %v2895_v1  ;;  %2690 = vmatprep.subr.bf16.mxu1 %v2895_v1  ;;  %v2809_v0 = vld [vmem:[%s2953_s28 + $0x68] ss:$12 sps:$4 sm:$0xff]   ;;  %v2811_v2 = vld [vmem:[%s2953_s28 + $0x80] ss:$12 sps:$4 sm:$0xff]   ;;  %v2812_v3 = vld [vmem:[%s2953_s28 + $0x124] ss:$12 sps:$4 sm:$0xff]  }
  0x21   : > { %v2814_v4 = vld [vmem:[%s2953_s28 + $0x98] ss:$12 sps:$4 sm:$0xff]   ;;  %v2815_v5 = vld [vmem:[%s2953_s28 + $0x120] ss:$12 sps:$4 sm:$0xff]   ;;  %v2816_v6 = vld [vmem:[%s2953_s28 + $0xb0] ss:$12 sps:$4 sm:$0xff]  }
  0x22   : > { %v2817_v7 = vld [vmem:[%s2953_s28 + $0x13c] ss:$12 sps:$4 sm:$0xff]   ;;  %v2820_v9 = vld [vmem:[%s2953_s28 + $0x138] ss:$12 sps:$4 sm:$0xff]  }
  0x23   : > { %1137 = vmatpush1.bf16.msra.mxu0 %v2732_v10  ;;  %2706 = vmatpush1.bf16.msra.mxu1 %v2732_v10  ;;  %v2819_v8 = vld [vmem:[%s2953_s28 + $0xc8] ss:$12 sps:$4 sm:$0xff]   ;;  %v2821_v10 = vld [vmem:[%s2953_s28 + $0xe0] ss:$12 sps:$4 sm:$0xff]  }
  0x24   : > { %1138 = vmatprep.subr.bf16.mxu0 %v2895_v1  ;;  %2691 = vmatprep.subr.bf16.mxu1 %v2895_v1 }
  0x27   : > { %1139 = vmatpush1.bf16.msra.mxu0 %v2733_v11  ;;  %2707 = vmatpush1.bf16.msra.mxu1 %v2733_v11  ;;  %v2822_v11 = vld [vmem:[%s2953_s28 + $0x154] ss:$12 sps:$4 sm:$0xff]  }
  0x28   : > { %1140 = vmatprep.subr.bf16.mxu0 %v2895_v1  ;;  %2692 = vmatprep.subr.bf16.mxu1 %v2895_v1 }
  0x2b   : > { %1141 = vmatpush1.bf16.msra.mxu0 %v2734_v12  ;;  %2708 = vmatpush1.bf16.msra.mxu1 %v2734_v12  ;;  %v2824_v12 = vld [vmem:[%s2953_s28 + $0xf8] ss:$12 sps:$4 sm:$0xff]  }
  0x2c   : > { %1142 = vmatprep.subr.bf16.mxu0 %v2895_v1  ;;  %2693 = vmatprep.subr.bf16.mxu1 %v2895_v1 }
  0x2f   : > { %1143 = vmatpush1.bf16.msra.mxu0 %v2735_v13  ;;  %2709 = vmatpush1.bf16.msra.mxu1 %v2735_v13  ;;  %v2825_v13 = vld [vmem:[%s2953_s28 + $0x150] ss:$12 sps:$4 sm:$0xff]  }
  0x30   : > { %1144 = vmatprep.subr.bf16.mxu0 %v2895_v1  ;;  %2694 = vmatprep.subr.bf16.mxu1 %v2895_v1 }
  0x33   : > { %1145 = vmatpush1.bf16.msra.mxu0 %v2736_v14  ;;  %2710 = vmatpush1.bf16.msra.mxu1 %v2736_v14  ;;  %v2826_v14 = vld [vmem:[%s2953_s28 + $0x110] ss:$12 sps:$4 sm:$0xff]  }
  0x34   : > { %1146 = vmatprep.subr.bf16.mxu0 %v2895_v1  ;;  %2695 = vmatprep.subr.bf16.mxu1 %v2895_v1 }
  0x37   : > { %1147 = vmatpush1.bf16.msra.mxu0 %v2737_v15  ;;  %2711 = vmatpush1.bf16.msra.mxu1 %v2737_v15  ;;  %v2827_v15 = vld [vmem:[%s2953_s28 + $0x16c] ss:$12 sps:$4 sm:$0xff]  }
  0x38   : > { %1148 = vmatprep.subr.bf16.mxu0 %v2895_v1  ;;  %2696 = vmatprep.subr.bf16.mxu1 %v2895_v1 }
  0x3b   : > { %1149 = vmatpush1.bf16.msra.mxu0 %v2738_v16  ;;  %2712 = vmatpush1.bf16.msra.mxu1 %v2738_v16  ;;  %v2829_v16 = vld [vmem:[%s2953_s28 + $0x128] ss:$12 sps:$4 sm:$0xff]  }
  0x3c   : > { %1150 = vmatprep.subr.bf16.mxu0 %v2895_v1  ;;  %2697 = vmatprep.subr.bf16.mxu1 %v2895_v1 }
  0x3f   : > { %1151 = vmatpush1.bf16.msra.mxu0 %v2739_v17  ;;  %2713 = vmatpush1.bf16.msra.mxu1 %v2739_v17  ;;  %v2830_v17 = vld [vmem:[%s2953_s28 + $0x168] ss:$12 sps:$4 sm:$0xff]  }
  0x40   : > { %1152 = vmatprep.subr.bf16.mxu0 %v2895_v1  ;;  %2698 = vmatprep.subr.bf16.mxu1 %v2895_v1  ;;  %v2810_v1 = vld [vmem:[%s2953_s28 + $0x108] ss:$12 sps:$4 sm:$0xff]  }
  0x43   : > { %1153 = vmatpush1.bf16.msra.mxu0 %v2740_v18  ;;  %2714 = vmatpush1.bf16.msra.mxu1 %v2740_v18  ;;  %v2831_v18 = vld [vmem:[%s2953_s28 + $0x140] ss:$12 sps:$4 sm:$0xff]  }
  0x44   : > { %2607 = vmatprep.subr.bf16.mxu1 %v2747_v19 }
  0x46   : > { %1155 = vmatmul.mubr.bf16.vlgmr.msra.gmra.mrb[0].mxu0 %v2741_v20  ;;  %1371 = vmatmul.mubr.bf16.vlgmr.msra.gmra.mrb[0].mxu1 %v2744_v21  ;;  %v2834_v20 = vld [vmem:[%s2953_s28 + $0x158] ss:$12 sps:$4 sm:$0xff]   ;;  %v2835_v21 = vld [vmem:[%s2953_s28 + $0x180] ss:$12 sps:$4 sm:$0xff]  }
  0x47   : > { %2608 = vmatpush3.bf16.msra.mxu1 %v2747_v19  ;;  %1162 = vmatprep.mubr.bf16.mxu0 %v2748_v22  ;;  %v2832_v19 = vld [vmem:[%s2953_s28 + $0x184] ss:$12 sps:$4 sm:$0xff]  }
  0x48   : > { %1378 = vmatprep.mubr.bf16.mxu1 %v2750_v23  ;;  %2609 = vmatprep.subr.bf16.mxu1 %v2772_v24  ;;  %v2836_v22 = vld [vmem:[%s2953_s28 + $0x170] ss:$12 sps:$4 sm:$0xff]  }
  0x49   : > { %v2837_v23 = vld [vmem:[%s2953_s28 + $0x19c] ss:$12 sps:$4 sm:$0xff]  }
  0x4b   : > { %2610 = vmatpush3.bf16.msra.mxu1 %v2772_v24  ;;  %v2839_v24 = vld [vmem:[%s2953_s28 + $0x188] ss:$12 sps:$4 sm:$0xff]  }
  0x4e   : > { %1163 = vmatmul.mubr.bf16.gmra.mrb[4].mxu0 %v2752_v25  ;;  %1379 = vmatmul.mubr.bf16.gmra.mrb[4].mxu1 %v2753_v26  ;;  %v2840_v25 = vld [vmem:[%s2953_s28 + $0x198] ss:$12 sps:$4 sm:$0xff]   ;;  %v2841_v26 = vld [vmem:[%s2953_s28 + $0x1a0] ss:$12 sps:$4 sm:$0xff]  }
  0x4f   : > { %1170 = vmatprep.mubr.bf16.mxu0 %v2754_v27  ;;  %1386 = vmatprep.mubr.bf16.mxu1 %v2756_v28  ;;  %v2842_v27 = vld [vmem:[%s2953_s28 + $0x1b4] ss:$12 sps:$4 sm:$0xff]   ;;  %v2844_v28 = vld [vmem:[%s2953_s28 + $0x1b8] ss:$12 sps:$4 sm:$0xff]  }
  0x56   : > { %1171 = vmatmul.mubr.bf16.gmra.mrb[8].mxu0 %v2758_v29  ;;  %1387 = vmatmul.mubr.bf16.gmra.mrb[8].mxu1 %v2759_v30  ;;  %v2845_v29 = vld [vmem:[%s2953_s28 + $0x1b0] ss:$12 sps:$4 sm:$0xff]  }
  0x57   : > { %1178 = vmatprep.mubr.bf16.mxu0 %v2760_v31  ;;  %1394 = vmatprep.mubr.bf16.mxu1 %v2762_v32  ;;  %v2846_v30 = vld [vmem:[%s2953_s28 + $0x1d0] ss:$12 sps:$4 sm:$0xff]   ;;  %v2847_v31 = vld [vmem:[%s2953_s28 + $0x1cc] ss:$12 sps:$4 sm:$0xff]   ;;  %v2849_v32 = vld [vmem:[%s2953_s28 + $0x1e8] ss:$12 sps:$4 sm:$0xff]  }
  0x5e   : > { %1179 = vmatmul.mubr.bf16.gmra.mrb[12].mxu0 %v2764_v33  ;;  %1395 = vmatmul.mubr.bf16.gmra.mrb[12].mxu1 %v2765_v34  ;;  %v2850_v33 = vld [vmem:[%s2953_s28 + $0x1c8] ss:$12 sps:$4 sm:$0xff]   ;;  %v2851_v34 = vld [vmem:[%s2953_s28 + $0x200] ss:$12 sps:$4 sm:$0xff]  }
  0x5f   : > { %1186 = vmatprep.mubr.bf16.mxu0 %v2766_v35  ;;  %1402 = vmatprep.mubr.bf16.mxu1 %v2768_v36  ;;  %v2852_v35 = vld [vmem:[%s2953_s28 + $0x1e4] ss:$12 sps:$4 sm:$0xff]  }
  0x60   : > { %v2854_v36 = vld [vmem:[%s2953_s28 + $0x218] ss:$12 sps:$4 sm:$0xff]  }
  0x66   : > { %1187 = vmatmul.mubr.bf16.gmra.mrb[16].mxu0 %v2770_v37  ;;  %1403 = vmatmul.mubr.bf16.gmra.mrb[16].mxu1 %v2771_v38  ;;  %v2855_v37 = vld [vmem:[%s2953_s28 + $0x1e0] ss:$12 sps:$4 sm:$0xff]   ;;  %v2856_v38 = vld [vmem:[%s2953_s28 + $0x230] ss:$12 sps:$4 sm:$0xff]  }
  0x67   : > { %1194 = vmatprep.mubr.bf16.mxu0 %v2773_v39  ;;  %1410 = vmatprep.mubr.bf16.mxu1 %v2775_v40  ;;  %v2857_v39 = vld [vmem:[%s2953_s28 + $0x1fc] ss:$12 sps:$4 sm:$0xff]  }
  0x68   : > { %v2859_v40 = vld [vmem:[%s2953_s28 + $0x248] ss:$12 sps:$4 sm:$0xff]  }
  0x6e   : > { %1195 = vmatmul.mubr.bf16.gmra.mrb[20].mxu0 %v2777_v41  ;;  %1411 = vmatmul.mubr.bf16.gmra.mrb[20].mxu1 %v2778_v42  ;;  %v2860_v41 = vld [vmem:[%s2953_s28 + $0x1f8] ss:$12 sps:$4 sm:$0xff]   ;;  %v2861_v42 = vld [vmem:[%s2953_s28 + $0x260] ss:$12 sps:$4 sm:$0xff]  }
  0x6f   : > { %1202 = vmatprep.mubr.bf16.mxu0 %v2779_v43  ;;  %1418 = vmatprep.mubr.bf16.mxu1 %v2781_v44  ;;  %v2862_v43 = vld [vmem:[%s2953_s28 + $0x214] ss:$12 sps:$4 sm:$0xff]   ;;  %v2864_v44 = vld [vmem:[%s2953_s28 + $0x278] ss:$12 sps:$4 sm:$0xff]  }
  0x76   : > { %1203 = vmatmul.mubr.bf16.gmra.mrb[24].mxu0 %v2783_v45  ;;  %1419 = vmatmul.mubr.bf16.gmra.mrb[24].mxu1 %v2784_v46  ;;  %v2865_v45 = vld [vmem:[%s2953_s28 + $0x210] ss:$12 sps:$4 sm:$0xff]  }
  0x77   : > { %1210 = vmatprep.mubr.bf16.mxu0 %v2785_v47  ;;  %1426 = vmatprep.mubr.bf16.mxu1 %v2787_v48  ;;  %v2866_v46 = vld [vmem:[%s2953_s28 + $0x290] ss:$12 sps:$4 sm:$0xff]   ;;  %v2867_v47 = vld [vmem:[%s2953_s28 + $0x22c] ss:$12 sps:$4 sm:$0xff]   ;;  %v2869_v48 = vld [vmem:[%s2953_s28 + $0x2a8] ss:$12 sps:$4 sm:$0xff]  }
  0x7e   : > { %1211 = vmatmul.mubr.bf16.gmra.mrb[28].mxu0 %v2789_v49  ;;  %1427 = vmatmul.mubr.bf16.gmra.mrb[28].mxu1 %v2790_v50  ;;  %v2870_v49 = vld [vmem:[%s2953_s28 + $0x228] ss:$12 sps:$4 sm:$0xff]   ;;  %v2871_v50 = vld [vmem:[%s2953_s28 + $0x2c0] ss:$12 sps:$4 sm:$0xff]  }
  0x7f   : > { %1218 = vmatprep.mubr.bf16.mxu0 %v2791_v51  ;;  %1434 = vmatprep.mubr.bf16.mxu1 %v2793_v52  ;;  %v2872_v51 = vld [vmem:[%s2953_s28 + $0x244] ss:$12 sps:$4 sm:$0xff]  }
  0x80   : > { %v2874_v52 = vld [vmem:[%s2953_s28 + $0x2d8] ss:$12 sps:$4 sm:$0xff]  }
  0x86   : > { %1219 = vmatmul.mubr.bf16.gmra.mrb[32].mxu0 %v2795_v53  ;;  %1435 = vmatmul.mubr.bf16.gmra.mrb[32].mxu1 %v2796_v54  ;;  %v2875_v53 = vld [vmem:[%s2953_s28 + $0x240] ss:$12 sps:$4 sm:$0xff]   ;;  %v2876_v54 = vld [vmem:[%s2953_s28 + $0x2f0] ss:$12 sps:$4 sm:$0xff]  }
  0x87   : > { %1226 = vmatprep.mubr.bf16.mxu0 %v2797_v55  ;;  %2611 = vmatprep.mubr.msk.bf16.mxu1 %vm1013_vm0, %v2799_v56  ;;  %v2877_v55 = vld [vmem:[%s2953_s28 + $0x25c] ss:$12 sps:$4 sm:$0xff]  }
  0x88   : > { %v2879_v56 = vld [vmem:[%s2953_s28 + $0x308] ss:$12 sps:$4 sm:$0xff]  }
  0x8e   : > { %1227 = vmatmul.mubr.bf16.gmra.mrb[36].mxu0 %v2800_v57  ;;  %2612 = vmatmul.mubr.msk.bf16.vlgmr.msra.gmra.mrb[36].mxu1 %vm1013_vm0, %v2801_v58  ;;  %v2880_v57 = vld [vmem:[%s2953_s28 + $0x258] ss:$12 sps:$4 sm:$0xff]   ;;  %v2881_v58 = vld [vmem:[%s2953_s28 + $0x320] ss:$12 sps:$4 sm:$0xff]  }
  0x8f   : > { %1234 = vmatprep.mubr.bf16.mxu0 %v2802_v59  ;;  %2615 = vmatprep.mubr.msk.bf16.mxu1 %vm1013_vm0, %v2804_v60  ;;  %v2882_v59 = vld [vmem:[%s2953_s28 + $0x274] ss:$12 sps:$4 sm:$0xff]   ;;  %v2884_v60 = vld [vmem:[%s2953_s28 + $0x338] ss:$12 sps:$4 sm:$0xff]  }
  0x96   : > { %1235 = vmatmul.mubr.bf16.gmra.mrb[40].mxu0 %v2805_v61  ;;  %2616 = vmatmul.mubr.msk.bf16.gmra.mrb[40].mxu1 %vm1013_vm0, %v2806_v62  ;;  %v2885_v61 = vld [vmem:[%s2953_s28 + $0x270] ss:$12 sps:$4 sm:$0xff]  }
  0x97   : > { %1242 = vmatprep.mubr.bf16.mxu0 %v2807_v63  ;;  %2619 = vmatprep.mubr.msk.bf16.mxu1 %vm1013_vm0, %v2809_v0  ;;  %v2886_v62 = vld [vmem:[%s2953_s28 + $0x350] ss:$12 sps:$4 sm:$0xff]  }
  0x9e   : > { %1243 = vmatmul.mubr.bf16.gmra.mrb[44].mxu0 %v2810_v1  ;;  %2620 = vmatmul.mubr.msk.bf16.gmra.mrb[44].mxu1 %vm1013_vm0, %v2811_v2 }
  0x9f   : > { %1250 = vmatprep.mubr.bf16.mxu0 %v2812_v3  ;;  %2623 = vmatprep.mubr.msk.bf16.mxu1 %vm1013_vm0, %v2814_v4 }
  0xa6   : > { %1251 = vmatmul.mubr.bf16.gmra.mrb[48].mxu0 %v2815_v5  ;;  %2624 = vmatmul.mubr.msk.bf16.gmra.mrb[48].mxu1 %vm1013_vm0, %v2816_v6 }
  0xa7   : > { %1258 = vmatprep.mubr.bf16.mxu0 %v2817_v7  ;;  %2627 = vmatprep.mubr.msk.bf16.mxu1 %vm1013_vm0, %v2819_v8 }
  0xae   : > { %1259 = vmatmul.mubr.bf16.gmra.mrb[52].mxu0 %v2820_v9  ;;  %2628 = vmatmul.mubr.msk.bf16.gmra.mrb[52].mxu1 %vm1013_vm0, %v2821_v10 }
  0xaf   : > { %1266 = vmatprep.mubr.bf16.mxu0 %v2822_v11  ;;  %2631 = vmatprep.mubr.msk.bf16.mxu1 %vm1013_vm0, %v2824_v12 }
  0xb6   : > { %1267 = vmatmul.mubr.bf16.gmra.mrb[56].mxu0 %v2825_v13  ;;  %2632 = vmatmul.mubr.msk.bf16.gmra.mrb[56].mxu1 %vm1013_vm0, %v2826_v14 }
  0xb7   : > { %1274 = vmatprep.mubr.bf16.mxu0 %v2827_v15  ;;  %2635 = vmatprep.mubr.msk.bf16.mxu1 %vm1013_vm0, %v2829_v16 }
  0xbe   : > { %1275 = vmatmul.mubr.bf16.gmra.mrb[60].mxu0 %v2830_v17  ;;  %2636 = vmatmul.mubr.msk.bf16.gmra.mrb[60].mxu1 %vm1013_vm0, %v2831_v18 }
  0xbf   : > { %1282 = vmatprep.mubr.bf16.mxu0 %v2832_v19  ;;  %2639 = vmatprep.mubr.msk.bf16.mxu1 %vm1013_vm0, %v2834_v20 }
  0xc6   : > { %1283 = vmatmul.mubr.bf16.gmra.mrb[64].mxu0 %v2835_v21  ;;  %2640 = vmatmul.mubr.msk.bf16.gmra.mrb[64].mxu1 %vm1013_vm0, %v2836_v22 }
  0xc7   : > { %1290 = vmatprep.mubr.bf16.mxu0 %v2837_v23  ;;  %2643 = vmatprep.mubr.msk.bf16.mxu1 %vm1013_vm0, %v2839_v24 }
  0xce   : > { %1291 = vmatmul.mubr.bf16.gmra.mrb[68].mxu0 %v2840_v25  ;;  %2644 = vmatmul.mubr.msk.bf16.gmra.mrb[68].mxu1 %vm1013_vm0, %v2841_v26 }
  0xcf   : > { %1298 = vmatprep.mubr.bf16.mxu0 %v2842_v27  ;;  %2647 = vmatprep.mubr.msk.bf16.mxu1 %vm1013_vm0, %v2844_v28 }
  0xd6   : > { %1299 = vmatmul.mubr.bf16.gmra.mrb[72].mxu0 %v2845_v29  ;;  %2648 = vmatmul.mubr.msk.bf16.gmra.mrb[72].mxu1 %vm1013_vm0, %v2846_v30 }
  0xd7   : > { %1306 = vmatprep.mubr.bf16.mxu0 %v2847_v31  ;;  %2651 = vmatprep.mubr.msk.bf16.mxu1 %vm1013_vm0, %v2849_v32 }
  0xde   : > { %1307 = vmatmul.mubr.bf16.gmra.mrb[76].mxu0 %v2850_v33  ;;  %2652 = vmatmul.mubr.msk.bf16.gmra.mrb[76].mxu1 %vm1013_vm0, %v2851_v34 }
  0xdf   : > { %1314 = vmatprep.mubr.bf16.mxu0 %v2852_v35  ;;  %2655 = vmatprep.mubr.msk.bf16.mxu1 %vm1013_vm0, %v2854_v36 }
  0xe6   : > { %1315 = vmatmul.mubr.bf16.gmra.mrb[80].mxu0 %v2855_v37  ;;  %2656 = vmatmul.mubr.msk.bf16.gmra.mrb[80].mxu1 %vm1013_vm0, %v2856_v38 }
  0xe7   : > { %1322 = vmatprep.mubr.bf16.mxu0 %v2857_v39  ;;  %2659 = vmatprep.mubr.msk.bf16.mxu1 %vm1013_vm0, %v2859_v40 }
  0xee   : > { %1323 = vmatmul.mubr.bf16.gmra.mrb[84].mxu0 %v2860_v41  ;;  %2660 = vmatmul.mubr.msk.bf16.gmra.mrb[84].mxu1 %vm1013_vm0, %v2861_v42 }
  0xef   : > { %1330 = vmatprep.mubr.bf16.mxu0 %v2862_v43  ;;  %2663 = vmatprep.mubr.msk.bf16.mxu1 %vm1013_vm0, %v2864_v44 }
  0xf6   : > { %1331 = vmatmul.mubr.bf16.gmra.mrb[88].mxu0 %v2865_v45  ;;  %2664 = vmatmul.mubr.msk.bf16.gmra.mrb[88].mxu1 %vm1013_vm0, %v2866_v46 }
  0xf7   : > { %1338 = vmatprep.mubr.bf16.mxu0 %v2867_v47  ;;  %2667 = vmatprep.mubr.msk.bf16.mxu1 %vm1013_vm0, %v2869_v48 }
  0xfe   : > { %1339 = vmatmul.mubr.bf16.gmra.mrb[92].mxu0 %v2870_v49  ;;  %2668 = vmatmul.mubr.msk.bf16.gmra.mrb[92].mxu1 %vm1013_vm0, %v2871_v50 }
  0xff   : > { %1346 = vmatprep.mubr.bf16.mxu0 %v2872_v51  ;;  %2671 = vmatprep.mubr.msk.bf16.mxu1 %vm1013_vm0, %v2874_v52 }
 0x106   : > { %1347 = vmatmul.mubr.bf16.gmra.mrb[96].mxu0 %v2875_v53  ;;  %2672 = vmatmul.mubr.msk.bf16.gmra.mrb[96].mxu1 %vm1013_vm0, %v2876_v54 }
 0x107   : > { %1354 = vmatprep.mubr.bf16.mxu0 %v2877_v55  ;;  %2675 = vmatprep.mubr.msk.bf16.mxu1 %vm1013_vm0, %v2879_v56 }
 0x10e   : > { %1355 = vmatmul.mubr.bf16.gmra.mrb[100].mxu0 %v2880_v57  ;;  %2676 = vmatmul.mubr.msk.bf16.gmra.mrb[100].mxu1 %vm1013_vm0, %v2881_v58 }
 0x10f   : > { %1362 = vmatprep.mubr.bf16.mxu0 %v2882_v59  ;;  %2679 = vmatprep.mubr.msk.bf16.mxu1 %vm1013_vm0, %v2884_v60 }
 0x116   : > { %1363 = vmatmul.mubr.bf16.gmra.mrb[104].mxu0 %v2885_v61  ;;  %2680 = vmatmul.mubr.msk.bf16.gmra.mrb[104].mxu1 %vm1013_vm0, %v2886_v62 }
 0x119   : > { %v3162_v63 = vpop.f32.mrb[0].mxu0  ;;  %v3164_v0 = vpop.f32.mrb[0].mxu1 }
 0x11a   : > { %v1158_v1 = vpop.f32.mrb[1].mxu0  ;;  %v1374_v2 = vpop.f32.mrb[1].mxu1 }
 0x11b   : > { %v3166_v3 = vpop.f32.mrb[2].mxu0  ;;  %v3168_v4 = vpop.f32.mrb[2].mxu1 }
 0x11c   : > { %v1161_v5 = vpop.f32.mrb[3].mxu0  ;;  %v1377_v6 = vpop.f32.mrb[3].mxu1 }
 0x121   : > { %v3170_v7 = vpop.f32.mrb[4].mxu0  ;;  %v3172_v8 = vpop.f32.mrb[4].mxu1 }
 0x122   : > { %v1166_v9 = vpop.f32.mrb[5].mxu0  ;;  %v1382_v10 = vpop.f32.mrb[5].mxu1 }
 0x123   : > { %v3174_v11 = vpop.f32.mrb[6].mxu0  ;;  %v3176_v12 = vpop.f32.mrb[6].mxu1 }
 0x124   : > { %v1169_v13 = vpop.f32.mrb[7].mxu0  ;;  %v1385_v14 = vpop.f32.mrb[7].mxu1 }
 0x129   : > { %v3178_v15 = vpop.f32.mrb[8].mxu0  ;;  %v3180_v16 = vpop.f32.mrb[8].mxu1 }
 0x12a   : > { %v1174_v17 = vpop.f32.mrb[9].mxu0  ;;  %v1390_v18 = vpop.f32.mrb[9].mxu1 }
 0x12b   : > { %v3182_v19 = vpop.f32.mrb[10].mxu0  ;;  %v3184_v20 = vpop.f32.mrb[10].mxu1  ;;  %v3237_v17 = vld [vmem:[%s3550_s2] ss:$0 sm:$0xff] }
 0x12c   : > { %v1177_v21 = vpop.f32.mrb[11].mxu0  ;;  %v1393_v22 = vpop.f32.mrb[11].mxu1  ;;  %v1165_v18 = vadd.f32 %v3237_v17, %v3170_v7 }
 0x12d   : > { %v1157_v21 = vadd.f32 %v3237_v17, %v3162_v63 }
 0x131   : > { %v3186_v23 = vpop.f32.mrb[12].mxu0  ;;  %v3188_v24 = vpop.f32.mrb[12].mxu1 }
 0x132   : > { %v1182_v25 = vpop.f32.mrb[13].mxu0  ;;  %v1398_v26 = vpop.f32.mrb[13].mxu1 }
 0x133   : > { %v3190_v27 = vpop.f32.mrb[14].mxu0  ;;  %v3192_v28 = vpop.f32.mrb[14].mxu1  ;;  %v1168_v26 = vadd.f32 %v3237_v17, %v3174_v11 }
 0x134   : > { %v1185_v29 = vpop.f32.mrb[15].mxu0  ;;  %v1401_v30 = vpop.f32.mrb[15].mxu1 }
 0x139   : > { %v3194_v31 = vpop.f32.mrb[16].mxu0  ;;  %v3196_v32 = vpop.f32.mrb[16].mxu1 }
 0x13a   : > { %v1190_v33 = vpop.f32.mrb[17].mxu0  ;;  %v1406_v34 = vpop.f32.mrb[17].mxu1 }
 0x13b   : > { %v3198_v35 = vpop.f32.mrb[18].mxu0  ;;  %v3200_v36 = vpop.f32.mrb[18].mxu1  ;;  %v1160_v34 = vadd.f32 %v3237_v17, %v3166_v3 }
 0x13c   : > { %v1193_v37 = vpop.f32.mrb[19].mxu0  ;;  %v1409_v38 = vpop.f32.mrb[19].mxu1 }
 0x141   : > { %v3202_v39 = vpop.f32.mrb[20].mxu0  ;;  %v3204_v40 = vpop.f32.mrb[20].mxu1 }
 0x142   : > { %v1198_v41 = vpop.f32.mrb[21].mxu0  ;;  %v1414_v42 = vpop.f32.mrb[21].mxu1 }
 0x143   : > { %v3206_v43 = vpop.f32.mrb[22].mxu0  ;;  %v3208_v44 = vpop.f32.mrb[22].mxu1 }
 0x144   : > { %v1201_v45 = vpop.f32.mrb[23].mxu0  ;;  %v1417_v46 = vpop.f32.mrb[23].mxu1 }
 0x149   : > { %v3210_v47 = vpop.f32.mrb[24].mxu0  ;;  %v3212_v48 = vpop.f32.mrb[24].mxu1 }
 0x14a   : > { %v1206_v49 = vpop.f32.mrb[25].mxu0  ;;  %v1422_v50 = vpop.f32.mrb[25].mxu1 }
 0x14b   : > { %v3214_v51 = vpop.f32.mrb[26].mxu0  ;;  %v3216_v52 = vpop.f32.mrb[26].mxu1 }
 0x14c   : > { %v1209_v53 = vpop.f32.mrb[27].mxu0  ;;  %v1425_v54 = vpop.f32.mrb[27].mxu1 }
 0x14d   : > { %v1181_v54 = vadd.f32 %v3237_v17, %v3186_v23 }
 0x151   : > { %v3218_v55 = vpop.f32.mrb[28].mxu0  ;;  %v3220_v56 = vpop.f32.mrb[28].mxu1 }
 0x152   : > { %v1214_v57 = vpop.f32.mrb[29].mxu0  ;;  %v1430_v58 = vpop.f32.mrb[29].mxu1 }
 0x153   : > { %v3222_v59 = vpop.f32.mrb[30].mxu0  ;;  %v3224_v60 = vpop.f32.mrb[30].mxu1  ;;  %v1173_v58 = vadd.f32 %v3237_v17, %v3178_v15 }
 0x154   : > { %v1217_v61 = vpop.f32.mrb[31].mxu0  ;;  %v1433_v62 = vpop.f32.mrb[31].mxu1 }
 0x159   : > { %v3226_v1 = vpop.f32.mrb[32].mxu0  ;;  %v3228_v2 = vpop.f32.mrb[32].mxu1 }
 0x15a   : > { %v1222_v5 = vpop.f32.mrb[33].mxu0  ;;  %v1438_v6 = vpop.f32.mrb[33].mxu1 }
 0x15b   : > { %v3230_v9 = vpop.f32.mrb[34].mxu0  ;;  %v3232_v10 = vpop.f32.mrb[34].mxu1  ;;  %v1184_v6 = vadd.f32 %v3237_v17, %v3190_v27 }
 0x15c   : > { %v1225_v13 = vpop.f32.mrb[35].mxu0  ;;  %v1441_v14 = vpop.f32.mrb[35].mxu1 }
 0x161   : > { %v3243_v22 = vpop.f32.mrb[36].mxu0  ;;  %v2613_v25 = vpop.f32.mrb[36].mxu1 }
 0x162   : > { %v1486_v29 = vadd.f32 %v2613_v25, %v1165_v18  ;;  %v1230_v30 = vpop.f32.mrb[37].mxu0  ;;  %v1477_v33 = vpop.f32.mrb[37].mxu1  ;;  %v1176_v18 = vadd.f32 %v3237_v17, %v3182_v19 }
 0x163   : > { %v1478_v37 = vadd.f32 %v1477_v33, %v1157_v21  ;;  %v3250_v38 = vpop.f32.mrb[38].mxu0  ;;  %v2614_v7 = vpop.f32.mrb[38].mxu1 }
 0x164   : > { %v1766_v41 = vmax.f32 %v1486_v29, 0.0  ;;  %v1489_v42 = vadd.f32 %v2614_v7, %v1168_v26  ;;  %v1233_v63 = vpop.f32.mrb[39].mxu0  ;;  %v1480_v45 = vpop.f32.mrb[39].mxu1 }
 0x165   : > { %v1764_v11 = vmax.f32 %v1478_v37, 0.0  ;;  %v1481_v46 = vadd.f32 %v1480_v45, %v1160_v34  ;;  %v1189_v45 = vadd.f32 %v3237_v17, %v3194_v31 }
 0x166   : > { %v2499_v3 = vpack.c.bf16 %v1766_v41, %v1766_v41  ;;  %v1767_v49 = vmax.f32 %v1489_v42, 0.0  ;;  %v1197_v42 = vadd.f32 %v3237_v17, %v3202_v39 }
 0x167   : > { %v2497_v50 = vpack.c.bf16 %v1764_v11, %v1764_v11  ;;  %v1765_v53 = vmax.f32 %v1481_v46, 0.0 }
 0x168   : > { %2127 = vst.msk [vmem:[%s3255_s8 + $0x8] sm:$0xf] %vm2124_vm1, %v2499_v3  ;;  %v2500_v57 = vpack.c.bf16 %v1767_v49, %v1767_v49  ;;  %v1200_v49 = vadd.f32 %v3237_v17, %v3206_v43 }
 0x169   : > { %2125 = vst.msk [vmem:[%s3255_s8] sm:$0xf] %vm2124_vm1, %v2497_v50  ;;  %v2498_v61 = vpack.c.bf16 %v1765_v53, %v1765_v53  ;;  %v3265_v62 = vpop.f32.mrb[40].mxu0  ;;  %v2617_v5 = vpop.f32.mrb[40].mxu1 }
 0x16a   : > { %2128 = vst.msk [vmem:[%s3255_s8 + $0xc] sm:$0xf] %vm2124_vm1, %v2500_v57  ;;  %v1502_v13 = vadd.f32 %v2617_v5, %v1181_v54  ;;  %v1238_v14 = vpop.f32.mrb[41].mxu0  ;;  %v1493_v23 = vpop.f32.mrb[41].mxu1  ;;  %v1192_v54 = vadd.f32 %v3237_v17, %v3198_v35 }
 0x16b   : > { %2126 = vst.msk [vmem:[%s3255_s8 + $0x4] sm:$0xf] %vm2124_vm1, %v2498_v61  ;;  %v1494_v15 = vadd.f32 %v1493_v23, %v1173_v58  ;;  %v3275_v21 = vpop.f32.mrb[42].mxu0  ;;  %v2618_v25 = vpop.f32.mrb[42].mxu1 }
 0x16c   : > { %v1770_v26 = vmax.f32 %v1502_v13, 0.0  ;;  %v1505_v29 = vadd.f32 %v2618_v25, %v1184_v6  ;;  %v1241_v30 = vpop.f32.mrb[43].mxu0  ;;  %v1496_v27 = vpop.f32.mrb[43].mxu1  ;;  %v1213_v25 = vadd.f32 %v3237_v17, %v3218_v55 }
 0x16d   : > { %v1768_v33 = vmax.f32 %v1494_v15, 0.0  ;;  %v1497_v34 = vadd.f32 %v1496_v27, %v1176_v18 }
 0x16e   : > { %v2503_v37 = vpack.c.bf16 %v1770_v26, %v1770_v26  ;;  %v1771_v7 = vmax.f32 %v1505_v29, 0.0  ;;  %v1205_v29 = vadd.f32 %v3237_v17, %v3210_v47 }
 0x16f   : > { %v2501_v41 = vpack.c.bf16 %v1768_v33, %v1768_v33  ;;  %v1769_v19 = vmax.f32 %v1497_v34, 0.0  ;;  %v1216_v34 = vadd.f32 %v3237_v17, %v3222_v59 }
 0x170   : > { %2131 = vst.msk [vmem:[%s3255_s8 + $0x18] sm:$0xf] %vm2124_vm1, %v2503_v37  ;;  %v2504_v63 = vpack.c.bf16 %v1771_v7, %v1771_v7 }
 0x171   : > { %2129 = vst.msk [vmem:[%s3255_s8 + $0x10] sm:$0xf] %vm2124_vm1, %v2501_v41  ;;  %v2502_v11 = vpack.c.bf16 %v1769_v19, %v1769_v19  ;;  %v3285_v46 = vpop.f32.mrb[44].mxu0  ;;  %v2621_v3 = vpop.f32.mrb[44].mxu1  ;;  %v1208_v41 = vadd.f32 %v3237_v17, %v3214_v51 }
 0x172   : > { %2132 = vst.msk [vmem:[%s3255_s8 + $0x1c] sm:$0xf] %vm2124_vm1, %v2504_v63  ;;  %v1518_v50 = vadd.f32 %v2621_v3, %v1197_v42  ;;  %v1246_v53 = vpop.f32.mrb[45].mxu0  ;;  %v1509_v39 = vpop.f32.mrb[45].mxu1 }
 0x173   : > { %2130 = vst.msk [vmem:[%s3255_s8 + $0x14] sm:$0xf] %vm2124_vm1, %v2502_v11  ;;  %v1510_v31 = vadd.f32 %v1509_v39, %v1189_v45  ;;  %v3295_v57 = vpop.f32.mrb[46].mxu0  ;;  %v2622_v58 = vpop.f32.mrb[46].mxu1 }
 0x174   : > { %v1774_v61 = vmax.f32 %v1518_v50, 0.0  ;;  %v1521_v5 = vadd.f32 %v2622_v58, %v1200_v49  ;;  %v1249_v6 = vpop.f32.mrb[47].mxu0  ;;  %v1512_v43 = vpop.f32.mrb[47].mxu1  ;;  %v1221_v58 = vadd.f32 %v3237_v17, %v3226_v1 }
 0x175   : > { %v1772_v13 = vmax.f32 %v1510_v31, 0.0  ;;  %v1513_v14 = vadd.f32 %v1512_v43, %v1192_v54  ;;  %v1229_v54 = vadd.f32 %v3237_v17, %v3243_v22  ;;  %v1232_v43 = vadd.f32 %v3237_v17, %v3250_v38 }
 0x176   : > { %v2507_v23 = vpack.c.bf16 %v1774_v61, %v1774_v61  ;;  %v1775_v18 = vmax.f32 %v1521_v5, 0.0  ;;  %v1224_v22 = vadd.f32 %v3237_v17, %v3230_v9  ;;  %v1245_v9 = vadd.f32 %v3237_v17, %v3285_v46 }
 0x177   : > { %v2505_v15 = vpack.c.bf16 %v1772_v13, %v1772_v13  ;;  %v1773_v35 = vmax.f32 %v1513_v14, 0.0  ;;  %v1240_v46 = vadd.f32 %v3237_v17, %v3275_v21 }
 0x178   : > { %2135 = vst.msk [vmem:[%s3255_s8 + $0x28] sm:$0xf] %vm2124_vm1, %v2507_v23  ;;  %v2508_v26 = vpack.c.bf16 %v1775_v18, %v1775_v18 }
 0x179   : > { %2133 = vst.msk [vmem:[%s3255_s8 + $0x20] sm:$0xf] %vm2124_vm1, %v2505_v15  ;;  %v2506_v30 = vpack.c.bf16 %v1773_v35, %v1773_v35  ;;  %v3305_v27 = vpop.f32.mrb[48].mxu0  ;;  %v2625_v33 = vpop.f32.mrb[48].mxu1 }
 0x17a   : > { %2136 = vst.msk [vmem:[%s3255_s8 + $0x2c] sm:$0xf] %vm2124_vm1, %v2508_v26  ;;  %v1534_v37 = vadd.f32 %v2625_v33, %v1213_v25  ;;  %v1254_v7 = vpop.f32.mrb[49].mxu0  ;;  %v1525_v55 = vpop.f32.mrb[49].mxu1 }
 0x17b   : > { %2134 = vst.msk [vmem:[%s3255_s8 + $0x24] sm:$0xf] %vm2124_vm1, %v2506_v30  ;;  %v1526_v47 = vadd.f32 %v1525_v55, %v1205_v29  ;;  %v3315_v19 = vpop.f32.mrb[50].mxu0  ;;  %v2626_v42 = vpop.f32.mrb[50].mxu1 }
 0x17c   : > { %v1778_v63 = vmax.f32 %v1534_v37, 0.0  ;;  %v1537_v45 = vadd.f32 %v2626_v42, %v1216_v34  ;;  %v1257_v11 = vpop.f32.mrb[51].mxu0  ;;  %v1528_v59 = vpop.f32.mrb[51].mxu1 }
 0x17d   : > { %v1776_v3 = vmax.f32 %v1526_v47, 0.0  ;;  %v1529_v49 = vadd.f32 %v1528_v59, %v1208_v41  ;;  %v1237_v41 = vadd.f32 %v3237_v17, %v3265_v62 }
 0x17e   : > { %v2511_v50 = vpack.c.bf16 %v1778_v63, %v1778_v63  ;;  %v1779_v53 = vmax.f32 %v1537_v45, 0.0  ;;  %v1248_v45 = vadd.f32 %v3237_v17, %v3295_v57 }
 0x17f   : > { %v2509_v39 = vpack.c.bf16 %v1776_v3, %v1776_v3  ;;  %v1777_v51 = vmax.f32 %v1529_v49, 0.0 }
 0x180   : > { %2139 = vst.msk [vmem:[%s3255_s8 + $0x38] sm:$0xf] %vm2124_vm1, %v2511_v50  ;;  %v2512_v31 = vpack.c.bf16 %v1779_v53, %v1779_v53 }
 0x181   : > { %2137 = vst.msk [vmem:[%s3255_s8 + $0x30] sm:$0xf] %vm2124_vm1, %v2509_v39  ;;  %v2510_v61 = vpack.c.bf16 %v1777_v51, %v1777_v51  ;;  %v1260_v5 = vpop.f32.mrb[52].mxu0  ;;  %v2629_v6 = vpop.f32.mrb[52].mxu1 }
 0x182   : > { %2140 = vst.msk [vmem:[%s3255_s8 + $0x3c] sm:$0xf] %vm2124_vm1, %v2512_v31  ;;  %v1550_v13 = vadd.f32 %v2629_v6, %v1229_v54  ;;  %v1262_v14 = vpop.f32.mrb[53].mxu0  ;;  %v1541_v23 = vpop.f32.mrb[53].mxu1  ;;  %v1261_v21 = vadd.f32 %v3237_v17, %v1260_v5  ;;  %v1256_v5 = vadd.f32 %v3237_v17, %v3315_v19 }
 0x183   : > { %2138 = vst.msk [vmem:[%s3255_s8 + $0x34] sm:$0xf] %vm2124_vm1, %v2510_v61  ;;  %v1542_v1 = vadd.f32 %v1541_v23, %v1221_v58  ;;  %v1263_v18 = vpop.f32.mrb[54].mxu0  ;;  %v2630_v15 = vpop.f32.mrb[54].mxu1  ;;  %v1253_v14 = vadd.f32 %v3237_v17, %v3305_v27 }
 0x184   : > { %v1782_v35 = vmax.f32 %v1550_v13, 0.0  ;;  %v1553_v25 = vadd.f32 %v2630_v15, %v1232_v43  ;;  %v1265_v26 = vpop.f32.mrb[55].mxu0  ;;  %v1544_v29 = vpop.f32.mrb[55].mxu1  ;;  %v1264_v15 = vadd.f32 %v3237_v17, %v1263_v18 }
 0x185   : > { %v1780_v38 = vmax.f32 %v1542_v1, 0.0  ;;  %v1545_v30 = vadd.f32 %v1544_v29, %v1224_v22 }
 0x186   : > { %v2515_v33 = vpack.c.bf16 %v1782_v35, %v1782_v35  ;;  %v1783_v34 = vmax.f32 %v1553_v25, 0.0 }
 0x187   : > { %v2513_v37 = vpack.c.bf16 %v1780_v38, %v1780_v38  ;;  %v1781_v7 = vmax.f32 %v1545_v30, 0.0 }
 0x188   : > { %2143 = vst.msk [vmem:[%s3255_s8 + $0x48] sm:$0xf] %vm2124_vm1, %v2515_v33  ;;  %v2516_v55 = vpack.c.bf16 %v1783_v34, %v1783_v34 }
 0x189   : > { %2141 = vst.msk [vmem:[%s3255_s8 + $0x40] sm:$0xf] %vm2124_vm1, %v2513_v37  ;;  %v2514_v47 = vpack.c.bf16 %v1781_v7, %v1781_v7  ;;  %v1268_v42 = vpop.f32.mrb[56].mxu0  ;;  %v2633_v63 = vpop.f32.mrb[56].mxu1 }
 0x18a   : > { %2144 = vst.msk [vmem:[%s3255_s8 + $0x4c] sm:$0xf] %vm2124_vm1, %v2516_v55  ;;  %v1566_v11 = vadd.f32 %v2633_v63, %v1245_v9  ;;  %v1270_v59 = vpop.f32.mrb[57].mxu0  ;;  %v1557_v3 = vpop.f32.mrb[57].mxu1 }
 0x18b   : > { %2142 = vst.msk [vmem:[%s3255_s8 + $0x44] sm:$0xf] %vm2124_vm1, %v2514_v47  ;;  %v1558_v62 = vadd.f32 %v1557_v3, %v1237_v41  ;;  %v1271_v49 = vpop.f32.mrb[58].mxu0  ;;  %v2634_v50 = vpop.f32.mrb[58].mxu1 }
 0x18c   : > { %v1786_v53 = vmax.f32 %v1566_v11, 0.0  ;;  %v1569_v39 = vadd.f32 %v2634_v50, %v1248_v45  ;;  %v1273_v51 = vpop.f32.mrb[59].mxu0  ;;  %v1560_v54 = vpop.f32.mrb[59].mxu1  ;;  %v1269_v45 = vadd.f32 %v3237_v17, %v1268_v42 }
 0x18d   : > { %v1784_v57 = vmax.f32 %v1558_v62, 0.0  ;;  %v1561_v31 = vadd.f32 %v1560_v54, %v1240_v46 }
 0x18e   : > { %v2519_v58 = vpack.c.bf16 %v1786_v53, %v1786_v53  ;;  %v1787_v61 = vmax.f32 %v1569_v39, 0.0  ;;  %v1272_v39 = vadd.f32 %v3237_v17, %v1271_v49 }
 0x18f   : > { %v2517_v6 = vpack.c.bf16 %v1784_v57, %v1784_v57  ;;  %v1785_v43 = vmax.f32 %v1561_v31, 0.0 }
 0x190   : > { %2147 = vst.msk [vmem:[%s3255_s8 + $0x58] sm:$0xf] %vm2124_vm1, %v2519_v58  ;;  %v2520_v13 = vpack.c.bf16 %v1787_v61, %v1787_v61 }
 0x191   : > { %2145 = vst.msk [vmem:[%s3255_s8 + $0x50] sm:$0xf] %vm2124_vm1, %v2517_v6  ;;  %v2518_v23 = vpack.c.bf16 %v1785_v43, %v1785_v43  ;;  %v1276_v22 = vpop.f32.mrb[60].mxu0  ;;  %v2637_v1 = vpop.f32.mrb[60].mxu1 }
 0x192   : > { %2148 = vst.msk [vmem:[%s3255_s8 + $0x5c] sm:$0xf] %vm2124_vm1, %v2520_v13  ;;  %v1582_v35 = vadd.f32 %v2637_v1, %v1261_v21  ;;  %v1278_v25 = vpop.f32.mrb[61].mxu0  ;;  %v1573_v26 = vpop.f32.mrb[61].mxu1  ;;  %v1277_v19 = vadd.f32 %v3237_v17, %v1276_v22 }
 0x193   : > { %2146 = vst.msk [vmem:[%s3255_s8 + $0x54] sm:$0xf] %vm2124_vm1, %v2518_v23  ;;  %v1574_v29 = vadd.f32 %v1573_v26, %v1253_v14  ;;  %v1279_v27 = vpop.f32.mrb[62].mxu0  ;;  %v2638_v38 = vpop.f32.mrb[62].mxu1 }
 0x194   : > { %v1790_v30 = vmax.f32 %v1582_v35, 0.0  ;;  %v1585_v33 = vadd.f32 %v2638_v38, %v1264_v15  ;;  %v1281_v34 = vpop.f32.mrb[63].mxu0  ;;  %v1576_v37 = vpop.f32.mrb[63].mxu1  ;;  %v1280_v46 = vadd.f32 %v3237_v17, %v1279_v27 }
 0x195   : > { %v1788_v18 = vmax.f32 %v1574_v29, 0.0  ;;  %v1577_v7 = vadd.f32 %v1576_v37, %v1256_v5 }
 0x196   : > { %v2523_v9 = vpack.c.bf16 %v1790_v30, %v1790_v30  ;;  %v1791_v55 = vmax.f32 %v1585_v33, 0.0 }
 0x197   : > { %v2521_v41 = vpack.c.bf16 %v1788_v18, %v1788_v18  ;;  %v1789_v47 = vmax.f32 %v1577_v7, 0.0 }
 0x198   : > { %2151 = vst.msk [vmem:[%s3255_s8 + $0x68] sm:$0xf] %vm2124_vm1, %v2523_v9  ;;  %v2524_v63 = vpack.c.bf16 %v1791_v55, %v1791_v55 }
 0x199   : > { %2149 = vst.msk [vmem:[%s3255_s8 + $0x60] sm:$0xf] %vm2124_vm1, %v2521_v41  ;;  %v2522_v11 = vpack.c.bf16 %v1789_v47, %v1789_v47  ;;  %v1284_v59 = vpop.f32.mrb[64].mxu0  ;;  %v2641_v3 = vpop.f32.mrb[64].mxu1 }
 0x19a   : > { %2152 = vst.msk [vmem:[%s3255_s8 + $0x6c] sm:$0xf] %vm2124_vm1, %v2524_v63  ;;  %v1598_v62 = vadd.f32 %v2641_v3, %v1277_v19  ;;  %v1286_v50 = vpop.f32.mrb[65].mxu0  ;;  %v1589_v53 = vpop.f32.mrb[65].mxu1  ;;  %v1285_v22 = vadd.f32 %v3237_v17, %v1284_v59 }
 0x19b   : > { %2150 = vst.msk [vmem:[%s3255_s8 + $0x64] sm:$0xf] %vm2124_vm1, %v2522_v11  ;;  %v1590_v51 = vadd.f32 %v1589_v53, %v1269_v45  ;;  %v1287_v42 = vpop.f32.mrb[66].mxu0  ;;  %v2642_v54 = vpop.f32.mrb[66].mxu1 }
 0x19c   : > { %v1794_v57 = vmax.f32 %v1598_v62, 0.0  ;;  %v1601_v31 = vadd.f32 %v2642_v54, %v1280_v46  ;;  %v1289_v58 = vpop.f32.mrb[67].mxu0  ;;  %v1592_v61 = vpop.f32.mrb[67].mxu1  ;;  %v1288_v29 = vadd.f32 %v3237_v17, %v1287_v42 }
 0x19d   : > { %v1792_v6 = vmax.f32 %v1590_v51, 0.0  ;;  %v1593_v43 = vadd.f32 %v1592_v61, %v1272_v39 }
 0x19e   : > { %v2527_v21 = vpack.c.bf16 %v1794_v57, %v1794_v57  ;;  %v1795_v13 = vmax.f32 %v1601_v31, 0.0 }
 0x19f   : > { %v2525_v14 = vpack.c.bf16 %v1792_v6, %v1792_v6  ;;  %v1793_v23 = vmax.f32 %v1593_v43, 0.0 }
 0x1a0   : > { %2155 = vst.msk [vmem:[%s3255_s8 + $0x78] sm:$0xf] %vm2124_vm1, %v2527_v21  ;;  %v2528_v49 = vpack.c.bf16 %v1795_v13, %v1795_v13 }
 0x1a1   : > { %2153 = vst.msk [vmem:[%s3255_s8 + $0x70] sm:$0xf] %vm2124_vm1, %v2525_v14  ;;  %v2526_v1 = vpack.c.bf16 %v1793_v23, %v1793_v23  ;;  %v1292_v15 = vpop.f32.mrb[68].mxu0  ;;  %v2645_v35 = vpop.f32.mrb[68].mxu1 }
 0x1a2   : > { %2156 = vst.msk [vmem:[%s3255_s8 + $0x7c] sm:$0xf] %vm2124_vm1, %v2528_v49  ;;  %v1293_v25 = vadd.f32 %v3237_v17, %v1292_v15  ;;  %v1294_v26 = vpop.f32.mrb[69].mxu0  ;;  %v1605_v5 = vpop.f32.mrb[69].mxu1 }
 0x1a3   : > { %2154 = vst.msk [vmem:[%s3255_s8 + $0x74] sm:$0xf] %vm2124_vm1, %v2526_v1  ;;  %v1606_v27 = vadd.f32 %v1605_v5, %v1285_v22  ;;  %v1295_v38 = vpop.f32.mrb[70].mxu0  ;;  %v2646_v30 = vpop.f32.mrb[70].mxu1 }
 0x1a4   : > { %v1614_v33 = vadd.f32 %v2645_v35, %v1293_v25  ;;  %v1296_v34 = vadd.f32 %v3237_v17, %v1295_v38  ;;  %v1297_v37 = vpop.f32.mrb[71].mxu0  ;;  %v1608_v18 = vpop.f32.mrb[71].mxu1 }
 0x1a5   : > { %v1796_v7 = vmax.f32 %v1606_v27, 0.0  ;;  %v1609_v9 = vadd.f32 %v1608_v18, %v1288_v29 }
 0x1a6   : > { %v1798_v55 = vmax.f32 %v1614_v33, 0.0  ;;  %v1617_v41 = vadd.f32 %v2646_v30, %v1296_v34 }
 0x1a7   : > { %v2529_v47 = vpack.c.bf16 %v1796_v7, %v1796_v7  ;;  %v1797_v19 = vmax.f32 %v1609_v9, 0.0 }
 0x1a8   : > { %v2531_v63 = vpack.c.bf16 %v1798_v55, %v1798_v55  ;;  %v1799_v45 = vmax.f32 %v1617_v41, 0.0 }
 0x1a9   : > { %2157 = vst.msk [vmem:[%s3255_s8 + $0x80] sm:$0xf] %vm2124_vm1, %v2529_v47  ;;  %v2530_v11 = vpack.c.bf16 %v1797_v19, %v1797_v19  ;;  %v1300_v59 = vpop.f32.mrb[72].mxu0  ;;  %v2649_v3 = vpop.f32.mrb[72].mxu1 }
 0x1aa   : > { %2159 = vst.msk [vmem:[%s3255_s8 + $0x88] sm:$0xf] %vm2124_vm1, %v2531_v63  ;;  %v2532_v46 = vpack.c.bf16 %v1799_v45, %v1799_v45  ;;  %v1301_v62 = vadd.f32 %v3237_v17, %v1300_v59  ;;  %v1302_v50 = vpop.f32.mrb[73].mxu0  ;;  %v1621_v53 = vpop.f32.mrb[73].mxu1 }
 0x1ab   : > { %2158 = vst.msk [vmem:[%s3255_s8 + $0x84] sm:$0xf] %vm2124_vm1, %v2530_v11  ;;  %v1303_v39 = vpop.f32.mrb[74].mxu0  ;;  %v2650_v51 = vpop.f32.mrb[74].mxu1 }
 0x1ac   : > { %2160 = vst.msk [vmem:[%s3255_s8 + $0x8c] sm:$0xf] %vm2124_vm1, %v2532_v46  ;;  %v1622_v42 = vadd.f32 %v1621_v53, %v1301_v62  ;;  %v1304_v54 = vadd.f32 %v3237_v17, %v1303_v39  ;;  %v1305_v57 = vpop.f32.mrb[75].mxu0  ;;  %v1624_v31 = vpop.f32.mrb[75].mxu1 }
 0x1ae   : > { %v1800_v58 = vmax.f32 %v1622_v42, 0.0  ;;  %v1625_v61 = vadd.f32 %v1624_v31, %v1304_v54 }
 0x1b0   : > { %v2533_v6 = vpack.c.bf16 %v1800_v58, %v1800_v58  ;;  %v1801_v43 = vmax.f32 %v1625_v61, 0.0 }
 0x1b1   : > { %v1308_v21 = vpop.f32.mrb[76].mxu0  ;;  %v2653_v13 = vpop.f32.mrb[76].mxu1 }
 0x1b2   : > { %2161 = vst.msk [vmem:[%s3255_s8 + $0x90] sm:$0xf] %vm2124_vm1, %v2533_v6  ;;  %v2534_v14 = vpack.c.bf16 %v1801_v43, %v1801_v43  ;;  %v1309_v23 = vadd.f32 %v3237_v17, %v1308_v21  ;;  %v1310_v49 = vpop.f32.mrb[77].mxu0  ;;  %v1637_v22 = vpop.f32.mrb[77].mxu1 }
 0x1b3   : > { %v1311_v1 = vpop.f32.mrb[78].mxu0  ;;  %v2654_v15 = vpop.f32.mrb[78].mxu1 }
 0x1b4   : > { %2162 = vst.msk [vmem:[%s3255_s8 + $0x94] sm:$0xf] %vm2124_vm1, %v2534_v14  ;;  %v1630_v35 = vadd.f32 %v2649_v3, %v1309_v23  ;;  %v1312_v25 = vadd.f32 %v3237_v17, %v1311_v1  ;;  %v1313_v26 = vpop.f32.mrb[79].mxu0  ;;  %v1640_v5 = vpop.f32.mrb[79].mxu1  ;;  %v1373_v14 = vadd.f32 %v3237_v17, %v3164_v0 }
 0x1b6   : > { %v1802_v29 = vmax.f32 %v1630_v35, 0.0  ;;  %v1633_v27 = vadd.f32 %v2650_v51, %v1312_v25  ;;  %v1376_v35 = vadd.f32 %v3237_v17, %v3168_v4 }
 0x1b8   : > { %v2535_v38 = vpack.c.bf16 %v1802_v29, %v1802_v29  ;;  %v1803_v30 = vmax.f32 %v1633_v27, 0.0 }
 0x1b9   : > { %v1316_v33 = vpop.f32.mrb[80].mxu0  ;;  %v3403_v34 = vpop.f32.mrb[80].mxu1 }
 0x1ba   : > { %2163 = vst.msk [vmem:[%s3255_s8 + $0x98] sm:$0xf] %vm2124_vm1, %v2535_v38  ;;  %v2536_v37 = vpack.c.bf16 %v1803_v30, %v1803_v30  ;;  %v1317_v18 = vadd.f32 %v3237_v17, %v1316_v33  ;;  %v1318_v7 = vpop.f32.mrb[81].mxu0  ;;  %v1653_v9 = vpop.f32.mrb[81].mxu1 }
 0x1bb   : > { %v1319_v55 = vpop.f32.mrb[82].mxu0  ;;  %v3408_v41 = vpop.f32.mrb[82].mxu1 }
 0x1bc   : > { %2164 = vst.msk [vmem:[%s3255_s8 + $0x9c] sm:$0xf] %vm2124_vm1, %v2536_v37  ;;  %v1638_v47 = vadd.f32 %v1637_v22, %v1317_v18  ;;  %v1320_v19 = vadd.f32 %v3237_v17, %v1319_v55  ;;  %v1321_v63 = vpop.f32.mrb[83].mxu0  ;;  %v1656_v45 = vpop.f32.mrb[83].mxu1 }
 0x1be   : > { %v1804_v11 = vmax.f32 %v1638_v47, 0.0  ;;  %v1641_v59 = vadd.f32 %v1640_v5, %v1320_v19  ;;  %v1389_v19 = vadd.f32 %v3237_v17, %v3180_v16 }
 0x1c0   : > { %v2537_v3 = vpack.c.bf16 %v1804_v11, %v1804_v11  ;;  %v1805_v46 = vmax.f32 %v1641_v59, 0.0  ;;  %v1381_v59 = vadd.f32 %v3237_v17, %v3172_v8 }
 0x1c1   : > { %v1324_v62 = vpop.f32.mrb[84].mxu0  ;;  %v3413_v50 = vpop.f32.mrb[84].mxu1 }
 0x1c2   : > { %2165 = vst.msk [vmem:[%s3255_s8 + $0xa0] sm:$0xf] %vm2124_vm1, %v2537_v3  ;;  %v2538_v53 = vpack.c.bf16 %v1805_v46, %v1805_v46  ;;  %v1325_v39 = vadd.f32 %v3237_v17, %v1324_v62  ;;  %v1326_v51 = vpop.f32.mrb[85].mxu0  ;;  %v3418_v42 = vpop.f32.mrb[85].mxu1  ;;  %v1392_v62 = vadd.f32 %v3237_v17, %v3184_v20 }
 0x1c3   : > { %v1327_v54 = vpop.f32.mrb[86].mxu0  ;;  %v3420_v57 = vpop.f32.mrb[86].mxu1 }
 0x1c4   : > { %2166 = vst.msk [vmem:[%s3255_s8 + $0xa4] sm:$0xf] %vm2124_vm1, %v2538_v53  ;;  %v1646_v31 = vadd.f32 %v2653_v13, %v1325_v39  ;;  %v1328_v58 = vadd.f32 %v3237_v17, %v1327_v54  ;;  %v1329_v61 = vpop.f32.mrb[87].mxu0  ;;  %v3425_v6 = vpop.f32.mrb[87].mxu1  ;;  %v1384_v54 = vadd.f32 %v3237_v17, %v3176_v12 }
 0x1c6   : > { %v1806_v43 = vmax.f32 %v1646_v31, 0.0  ;;  %v1649_v21 = vadd.f32 %v2654_v15, %v1328_v58 }
 0x1c8   : > { %v2539_v23 = vpack.c.bf16 %v1806_v43, %v1806_v43  ;;  %v1807_v49 = vmax.f32 %v1649_v21, 0.0 }
 0x1c9   : > { %v1332_v22 = vpop.f32.mrb[88].mxu0  ;;  %v2665_v1 = vpop.f32.mrb[88].mxu1 }
 0x1ca   : > { %2167 = vst.msk [vmem:[%s3255_s8 + $0xa8] sm:$0xf] %vm2124_vm1, %v2539_v23  ;;  %v2540_v13 = vpack.c.bf16 %v1807_v49, %v1807_v49  ;;  %v1333_v25 = vadd.f32 %v3237_v17, %v1332_v22  ;;  %v1694_v26 = vadd.f32 %v2665_v1, %v1373_v14  ;;  %v1334_v5 = vpop.f32.mrb[89].mxu0  ;;  %v3434_v29 = vpop.f32.mrb[89].mxu1 }
 0x1cb   : > { %v1335_v15 = vpop.f32.mrb[90].mxu0  ;;  %v2666_v27 = vpop.f32.mrb[90].mxu1 }
 0x1cc   : > { %2168 = vst.msk [vmem:[%s3255_s8 + $0xac] sm:$0xf] %vm2124_vm1, %v2540_v13  ;;  %v1654_v0 = vadd.f32 %v1653_v9, %v1333_v25  ;;  %v1818_v38 = vmax.f32 %v1694_v26, 0.0  ;;  %v1336_v30 = vadd.f32 %v3237_v17, %v1335_v15  ;;  %v1697_v33 = vadd.f32 %v2666_v27, %v1376_v35  ;;  %v1337_v4 = vpop.f32.mrb[91].mxu0  ;;  %v3439_v37 = vpop.f32.mrb[91].mxu1 }
 0x1ce   : > { %v1808_v18 = vmax.f32 %v1654_v0, 0.0  ;;  %v2551_v7 = vpack.c.bf16 %v1818_v38, %v1818_v38  ;;  %v1657_v55 = vadd.f32 %v1656_v45, %v1336_v30  ;;  %v1819_v47 = vmax.f32 %v1697_v33, 0.0 }
 0x1cf   : > { %v1397_v0 = vadd.f32 %v3237_v17, %v3188_v24  ;;  %v1408_v33 = vadd.f32 %v3237_v17, %v3200_v36  ;;  %v1400_v24 = vadd.f32 %v3237_v17, %v3192_v28 }
 0x1d0   : > { %v2541_v63 = vpack.c.bf16 %v1808_v18, %v1808_v18  ;;  %2179 = vst.msk [vmem:[%s3255_s8 + $0xd8] sm:$0xf] %vm2124_vm1, %v2551_v7  ;;  %v1809_v9 = vmax.f32 %v1657_v55, 0.0  ;;  %v2552_v11 = vpack.c.bf16 %v1819_v47, %v1819_v47 }
 0x1d1   : > { %v1340_v3 = vpop.f32.mrb[92].mxu0  ;;  %v2669_v46 = vpop.f32.mrb[92].mxu1 }
 0x1d2   : > { %2169 = vst.msk [vmem:[%s3255_s8 + $0xb0] sm:$0xf] %vm2124_vm1, %v2541_v63  ;;  %v2542_v45 = vpack.c.bf16 %v1809_v9, %v1809_v9  ;;  %2180 = vst.msk [vmem:[%s3255_s8 + $0xdc] sm:$0xf] %vm2124_vm1, %v2552_v11  ;;  %v1341_v16 = vadd.f32 %v3237_v17, %v1340_v3  ;;  %v1710_v53 = vadd.f32 %v2669_v46, %v1389_v19  ;;  %v1342_v39 = vpop.f32.mrb[93].mxu0  ;;  %v1701_v51 = vpop.f32.mrb[93].mxu1 }
 0x1d3   : > { %v1702_v31 = vadd.f32 %v1701_v51, %v1381_v59  ;;  %v1343_v8 = vpop.f32.mrb[94].mxu0  ;;  %v2670_v58 = vpop.f32.mrb[94].mxu1 }
 0x1d4   : > { %2170 = vst.msk [vmem:[%s3255_s8 + $0xb4] sm:$0xf] %vm2124_vm1, %v2542_v45  ;;  %v1662_v20 = vadd.f32 %v3403_v34, %v1341_v16  ;;  %v1822_v61 = vmax.f32 %v1710_v53, 0.0  ;;  %v1344_v43 = vadd.f32 %v3237_v17, %v1343_v8  ;;  %v1713_v21 = vadd.f32 %v2670_v58, %v1392_v62  ;;  %v1345_v14 = vpop.f32.mrb[95].mxu0  ;;  %v1704_v23 = vpop.f32.mrb[95].mxu1 }
 0x1d5   : > { %v1820_v49 = vmax.f32 %v1702_v31, 0.0  ;;  %v1705_v22 = vadd.f32 %v1704_v23, %v1384_v54  ;;  %v1405_v34 = vadd.f32 %v3237_v17, %v3196_v32 }
 0x1d6   : > { %v1810_v1 = vmax.f32 %v1662_v20, 0.0  ;;  %v2555_v35 = vpack.c.bf16 %v1822_v61, %v1822_v61  ;;  %v1665_v12 = vadd.f32 %v3408_v41, %v1344_v43  ;;  %v1823_v13 = vmax.f32 %v1713_v21, 0.0 }
 0x1d7   : > { %v2553_v25 = vpack.c.bf16 %v1820_v49, %v1820_v49  ;;  %v1821_v26 = vmax.f32 %v1705_v22, 0.0  ;;  %v1413_v20 = vadd.f32 %v3237_v17, %v3204_v40  ;;  %v1424_v21 = vadd.f32 %v3237_v17, %v3216_v52 }
 0x1d8   : > { %v2543_v5 = vpack.c.bf16 %v1810_v1, %v1810_v1  ;;  %2183 = vst.msk [vmem:[%s3255_s8 + $0xe8] sm:$0xf] %vm2124_vm1, %v2555_v35  ;;  %v1811_v15 = vmax.f32 %v1665_v12, 0.0  ;;  %v2556_v27 = vpack.c.bf16 %v1823_v13, %v1823_v13  ;;  %v1416_v40 = vadd.f32 %v3237_v17, %v3208_v44 }
 0x1d9   : > { %2181 = vst.msk [vmem:[%s3255_s8 + $0xe0] sm:$0xf] %vm2124_vm1, %v2553_v25  ;;  %v2554_v38 = vpack.c.bf16 %v1821_v26, %v1821_v26  ;;  %v1348_v41 = vpop.f32.mrb[96].mxu0  ;;  %v2673_v30 = vpop.f32.mrb[96].mxu1 }
 0x1da   : > { %2171 = vst.msk [vmem:[%s3255_s8 + $0xb8] sm:$0xf] %vm2124_vm1, %v2543_v5  ;;  %v2544_v32 = vpack.c.bf16 %v1811_v15, %v1811_v15  ;;  %2184 = vst.msk [vmem:[%s3255_s8 + $0xec] sm:$0xf] %vm2124_vm1, %v2556_v27  ;;  %v1349_v4 = vadd.f32 %v3237_v17, %v1348_v41  ;;  %v1726_v18 = vadd.f32 %v2673_v30, %v1405_v34  ;;  %v1350_v7 = vpop.f32.mrb[97].mxu0  ;;  %v1717_v55 = vpop.f32.mrb[97].mxu1 }
 0x1db   : > { %2182 = vst.msk [vmem:[%s3255_s8 + $0xe4] sm:$0xf] %vm2124_vm1, %v2554_v38  ;;  %v1718_v47 = vadd.f32 %v1717_v55, %v1397_v0  ;;  %v1351_v19 = vpop.f32.mrb[98].mxu0  ;;  %v2674_v63 = vpop.f32.mrb[98].mxu1  ;;  %v1429_v7 = vadd.f32 %v3237_v17, %v3220_v56  ;;  %v1432_v56 = vadd.f32 %v3237_v17, %v3224_v60 }
 0x1dc   : > { %2172 = vst.msk [vmem:[%s3255_s8 + $0xbc] sm:$0xf] %vm2124_vm1, %v2544_v32  ;;  %v1670_v36 = vadd.f32 %v3418_v42, %v1349_v4  ;;  %v1826_v9 = vmax.f32 %v1726_v18, 0.0  ;;  %v1352_v11 = vadd.f32 %v3237_v17, %v1351_v19  ;;  %v1729_v59 = vadd.f32 %v2674_v63, %v1408_v33  ;;  %v1353_v3 = vpop.f32.mrb[99].mxu0  ;;  %v1720_v46 = vpop.f32.mrb[99].mxu1 }
 0x1dd   : > { %v1824_v62 = vmax.f32 %v1718_v47, 0.0  ;;  %v1721_v45 = vadd.f32 %v1720_v46, %v1400_v24  ;;  %v1421_v42 = vadd.f32 %v3237_v17, %v3212_v48  ;;  %v1440_v47 = vadd.f32 %v3237_v17, %v3232_v10 }
 0x1de   : > { %v1812_v28 = vmax.f32 %v1670_v36, 0.0  ;;  %v2559_v16 = vpack.c.bf16 %v1826_v9, %v1826_v9  ;;  %v1673_v53 = vadd.f32 %v3425_v6, %v1352_v11  ;;  %v1827_v39 = vmax.f32 %v1729_v59, 0.0 }
 0x1df   : > { %v2557_v51 = vpack.c.bf16 %v1824_v62, %v1824_v62  ;;  %v1825_v54 = vmax.f32 %v1721_v45, 0.0 }
 0x1e0   : > { %v2545_v31 = vpack.c.bf16 %v1812_v28, %v1812_v28  ;;  %2187 = vst.msk [vmem:[%s3255_s8 + $0xf8] sm:$0xf] %vm2124_vm1, %v2559_v16  ;;  %v1813_v8 = vmax.f32 %v1673_v53, 0.0  ;;  %v2560_v58 = vpack.c.bf16 %v1827_v39, %v1827_v39 }
 0x1e1   : > { %2185 = vst.msk [vmem:[%s3255_s8 + $0xf0] sm:$0xf] %vm2124_vm1, %v2557_v51  ;;  %v2558_v61 = vpack.c.bf16 %v1825_v54, %v1825_v54  ;;  %v1356_v6 = vpop.f32.mrb[100].mxu0  ;;  %v2677_v43 = vpop.f32.mrb[100].mxu1 }
 0x1e2   : > { %2173 = vst.msk [vmem:[%s3255_s8 + $0xc0] sm:$0xf] %vm2124_vm1, %v2545_v31  ;;  %v2546_v48 = vpack.c.bf16 %v1813_v8, %v1813_v8  ;;  %2188 = vst.msk [vmem:[%s3255_s8 + $0xfc] sm:$0xf] %vm2124_vm1, %v2560_v58  ;;  %v1357_v14 = vadd.f32 %v3237_v17, %v1356_v6  ;;  %v1742_v23 = vadd.f32 %v2677_v43, %v1421_v42  ;;  %v1358_v49 = vpop.f32.mrb[101].mxu0  ;;  %v1733_v22 = vpop.f32.mrb[101].mxu1 }
 0x1e3   : > { %2186 = vst.msk [vmem:[%s3255_s8 + $0xf4] sm:$0xf] %vm2124_vm1, %v2558_v61  ;;  %v1734_v1 = vadd.f32 %v1733_v22, %v1413_v20  ;;  %v1359_v35 = vpop.f32.mrb[102].mxu0  ;;  %v2678_v12 = vpop.f32.mrb[102].mxu1 }
 0x1e4   : > { %2174 = vst.msk [vmem:[%s3255_s8 + $0xc4] sm:$0xf] %vm2124_vm1, %v2546_v48  ;;  %v1678_v52 = vadd.f32 %v3413_v50, %v1357_v14  ;;  %v1830_v13 = vmax.f32 %v1742_v23, 0.0  ;;  %v1360_v25 = vadd.f32 %v3237_v17, %v1359_v35  ;;  %v1745_v26 = vadd.f32 %v2678_v12, %v1424_v21  ;;  %v1361_v34 = vpop.f32.mrb[103].mxu0  ;;  %v1736_v5 = vpop.f32.mrb[103].mxu1 }
 0x1e5   : > { %v1828_v15 = vmax.f32 %v1734_v1, 0.0  ;;  %v1737_v27 = vadd.f32 %v1736_v5, %v1416_v40  ;;  %v1437_v50 = vadd.f32 %v3237_v17, %v3228_v2 }
 0x1e6   : > { %v1814_v44 = vmax.f32 %v1678_v52, 0.0  ;;  %v2563_v0 = vpack.c.bf16 %v1830_v13, %v1830_v13  ;;  %v1681_v38 = vadd.f32 %v3420_v57, %v1360_v25  ;;  %v1831_v41 = vmax.f32 %v1745_v26, 0.0 }
 0x1e7   : > { %v2561_v30 = vpack.c.bf16 %v1828_v15, %v1828_v15  ;;  %v1829_v33 = vmax.f32 %v1737_v27, 0.0 }
 0x1e8   : > { %v2547_v32 = vpack.c.bf16 %v1814_v44, %v1814_v44  ;;  %2191 = vst.msk [vmem:[%s3255_s8 + $0x108] sm:$0xf] %vm2124_vm1, %v2563_v0  ;;  %v1815_v4 = vmax.f32 %v1681_v38, 0.0  ;;  %v2564_v18 = vpack.c.bf16 %v1831_v41, %v1831_v41 }
 0x1e9   : > { %2189 = vst.msk [vmem:[%s3255_s8 + $0x100] sm:$0xf] %vm2124_vm1, %v2561_v30  ;;  %v2562_v55 = vpack.c.bf16 %v1829_v33, %v1829_v33  ;;  %v1364_v57 = vpop.f32.mrb[104].mxu0  ;;  %v2681_v24 = vpop.f32.mrb[104].mxu1 }
 0x1ea   : > { %2175 = vst.msk [vmem:[%s3255_s8 + $0xc8] sm:$0xf] %vm2124_vm1, %v2547_v32  ;;  %v2548_v2 = vpack.c.bf16 %v1815_v4, %v1815_v4  ;;  %2192 = vst.msk [vmem:[%s3255_s8 + $0x10c] sm:$0xf] %vm2124_vm1, %v2564_v18  ;;  %v1365_v19 = vadd.f32 %v3237_v17, %v1364_v57  ;;  %v1758_v63 = vadd.f32 %v2681_v24, %v1437_v50  ;;  %v1366_v36 = vpop.f32.mrb[105].mxu0  ;;  %v1749_v9 = vpop.f32.mrb[105].mxu1 }
 0x1eb   : > { %2190 = vst.msk [vmem:[%s3255_s8 + $0x104] sm:$0xf] %vm2124_vm1, %v2562_v55  ;;  %v1750_v11 = vadd.f32 %v1749_v9, %v1429_v7  ;;  %v1367_v59 = vpop.f32.mrb[106].mxu0  ;;  %v2682_v3 = vpop.f32.mrb[106].mxu1 }
 0x1ec   : > { %2176 = vst.msk [vmem:[%s3255_s8 + $0xcc] sm:$0xf] %vm2124_vm1, %v2548_v2  ;;  %v1686_v10 = vadd.f32 %v3434_v29, %v1365_v19  ;;  %v1834_v46 = vmax.f32 %v1758_v63, 0.0  ;;  %v1368_v62 = vadd.f32 %v3237_v17, %v1367_v59  ;;  %v1761_v45 = vadd.f32 %v2682_v3, %v1440_v47  ;;  %v1369_v28 = vpop.f32.mrb[107].mxu0  ;;  %v1752_v16 = vpop.f32.mrb[107].mxu1 }
 0x1ed   : > { %v1832_v53 = vmax.f32 %v1750_v11, 0.0  ;;  %v1753_v60 = vadd.f32 %v1752_v16, %v1432_v56 }
 0x1ee   : > { %v1816_v39 = vmax.f32 %v1686_v10, 0.0  ;;  %v2567_v51 = vpack.c.bf16 %v1834_v46, %v1834_v46  ;;  %v1689_v54 = vadd.f32 %v3439_v37, %v1368_v62  ;;  %v1835_v42 = vmax.f32 %v1761_v45, 0.0 }
 0x1ef   : > { %v2565_v31 = vpack.c.bf16 %v1832_v53, %v1832_v53  ;;  %v1833_v29 = vmax.f32 %v1753_v60, 0.0 }
 0x1f0   : > { %v2549_v8 = vpack.c.bf16 %v1816_v39, %v1816_v39  ;;  %2195 = vst.msk [vmem:[%s3255_s8 + $0x118] sm:$0xf] %vm2124_vm1, %v2567_v51  ;;  %v1817_v17 = vmax.f32 %v1689_v54, 0.0  ;;  %v2568_v58 = vpack.c.bf16 %v1835_v42, %v1835_v42 }
 0x1f1   : > { %2193 = vst.msk [vmem:[%s3255_s8 + $0x110] sm:$0xf] %vm2124_vm1, %v2565_v31  ;;  %v2566_v20 = vpack.c.bf16 %v1833_v29, %v1833_v29 }
 0x1f2   : > { %2177 = vst.msk [vmem:[%s3255_s8 + $0xd0] sm:$0xf] %vm2124_vm1, %v2549_v8  ;;  %v2550_v61 = vpack.c.bf16 %v1817_v17, %v1817_v17  ;;  %2196 = vst.msk [vmem:[%s3255_s8 + $0x11c] sm:$0xf] %vm2124_vm1, %v2568_v58 }
 0x1f3   : > { %2194 = vst.msk [vmem:[%s3255_s8 + $0x114] sm:$0xf] %vm2124_vm1, %v2566_v20 }
 0x1f4   : > { %2178 = vst.msk [vmem:[%s3255_s8 + $0xd4] sm:$0xf] %vm2124_vm1, %v2550_v61 }
 0x1f5 PF: > { %s13_s12 = sadd.s32 1, %s2893_s12  }
 0x1f6   : > { %p10_p4 = scmp.ge.s32.totalorder %s13_s12, 4  }
 0x1f8   :  { %12 = sbr.rel (!%p10_p4) target bundleno = 1 (0x1), region = 62 }

// kernel: cnn_forward.5
= control target key start
LH: loop header
LB: loop body
LE: loop exit
PB: predicated region body
PF: predicated region fallthrough
CT: control target
= control target key end

     0   :  { %10 = vsyncpa [#allocation4], 0  ;;  %s17719_s18 = smov 0   ;;  %s17721_s19 = smov 0   ;;  %s19275_s0 = inlined_call_operand.vmem [shape: bf16[2,36864], index: 0, kind: input, shape index: {}]   ;;  %s19276_s1 = inlined_call_operand.vmem [shape: bf16[36864,128], index: 1, kind: input, shape index: {}]   ;;  %s19277_s2 = inlined_call_operand.vmem [shape: f32[1,128], index: 2, kind: input, shape index: {}]   ;;  %s19278_s3 = inlined_call_operand.vmem [shape: bf16[128,128], index: 3, kind: input, shape index: {}]   ;;  %s19279_s4 = inlined_call_operand.vmem [shape: f32[1,128], index: 4, kind: input, shape index: {}]   ;;  %s19280_s5 = inlined_call_operand.hbm [shape: f32[2,128], index: 5, kind: output, shape index: {}]  }
   0x1   :  { %s17723_s20 = smov 0  }
   0x2 LB: > { %s13631_s21 = sadd.s32 4294967295, %s17682_s20   ;;  %s25_s22 = sadd.s32 1, %s17678_s19  ;;  %s17682_s20 = sphi %s17723_s20, %s16_s20   ;;  %s17678_s19 = sphi %s17721_s19, %s19283_s19   ;;  %s17674_s18 = sphi %s17719_s18, %s19282_s18  }
   0x3   : > { %p26_p0 = scmp.ge.s32.totalorder %s25_s22, 2  ;;  %p13634_p1 = scmp.ge.s32.totalorder %s17682_s20, 1 }
   0x4   : > { %p217_p2 = scmp.lt.s32.totalorder %s17682_s20, 3 }
   0x5   : > { %s19285_s22 = smov (%p26_p0, %s25_s22), 0 }
   0x6   : > { %p218_p3 = pnand %p13634_p1, %p217_p2 }
   0x7   : > { %s248_s23 = smul.u32 (!%p218_p3), 144, %s17674_s18  ;;  %p13636_p6 = scmp.ne.s32.totalorder (!%p218_p3), %s17674_s18, 0 }
   0x8   : > { %221 = sbr.rel (%p218_p3) target bundleno = 1653 (0x675), region = 40 }
   0x9   : > { %s257_s24 = smul.u32 (!%p218_p3), 2304, %s17674_s18  ;;  %p251_p4 = scmp.lt.s32.totalorder (!%p218_p3), %s248_s23, 287 }
   0xb   : > { %p258_p5 = scmp.lt.s32.totalorder (!%p218_p3), %s257_s24, 4607 }
   0xf   : > { %s19287_s23 = smov (!%p251_p4, %s248_s23), 287  ;;  %s19289_s24 = smov (!%p258_p5, %s257_s24), 4607 }
  0x10   : > { %s17745_s27 = scalar_lea.vmem %s19275_s0, %s19287_s23  ;;  %s13635_s28 = sshll.u32 %s19289_s24, 2  ;;  %v17684_v0 = vmov (!%p13636_p6), 0.0  }
  0x11   : > { %s17750_s6 = scalar_lea.vmem %s19276_s1, %s13635_s28  ;;  %267 = sbr.rel (%p13636_p6) target bundleno = 24 (0x18), region = 44  ;;  %268 = vst [vmem:[#allocation2] sm:$0x3] (!%p13636_p6), %v17684_v0 }
  0x18 PF: > { %v16452_v1 = vld [vmem:[%s17750_s6 + $0x40] sm:$0xff]   ;;  %v16456_v5 = vld [vmem:[%s17750_s6 + $0x48] sm:$0xff]   ;;  %v16460_v9 = vld [vmem:[%s17750_s6 + $0x50] sm:$0xff]   ;;  %v2614_v29 = vlaneseq  ;;  %v17685_v37 = vmov 1966171168   ;;  %p14789_p7 = scmp.ne.s32.totalorder %s17674_s18, 1 }
  0x19   : > { %v16453_v2 = vld [vmem:[%s17750_s6 + $0xc0] sm:$0xff]   ;;  %14804 = vmatprep.subr.bf16.mxu0 %v16452_v1  ;;  %v16457_v6 = vld [vmem:[%s17750_s6 + $0xc8] sm:$0xff]   ;;  %v16461_v10 = vld [vmem:[%s17750_s6 + $0xd0] sm:$0xff]   ;;  %v2612_v38 = vunpack.c.l.s4 %v17685_v37  ;;  %vm17687_vm0 = vmmov (!%p14789_p7), 0  }
  0x1a   : > { %v16454_v3 = vld [vmem:[%s17750_s6] sm:$0xff]   ;;  %14826 = vmatprep.subr.bf16.mxu1 %v16453_v2  ;;  %v16458_v7 = vld [vmem:[%s17750_s6 + $0x8] sm:$0xff]   ;;  %v16462_v11 = vld [vmem:[%s17750_s6 + $0x10] sm:$0xff]   ;;  %v2615_v34 = vshrl.u32 %v2614_v29, 7 }
  0x1b   : > { %v16455_v4 = vld [vmem:[%s17750_s6 + $0x80] sm:$0xff]   ;;  %14805 = vmatpush3.bf16.msra.mxu0 %v16454_v3  ;;  %v16459_v8 = vld [vmem:[%s17750_s6 + $0x88] sm:$0xff]   ;;  %v16463_v12 = vld [vmem:[%s17750_s6 + $0x90] sm:$0xff]   ;;  %v2613_v41 = vunpack.c.0.s8 %v2612_v38 }
  0x1c   : > { %14827 = vmatpush3.bf16.msra.mxu1 %v16455_v4  ;;  %14806 = vmatprep.subr.bf16.mxu0 %v16456_v5  ;;  %v16464_v13 = vld [vmem:[%s17750_s6 + $0x58] sm:$0xff]   ;;  %v16468_v17 = vld [vmem:[%s17750_s6 + $0x60] sm:$0xff]   ;;  %v16472_v21 = vld [vmem:[%s17750_s6 + $0x68] sm:$0xff]  }
  0x1d   : > { %14828 = vmatprep.subr.bf16.mxu1 %v16457_v6  ;;  %v16465_v14 = vld [vmem:[%s17750_s6 + $0xd8] sm:$0xff]   ;;  %v16469_v18 = vld [vmem:[%s17750_s6 + $0xe0] sm:$0xff]   ;;  %v16473_v22 = vld [vmem:[%s17750_s6 + $0xe8] sm:$0xff]   ;;  %v17788_v42 = vsub.s32 %v2613_v41, %v2615_v34 }
  0x1e   : > { %v16466_v15 = vld [vmem:[%s17750_s6 + $0x18] sm:$0xff]   ;;  %v16470_v19 = vld [vmem:[%s17750_s6 + $0x20] sm:$0xff]   ;;  %v16474_v23 = vld [vmem:[%s17750_s6 + $0x28] sm:$0xff]  }
  0x1f   : > { %14807 = vmatpush3.bf16.msra.mxu0 %v16458_v7  ;;  %v16467_v16 = vld [vmem:[%s17750_s6 + $0x98] sm:$0xff]   ;;  %v16471_v20 = vld [vmem:[%s17750_s6 + $0xa0] sm:$0xff]   ;;  %v16475_v24 = vld [vmem:[%s17750_s6 + $0xa8] sm:$0xff]  }
  0x20   : > { %14829 = vmatpush3.bf16.msra.mxu1 %v16459_v8  ;;  %14808 = vmatprep.subr.bf16.mxu0 %v16460_v9  ;;  %v16476_v25 = vld [vmem:[%s17750_s6 + $0x70] sm:$0xff]   ;;  %v16480_v30 = vld [vmem:[%s17750_s6 + $0x78] sm:$0xff]   ;;  %v270_v35 = vld [vmem:[%s17745_s27] sm:$0xff] }
  0x21   : > { %14830 = vmatprep.subr.bf16.mxu1 %v16461_v10  ;;  %v16477_v26 = vld [vmem:[%s17750_s6 + $0xf0] sm:$0xff]   ;;  %v16481_v31 = vld [vmem:[%s17750_s6 + $0xf8] sm:$0xff]   ;;  %v16485_v36 = vld [vmem:[%s17750_s6 + $0x140] sm:$0xff]   ;;  %v2610_v40 = vcombine.high %v270_v35, %v270_v35  ;;  %v2617_v43 = vrot.slane %v270_v35, %v17788_v42 }
  0x22   : > { %v16478_v27 = vld [vmem:[%s17750_s6 + $0x30] sm:$0xff]   ;;  %v16482_v32 = vld [vmem:[%s17750_s6 + $0x38] sm:$0xff]   ;;  %v16486_v39 = vld [vmem:[%s17750_s6 + $0x1c0] sm:$0xff]  }
  0x23   : > { %14809 = vmatpush3.bf16.msra.mxu0 %v16462_v11  ;;  %v16479_v28 = vld [vmem:[%s17750_s6 + $0xb0] sm:$0xff]   ;;  %v16483_v33 = vld [vmem:[%s17750_s6 + $0xb8] sm:$0xff]   ;;  %v17792_v44 = vrot.slane %v2610_v40, %v17788_v42  ;;  %v2625_v45 = vcombine.high %v2617_v43, %v2617_v43  ;;  %v2633_v46 = vrot.slane %v2617_v43, %v17788_v42  ;;  %v16487_v48 = vld [vmem:[%s17750_s6 + $0x100] sm:$0xff]  }
  0x24   : > { %14831 = vmatpush3.bf16.msra.mxu1 %v16463_v12  ;;  %14810 = vmatprep.subr.bf16.mxu0 %v16464_v13  ;;  %v16488_v50 = vld [vmem:[%s17750_s6 + $0x180] sm:$0xff]   ;;  %v16489_v53 = vld [vmem:[%s17750_s6 + $0x148] sm:$0xff]   ;;  %v16493_v59 = vld [vmem:[%s17750_s6 + $0x150] sm:$0xff]  }
  0x25   : > { %14832 = vmatprep.subr.bf16.mxu1 %v16465_v14  ;;  %v2626_v47 = vcombine.high %v17792_v44, %v17792_v44  ;;  %v2647_v49 = vrot.slane %v2625_v45, %v17788_v42  ;;  %v2655_v52 = vcombine.high %v2633_v46, %v2633_v46  ;;  %v16490_v55 = vld [vmem:[%s17750_s6 + $0x1c8] sm:$0xff]   ;;  %v16494_v60 = vld [vmem:[%s17750_s6 + $0x1d0] sm:$0xff]   ;;  %v16497_v63 = vld [vmem:[%s17750_s6 + $0x158] sm:$0xff]  }
  0x26   : > { %v16491_v56 = vld [vmem:[%s17750_s6 + $0x108] sm:$0xff]   ;;  %v16495_v61 = vld [vmem:[%s17750_s6 + $0x110] sm:$0xff]   ;;  %v16498_v0 = vld [vmem:[%s17750_s6 + $0x1d8] sm:$0xff]  }
  0x27   : > { %14811 = vmatpush3.bf16.msra.mxu0 %v16466_v15  ;;  %v2654_v51 = vrot.slane %v2626_v47, %v17788_v42  ;;  %10580 = vmatprep.mubr.bf16.mxu0 %v2647_v49  ;;  %v2657_v54 = vcombine.high %v2647_v49, %v2647_v49  ;;  %v16492_v58 = vld [vmem:[%s17750_s6 + $0x188] sm:$0xff]   ;;  %v16496_v62 = vld [vmem:[%s17750_s6 + $0x190] sm:$0xff]   ;;  %v16499_v1 = vld [vmem:[%s17750_s6 + $0x118] sm:$0xff]  }
  0x28   : > { %14833 = vmatpush3.bf16.msra.mxu1 %v16467_v16  ;;  %14812 = vmatprep.subr.bf16.mxu0 %v16468_v17  ;;  %v16500_v2 = vld [vmem:[%s17750_s6 + $0x198] sm:$0xff]   ;;  %v16501_v3 = vld [vmem:[%s17750_s6 + $0x160] sm:$0xff]   ;;  %v16505_v7 = vld [vmem:[%s17750_s6 + $0x168] sm:$0xff]  }
  0x29   : > { %14834 = vmatprep.subr.bf16.mxu1 %v16469_v18  ;;  %v2658_v57 = vcombine.high %v2654_v51, %v2654_v51  ;;  %10620 = vmatprep.mubr.bf16.mxu1 %v2657_v54  ;;  %v16502_v4 = vld [vmem:[%s17750_s6 + $0x1e0] sm:$0xff]   ;;  %v16506_v8 = vld [vmem:[%s17750_s6 + $0x1e8] sm:$0xff]   ;;  %v16509_v11 = vld [vmem:[%s17750_s6 + $0x170] sm:$0xff]  }
  0x2a   : > { %v16503_v5 = vld [vmem:[%s17750_s6 + $0x120] sm:$0xff]   ;;  %v16507_v9 = vld [vmem:[%s17750_s6 + $0x128] sm:$0xff]   ;;  %v16510_v12 = vld [vmem:[%s17750_s6 + $0x1f0] sm:$0xff]  }
  0x2b   : > { %14813 = vmatpush3.bf16.msra.mxu0 %v16470_v19  ;;  %v16504_v6 = vld [vmem:[%s17750_s6 + $0x1a0] sm:$0xff]   ;;  %v16508_v10 = vld [vmem:[%s17750_s6 + $0x1a8] sm:$0xff]   ;;  %v16511_v13 = vld [vmem:[%s17750_s6 + $0x130] sm:$0xff]   ;;  %v2640_v19 = vrot.slane %v17792_v44, %v17788_v42 }
  0x2c   : > { %14835 = vmatpush3.bf16.msra.mxu1 %v16471_v20  ;;  %14814 = vmatprep.subr.bf16.mxu0 %v16472_v21  ;;  %v16512_v14 = vld [vmem:[%s17750_s6 + $0x1b0] sm:$0xff]   ;;  %v16513_v15 = vld [vmem:[%s17750_s6 + $0x178] sm:$0xff]   ;;  %v16517_v20 = vld [vmem:[%s17750_s6 + $0x240] sm:$0xff]  }
  0x2d   : > { %14836 = vmatprep.subr.bf16.mxu1 %v16473_v22  ;;  %v16514_v16 = vld [vmem:[%s17750_s6 + $0x1f8] sm:$0xff]   ;;  %v16518_v21 = vld [vmem:[%s17750_s6 + $0x2c0] sm:$0xff]   ;;  %v16525_v29 = vld [vmem:[%s17750_s6 + $0x250] sm:$0xff]  }
  0x2e   : > { %v16515_v17 = vld [vmem:[%s17750_s6 + $0x138] sm:$0xff]   ;;  %v16519_v22 = vld [vmem:[%s17750_s6 + $0x200] sm:$0xff]   ;;  %v16537_v41 = vld [vmem:[%s17750_s6 + $0x268] sm:$0xff]  }
  0x2f   : > { %14815 = vmatpush3.bf16.msra.mxu0 %v16474_v23  ;;  %v16516_v18 = vld [vmem:[%s17750_s6 + $0x1b8] sm:$0xff]   ;;  %v16520_v23 = vld [vmem:[%s17750_s6 + $0x280] sm:$0xff]   ;;  %v16538_v43 = vld [vmem:[%s17750_s6 + $0x2e8] sm:$0xff]  }
  0x30   : > { %14837 = vmatpush3.bf16.msra.mxu1 %v16475_v24  ;;  %14816 = vmatprep.subr.bf16.mxu0 %v16476_v25  ;;  %v2656_v24 = vcombine.high %v2640_v19, %v2640_v19  ;;  %v16521_v25 = vld [vmem:[%s17750_s6 + $0x248] sm:$0xff]   ;;  %v16530_v34 = vld [vmem:[%s17750_s6 + $0x2d8] sm:$0xff]   ;;  %v16533_v37 = vld [vmem:[%s17750_s6 + $0x260] sm:$0xff]  }
  0x31   : > { %14838 = vmatprep.subr.bf16.mxu1 %v16477_v26  ;;  %v16522_v26 = vld [vmem:[%s17750_s6 + $0x2c8] sm:$0xff]   ;;  %v16531_v35 = vld [vmem:[%s17750_s6 + $0x218] sm:$0xff]   ;;  %v16534_v38 = vld [vmem:[%s17750_s6 + $0x2e0] sm:$0xff]  }
  0x32   : > { %v16536_v40 = vld [vmem:[%s17750_s6 + $0x2a0] sm:$0xff]   ;;  %v16539_v44 = vld [vmem:[%s17750_s6 + $0x228] sm:$0xff]  }
  0x33   : > { %14817 = vmatpush3.bf16.msra.mxu0 %v16478_v27  ;;  %v16523_v27 = vld [vmem:[%s17750_s6 + $0x208] sm:$0xff]  }
  0x34   : > { %14839 = vmatpush3.bf16.msra.mxu1 %v16479_v28  ;;  %14818 = vmatprep.subr.bf16.mxu0 %v16480_v30  ;;  %v16524_v28 = vld [vmem:[%s17750_s6 + $0x288] sm:$0xff]   ;;  %v16526_v30 = vld [vmem:[%s17750_s6 + $0x2d0] sm:$0xff]  }
  0x35   : > { %14840 = vmatprep.subr.bf16.mxu1 %v16481_v31  ;;  %v16527_v31 = vld [vmem:[%s17750_s6 + $0x210] sm:$0xff]   ;;  %v16540_v45 = vld [vmem:[%s17750_s6 + $0x2a8] sm:$0xff]  }
  0x36   : > { %v271_v47 = vld [vmem:[%s17745_s27 + $0x8] sm:$0xff] }
  0x37   : > { %14819 = vmatpush3.bf16.msra.mxu0 %v16482_v32  ;;  %v16528_v32 = vld [vmem:[%s17750_s6 + $0x290] sm:$0xff]   ;;  %v2666_v49 = vrot.slane %v271_v47, %v17788_v42 }
  0x38   : > { %14841 = vmatpush3.bf16.msra.mxu1 %v16483_v33  ;;  %14848 = vmatprep.subr.bf16.mxu0 %v16485_v36  ;;  %v16529_v33 = vld [vmem:[%s17750_s6 + $0x258] sm:$0xff]  }
  0x39   : > { %14870 = vmatprep.subr.bf16.mxu1 %v16486_v39  ;;  %v16532_v36 = vld [vmem:[%s17750_s6 + $0x298] sm:$0xff]   ;;  %v16535_v39 = vld [vmem:[%s17750_s6 + $0x220] sm:$0xff]  }
  0x3a   : > { %10581 = vmatmul.mubr.bf16.vlgmr.msra.gmra.mrb[0].mxu0 %v2633_v46  ;;  %v16541_v46 = vld [vmem:[%s17750_s6 + $0x270] sm:$0xff]  }
  0x3b   : > { %14849 = vmatpush3.bf16.msra.mxu0 %v16487_v48  ;;  %10621 = vmatmul.mubr.bf16.vlgmr.msra.gmra.mrb[0].mxu1 %v2655_v52  ;;  %v16542_v48 = vld [vmem:[%s17750_s6 + $0x2f0] sm:$0xff]  }
  0x3c   : > { %14850 = vmatprep.subr.bf16.mxu0 %v16489_v53  ;;  %14871 = vmatpush3.bf16.msra.mxu1 %v16488_v50  ;;  %v2659_v50 = vcombine.high %v271_v47, %v271_v47  ;;  %v16544_v52 = vld [vmem:[%s17750_s6 + $0x2b0] sm:$0xff]   ;;  %v2674_v53 = vcombine.high %v2666_v49, %v2666_v49 }
  0x3d   : > { %10660 = vmatprep.mubr.bf16.mxu0 %v2654_v51  ;;  %14872 = vmatprep.subr.bf16.mxu1 %v16490_v55  ;;  %v16543_v51 = vld [vmem:[%s17750_s6 + $0x230] sm:$0xff]   ;;  %v16545_v55 = vld [vmem:[%s17750_s6 + $0x278] sm:$0xff]  }
  0x3e   : > { %10700 = vmatprep.mubr.bf16.mxu1 %v2658_v57  ;;  %v17862_v54 = vrot.slane %v2659_v50, %v17788_v42  ;;  %v2696_v57 = vrot.slane %v2674_v53, %v17788_v42  ;;  %v16592_v47 = vld [vmem:[%s17750_s6 + $0x410] sm:$0xff]   ;;  %v16595_v50 = vld [vmem:[%s17750_s6 + $0x4d8] sm:$0xff]   ;;  %v16598_v53 = vld [vmem:[%s17750_s6 + $0x460] sm:$0xff]  }
  0x3f   : > { %14851 = vmatpush3.bf16.msra.mxu0 %v16491_v56  ;;  %v16546_v56 = vld [vmem:[%s17750_s6 + $0x2f8] sm:$0xff]  }
  0x40   : > { %14852 = vmatprep.subr.bf16.mxu0 %v16493_v59  ;;  %14873 = vmatpush3.bf16.msra.mxu1 %v16492_v58  ;;  %v2675_v58 = vcombine.high %v17862_v54, %v17862_v54  ;;  %v16547_v59 = vld [vmem:[%s17750_s6 + $0x238] sm:$0xff]  }
  0x41   : > { %14874 = vmatprep.subr.bf16.mxu1 %v16494_v60  ;;  %v16548_v60 = vld [vmem:[%s17750_s6 + $0x2b8] sm:$0xff]  }
  0x43   : > { %14853 = vmatpush3.bf16.msra.mxu0 %v16495_v61  ;;  %v2706_v61 = vcombine.high %v2696_v57, %v2696_v57 }
  0x44   : > { %14854 = vmatprep.subr.bf16.mxu0 %v16497_v63  ;;  %14875 = vmatpush3.bf16.msra.mxu1 %v16496_v62  ;;  %v2682_v62 = vrot.slane %v2666_v49, %v17788_v42  ;;  %v16549_v63 = vld [vmem:[%s17750_s6 + $0x340] sm:$0xff]   ;;  %v16594_v49 = vld [vmem:[%s17750_s6 + $0x458] sm:$0xff]  }
  0x45   : > { %14876 = vmatprep.subr.bf16.mxu1 %v16498_v0  ;;  %v16550_v0 = vld [vmem:[%s17750_s6 + $0x3c0] sm:$0xff]  }
  0x47   : > { %14855 = vmatpush3.bf16.msra.mxu0 %v16499_v1  ;;  %v2703_v1 = vrot.slane %v2675_v58, %v17788_v42  ;;  %v16603_v58 = vld [vmem:[%s17750_s6 + $0x4e8] sm:$0xff]  }
  0x48   : > { %14856 = vmatprep.subr.bf16.mxu0 %v16501_v3  ;;  %14877 = vmatpush3.bf16.msra.mxu1 %v16500_v2  ;;  %v16551_v2 = vld [vmem:[%s17750_s6 + $0x300] sm:$0xff]  }
  0x49   : > { %14878 = vmatprep.subr.bf16.mxu1 %v16502_v4  ;;  %v16552_v3 = vld [vmem:[%s17750_s6 + $0x380] sm:$0xff]   ;;  %v2704_v4 = vcombine.high %v2682_v62, %v2682_v62 }
  0x4b   : > { %14857 = vmatpush3.bf16.msra.mxu0 %v16503_v5  ;;  %v16553_v5 = vld [vmem:[%s17750_s6 + $0x348] sm:$0xff]  }
  0x4c   : > { %14858 = vmatprep.subr.bf16.mxu0 %v16505_v7  ;;  %14879 = vmatpush3.bf16.msra.mxu1 %v16504_v6  ;;  %v16554_v6 = vld [vmem:[%s17750_s6 + $0x3c8] sm:$0xff]   ;;  %v2707_v7 = vcombine.high %v2703_v1, %v2703_v1 }
  0x4d   : > { %14880 = vmatprep.subr.bf16.mxu1 %v16506_v8  ;;  %v16555_v8 = vld [vmem:[%s17750_s6 + $0x308] sm:$0xff]  }
  0x4f   : > { %14859 = vmatpush3.bf16.msra.mxu0 %v16507_v9  ;;  %v16556_v9 = vld [vmem:[%s17750_s6 + $0x388] sm:$0xff]  }
  0x50   : > { %14860 = vmatprep.subr.bf16.mxu0 %v16509_v11  ;;  %14881 = vmatpush3.bf16.msra.mxu1 %v16508_v10  ;;  %v16557_v10 = vld [vmem:[%s17750_s6 + $0x350] sm:$0xff]  }
  0x51   : > { %14882 = vmatprep.subr.bf16.mxu1 %v16510_v12  ;;  %v16558_v11 = vld [vmem:[%s17750_s6 + $0x3d0] sm:$0xff]  }
  0x52   : > { %v16559_v12 = vld [vmem:[%s17750_s6 + $0x310] sm:$0xff]  }
  0x53   : > { %14861 = vmatpush3.bf16.msra.mxu0 %v16511_v13  ;;  %v16560_v13 = vld [vmem:[%s17750_s6 + $0x390] sm:$0xff]  }
  0x54   : > { %14862 = vmatprep.subr.bf16.mxu0 %v16513_v15  ;;  %14883 = vmatpush3.bf16.msra.mxu1 %v16512_v14  ;;  %v16561_v14 = vld [vmem:[%s17750_s6 + $0x358] sm:$0xff]  }
  0x55   : > { %14884 = vmatprep.subr.bf16.mxu1 %v16514_v16  ;;  %v16562_v15 = vld [vmem:[%s17750_s6 + $0x3d8] sm:$0xff]  }
  0x56   : > { %v16563_v16 = vld [vmem:[%s17750_s6 + $0x318] sm:$0xff]  }
  0x57   : > { %14863 = vmatpush3.bf16.msra.mxu0 %v16515_v17  ;;  %v16564_v17 = vld [vmem:[%s17750_s6 + $0x398] sm:$0xff]  }
  0x58   : > { %14892 = vmatprep.subr.bf16.mxu0 %v16517_v20  ;;  %14885 = vmatpush3.bf16.msra.mxu1 %v16516_v18  ;;  %v16565_v18 = vld [vmem:[%s17750_s6 + $0x360] sm:$0xff]  }
  0x59   : > { %14914 = vmatprep.subr.bf16.mxu1 %v16518_v21  ;;  %v16567_v20 = vld [vmem:[%s17750_s6 + $0x320] sm:$0xff]  }
  0x5a   : > { %10661 = vmatmul.mubr.bf16.vlgmr.msra.gmra.mrb[4].mxu0 %v2640_v19  ;;  %v16566_v19 = vld [vmem:[%s17750_s6 + $0x3e0] sm:$0xff]  }
  0x5b   : > { %14893 = vmatpush3.bf16.msra.mxu0 %v16519_v22  ;;  %10701 = vmatmul.mubr.bf16.vlgmr.msra.gmra.mrb[4].mxu1 %v2656_v24  ;;  %v16568_v21 = vld [vmem:[%s17750_s6 + $0x3a0] sm:$0xff]   ;;  %v16569_v22 = vld [vmem:[%s17750_s6 + $0x368] sm:$0xff]  }
  0x5c   : > { %14894 = vmatprep.subr.bf16.mxu0 %v16521_v25  ;;  %14915 = vmatpush3.bf16.msra.mxu1 %v16520_v23  ;;  %v16570_v23 = vld [vmem:[%s17750_s6 + $0x3e8] sm:$0xff]  }
  0x5d   : > { %14916 = vmatprep.subr.bf16.mxu1 %v16522_v26  ;;  %10740 = vmatprep.mubr.bf16.mxu0 %v2696_v57  ;;  %v16571_v24 = vld [vmem:[%s17750_s6 + $0x328] sm:$0xff]   ;;  %v16573_v26 = vld [vmem:[%s17750_s6 + $0x370] sm:$0xff]  }
  0x5e   : > { %10780 = vmatprep.mubr.bf16.mxu1 %v2706_v61  ;;  %v16572_v25 = vld [vmem:[%s17750_s6 + $0x3a8] sm:$0xff]   ;;  %v16606_v61 = vld [vmem:[%s17750_s6 + $0x470] sm:$0xff]  }
  0x5f   : > { %14895 = vmatpush3.bf16.msra.mxu0 %v16523_v27  ;;  %v16574_v27 = vld [vmem:[%s17750_s6 + $0x3f0] sm:$0xff]   ;;  %v16602_v57 = vld [vmem:[%s17750_s6 + $0x468] sm:$0xff]  }
  0x60   : > { %14896 = vmatprep.subr.bf16.mxu0 %v16525_v29  ;;  %14917 = vmatpush3.bf16.msra.mxu1 %v16524_v28  ;;  %v16575_v28 = vld [vmem:[%s17750_s6 + $0x330] sm:$0xff]  }
  0x61   : > { %14918 = vmatprep.subr.bf16.mxu1 %v16526_v30  ;;  %v16576_v29 = vld [vmem:[%s17750_s6 + $0x3b0] sm:$0xff]   ;;  %v16577_v30 = vld [vmem:[%s17750_s6 + $0x378] sm:$0xff]  }
  0x63   : > { %14897 = vmatpush3.bf16.msra.mxu0 %v16527_v31  ;;  %v16578_v31 = vld [vmem:[%s17750_s6 + $0x3f8] sm:$0xff]  }
  0x64   : > { %14898 = vmatprep.subr.bf16.mxu0 %v16529_v33  ;;  %14919 = vmatpush3.bf16.msra.mxu1 %v16528_v32  ;;  %v16579_v32 = vld [vmem:[%s17750_s6 + $0x338] sm:$0xff]  }
  0x65   : > { %14920 = vmatprep.subr.bf16.mxu1 %v16530_v34  ;;  %v16580_v33 = vld [vmem:[%s17750_s6 + $0x3b8] sm:$0xff]   ;;  %v2689_v34 = vrot.slane %v17862_v54, %v17788_v42  ;;  %v16599_v54 = vld [vmem:[%s17750_s6 + $0x4e0] sm:$0xff]  }
  0x67   : > { %14899 = vmatpush3.bf16.msra.mxu0 %v16531_v35  ;;  %v16582_v35 = vld [vmem:[%s17750_s6 + $0x440] sm:$0xff]  }
  0x68   : > { %14900 = vmatprep.subr.bf16.mxu0 %v16533_v37  ;;  %14921 = vmatpush3.bf16.msra.mxu1 %v16532_v36  ;;  %v16583_v36 = vld [vmem:[%s17750_s6 + $0x4c0] sm:$0xff]  }
  0x69   : > { %14922 = vmatprep.subr.bf16.mxu1 %v16534_v38  ;;  %v16584_v37 = vld [vmem:[%s17750_s6 + $0x400] sm:$0xff]  }
  0x6a   : > { %v16585_v38 = vld [vmem:[%s17750_s6 + $0x480] sm:$0xff]  }
  0x6b   : > { %14901 = vmatpush3.bf16.msra.mxu0 %v16535_v39  ;;  %v2705_v39 = vcombine.high %v2689_v34, %v2689_v34 }
  0x6c   : > { %14902 = vmatprep.subr.bf16.mxu0 %v16537_v41  ;;  %14923 = vmatpush3.bf16.msra.mxu1 %v16536_v40  ;;  %v16586_v40 = vld [vmem:[%s17750_s6 + $0x448] sm:$0xff]  }
  0x6d   : > { %14924 = vmatprep.subr.bf16.mxu1 %v16538_v43  ;;  %v16587_v41 = vld [vmem:[%s17750_s6 + $0x4c8] sm:$0xff]  }
  0x6e   : > { %v16588_v43 = vld [vmem:[%s17750_s6 + $0x408] sm:$0xff]  }
  0x6f   : > { %14903 = vmatpush3.bf16.msra.mxu0 %v16539_v44  ;;  %v16589_v44 = vld [vmem:[%s17750_s6 + $0x488] sm:$0xff]  }
  0x70   : > { %14904 = vmatprep.subr.bf16.mxu0 %v16541_v46  ;;  %14925 = vmatpush3.bf16.msra.mxu1 %v16540_v45  ;;  %v16590_v45 = vld [vmem:[%s17750_s6 + $0x450] sm:$0xff]  }
  0x71   : > { %14926 = vmatprep.subr.bf16.mxu1 %v16542_v48  ;;  %v16591_v46 = vld [vmem:[%s17750_s6 + $0x4d0] sm:$0xff]  }
  0x72   : > { %v16593_v48 = vld [vmem:[%s17750_s6 + $0x490] sm:$0xff]  }
  0x73   : > { %14905 = vmatpush3.bf16.msra.mxu0 %v16543_v51  ;;  %v16596_v51 = vld [vmem:[%s17750_s6 + $0x418] sm:$0xff]  }
  0x74   : > { %14906 = vmatprep.subr.bf16.mxu0 %v16545_v55  ;;  %14927 = vmatpush3.bf16.msra.mxu1 %v16544_v52  ;;  %v16597_v52 = vld [vmem:[%s17750_s6 + $0x498] sm:$0xff]   ;;  %v16600_v55 = vld [vmem:[%s17750_s6 + $0x420] sm:$0xff]  }
  0x75   : > { %14928 = vmatprep.subr.bf16.mxu1 %v16546_v56  ;;  %v16601_v56 = vld [vmem:[%s17750_s6 + $0x4a0] sm:$0xff]  }
  0x77   : > { %14907 = vmatpush3.bf16.msra.mxu0 %v16547_v59  ;;  %v16604_v59 = vld [vmem:[%s17750_s6 + $0x428] sm:$0xff]  }
  0x78   : > { %14936 = vmatprep.subr.bf16.mxu0 %v16549_v63  ;;  %14929 = vmatpush3.bf16.msra.mxu1 %v16548_v60  ;;  %v16605_v60 = vld [vmem:[%s17750_s6 + $0x4a8] sm:$0xff]   ;;  %v16607_v63 = vld [vmem:[%s17750_s6 + $0x4f0] sm:$0xff]  }
  0x79   : > { %14958 = vmatprep.subr.bf16.mxu1 %v16550_v0 }
  0x7a   : > { %10741 = vmatmul.mubr.bf16.vlgmr.msra.gmra.mrb[8].mxu0 %v2682_v62  ;;  %v272_v62 = vld [vmem:[%s17745_s27 + $0x10] sm:$0xff] }
  0x7b   : > { %14937 = vmatpush3.bf16.msra.mxu0 %v16551_v2  ;;  %10820 = vmatprep.mubr.bf16.mxu0 %v2703_v1  ;;  %v2715_v0 = vrot.slane %v272_v62, %v17788_v42  ;;  %v2708_v1 = vcombine.high %v272_v62, %v272_v62  ;;  %v16608_v2 = vld [vmem:[%s17750_s6 + $0x430] sm:$0xff]  }
  0x7c   : > { %10781 = vmatmul.mubr.bf16.vlgmr.msra.gmra.mrb[8].mxu1 %v2704_v4  ;;  %14938 = vmatprep.subr.bf16.mxu0 %v16553_v5  ;;  %v16657_v62 = vld [vmem:[%s17750_s6 + $0x610] sm:$0xff]  }
  0x7d   : > { %14959 = vmatpush3.bf16.msra.mxu1 %v16552_v3  ;;  %10860 = vmatprep.mubr.bf16.mxu1 %v2707_v7  ;;  %v16609_v3 = vld [vmem:[%s17750_s6 + $0x4b0] sm:$0xff]   ;;  %v2723_v4 = vcombine.high %v2715_v0, %v2715_v0  ;;  %v17938_v5 = vrot.slane %v2708_v1, %v17788_v42  ;;  %v16611_v7 = vld [vmem:[%s17750_s6 + $0x4f8] sm:$0xff]  }
  0x7e   : > { %14960 = vmatprep.subr.bf16.mxu1 %v16554_v6  ;;  %v16610_v6 = vld [vmem:[%s17750_s6 + $0x478] sm:$0xff]  }
  0x7f   : > { %14939 = vmatpush3.bf16.msra.mxu0 %v16555_v8  ;;  %v2745_v8 = vrot.slane %v2723_v4, %v17788_v42  ;;  %v16660_v1 = vld [vmem:[%s17750_s6 + $0x6d8] sm:$0xff]   ;;  %v16663_v4 = vld [vmem:[%s17750_s6 + $0x660] sm:$0xff]  }
  0x80   : > { %14940 = vmatprep.subr.bf16.mxu0 %v16557_v10  ;;  %v16612_v10 = vld [vmem:[%s17750_s6 + $0x438] sm:$0xff]  }
  0x81   : > { %14961 = vmatpush3.bf16.msra.mxu1 %v16556_v9  ;;  %v2724_v9 = vcombine.high %v17938_v5, %v17938_v5 }
  0x82   : > { %14962 = vmatprep.subr.bf16.mxu1 %v16558_v11  ;;  %v16613_v11 = vld [vmem:[%s17750_s6 + $0x4b8] sm:$0xff]  }
  0x83   : > { %14941 = vmatpush3.bf16.msra.mxu0 %v16559_v12  ;;  %v2755_v12 = vcombine.high %v2745_v8, %v2745_v8 }
  0x84   : > { %14942 = vmatprep.subr.bf16.mxu0 %v16561_v14  ;;  %v16614_v14 = vld [vmem:[%s17750_s6 + $0x540] sm:$0xff]  }
  0x85   : > { %14963 = vmatpush3.bf16.msra.mxu1 %v16560_v13  ;;  %v2731_v13 = vrot.slane %v2715_v0, %v17788_v42  ;;  %v16659_v0 = vld [vmem:[%s17750_s6 + $0x658] sm:$0xff]  }
  0x86   : > { %14964 = vmatprep.subr.bf16.mxu1 %v16562_v15  ;;  %v16615_v15 = vld [vmem:[%s17750_s6 + $0x5c0] sm:$0xff]  }
  0x87   : > { %14943 = vmatpush3.bf16.msra.mxu0 %v16563_v16  ;;  %v2752_v16 = vrot.slane %v2724_v9, %v17788_v42  ;;  %v16668_v9 = vld [vmem:[%s17750_s6 + $0x6e8] sm:$0xff]  }
  0x88   : > { %14944 = vmatprep.subr.bf16.mxu0 %v16565_v18  ;;  %v16617_v18 = vld [vmem:[%s17750_s6 + $0x580] sm:$0xff]  }
  0x89   : > { %14965 = vmatpush3.bf16.msra.mxu1 %v16564_v17  ;;  %v16616_v17 = vld [vmem:[%s17750_s6 + $0x500] sm:$0xff]  }
  0x8a   : > { %14966 = vmatprep.subr.bf16.mxu1 %v16566_v19  ;;  %v2753_v19 = vcombine.high %v2731_v13, %v2731_v13 }
  0x8b   : > { %14945 = vmatpush3.bf16.msra.mxu0 %v16567_v20  ;;  %v16618_v20 = vld [vmem:[%s17750_s6 + $0x548] sm:$0xff]  }
  0x8c   : > { %14946 = vmatprep.subr.bf16.mxu0 %v16569_v22  ;;  %v2756_v22 = vcombine.high %v2752_v16, %v2752_v16 }
  0x8d   : > { %14967 = vmatpush3.bf16.msra.mxu1 %v16568_v21  ;;  %v16619_v21 = vld [vmem:[%s17750_s6 + $0x5c8] sm:$0xff]  }
  0x8e   : > { %14968 = vmatprep.subr.bf16.mxu1 %v16570_v23  ;;  %v16620_v23 = vld [vmem:[%s17750_s6 + $0x508] sm:$0xff]  }
  0x8f   : > { %14947 = vmatpush3.bf16.msra.mxu0 %v16571_v24  ;;  %v16621_v24 = vld [vmem:[%s17750_s6 + $0x588] sm:$0xff]  }
  0x90   : > { %14948 = vmatprep.subr.bf16.mxu0 %v16573_v26  ;;  %v16623_v26 = vld [vmem:[%s17750_s6 + $0x5d0] sm:$0xff]  }
  0x91   : > { %14969 = vmatpush3.bf16.msra.mxu1 %v16572_v25  ;;  %v16622_v25 = vld [vmem:[%s17750_s6 + $0x550] sm:$0xff]  }
  0x92   : > { %14970 = vmatprep.subr.bf16.mxu1 %v16574_v27  ;;  %v16624_v27 = vld [vmem:[%s17750_s6 + $0x510] sm:$0xff]  }
  0x93   : > { %14949 = vmatpush3.bf16.msra.mxu0 %v16575_v28  ;;  %v16625_v28 = vld [vmem:[%s17750_s6 + $0x590] sm:$0xff]  }
  0x94   : > { %14950 = vmatprep.subr.bf16.mxu0 %v16577_v30  ;;  %v16627_v30 = vld [vmem:[%s17750_s6 + $0x5d8] sm:$0xff]  }
  0x95   : > { %14971 = vmatpush3.bf16.msra.mxu1 %v16576_v29  ;;  %v16626_v29 = vld [vmem:[%s17750_s6 + $0x558] sm:$0xff]  }
  0x96   : > { %14972 = vmatprep.subr.bf16.mxu1 %v16578_v31  ;;  %v16628_v31 = vld [vmem:[%s17750_s6 + $0x518] sm:$0xff]  }
  0x97   : > { %14951 = vmatpush3.bf16.msra.mxu0 %v16579_v32  ;;  %v16629_v32 = vld [vmem:[%s17750_s6 + $0x598] sm:$0xff]  }
  0x98   : > { %14980 = vmatprep.subr.bf16.mxu0 %v16582_v35  ;;  %v16632_v35 = vld [vmem:[%s17750_s6 + $0x520] sm:$0xff]  }
  0x99   : > { %14973 = vmatpush3.bf16.msra.mxu1 %v16580_v33  ;;  %v16630_v33 = vld [vmem:[%s17750_s6 + $0x560] sm:$0xff]  }
  0x9a   : > { %10821 = vmatmul.mubr.bf16.vlgmr.msra.gmra.mrb[12].mxu0 %v2689_v34  ;;  %15002 = vmatprep.subr.bf16.mxu1 %v16583_v36  ;;  %v16631_v34 = vld [vmem:[%s17750_s6 + $0x5e0] sm:$0xff]  }
  0x9b   : > { %14981 = vmatpush3.bf16.msra.mxu0 %v16584_v37  ;;  %10900 = vmatprep.mubr.bf16.mxu0 %v2745_v8  ;;  %v16633_v36 = vld [vmem:[%s17750_s6 + $0x5a0] sm:$0xff]   ;;  %v16634_v37 = vld [vmem:[%s17750_s6 + $0x568] sm:$0xff]  }
  0x9c   : > { %10861 = vmatmul.mubr.bf16.vlgmr.msra.gmra.mrb[12].mxu1 %v2705_v39  ;;  %14982 = vmatprep.subr.bf16.mxu0 %v16586_v40  ;;  %v16636_v39 = vld [vmem:[%s17750_s6 + $0x528] sm:$0xff]  }
  0x9d   : > { %15003 = vmatpush3.bf16.msra.mxu1 %v16585_v38  ;;  %10940 = vmatprep.mubr.bf16.mxu1 %v2755_v12  ;;  %v16635_v38 = vld [vmem:[%s17750_s6 + $0x5e8] sm:$0xff]   ;;  %v16671_v12 = vld [vmem:[%s17750_s6 + $0x670] sm:$0xff]  }
  0x9e   : > { %15004 = vmatprep.subr.bf16.mxu1 %v16587_v41  ;;  %v16637_v40 = vld [vmem:[%s17750_s6 + $0x5a8] sm:$0xff]   ;;  %v16638_v41 = vld [vmem:[%s17750_s6 + $0x570] sm:$0xff]  }
  0x9f   : > { %14983 = vmatpush3.bf16.msra.mxu0 %v16588_v43  ;;  %v16639_v43 = vld [vmem:[%s17750_s6 + $0x5f0] sm:$0xff]   ;;  %v16667_v8 = vld [vmem:[%s17750_s6 + $0x668] sm:$0xff]  }
  0xa0   : > { %14984 = vmatprep.subr.bf16.mxu0 %v16590_v45  ;;  %v16641_v45 = vld [vmem:[%s17750_s6 + $0x5b0] sm:$0xff]  }
  0xa1   : > { %15005 = vmatpush3.bf16.msra.mxu1 %v16589_v44  ;;  %v16640_v44 = vld [vmem:[%s17750_s6 + $0x530] sm:$0xff]  }
  0xa2   : > { %15006 = vmatprep.subr.bf16.mxu1 %v16591_v46  ;;  %v16642_v46 = vld [vmem:[%s17750_s6 + $0x578] sm:$0xff]  }
  0xa3   : > { %14985 = vmatpush3.bf16.msra.mxu0 %v16592_v47  ;;  %v16643_v47 = vld [vmem:[%s17750_s6 + $0x5f8] sm:$0xff]  }
  0xa4   : > { %14986 = vmatprep.subr.bf16.mxu0 %v16594_v49  ;;  %v16645_v49 = vld [vmem:[%s17750_s6 + $0x5b8] sm:$0xff]  }
  0xa5   : > { %15007 = vmatpush3.bf16.msra.mxu1 %v16593_v48  ;;  %v16644_v48 = vld [vmem:[%s17750_s6 + $0x538] sm:$0xff]  }
  0xa6   : > { %15008 = vmatprep.subr.bf16.mxu1 %v16595_v50  ;;  %v2738_v50 = vrot.slane %v17938_v5, %v17788_v42  ;;  %v16664_v5 = vld [vmem:[%s17750_s6 + $0x6e0] sm:$0xff]  }
  0xa7   : > { %14987 = vmatpush3.bf16.msra.mxu0 %v16596_v51  ;;  %v16647_v51 = vld [vmem:[%s17750_s6 + $0x640] sm:$0xff]  }
  0xa8   : > { %14988 = vmatprep.subr.bf16.mxu0 %v16598_v53  ;;  %v16649_v53 = vld [vmem:[%s17750_s6 + $0x600] sm:$0xff]  }
  0xa9   : > { %15009 = vmatpush3.bf16.msra.mxu1 %v16597_v52  ;;  %v16648_v52 = vld [vmem:[%s17750_s6 + $0x6c0] sm:$0xff]  }
  0xaa   : > { %15010 = vmatprep.subr.bf16.mxu1 %v16599_v54  ;;  %v16650_v54 = vld [vmem:[%s17750_s6 + $0x680] sm:$0xff]  }
  0xab   : > { %14989 = vmatpush3.bf16.msra.mxu0 %v16600_v55  ;;  %v2754_v55 = vcombine.high %v2738_v50, %v2738_v50 }
  0xac   : > { %14990 = vmatprep.subr.bf16.mxu0 %v16602_v57  ;;  %v16652_v57 = vld [vmem:[%s17750_s6 + $0x6c8] sm:$0xff]  }
  0xad   : > { %15011 = vmatpush3.bf16.msra.mxu1 %v16601_v56  ;;  %v16651_v56 = vld [vmem:[%s17750_s6 + $0x648] sm:$0xff]  }
  0xae   : > { %15012 = vmatprep.subr.bf16.mxu1 %v16603_v58  ;;  %v16653_v58 = vld [vmem:[%s17750_s6 + $0x608] sm:$0xff]  }
  0xaf   : > { %14991 = vmatpush3.bf16.msra.mxu0 %v16604_v59  ;;  %v16654_v59 = vld [vmem:[%s17750_s6 + $0x688] sm:$0xff]  }
  0xb0   : > { %14992 = vmatprep.subr.bf16.mxu0 %v16606_v61  ;;  %v16656_v61 = vld [vmem:[%s17750_s6 + $0x6d0] sm:$0xff]  }
  0xb1   : > { %15013 = vmatpush3.bf16.msra.mxu1 %v16605_v60  ;;  %v16655_v60 = vld [vmem:[%s17750_s6 + $0x650] sm:$0xff]  }
  0xb2   : > { %15014 = vmatprep.subr.bf16.mxu1 %v16607_v63  ;;  %v16658_v63 = vld [vmem:[%s17750_s6 + $0x690] sm:$0xff]  }
  0xb3   : > { %14993 = vmatpush3.bf16.msra.mxu0 %v16608_v2  ;;  %v16661_v2 = vld [vmem:[%s17750_s6 + $0x618] sm:$0xff]  }
  0xb4   : > { %14994 = vmatprep.subr.bf16.mxu0 %v16610_v6  ;;  %v16665_v6 = vld [vmem:[%s17750_s6 + $0x620] sm:$0xff]  }
  0xb5   : > { %15015 = vmatpush3.bf16.msra.mxu1 %v16609_v3  ;;  %v16662_v3 = vld [vmem:[%s17750_s6 + $0x698] sm:$0xff]  }
  0xb6   : > { %15016 = vmatprep.subr.bf16.mxu1 %v16611_v7  ;;  %v16666_v7 = vld [vmem:[%s17750_s6 + $0x6a0] sm:$0xff]  }
  0xb7   : > { %14995 = vmatpush3.bf16.msra.mxu0 %v16612_v10  ;;  %v16669_v10 = vld [vmem:[%s17750_s6 + $0x628] sm:$0xff]  }
  0xb8   : > { %15024 = vmatprep.subr.bf16.mxu0 %v16614_v14  ;;  %v273_v14 = vld [vmem:[%s17745_s27 + $0x18] sm:$0xff] }
  0xb9   : > { %15017 = vmatpush3.bf16.msra.mxu1 %v16613_v11  ;;  %v16670_v11 = vld [vmem:[%s17750_s6 + $0x6a8] sm:$0xff]  }
  0xba   : > { %10901 = vmatmul.mubr.bf16.vlgmr.msra.gmra.mrb[16].mxu0 %v2731_v13  ;;  %15046 = vmatprep.subr.bf16.mxu1 %v16615_v15  ;;  %v16672_v13 = vld [vmem:[%s17750_s6 + $0x6f0] sm:$0xff]  }
  0xbb   : > { %15025 = vmatpush3.bf16.msra.mxu0 %v16616_v17  ;;  %10980 = vmatprep.mubr.bf16.mxu0 %v2752_v16  ;;  %v16673_v15 = vld [vmem:[%s17750_s6 + $0x630] sm:$0xff]   ;;  %v2764_v16 = vrot.slane %v273_v14, %v17788_v42  ;;  %v2757_v17 = vcombine.high %v273_v14, %v273_v14  ;;  %v16713_v14 = vld [vmem:[%s17750_s6 + $0x8c0] sm:$0xff]  }
  0xbc   : > { %10941 = vmatmul.mubr.bf16.vlgmr.msra.gmra.mrb[16].mxu1 %v2753_v19  ;;  %15026 = vmatprep.subr.bf16.mxu0 %v16618_v20  ;;  %v16675_v19 = vld [vmem:[%s17750_s6 + $0x678] sm:$0xff]  }
  0xbd   : > { %15047 = vmatpush3.bf16.msra.mxu1 %v16617_v18  ;;  %11020 = vmatprep.mubr.bf16.mxu1 %v2756_v22  ;;  %v16674_v18 = vld [vmem:[%s17750_s6 + $0x6b0] sm:$0xff]   ;;  %v2772_v20 = vcombine.high %v2764_v16, %v2764_v16  ;;  %v16676_v22 = vld [vmem:[%s17750_s6 + $0x6f8] sm:$0xff]  }
  0xbe   : > { %15048 = vmatprep.subr.bf16.mxu1 %v16619_v21  ;;  %v18015_v21 = vrot.slane %v2757_v17, %v17788_v42 }
  0xbf   : > { %15027 = vmatpush3.bf16.msra.mxu0 %v16620_v23  ;;  %v16677_v23 = vld [vmem:[%s17750_s6 + $0x638] sm:$0xff]  }
  0xc0   : > { %15028 = vmatprep.subr.bf16.mxu0 %v16622_v25  ;;  %v2773_v25 = vcombine.high %v18015_v21, %v18015_v21 }
  0xc1   : > { %15049 = vmatpush3.bf16.msra.mxu1 %v16621_v24  ;;  %v2794_v24 = vrot.slane %v2772_v20, %v17788_v42  ;;  %v16718_v20 = vld [vmem:[%s17750_s6 + $0x808] sm:$0xff]  }
  0xc2   : > { %15050 = vmatprep.subr.bf16.mxu1 %v16623_v26  ;;  %v16678_v26 = vld [vmem:[%s17750_s6 + $0x6b8] sm:$0xff]  }
  0xc3   : > { %15029 = vmatpush3.bf16.msra.mxu0 %v16624_v27  ;;  %v2804_v27 = vcombine.high %v2794_v24, %v2794_v24 }
  0xc4   : > { %15030 = vmatprep.subr.bf16.mxu0 %v16626_v29  ;;  %v16679_v29 = vld [vmem:[%s17750_s6 + $0x740] sm:$0xff]  }
  0xc5   : > { %15051 = vmatpush3.bf16.msra.mxu1 %v16625_v28  ;;  %v2780_v28 = vrot.slane %v2764_v16, %v17788_v42  ;;  %v16715_v16 = vld [vmem:[%s17750_s6 + $0x880] sm:$0xff]  }
  0xc6   : > { %15052 = vmatprep.subr.bf16.mxu1 %v16627_v30  ;;  %v16680_v30 = vld [vmem:[%s17750_s6 + $0x7c0] sm:$0xff]  }
  0xc7   : > { %15031 = vmatpush3.bf16.msra.mxu0 %v16628_v31  ;;  %v2801_v31 = vrot.slane %v2773_v25, %v17788_v42  ;;  %v16723_v25 = vld [vmem:[%s17750_s6 + $0x890] sm:$0xff]  }
  0xc8   : > { %15032 = vmatprep.subr.bf16.mxu0 %v16630_v33  ;;  %v16682_v33 = vld [vmem:[%s17750_s6 + $0x780] sm:$0xff]  }
  0xc9   : > { %15053 = vmatpush3.bf16.msra.mxu1 %v16629_v32  ;;  %v16681_v32 = vld [vmem:[%s17750_s6 + $0x700] sm:$0xff]  }
  0xca   : > { %15054 = vmatprep.subr.bf16.mxu1 %v16631_v34  ;;  %v2802_v34 = vcombine.high %v2780_v28, %v2780_v28 }
  0xcb   : > { %15033 = vmatpush3.bf16.msra.mxu0 %v16632_v35  ;;  %v16683_v35 = vld [vmem:[%s17750_s6 + $0x748] sm:$0xff]  }
  0xcc   : > { %15034 = vmatprep.subr.bf16.mxu0 %v16634_v37  ;;  %v2805_v37 = vcombine.high %v2801_v31, %v2801_v31 }
  0xcd   : > { %15055 = vmatpush3.bf16.msra.mxu1 %v16633_v36  ;;  %v16684_v36 = vld [vmem:[%s17750_s6 + $0x7c8] sm:$0xff]  }
  0xce   : > { %15056 = vmatprep.subr.bf16.mxu1 %v16635_v38  ;;  %v16685_v38 = vld [vmem:[%s17750_s6 + $0x708] sm:$0xff]  }
  0xcf   : > { %15035 = vmatpush3.bf16.msra.mxu0 %v16636_v39  ;;  %v16686_v39 = vld [vmem:[%s17750_s6 + $0x788] sm:$0xff]  }
  0xd0   : > { %15036 = vmatprep.subr.bf16.mxu0 %v16638_v41  ;;  %v16688_v41 = vld [vmem:[%s17750_s6 + $0x7d0] sm:$0xff]  }
  0xd1   : > { %15057 = vmatpush3.bf16.msra.mxu1 %v16637_v40  ;;  %v16687_v40 = vld [vmem:[%s17750_s6 + $0x750] sm:$0xff]  }
  0xd2   : > { %15058 = vmatprep.subr.bf16.mxu1 %v16639_v43  ;;  %v16689_v43 = vld [vmem:[%s17750_s6 + $0x710] sm:$0xff]  }
  0xd3   : > { %15037 = vmatpush3.bf16.msra.mxu0 %v16640_v44  ;;  %v16690_v44 = vld [vmem:[%s17750_s6 + $0x790] sm:$0xff]  }
  0xd4   : > { %15038 = vmatprep.subr.bf16.mxu0 %v16642_v46  ;;  %v16692_v46 = vld [vmem:[%s17750_s6 + $0x7d8] sm:$0xff]  }
  0xd5   : > { %15059 = vmatpush3.bf16.msra.mxu1 %v16641_v45  ;;  %v16691_v45 = vld [vmem:[%s17750_s6 + $0x758] sm:$0xff]  }
  0xd6   : > { %15060 = vmatprep.subr.bf16.mxu1 %v16643_v47  ;;  %v16693_v47 = vld [vmem:[%s17750_s6 + $0x718] sm:$0xff]  }
  0xd7   : > { %15039 = vmatpush3.bf16.msra.mxu0 %v16644_v48  ;;  %v16694_v48 = vld [vmem:[%s17750_s6 + $0x798] sm:$0xff]  }
  0xd8   : > { %15068 = vmatprep.subr.bf16.mxu0 %v16647_v51  ;;  %v16697_v51 = vld [vmem:[%s17750_s6 + $0x720] sm:$0xff]  }
  0xd9   : > { %15061 = vmatpush3.bf16.msra.mxu1 %v16645_v49  ;;  %v16695_v49 = vld [vmem:[%s17750_s6 + $0x760] sm:$0xff]  }
  0xda   : > { %10981 = vmatmul.mubr.bf16.vlgmr.msra.gmra.mrb[20].mxu0 %v2738_v50  ;;  %15090 = vmatprep.subr.bf16.mxu1 %v16648_v52  ;;  %v16696_v50 = vld [vmem:[%s17750_s6 + $0x7e0] sm:$0xff]  }
  0xdb   : > { %15069 = vmatpush3.bf16.msra.mxu0 %v16649_v53  ;;  %11060 = vmatprep.mubr.bf16.mxu0 %v2794_v24  ;;  %v16698_v52 = vld [vmem:[%s17750_s6 + $0x7a0] sm:$0xff]   ;;  %v16699_v53 = vld [vmem:[%s17750_s6 + $0x768] sm:$0xff]   ;;  %v16722_v24 = vld [vmem:[%s17750_s6 + $0x810] sm:$0xff]  }
  0xdc   : > { %11021 = vmatmul.mubr.bf16.vlgmr.msra.gmra.mrb[20].mxu1 %v2754_v55  ;;  %15070 = vmatprep.subr.bf16.mxu0 %v16651_v56  ;;  %v16701_v55 = vld [vmem:[%s17750_s6 + $0x728] sm:$0xff]  }
  0xdd   : > { %15091 = vmatpush3.bf16.msra.mxu1 %v16650_v54  ;;  %11100 = vmatprep.mubr.bf16.mxu1 %v2804_v27  ;;  %v16700_v54 = vld [vmem:[%s17750_s6 + $0x7e8] sm:$0xff]   ;;  %v16725_v27 = vld [vmem:[%s17750_s6 + $0x8d8] sm:$0xff]  }
  0xde   : > { %15092 = vmatprep.subr.bf16.mxu1 %v16652_v57  ;;  %v16702_v56 = vld [vmem:[%s17750_s6 + $0x7a8] sm:$0xff]   ;;  %v16703_v57 = vld [vmem:[%s17750_s6 + $0x770] sm:$0xff]  }
  0xdf   : > { %15071 = vmatpush3.bf16.msra.mxu0 %v16653_v58 }
  0xe0   : > { %15072 = vmatprep.subr.bf16.mxu0 %v16655_v60 }
  0xe1   : > { %15093 = vmatpush3.bf16.msra.mxu1 %v16654_v59  ;;  %v16704_v59 = vld [vmem:[%s17750_s6 + $0x7f0] sm:$0xff]  }
  0xe2   : > { %15094 = vmatprep.subr.bf16.mxu1 %v16656_v61  ;;  %v16705_v61 = vld [vmem:[%s17750_s6 + $0x730] sm:$0xff]  }
  0xe3   : > { %15073 = vmatpush3.bf16.msra.mxu0 %v16657_v62 }
  0xe4   : > { %15074 = vmatprep.subr.bf16.mxu0 %v16659_v0 }
  0xe5   : > { %15095 = vmatpush3.bf16.msra.mxu1 %v16658_v63 }
  0xe6   : > { %15096 = vmatprep.subr.bf16.mxu1 %v16660_v1  ;;  %v16706_v1 = vld [vmem:[%s17750_s6 + $0x7b0] sm:$0xff]  }
  0xe7   : > { %15075 = vmatpush3.bf16.msra.mxu0 %v16661_v2  ;;  %v16707_v2 = vld [vmem:[%s17750_s6 + $0x778] sm:$0xff]  }
  0xe8   : > { %15076 = vmatprep.subr.bf16.mxu0 %v16663_v4 }
  0xe9   : > { %15097 = vmatpush3.bf16.msra.mxu1 %v16662_v3 }
  0xea   : > { %15098 = vmatprep.subr.bf16.mxu1 %v16664_v5 }
  0xeb   : > { %15077 = vmatpush3.bf16.msra.mxu0 %v16665_v6 }
  0xec   : > { %15078 = vmatprep.subr.bf16.mxu0 %v16667_v8 }
  0xed   : > { %15099 = vmatpush3.bf16.msra.mxu1 %v16666_v7  ;;  %v16708_v7 = vld [vmem:[%s17750_s6 + $0x7f8] sm:$0xff]  }
  0xee   : > { %15100 = vmatprep.subr.bf16.mxu1 %v16668_v9  ;;  %v16709_v9 = vld [vmem:[%s17750_s6 + $0x738] sm:$0xff]  }
  0xef   : > { %15079 = vmatpush3.bf16.msra.mxu0 %v16669_v10 }
  0xf0   : > { %15080 = vmatprep.subr.bf16.mxu0 %v16671_v12  ;;  %v2787_v12 = vrot.slane %v18015_v21, %v17788_v42  ;;  %v16719_v21 = vld [vmem:[%s17750_s6 + $0x888] sm:$0xff]  }
  0xf1   : > { %15101 = vmatpush3.bf16.msra.mxu1 %v16670_v11  ;;  %v16710_v11 = vld [vmem:[%s17750_s6 + $0x7b8] sm:$0xff]  }
  0xf2   : > { %15102 = vmatprep.subr.bf16.mxu1 %v16672_v13  ;;  %v16712_v13 = vld [vmem:[%s17750_s6 + $0x840] sm:$0xff]   ;;  %v2803_v17 = vcombine.high %v2787_v12, %v2787_v12 }
  0xf3   : > { %15081 = vmatpush3.bf16.msra.mxu0 %v16673_v15  ;;  %v16714_v15 = vld [vmem:[%s17750_s6 + $0x800] sm:$0xff]  }
  0xf4   : > { %15082 = vmatprep.subr.bf16.mxu0 %v16675_v19  ;;  %v16717_v19 = vld [vmem:[%s17750_s6 + $0x8c8] sm:$0xff]  }
  0xf5   : > { %15103 = vmatpush3.bf16.msra.mxu1 %v16674_v18  ;;  %v16716_v18 = vld [vmem:[%s17750_s6 + $0x848] sm:$0xff]  }
  0xf6   : > { %15104 = vmatprep.subr.bf16.mxu1 %v16676_v22  ;;  %v16720_v22 = vld [vmem:[%s17750_s6 + $0x850] sm:$0xff]  }
  0xf7   : > { %15083 = vmatpush3.bf16.msra.mxu0 %v16677_v23  ;;  %v16721_v23 = vld [vmem:[%s17750_s6 + $0x8d0] sm:$0xff]  }
  0xf8   : > { %15112 = vmatprep.subr.bf16.mxu0 %v16679_v29  ;;  %v16727_v29 = vld [vmem:[%s17750_s6 + $0x898] sm:$0xff]  }
  0xf9   : > { %15105 = vmatpush3.bf16.msra.mxu1 %v16678_v26  ;;  %v16724_v26 = vld [vmem:[%s17750_s6 + $0x858] sm:$0xff]  }
  0xfa   : > { %11061 = vmatmul.mubr.bf16.vlgmr.msra.gmra.mrb[24].mxu0 %v2780_v28  ;;  %15134 = vmatprep.subr.bf16.mxu1 %v16680_v30  ;;  %v16726_v28 = vld [vmem:[%s17750_s6 + $0x818] sm:$0xff]   ;;  %v16728_v30 = vld [vmem:[%s17750_s6 + $0x860] sm:$0xff]  }
  0xfb   : > { %15113 = vmatpush3.bf16.msra.mxu0 %v16681_v32  ;;  %11140 = vmatprep.mubr.bf16.mxu0 %v2801_v31  ;;  %v16729_v31 = vld [vmem:[%s17750_s6 + $0x8e0] sm:$0xff]  }
  0xfc   : > { %11101 = vmatmul.mubr.bf16.vlgmr.msra.gmra.mrb[24].mxu1 %v2802_v34  ;;  %15114 = vmatprep.subr.bf16.mxu0 %v16683_v35  ;;  %v16730_v32 = vld [vmem:[%s17750_s6 + $0x820] sm:$0xff]   ;;  %v16732_v34 = vld [vmem:[%s17750_s6 + $0x868] sm:$0xff]  }
  0xfd   : > { %15135 = vmatpush3.bf16.msra.mxu1 %v16682_v33  ;;  %11180 = vmatprep.mubr.bf16.mxu1 %v2805_v37  ;;  %v16731_v33 = vld [vmem:[%s17750_s6 + $0x8a0] sm:$0xff]   ;;  %v16733_v35 = vld [vmem:[%s17750_s6 + $0x8e8] sm:$0xff]  }
  0xfe   : > { %15136 = vmatprep.subr.bf16.mxu1 %v16684_v36  ;;  %v16734_v36 = vld [vmem:[%s17750_s6 + $0x828] sm:$0xff]  }
  0xff   : > { %15115 = vmatpush3.bf16.msra.mxu0 %v16685_v38  ;;  %v16735_v37 = vld [vmem:[%s17750_s6 + $0x8a8] sm:$0xff]   ;;  %v16736_v38 = vld [vmem:[%s17750_s6 + $0x870] sm:$0xff]  }
 0x100   : > { %15116 = vmatprep.subr.bf16.mxu0 %v16687_v40  ;;  %v16737_v40 = vld [vmem:[%s17750_s6 + $0x8f0] sm:$0xff]  }
 0x101   : > { %15137 = vmatpush3.bf16.msra.mxu1 %v16686_v39 }
 0x102   : > { %15138 = vmatprep.subr.bf16.mxu1 %v16688_v41  ;;  %v274_v41 = vld [vmem:[%s17745_s27 + $0x20] sm:$0xff] }
 0x103   : > { %15117 = vmatpush3.bf16.msra.mxu0 %v16689_v43 }
 0x104   : > { %15118 = vmatprep.subr.bf16.mxu0 %v16691_v45  ;;  %v2813_v45 = vrot.slane %v274_v41, %v17788_v42 }
 0x105   : > { %15139 = vmatpush3.bf16.msra.mxu1 %v16690_v44  ;;  %v16738_v44 = vld [vmem:[%s17750_s6 + $0x830] sm:$0xff]  }
 0x106   : > { %15140 = vmatprep.subr.bf16.mxu1 %v16692_v46  ;;  %v2806_v46 = vcombine.high %v274_v41, %v274_v41 }
 0x107   : > { %15119 = vmatpush3.bf16.msra.mxu0 %v16693_v47 }
 0x108   : > { %15120 = vmatprep.subr.bf16.mxu0 %v16695_v49 }
 0x109   : > { %15141 = vmatpush3.bf16.msra.mxu1 %v16694_v48 }
 0x10a   : > { %15142 = vmatprep.subr.bf16.mxu1 %v16696_v50 }
 0x10b   : > { %15121 = vmatpush3.bf16.msra.mxu0 %v16697_v51 }
 0x10c   : > { %15122 = vmatprep.subr.bf16.mxu0 %v16699_v53  ;;  %v16740_v53 = vld [vmem:[%s17750_s6 + $0x878] sm:$0xff]  }
 0x10d   : > { %15143 = vmatpush3.bf16.msra.mxu1 %v16698_v52  ;;  %v14820_v58 = vpop.f32.mrb[0].mxu0  ;;  %v16739_v52 = vld [vmem:[%s17750_s6 + $0x8b0] sm:$0xff]  }
 0x10e   : > { %v14821_v60 = vpop.f32.mrb[1].mxu0  ;;  %15144 = vmatprep.subr.bf16.mxu1 %v16700_v54  ;;  %v14842_v62 = vpop.f32.mrb[0].mxu1  ;;  %v2821_v54 = vcombine.high %v2813_v45, %v2813_v45 }
 0x10f   : > { %v14822_v63 = vadd.f32 %v14821_v60, %v14820_v58  ;;  %v14823_v0 = vpop.f32.mrb[2].mxu0  ;;  %15123 = vmatpush3.bf16.msra.mxu0 %v16701_v55  ;;  %v14843_v3 = vpop.f32.mrb[1].mxu1  ;;  %v18093_v55 = vrot.slane %v2806_v46, %v17788_v42 }
 0x110   : > { %v14824_v4 = vpop.f32.mrb[3].mxu0  ;;  %15124 = vmatprep.subr.bf16.mxu0 %v16703_v57  ;;  %v14844_v5 = vadd.f32 %v14843_v3, %v14842_v62  ;;  %v14845_v6 = vpop.f32.mrb[2].mxu1  ;;  %v2843_v62 = vrot.slane %v2821_v54, %v17788_v42  ;;  %v2829_v3 = vrot.slane %v2813_v45, %v17788_v42  ;;  %v16778_v54 = vld [vmem:[%s17750_s6 + $0xac0] sm:$0xff]  }
 0x111   : > { %15145 = vmatpush3.bf16.msra.mxu1 %v16702_v56  ;;  %v14846_v8 = vpop.f32.mrb[3].mxu1  ;;  %v16744_v4 = vld [vmem:[%s17750_s6 + $0x940] sm:$0xff]  }
 0x112   : > { %15146 = vmatprep.subr.bf16.mxu1 %v16704_v59  ;;  %v18056_v10 = vadd.f32 %v14844_v5, %v14822_v63  ;;  %v16741_v59 = vld [vmem:[%s17750_s6 + $0x8f8] sm:$0xff]   ;;  %v2822_v63 = vcombine.high %v18093_v55, %v18093_v55  ;;  %v16745_v5 = vld [vmem:[%s17750_s6 + $0x9c0] sm:$0xff]  }
 0x113   : > { %15125 = vmatpush3.bf16.msra.mxu0 %v16705_v61  ;;  %v16742_v61 = vld [vmem:[%s17750_s6 + $0x838] sm:$0xff]   ;;  %v16747_v8 = vld [vmem:[%s17750_s6 + $0x980] sm:$0xff]  }
 0x114   : > { %15126 = vmatprep.subr.bf16.mxu0 %v16707_v2  ;;  %v2853_v2 = vcombine.high %v2843_v62, %v2843_v62  ;;  %v2850_v6 = vrot.slane %v2822_v63, %v17788_v42  ;;  %v16786_v63 = vld [vmem:[%s17750_s6 + $0xad0] sm:$0xff]  }
 0x115   : > { %15147 = vmatpush3.bf16.msra.mxu1 %v16706_v1  ;;  %v16743_v1 = vld [vmem:[%s17750_s6 + $0x8b8] sm:$0xff]  }
 0x116   : > { %15148 = vmatprep.subr.bf16.mxu1 %v16708_v7  ;;  %v16746_v7 = vld [vmem:[%s17750_s6 + $0x900] sm:$0xff]  }
 0x117   : > { %15127 = vmatpush3.bf16.msra.mxu0 %v16709_v9  ;;  %v2851_v9 = vcombine.high %v2829_v3, %v2829_v3 }
 0x118   : > { %15156 = vmatprep.subr.bf16.mxu0 %v16712_v13  ;;  %v16750_v13 = vld [vmem:[%s17750_s6 + $0x908] sm:$0xff]  }
 0x119   : > { %15149 = vmatpush3.bf16.msra.mxu1 %v16710_v11  ;;  %v16749_v11 = vld [vmem:[%s17750_s6 + $0x9c8] sm:$0xff]  }
 0x11a   : > { %11141 = vmatmul.mubr.bf16.vlgmr.msra.gmra.mrb[28].mxu0 %v2787_v12  ;;  %15178 = vmatprep.subr.bf16.mxu1 %v16713_v14  ;;  %v2854_v12 = vcombine.high %v2850_v6, %v2850_v6  ;;  %v16751_v14 = vld [vmem:[%s17750_s6 + $0x988] sm:$0xff]  }
 0x11b   : > { %15157 = vmatpush3.bf16.msra.mxu0 %v16714_v15  ;;  %11220 = vmatprep.mubr.bf16.mxu0 %v2843_v62  ;;  %v16752_v15 = vld [vmem:[%s17750_s6 + $0x950] sm:$0xff]  }
 0x11c   : > { %11181 = vmatmul.mubr.bf16.vlgmr.msra.gmra.mrb[28].mxu1 %v2803_v17  ;;  %15158 = vmatprep.subr.bf16.mxu0 %v16716_v18  ;;  %v16754_v17 = vld [vmem:[%s17750_s6 + $0x910] sm:$0xff]  }
 0x11d   : > { %15179 = vmatpush3.bf16.msra.mxu1 %v16715_v16  ;;  %11260 = vmatprep.mubr.bf16.mxu1 %v2853_v2  ;;  %v16753_v16 = vld [vmem:[%s17750_s6 + $0x9d0] sm:$0xff]   ;;  %v16789_v2 = vld [vmem:[%s17750_s6 + $0xa58] sm:$0xff]  }
 0x11e   : > { %15180 = vmatprep.subr.bf16.mxu1 %v16717_v19  ;;  %v16755_v18 = vld [vmem:[%s17750_s6 + $0x990] sm:$0xff]   ;;  %v16756_v19 = vld [vmem:[%s17750_s6 + $0x958] sm:$0xff]  }
 0x11f   : > { %15159 = vmatpush3.bf16.msra.mxu0 %v16718_v20  ;;  %v16757_v20 = vld [vmem:[%s17750_s6 + $0x9d8] sm:$0xff]   ;;  %v16785_v62 = vld [vmem:[%s17750_s6 + $0xa50] sm:$0xff]  }
 0x120   : > { %15160 = vmatprep.subr.bf16.mxu0 %v16720_v22  ;;  %v16759_v22 = vld [vmem:[%s17750_s6 + $0x998] sm:$0xff]  }
 0x121   : > { %15181 = vmatpush3.bf16.msra.mxu1 %v16719_v21  ;;  %v16758_v21 = vld [vmem:[%s17750_s6 + $0x918] sm:$0xff]  }
 0x122   : > { %15182 = vmatprep.subr.bf16.mxu1 %v16721_v23  ;;  %v16760_v23 = vld [vmem:[%s17750_s6 + $0x960] sm:$0xff]  }
 0x123   : > { %15161 = vmatpush3.bf16.msra.mxu0 %v16722_v24  ;;  %v16761_v24 = vld [vmem:[%s17750_s6 + $0x9e0] sm:$0xff]  }
 0x124   : > { %15162 = vmatprep.subr.bf16.mxu0 %v16724_v26  ;;  %v16763_v26 = vld [vmem:[%s17750_s6 + $0x9a0] sm:$0xff]  }
 0x125   : > { %15183 = vmatpush3.bf16.msra.mxu1 %v16723_v25  ;;  %v16762_v25 = vld [vmem:[%s17750_s6 + $0x920] sm:$0xff]  }
 0x126   : > { %15184 = vmatprep.subr.bf16.mxu1 %v16725_v27  ;;  %v16764_v27 = vld [vmem:[%s17750_s6 + $0x968] sm:$0xff]  }
 0x127   : > { %15163 = vmatpush3.bf16.msra.mxu0 %v16726_v28  ;;  %v16765_v28 = vld [vmem:[%s17750_s6 + $0x9e8] sm:$0xff]  }
 0x128   : > { %15164 = vmatprep.subr.bf16.mxu0 %v16728_v30  ;;  %v16767_v30 = vld [vmem:[%s17750_s6 + $0x9a8] sm:$0xff]  }
 0x129   : > { %15185 = vmatpush3.bf16.msra.mxu1 %v16727_v29  ;;  %v16766_v29 = vld [vmem:[%s17750_s6 + $0x928] sm:$0xff]  }
 0x12a   : > { %15186 = vmatprep.subr.bf16.mxu1 %v16729_v31  ;;  %v16768_v31 = vld [vmem:[%s17750_s6 + $0x970] sm:$0xff]  }
 0x12b   : > { %15165 = vmatpush3.bf16.msra.mxu0 %v16730_v32 }
 0x12c   : > { %15166 = vmatprep.subr.bf16.mxu0 %v16732_v34 }
 0x12d   : > { %15187 = vmatpush3.bf16.msra.mxu1 %v16731_v33  ;;  %v14864_v39 = vpop.f32.mrb[4].mxu0  ;;  %v16769_v33 = vld [vmem:[%s17750_s6 + $0x9f0] sm:$0xff]  }
 0x12e   : > { %v14865_v43 = vpop.f32.mrb[5].mxu0  ;;  %15188 = vmatprep.subr.bf16.mxu1 %v16733_v35  ;;  %v14886_v47 = vpop.f32.mrb[4].mxu1  ;;  %v16770_v35 = vld [vmem:[%s17750_s6 + $0x930] sm:$0xff]  }
 0x12f   : > { %v14866_v48 = vadd.f32 %v14865_v43, %v14864_v39  ;;  %v14867_v49 = vpop.f32.mrb[6].mxu0  ;;  %15167 = vmatpush3.bf16.msra.mxu0 %v16734_v36  ;;  %v14887_v50 = vpop.f32.mrb[5].mxu1  ;;  %v16771_v39 = vld [vmem:[%s17750_s6 + $0x9b0] sm:$0xff]  }
 0x130   : > { %v14868_v51 = vpop.f32.mrb[7].mxu0  ;;  %15168 = vmatprep.subr.bf16.mxu0 %v16736_v38  ;;  %v14888_v57 = vadd.f32 %v14887_v50, %v14886_v47  ;;  %v14889_v58 = vpop.f32.mrb[6].mxu1  ;;  %v16773_v47 = vld [vmem:[%s17750_s6 + $0x9f8] sm:$0xff]  }
 0x131   : > { %v10663_v56 = vadd.f32 %v14866_v48, %v18056_v10  ;;  %15189 = vmatpush3.bf16.msra.mxu1 %v16735_v37  ;;  %v14890_v60 = vpop.f32.mrb[7].mxu1  ;;  %v16748_v10 = vld [vmem:[%s17750_s6 + $0x948] sm:$0xff]   ;;  %v16774_v49 = vld [vmem:[%s17750_s6 + $0x938] sm:$0xff]  }
 0x132   : > { %15190 = vmatprep.subr.bf16.mxu1 %v16737_v40  ;;  %v16772_v40 = vld [vmem:[%s17750_s6 + $0x978] sm:$0xff]   ;;  %v16782_v60 = vld [vmem:[%s17750_s6 + $0xac8] sm:$0xff]  }
 0x133   : > { %v18101_v0 = vadd.f32 %v14888_v57, %v10663_v56  ;;  %15169 = vmatpush3.bf16.msra.mxu0 %v16738_v44  ;;  %v16775_v51 = vld [vmem:[%s17750_s6 + $0x9b8] sm:$0xff]   ;;  %v16779_v56 = vld [vmem:[%s17750_s6 + $0xa00] sm:$0xff]  }
 0x134   : > { %15170 = vmatprep.subr.bf16.mxu0 %v16740_v53  ;;  %v16777_v53 = vld [vmem:[%s17750_s6 + $0xa40] sm:$0xff]  }
 0x135   : > { %15191 = vmatpush3.bf16.msra.mxu1 %v16739_v52  ;;  %v2836_v52 = vrot.slane %v18093_v55, %v17788_v42  ;;  %v16780_v57 = vld [vmem:[%s17750_s6 + $0xa80] sm:$0xff]   ;;  %v16783_v55 = vld [vmem:[%s17750_s6 + $0xa08] sm:$0xff]  }
 0x136   : > { %15192 = vmatprep.subr.bf16.mxu1 %v16741_v59  ;;  %v16781_v59 = vld [vmem:[%s17750_s6 + $0xa48] sm:$0xff]  }
 0x137   : > { %15171 = vmatpush3.bf16.msra.mxu0 %v16742_v61  ;;  %v2852_v58 = vcombine.high %v2836_v52, %v2836_v52  ;;  %v16784_v61 = vld [vmem:[%s17750_s6 + $0xa88] sm:$0xff]  }
 0x138   : > { %15200 = vmatprep.subr.bf16.mxu0 %v16744_v4  ;;  %v16791_v4 = vld [vmem:[%s17750_s6 + $0xa18] sm:$0xff]  }
 0x139   : > { %15193 = vmatpush3.bf16.msra.mxu1 %v16743_v1  ;;  %v16788_v1 = vld [vmem:[%s17750_s6 + $0xa90] sm:$0xff]  }
 0x13a   : > { %11221 = vmatmul.mubr.bf16.vlgmr.msra.gmra.mrb[32].mxu0 %v2829_v3  ;;  %15222 = vmatprep.subr.bf16.mxu1 %v16745_v5  ;;  %v16790_v3 = vld [vmem:[%s17750_s6 + $0xad8] sm:$0xff]  }
 0x13b   : > { %15201 = vmatpush3.bf16.msra.mxu0 %v16746_v7  ;;  %11300 = vmatprep.mubr.bf16.mxu0 %v2850_v6  ;;  %v16792_v5 = vld [vmem:[%s17750_s6 + $0xa98] sm:$0xff]   ;;  %v16793_v6 = vld [vmem:[%s17750_s6 + $0xa60] sm:$0xff]  }
 0x13c   : > { %11261 = vmatmul.mubr.bf16.vlgmr.msra.gmra.mrb[32].mxu1 %v2851_v9  ;;  %15202 = vmatprep.subr.bf16.mxu0 %v16748_v10  ;;  %v16794_v7 = vld [vmem:[%s17750_s6 + $0xae0] sm:$0xff]   ;;  %v16797_v10 = vld [vmem:[%s17750_s6 + $0xa68] sm:$0xff]  }
 0x13d   : > { %15223 = vmatpush3.bf16.msra.mxu1 %v16747_v8  ;;  %11340 = vmatprep.mubr.bf16.mxu1 %v2854_v12  ;;  %v16795_v8 = vld [vmem:[%s17750_s6 + $0xa20] sm:$0xff]   ;;  %v16799_v12 = vld [vmem:[%s17750_s6 + $0xa28] sm:$0xff]  }
 0x13e   : > { %15224 = vmatprep.subr.bf16.mxu1 %v16749_v11  ;;  %v16796_v9 = vld [vmem:[%s17750_s6 + $0xaa0] sm:$0xff]   ;;  %v16798_v11 = vld [vmem:[%s17750_s6 + $0xae8] sm:$0xff]  }
 0x13f   : > { %15203 = vmatpush3.bf16.msra.mxu0 %v16750_v13  ;;  %v16800_v13 = vld [vmem:[%s17750_s6 + $0xaa8] sm:$0xff]  }
 0x140   : > { %15204 = vmatprep.subr.bf16.mxu0 %v16752_v15 }
 0x141   : > { %15225 = vmatpush3.bf16.msra.mxu1 %v16751_v14  ;;  %v16801_v14 = vld [vmem:[%s17750_s6 + $0xa70] sm:$0xff]  }
 0x142   : > { %15226 = vmatprep.subr.bf16.mxu1 %v16753_v16  ;;  %v16802_v16 = vld [vmem:[%s17750_s6 + $0xaf0] sm:$0xff]  }
 0x143   : > { %15205 = vmatpush3.bf16.msra.mxu0 %v16754_v17 }
 0x144   : > { %15206 = vmatprep.subr.bf16.mxu0 %v16756_v19  ;;  %v275_v19 = vld [vmem:[%s17745_s27 + $0x28] sm:$0xff] }
 0x145   : > { %15227 = vmatpush3.bf16.msra.mxu1 %v16755_v18  ;;  %v16803_v18 = vld [vmem:[%s17750_s6 + $0xa30] sm:$0xff]  }
 0x146   : > { %15228 = vmatprep.subr.bf16.mxu1 %v16757_v20 }
 0x147   : > { %15207 = vmatpush3.bf16.msra.mxu0 %v16758_v21 }
 0x148   : > { %15208 = vmatprep.subr.bf16.mxu0 %v16760_v23  ;;  %v2862_v23 = vrot.slane %v275_v19, %v17788_v42 }
 0x149   : > { %15229 = vmatpush3.bf16.msra.mxu1 %v16759_v22 }
 0x14a   : > { %15230 = vmatprep.subr.bf16.mxu1 %v16761_v24  ;;  %v2855_v24 = vcombine.high %v275_v19, %v275_v19 }
 0x14b   : > { %15209 = vmatpush3.bf16.msra.mxu0 %v16762_v25 }
 0x14c   : > { %15210 = vmatprep.subr.bf16.mxu0 %v16764_v27  ;;  %v16804_v27 = vld [vmem:[%s17750_s6 + $0xab0] sm:$0xff]  }
 0x14d   : > { %15231 = vmatpush3.bf16.msra.mxu1 %v16763_v26  ;;  %v14908_v32 = vpop.f32.mrb[8].mxu0 }
 0x14e   : > { %v14909_v34 = vpop.f32.mrb[9].mxu0  ;;  %15232 = vmatprep.subr.bf16.mxu1 %v16765_v28  ;;  %v16805_v28 = vld [vmem:[%s17750_s6 + $0xa78] sm:$0xff]  }
 0x14f   : > { %v14930_v36 = vpop.f32.mrb[8].mxu1  ;;  %v14910_v37 = vadd.f32 %v14909_v34, %v14908_v32  ;;  %v14911_v38 = vpop.f32.mrb[10].mxu0  ;;  %15211 = vmatpush3.bf16.msra.mxu0 %v16766_v29  ;;  %v16806_v32 = vld [vmem:[%s17750_s6 + $0xaf8] sm:$0xff]  }
 0x150   : > { %v14931_v41 = vpop.f32.mrb[9].mxu1  ;;  %v14912_v43 = vpop.f32.mrb[11].mxu0  ;;  %15212 = vmatprep.subr.bf16.mxu0 %v16768_v31  ;;  %v16808_v38 = vld [vmem:[%s17750_s6 + $0xab8] sm:$0xff]  }
 0x151   : > { %v10743_v44 = vadd.f32 %v14910_v37, %v18101_v0  ;;  %v14932_v45 = vadd.f32 %v14931_v41, %v14930_v36  ;;  %v14933_v46 = vpop.f32.mrb[10].mxu1  ;;  %15233 = vmatpush3.bf16.msra.mxu1 %v16767_v30  ;;  %v16787_v0 = vld [vmem:[%s17750_s6 + $0xa10] sm:$0xff]   ;;  %v18178_v36 = vrot.slane %v2855_v24, %v17788_v42  ;;  %v16809_v41 = vld [vmem:[%s17750_s6 + $0xb40] sm:$0xff]   ;;  %v16839_v24 = vld [vmem:[%s17750_s6 + $0xb38] sm:$0xff]  }
 0x152   : > { %v14934_v48 = vpop.f32.mrb[11].mxu1  ;;  %15234 = vmatprep.subr.bf16.mxu1 %v16769_v33  ;;  %v2870_v33 = vcombine.high %v2862_v23, %v2862_v23  ;;  %v16811_v46 = vld [vmem:[%s17750_s6 + $0xb00] sm:$0xff]  }
 0x153   : > { %v18138_v50 = vadd.f32 %v14932_v45, %v10743_v44  ;;  %15213 = vmatpush3.bf16.msra.mxu0 %v16770_v35  ;;  %v16807_v35 = vld [vmem:[%s17750_s6 + $0xa38] sm:$0xff]   ;;  %v2871_v43 = vcombine.high %v18178_v36, %v18178_v36  ;;  %v16810_v45 = vld [vmem:[%s17750_s6 + $0xbc0] sm:$0xff]  }
 0x154   : > { %15214 = vmatprep.subr.bf16.mxu0 %v16772_v40  ;;  %v2878_v40 = vrot.slane %v2862_v23, %v17788_v42  ;;  %v16812_v48 = vld [vmem:[%s17750_s6 + $0xb80] sm:$0xff]  }
 0x155   : > { %15235 = vmatpush3.bf16.msra.mxu1 %v16771_v39  ;;  %v2892_v39 = vrot.slane %v2870_v33, %v17788_v42  ;;  %v16846_v33 = vld [vmem:[%s17750_s6 + $0xc48] sm:$0xff]  }
 0x156   : > { %15236 = vmatprep.subr.bf16.mxu1 %v16773_v47  ;;  %v2899_v47 = vrot.slane %v2871_v43, %v17788_v42  ;;  %v16855_v43 = vld [vmem:[%s17750_s6 + $0xcd8] sm:$0xff]  }
 0x157   : > { %15215 = vmatpush3.bf16.msra.mxu0 %v16774_v49  ;;  %v2902_v44 = vcombine.high %v2892_v39, %v2892_v39  ;;  %v2900_v49 = vcombine.high %v2878_v40, %v2878_v40 }
 0x158   : > { %15244 = vmatprep.subr.bf16.mxu0 %v16777_v53  ;;  %v16815_v53 = vld [vmem:[%s17750_s6 + $0xb08] sm:$0xff]  }
 0x159   : > { %15237 = vmatpush3.bf16.msra.mxu1 %v16775_v51  ;;  %v16814_v51 = vld [vmem:[%s17750_s6 + $0xbc8] sm:$0xff]  }
 0x15a   : > { %11301 = vmatmul.mubr.bf16.vlgmr.msra.gmra.mrb[36].mxu0 %v2836_v52  ;;  %15266 = vmatprep.subr.bf16.mxu1 %v16778_v54  ;;  %v2903_v52 = vcombine.high %v2899_v47, %v2899_v47  ;;  %v16816_v54 = vld [vmem:[%s17750_s6 + $0xb88] sm:$0xff]  }
 0x15b   : > { %15245 = vmatpush3.bf16.msra.mxu0 %v16779_v56  ;;  %11380 = vmatprep.mubr.bf16.mxu0 %v2892_v39  ;;  %v16817_v56 = vld [vmem:[%s17750_s6 + $0xb50] sm:$0xff]  }
 0x15c   : > { %11341 = vmatmul.mubr.bf16.vlgmr.msra.gmra.mrb[36].mxu1 %v2852_v58  ;;  %15246 = vmatprep.subr.bf16.mxu0 %v16781_v59  ;;  %v16819_v58 = vld [vmem:[%s17750_s6 + $0xb10] sm:$0xff]  }
 0x15d   : > { %15267 = vmatpush3.bf16.msra.mxu1 %v16780_v57  ;;  %11420 = vmatprep.mubr.bf16.mxu1 %v2902_v44  ;;  %v16818_v57 = vld [vmem:[%s17750_s6 + $0xbd0] sm:$0xff]   ;;  %v16856_v44 = vld [vmem:[%s17750_s6 + $0xc18] sm:$0xff]  }
 0x15e   : > { %15268 = vmatprep.subr.bf16.mxu1 %v16782_v60  ;;  %v16820_v59 = vld [vmem:[%s17750_s6 + $0xb90] sm:$0xff]   ;;  %v16821_v60 = vld [vmem:[%s17750_s6 + $0xb58] sm:$0xff]  }
 0x15f   : > { %15247 = vmatpush3.bf16.msra.mxu0 %v16783_v55  ;;  %v16822_v55 = vld [vmem:[%s17750_s6 + $0xbd8] sm:$0xff]   ;;  %v16852_v39 = vld [vmem:[%s17750_s6 + $0xc10] sm:$0xff]  }
 0x160   : > { %15248 = vmatprep.subr.bf16.mxu0 %v16785_v62  ;;  %v16824_v62 = vld [vmem:[%s17750_s6 + $0xb98] sm:$0xff]  }
 0x161   : > { %15269 = vmatpush3.bf16.msra.mxu1 %v16784_v61  ;;  %v16823_v61 = vld [vmem:[%s17750_s6 + $0xb18] sm:$0xff]  }
 0x162   : > { %15270 = vmatprep.subr.bf16.mxu1 %v16786_v63  ;;  %v16825_v63 = vld [vmem:[%s17750_s6 + $0xb60] sm:$0xff]  }
 0x163   : > { %15249 = vmatpush3.bf16.msra.mxu0 %v16787_v0  ;;  %v16826_v0 = vld [vmem:[%s17750_s6 + $0xbe0] sm:$0xff]  }
 0x164   : > { %15250 = vmatprep.subr.bf16.mxu0 %v16789_v2  ;;  %v16828_v2 = vld [vmem:[%s17750_s6 + $0xba0] sm:$0xff]  }
 0x165   : > { %15271 = vmatpush3.bf16.msra.mxu1 %v16788_v1  ;;  %v16827_v1 = vld [vmem:[%s17750_s6 + $0xb20] sm:$0xff]  }
 0x166   : > { %15272 = vmatprep.subr.bf16.mxu1 %v16790_v3  ;;  %v16829_v3 = vld [vmem:[%s17750_s6 + $0xb68] sm:$0xff]  }
 0x167   : > { %15251 = vmatpush3.bf16.msra.mxu0 %v16791_v4  ;;  %v16830_v4 = vld [vmem:[%s17750_s6 + $0xbe8] sm:$0xff]  }
 0x168   : > { %15252 = vmatprep.subr.bf16.mxu0 %v16793_v6  ;;  %v16832_v6 = vld [vmem:[%s17750_s6 + $0xba8] sm:$0xff]  }
 0x169   : > { %15273 = vmatpush3.bf16.msra.mxu1 %v16792_v5  ;;  %v16831_v5 = vld [vmem:[%s17750_s6 + $0xb28] sm:$0xff]  }
 0x16a   : > { %15274 = vmatprep.subr.bf16.mxu1 %v16794_v7  ;;  %v16833_v7 = vld [vmem:[%s17750_s6 + $0xb70] sm:$0xff]  }
 0x16b   : > { %15253 = vmatpush3.bf16.msra.mxu0 %v16795_v8 }
 0x16c   : > { %15254 = vmatprep.subr.bf16.mxu0 %v16797_v10 }
 0x16d   : > { %15275 = vmatpush3.bf16.msra.mxu1 %v16796_v9  ;;  %v14952_v15 = vpop.f32.mrb[12].mxu0  ;;  %v16834_v9 = vld [vmem:[%s17750_s6 + $0xbf0] sm:$0xff]  }
 0x16e   : > { %v14953_v17 = vpop.f32.mrb[13].mxu0  ;;  %15276 = vmatprep.subr.bf16.mxu1 %v16798_v11  ;;  %v16835_v11 = vld [vmem:[%s17750_s6 + $0xb30] sm:$0xff]  }
 0x16f   : > { %v14974_v20 = vpop.f32.mrb[12].mxu1  ;;  %v14954_v21 = vadd.f32 %v14953_v17, %v14952_v15  ;;  %v14955_v22 = vpop.f32.mrb[14].mxu0  ;;  %15255 = vmatpush3.bf16.msra.mxu0 %v16799_v12  ;;  %v16836_v15 = vld [vmem:[%s17750_s6 + $0xbb0] sm:$0xff]  }
 0x170   : > { %v14975_v25 = vpop.f32.mrb[13].mxu1  ;;  %v14956_v26 = vpop.f32.mrb[15].mxu0  ;;  %15256 = vmatprep.subr.bf16.mxu0 %v16801_v14  ;;  %v16838_v22 = vld [vmem:[%s17750_s6 + $0xbf8] sm:$0xff]  }
 0x171   : > { %v10823_v29 = vadd.f32 %v14954_v21, %v18138_v50  ;;  %v14976_v30 = vadd.f32 %v14975_v25, %v14974_v20  ;;  %v14977_v31 = vpop.f32.mrb[14].mxu1  ;;  %15277 = vmatpush3.bf16.msra.mxu1 %v16800_v13  ;;  %v16813_v50 = vld [vmem:[%s17750_s6 + $0xb48] sm:$0xff]   ;;  %v16840_v26 = vld [vmem:[%s17750_s6 + $0xbb8] sm:$0xff]  }
 0x172   : > { %v14978_v34 = vpop.f32.mrb[15].mxu1  ;;  %15278 = vmatprep.subr.bf16.mxu1 %v16802_v16  ;;  %v16837_v16 = vld [vmem:[%s17750_s6 + $0xb78] sm:$0xff]   ;;  %v16845_v31 = vld [vmem:[%s17750_s6 + $0xc80] sm:$0xff]  }
 0x173   : > { %v18180_v37 = vadd.f32 %v14976_v30, %v10823_v29  ;;  %15257 = vmatpush3.bf16.msra.mxu0 %v16803_v18  ;;  %v16843_v29 = vld [vmem:[%s17750_s6 + $0xcc0] sm:$0xff]   ;;  %v16847_v34 = vld [vmem:[%s17750_s6 + $0xcc8] sm:$0xff]  }
 0x174   : > { %15258 = vmatprep.subr.bf16.mxu0 %v16805_v28  ;;  %v16842_v28 = vld [vmem:[%s17750_s6 + $0xc40] sm:$0xff]  }
 0x175   : > { %15279 = vmatpush3.bf16.msra.mxu1 %v16804_v27  ;;  %v2885_v27 = vrot.slane %v18178_v36, %v17788_v42  ;;  %v16844_v30 = vld [vmem:[%s17750_s6 + $0xc00] sm:$0xff]   ;;  %v16849_v36 = vld [vmem:[%s17750_s6 + $0xc88] sm:$0xff]  }
 0x176   : > { %15280 = vmatprep.subr.bf16.mxu1 %v16806_v32 }
 0x177   : > { %15259 = vmatpush3.bf16.msra.mxu0 %v16807_v35  ;;  %v2901_v32 = vcombine.high %v2885_v27, %v2885_v27  ;;  %v16848_v35 = vld [vmem:[%s17750_s6 + $0xc08] sm:$0xff]  }
 0x178   : > { %15288 = vmatprep.subr.bf16.mxu0 %v16809_v41  ;;  %v16854_v41 = vld [vmem:[%s17750_s6 + $0xc58] sm:$0xff]  }
 0x179   : > { %15281 = vmatpush3.bf16.msra.mxu1 %v16808_v38  ;;  %v16851_v38 = vld [vmem:[%s17750_s6 + $0xcd0] sm:$0xff]  }
 0x17a   : > { %11381 = vmatmul.mubr.bf16.vlgmr.msra.gmra.mrb[40].mxu0 %v2878_v40  ;;  %15310 = vmatprep.subr.bf16.mxu1 %v16810_v45  ;;  %v16853_v40 = vld [vmem:[%s17750_s6 + $0xc90] sm:$0xff]   ;;  %v16857_v45 = vld [vmem:[%s17750_s6 + $0xc98] sm:$0xff]  }
 0x17b   : > { %15289 = vmatpush3.bf16.msra.mxu0 %v16811_v46  ;;  %11460 = vmatprep.mubr.bf16.mxu0 %v2899_v47  ;;  %v16858_v46 = vld [vmem:[%s17750_s6 + $0xc60] sm:$0xff]  }
 0x17c   : > { %11421 = vmatmul.mubr.bf16.vlgmr.msra.gmra.mrb[40].mxu1 %v2900_v49  ;;  %15290 = vmatprep.subr.bf16.mxu0 %v16813_v50  ;;  %v16859_v47 = vld [vmem:[%s17750_s6 + $0xce0] sm:$0xff]   ;;  %v16862_v50 = vld [vmem:[%s17750_s6 + $0xc68] sm:$0xff]  }
 0x17d   : > { %15311 = vmatpush3.bf16.msra.mxu1 %v16812_v48  ;;  %11500 = vmatprep.mubr.bf16.mxu1 %v2903_v52  ;;  %v16860_v48 = vld [vmem:[%s17750_s6 + $0xc20] sm:$0xff]   ;;  %v16864_v52 = vld [vmem:[%s17750_s6 + $0xc28] sm:$0xff]  }
 0x17e   : > { %15312 = vmatprep.subr.bf16.mxu1 %v16814_v51  ;;  %v16861_v49 = vld [vmem:[%s17750_s6 + $0xca0] sm:$0xff]   ;;  %v16863_v51 = vld [vmem:[%s17750_s6 + $0xce8] sm:$0xff]  }
 0x17f   : > { %15291 = vmatpush3.bf16.msra.mxu0 %v16815_v53  ;;  %v16865_v53 = vld [vmem:[%s17750_s6 + $0xca8] sm:$0xff]  }
 0x180   : > { %15292 = vmatprep.subr.bf16.mxu0 %v16817_v56 }
 0x181   : > { %15313 = vmatpush3.bf16.msra.mxu1 %v16816_v54  ;;  %v16866_v54 = vld [vmem:[%s17750_s6 + $0xc70] sm:$0xff]  }
 0x182   : > { %15314 = vmatprep.subr.bf16.mxu1 %v16818_v57  ;;  %v16867_v57 = vld [vmem:[%s17750_s6 + $0xcf0] sm:$0xff]  }
 0x183   : > { %15293 = vmatpush3.bf16.msra.mxu0 %v16819_v58 }
 0x184   : > { %15294 = vmatprep.subr.bf16.mxu0 %v16821_v60 }
 0x185   : > { %15315 = vmatpush3.bf16.msra.mxu1 %v16820_v59  ;;  %v16868_v59 = vld [vmem:[%s17750_s6 + $0xc30] sm:$0xff]  }
 0x186   : > { %15316 = vmatprep.subr.bf16.mxu1 %v16822_v55 }
 0x187   : > { %15295 = vmatpush3.bf16.msra.mxu0 %v16823_v61 }
 0x188   : > { %15296 = vmatprep.subr.bf16.mxu0 %v16825_v63  ;;  %v16870_v63 = vld [vmem:[%s17750_s6 + $0xc78] sm:$0xff]  }
 0x189   : > { %15317 = vmatpush3.bf16.msra.mxu1 %v16824_v62  ;;  %v16869_v62 = vld [vmem:[%s17750_s6 + $0xcb0] sm:$0xff]  }
 0x18a   : > { %15318 = vmatprep.subr.bf16.mxu1 %v16826_v0  ;;  %v276_v0 = vld [vmem:[%s17745_s27 + $0x30] sm:$0xff] }
 0x18b   : > { %15297 = vmatpush3.bf16.msra.mxu0 %v16827_v1 }
 0x18c   : > { %15298 = vmatprep.subr.bf16.mxu0 %v16829_v3  ;;  %v2911_v3 = vrot.slane %v276_v0, %v17788_v42 }
 0x18d   : > { %15319 = vmatpush3.bf16.msra.mxu1 %v16828_v2  ;;  %v14996_v8 = vpop.f32.mrb[16].mxu0 }
 0x18e   : > { %v14997_v10 = vpop.f32.mrb[17].mxu0  ;;  %15320 = vmatprep.subr.bf16.mxu1 %v16830_v4  ;;  %v2904_v4 = vcombine.high %v276_v0, %v276_v0  ;;  %v16904_v0 = vld [vmem:[%s17750_s6 + $0xd38] sm:$0xff]  }
 0x18f   : > { %v15018_v12 = vpop.f32.mrb[16].mxu1  ;;  %v14998_v13 = vadd.f32 %v14997_v10, %v14996_v8  ;;  %v14999_v14 = vpop.f32.mrb[18].mxu0  ;;  %15299 = vmatpush3.bf16.msra.mxu0 %v16831_v5  ;;  %v16871_v8 = vld [vmem:[%s17750_s6 + $0xcf8] sm:$0xff]  }
 0x190   : > { %v15019_v17 = vpop.f32.mrb[17].mxu1  ;;  %v15000_v18 = vpop.f32.mrb[19].mxu0  ;;  %15300 = vmatprep.subr.bf16.mxu0 %v16833_v7  ;;  %v16872_v10 = vld [vmem:[%s17750_s6 + $0xc38] sm:$0xff]  }
 0x191   : > { %v10903_v19 = vadd.f32 %v14998_v13, %v18180_v37  ;;  %v15020_v20 = vadd.f32 %v15019_v17, %v15018_v12  ;;  %v15021_v21 = vpop.f32.mrb[18].mxu1  ;;  %15321 = vmatpush3.bf16.msra.mxu1 %v16832_v6  ;;  %v16850_v37 = vld [vmem:[%s17750_s6 + $0xc50] sm:$0xff]   ;;  %v18260_v12 = vrot.slane %v2904_v4, %v17788_v42  ;;  %v16873_v14 = vld [vmem:[%s17750_s6 + $0xcb8] sm:$0xff]   ;;  %v16874_v17 = vld [vmem:[%s17750_s6 + $0xd40] sm:$0xff]  }
 0x192   : > { %v15022_v23 = vpop.f32.mrb[19].mxu1  ;;  %15322 = vmatprep.subr.bf16.mxu1 %v16834_v9  ;;  %v16876_v21 = vld [vmem:[%s17750_s6 + $0xd00] sm:$0xff]  }
 0x193   : > { %v18220_v25 = vadd.f32 %v15020_v20, %v10903_v19  ;;  %15301 = vmatpush3.bf16.msra.mxu0 %v16835_v11  ;;  %v2919_v11 = vcombine.high %v2911_v3, %v2911_v3  ;;  %v2920_v18 = vcombine.high %v18260_v12, %v18260_v12  ;;  %v16875_v19 = vld [vmem:[%s17750_s6 + $0xdc0] sm:$0xff]  }
 0x194   : > { %15302 = vmatprep.subr.bf16.mxu0 %v16837_v16  ;;  %v2927_v16 = vrot.slane %v2911_v3, %v17788_v42  ;;  %v16877_v23 = vld [vmem:[%s17750_s6 + $0xd80] sm:$0xff]   ;;  %v2934_v3 = vrot.slane %v18260_v12, %v17788_v42  ;;  %v16914_v12 = vld [vmem:[%s17750_s6 + $0xe88] sm:$0xff]  }
 0x195   : > { %15323 = vmatpush3.bf16.msra.mxu1 %v16836_v15  ;;  %v2941_v15 = vrot.slane %v2919_v11, %v17788_v42  ;;  %v16907_v4 = vld [vmem:[%s17750_s6 + $0xe40] sm:$0xff]   ;;  %v16913_v11 = vld [vmem:[%s17750_s6 + $0xe08] sm:$0xff]  }
 0x196   : > { %15324 = vmatprep.subr.bf16.mxu1 %v16838_v22  ;;  %v2948_v22 = vrot.slane %v2920_v18, %v17788_v42  ;;  %v16920_v18 = vld [vmem:[%s17750_s6 + $0xed8] sm:$0xff]  }
 0x197   : > { %15303 = vmatpush3.bf16.msra.mxu0 %v16839_v24  ;;  %v2951_v20 = vcombine.high %v2941_v15, %v2941_v15  ;;  %v2949_v24 = vcombine.high %v2927_v16, %v2927_v16 }
 0x198   : > { %15332 = vmatprep.subr.bf16.mxu0 %v16842_v28  ;;  %v16880_v28 = vld [vmem:[%s17750_s6 + $0xd08] sm:$0xff]  }
 0x199   : > { %15325 = vmatpush3.bf16.msra.mxu1 %v16840_v26  ;;  %v16879_v26 = vld [vmem:[%s17750_s6 + $0xdc8] sm:$0xff]  }
 0x19a   : > { %11461 = vmatmul.mubr.bf16.vlgmr.msra.gmra.mrb[44].mxu0 %v2885_v27  ;;  %15354 = vmatprep.subr.bf16.mxu1 %v16843_v29  ;;  %v2952_v27 = vcombine.high %v2948_v22, %v2948_v22  ;;  %v16881_v29 = vld [vmem:[%s17750_s6 + $0xd88] sm:$0xff]  }
 0x19b   : > { %15333 = vmatpush3.bf16.msra.mxu0 %v16844_v30  ;;  %11540 = vmatprep.mubr.bf16.mxu0 %v2941_v15  ;;  %v16882_v30 = vld [vmem:[%s17750_s6 + $0xd50] sm:$0xff]  }
 0x19c   : > { %11501 = vmatmul.mubr.bf16.vlgmr.msra.gmra.mrb[44].mxu1 %v2901_v32  ;;  %15334 = vmatprep.subr.bf16.mxu0 %v16846_v33  ;;  %v16884_v32 = vld [vmem:[%s17750_s6 + $0xd10] sm:$0xff]  }
 0x19d   : > { %15355 = vmatpush3.bf16.msra.mxu1 %v16845_v31  ;;  %11580 = vmatprep.mubr.bf16.mxu1 %v2951_v20  ;;  %v16883_v31 = vld [vmem:[%s17750_s6 + $0xdd0] sm:$0xff]   ;;  %v16922_v20 = vld [vmem:[%s17750_s6 + $0xe98] sm:$0xff]  }
 0x19e   : > { %15356 = vmatprep.subr.bf16.mxu1 %v16847_v34  ;;  %v16885_v33 = vld [vmem:[%s17750_s6 + $0xd90] sm:$0xff]   ;;  %v16886_v34 = vld [vmem:[%s17750_s6 + $0xd58] sm:$0xff]  }
 0x19f   : > { %15335 = vmatpush3.bf16.msra.mxu0 %v16848_v35  ;;  %v16887_v35 = vld [vmem:[%s17750_s6 + $0xdd8] sm:$0xff]   ;;  %v16917_v15 = vld [vmem:[%s17750_s6 + $0xe10] sm:$0xff]  }
 0x1a0   : > { %15336 = vmatprep.subr.bf16.mxu0 %v16850_v37  ;;  %v16889_v37 = vld [vmem:[%s17750_s6 + $0xd98] sm:$0xff]  }
 0x1a1   : > { %15357 = vmatpush3.bf16.msra.mxu1 %v16849_v36  ;;  %v16888_v36 = vld [vmem:[%s17750_s6 + $0xd18] sm:$0xff]  }
 0x1a2   : > { %15358 = vmatprep.subr.bf16.mxu1 %v16851_v38  ;;  %v16890_v38 = vld [vmem:[%s17750_s6 + $0xd60] sm:$0xff]  }
 0x1a3   : > { %15337 = vmatpush3.bf16.msra.mxu0 %v16852_v39  ;;  %v16891_v39 = vld [vmem:[%s17750_s6 + $0xde0] sm:$0xff]  }
 0x1a4   : > { %15338 = vmatprep.subr.bf16.mxu0 %v16854_v41  ;;  %v16893_v41 = vld [vmem:[%s17750_s6 + $0xda0] sm:$0xff]  }
 0x1a5   : > { %15359 = vmatpush3.bf16.msra.mxu1 %v16853_v40  ;;  %v16892_v40 = vld [vmem:[%s17750_s6 + $0xd20] sm:$0xff]  }
 0x1a6   : > { %15360 = vmatprep.subr.bf16.mxu1 %v16855_v43  ;;  %v16894_v43 = vld [vmem:[%s17750_s6 + $0xd68] sm:$0xff]  }
 0x1a7   : > { %15339 = vmatpush3.bf16.msra.mxu0 %v16856_v44  ;;  %v16895_v44 = vld [vmem:[%s17750_s6 + $0xde8] sm:$0xff]  }
 0x1a8   : > { %15340 = vmatprep.subr.bf16.mxu0 %v16858_v46  ;;  %v16897_v46 = vld [vmem:[%s17750_s6 + $0xda8] sm:$0xff]  }
 0x1a9   : > { %15361 = vmatpush3.bf16.msra.mxu1 %v16857_v45  ;;  %v16896_v45 = vld [vmem:[%s17750_s6 + $0xd28] sm:$0xff]  }
 0x1aa   : > { %15362 = vmatprep.subr.bf16.mxu1 %v16859_v47  ;;  %v16898_v47 = vld [vmem:[%s17750_s6 + $0xd70] sm:$0xff]  }
 0x1ab   : > { %15341 = vmatpush3.bf16.msra.mxu0 %v16860_v48 }
 0x1ac   : > { %15342 = vmatprep.subr.bf16.mxu0 %v16862_v50 }
 0x1ad   : > { %15363 = vmatpush3.bf16.msra.mxu1 %v16861_v49  ;;  %v15040_v56 = vpop.f32.mrb[20].mxu0  ;;  %v16899_v49 = vld [vmem:[%s17750_s6 + $0xdf0] sm:$0xff]  }
 0x1ae   : > { %v15041_v58 = vpop.f32.mrb[21].mxu0  ;;  %15364 = vmatprep.subr.bf16.mxu1 %v16863_v51  ;;  %v16900_v51 = vld [vmem:[%s17750_s6 + $0xd30] sm:$0xff]  }
 0x1af   : > { %v15062_v60 = vpop.f32.mrb[20].mxu1  ;;  %v15042_v55 = vadd.f32 %v15041_v58, %v15040_v56  ;;  %v15043_v61 = vpop.f32.mrb[22].mxu0  ;;  %15343 = vmatpush3.bf16.msra.mxu0 %v16864_v52  ;;  %v16901_v56 = vld [vmem:[%s17750_s6 + $0xdb0] sm:$0xff]  }
 0x1b0   : > { %v15063_v1 = vpop.f32.mrb[21].mxu1  ;;  %v15044_v2 = vpop.f32.mrb[23].mxu0  ;;  %15344 = vmatprep.subr.bf16.mxu0 %v16866_v54 }
 0x1b1   : > { %v10983_v5 = vadd.f32 %v15042_v55, %v18220_v25  ;;  %v15064_v6 = vadd.f32 %v15063_v1, %v15062_v60  ;;  %v15065_v7 = vpop.f32.mrb[22].mxu1  ;;  %15365 = vmatpush3.bf16.msra.mxu1 %v16865_v53  ;;  %v16878_v25 = vld [vmem:[%s17750_s6 + $0xd48] sm:$0xff]   ;;  %v16905_v2 = vld [vmem:[%s17750_s6 + $0xdb8] sm:$0xff]  }
 0x1b2   : > { %v15066_v9 = vpop.f32.mrb[23].mxu1  ;;  %15366 = vmatprep.subr.bf16.mxu1 %v16867_v57  ;;  %v16902_v57 = vld [vmem:[%s17750_s6 + $0xd78] sm:$0xff]   ;;  %v16910_v7 = vld [vmem:[%s17750_s6 + $0xe80] sm:$0xff]  }
 0x1b3   : > { %v18262_v13 = vadd.f32 %v15064_v6, %v10983_v5  ;;  %15345 = vmatpush3.bf16.msra.mxu0 %v16868_v59  ;;  %v16908_v5 = vld [vmem:[%s17750_s6 + $0xec0] sm:$0xff]   ;;  %v16911_v9 = vld [vmem:[%s17750_s6 + $0xe48] sm:$0xff]  }
 0x1b4   : > { %15346 = vmatprep.subr.bf16.mxu0 %v16870_v63  ;;  %v16909_v6 = vld [vmem:[%s17750_s6 + $0xe00] sm:$0xff]  }
 0x1b5   : > { %15367 = vmatpush3.bf16.msra.mxu1 %v16869_v62  ;;  %v16903_v62 = vld [vmem:[%s17750_s6 + $0xdf8] sm:$0xff]  }
 0x1b6   : > { %15368 = vmatprep.subr.bf16.mxu1 %v16871_v8  ;;  %v2950_v8 = vcombine.high %v2934_v3, %v2934_v3 }
 0x1b7   : > { %15347 = vmatpush3.bf16.msra.mxu0 %v16872_v10  ;;  %v16912_v10 = vld [vmem:[%s17750_s6 + $0xec8] sm:$0xff]  }
 0x1b8   : > { %15376 = vmatprep.subr.bf16.mxu0 %v16874_v17  ;;  %v16919_v17 = vld [vmem:[%s17750_s6 + $0xe58] sm:$0xff]  }
 0x1b9   : > { %15369 = vmatpush3.bf16.msra.mxu1 %v16873_v14  ;;  %v16916_v14 = vld [vmem:[%s17750_s6 + $0xed0] sm:$0xff]  }
 0x1ba   : > { %11541 = vmatmul.mubr.bf16.vlgmr.msra.gmra.mrb[48].mxu0 %v2927_v16  ;;  %15398 = vmatprep.subr.bf16.mxu1 %v16875_v19  ;;  %v16918_v16 = vld [vmem:[%s17750_s6 + $0xe90] sm:$0xff]   ;;  %v16921_v19 = vld [vmem:[%s17750_s6 + $0xe18] sm:$0xff]  }
 0x1bb   : > { %15377 = vmatpush3.bf16.msra.mxu0 %v16876_v21  ;;  %11620 = vmatprep.mubr.bf16.mxu0 %v2948_v22  ;;  %v16923_v21 = vld [vmem:[%s17750_s6 + $0xe60] sm:$0xff]  }
 0x1bc   : > { %11581 = vmatmul.mubr.bf16.vlgmr.msra.gmra.mrb[48].mxu1 %v2949_v24  ;;  %15378 = vmatprep.subr.bf16.mxu0 %v16878_v25  ;;  %v16924_v22 = vld [vmem:[%s17750_s6 + $0xee0] sm:$0xff]   ;;  %v16927_v25 = vld [vmem:[%s17750_s6 + $0xe68] sm:$0xff]  }
 0x1bd   : > { %15399 = vmatpush3.bf16.msra.mxu1 %v16877_v23  ;;  %11660 = vmatprep.mubr.bf16.mxu1 %v2952_v27  ;;  %v16925_v23 = vld [vmem:[%s17750_s6 + $0xe20] sm:$0xff]   ;;  %v16929_v27 = vld [vmem:[%s17750_s6 + $0xe28] sm:$0xff]  }
 0x1be   : > { %15400 = vmatprep.subr.bf16.mxu1 %v16879_v26  ;;  %v16926_v24 = vld [vmem:[%s17750_s6 + $0xea0] sm:$0xff]   ;;  %v16928_v26 = vld [vmem:[%s17750_s6 + $0xee8] sm:$0xff]  }
 0x1bf   : > { %15379 = vmatpush3.bf16.msra.mxu0 %v16880_v28  ;;  %v16930_v28 = vld [vmem:[%s17750_s6 + $0xea8] sm:$0xff]  }
 0x1c0   : > { %15380 = vmatprep.subr.bf16.mxu0 %v16882_v30 }
 0x1c1   : > { %15401 = vmatpush3.bf16.msra.mxu1 %v16881_v29  ;;  %v16931_v29 = vld [vmem:[%s17750_s6 + $0xe70] sm:$0xff]  }
 0x1c2   : > { %15402 = vmatprep.subr.bf16.mxu1 %v16883_v31  ;;  %v16932_v31 = vld [vmem:[%s17750_s6 + $0xef0] sm:$0xff]  }
 0x1c3   : > { %15381 = vmatpush3.bf16.msra.mxu0 %v16884_v32 }
 0x1c4   : > { %15382 = vmatprep.subr.bf16.mxu0 %v16886_v34 }
 0x1c5   : > { %15403 = vmatpush3.bf16.msra.mxu1 %v16885_v33  ;;  %v16933_v33 = vld [vmem:[%s17750_s6 + $0xe30] sm:$0xff]  }
 0x1c6   : > { %15404 = vmatprep.subr.bf16.mxu1 %v16887_v35 }
 0x1c7   : > { %15383 = vmatpush3.bf16.msra.mxu0 %v16888_v36 }
 0x1c8   : > { %15384 = vmatprep.subr.bf16.mxu0 %v16890_v38  ;;  %v16935_v38 = vld [vmem:[%s17750_s6 + $0xe78] sm:$0xff]  }
 0x1c9   : > { %15405 = vmatpush3.bf16.msra.mxu1 %v16889_v37  ;;  %v16934_v37 = vld [vmem:[%s17750_s6 + $0xeb0] sm:$0xff]  }
 0x1ca   : > { %15406 = vmatprep.subr.bf16.mxu1 %v16891_v39 }
 0x1cb   : > { %15385 = vmatpush3.bf16.msra.mxu0 %v16892_v40 }
 0x1cc   : > { %15386 = vmatprep.subr.bf16.mxu0 %v16894_v43 }
 0x1cd   : > { %15407 = vmatpush3.bf16.msra.mxu1 %v16893_v41  ;;  %v15084_v48 = vpop.f32.mrb[24].mxu0  ;;  %v16936_v41 = vld [vmem:[%s17750_s6 + $0xef8] sm:$0xff]  }
 0x1ce   : > { %v15085_v50 = vpop.f32.mrb[25].mxu0  ;;  %15408 = vmatprep.subr.bf16.mxu1 %v16895_v44 }
 0x1cf   : > { %v15106_v52 = vpop.f32.mrb[24].mxu1  ;;  %v15086_v53 = vadd.f32 %v15085_v50, %v15084_v48  ;;  %v15087_v54 = vpop.f32.mrb[26].mxu0  ;;  %15387 = vmatpush3.bf16.msra.mxu0 %v16896_v45  ;;  %v16937_v48 = vld [vmem:[%s17750_s6 + $0xe38] sm:$0xff]  }
 0x1d0   : > { %v15107_v58 = vpop.f32.mrb[25].mxu1  ;;  %v15088_v59 = vpop.f32.mrb[27].mxu0  ;;  %15388 = vmatprep.subr.bf16.mxu0 %v16898_v47 }
 0x1d1   : > { %v11063_v60 = vadd.f32 %v15086_v53, %v18262_v13  ;;  %v15108_v55 = vadd.f32 %v15107_v58, %v15106_v52  ;;  %v15109_v61 = vpop.f32.mrb[26].mxu1  ;;  %15409 = vmatpush3.bf16.msra.mxu1 %v16897_v46  ;;  %v16915_v13 = vld [vmem:[%s17750_s6 + $0xe50] sm:$0xff]   ;;  %v277_v46 = vld [vmem:[%s17745_s27 + $0x38] sm:$0xff]  ;;  %v16940_v58 = vld [vmem:[%s17750_s6 + $0xfc0] sm:$0xff]  }
 0x1d2   : > { %v15110_v63 = vpop.f32.mrb[27].mxu1  ;;  %15410 = vmatprep.subr.bf16.mxu1 %v16899_v49  ;;  %v2960_v49 = vrot.slane %v277_v46, %v17788_v42  ;;  %v2953_v50 = vcombine.high %v277_v46, %v277_v46  ;;  %v16938_v52 = vld [vmem:[%s17750_s6 + $0xeb8] sm:$0xff]   ;;  %v16942_v61 = vld [vmem:[%s17750_s6 + $0xf80] sm:$0xff]  }
 0x1d3   : > { %v18302_v1 = vadd.f32 %v15108_v55, %v11063_v60  ;;  %15389 = vmatpush3.bf16.msra.mxu0 %v16900_v51  ;;  %v16941_v60 = vld [vmem:[%s17750_s6 + $0xf00] sm:$0xff]  }
 0x1d4   : > { %15390 = vmatprep.subr.bf16.mxu0 %v16902_v57  ;;  %v2968_v53 = vcombine.high %v2960_v49, %v2960_v49  ;;  %v2976_v54 = vrot.slane %v2960_v49, %v17788_v42  ;;  %v18347_v57 = vrot.slane %v2953_v50, %v17788_v42  ;;  %v16974_v46 = vld [vmem:[%s17750_s6 + $0x1000] sm:$0xff]   ;;  %v16976_v49 = vld [vmem:[%s17750_s6 + $0x1048] sm:$0xff]  }
 0x1d5   : > { %15411 = vmatpush3.bf16.msra.mxu1 %v16901_v56  ;;  %v16939_v56 = vld [vmem:[%s17750_s6 + $0xf40] sm:$0xff]   ;;  %v16977_v50 = vld [vmem:[%s17750_s6 + $0x10c8] sm:$0xff]  }
 0x1d6   : > { %15412 = vmatprep.subr.bf16.mxu1 %v16903_v62  ;;  %v2990_v59 = vrot.slane %v2968_v53, %v17788_v42  ;;  %v2969_v55 = vcombine.high %v18347_v57, %v18347_v57  ;;  %v2998_v63 = vcombine.high %v2976_v54, %v2976_v54  ;;  %v16980_v53 = vld [vmem:[%s17750_s6 + $0x1050] sm:$0xff]  }
 0x1d7   : > { %15391 = vmatpush3.bf16.msra.mxu0 %v16904_v0  ;;  %v16943_v0 = vld [vmem:[%s17750_s6 + $0xf48] sm:$0xff]  }
 0x1d8   : > { %15420 = vmatprep.subr.bf16.mxu0 %v16907_v4  ;;  %v3000_v62 = vcombine.high %v2990_v59, %v2990_v59 }
 0x1d9   : > { %15413 = vmatpush3.bf16.msra.mxu1 %v16905_v2  ;;  %v16944_v2 = vld [vmem:[%s17750_s6 + $0xfc8] sm:$0xff]  }
 0x1da   : > { %11621 = vmatmul.mubr.bf16.vlgmr.msra.gmra.mrb[52].mxu0 %v2934_v3  ;;  %15442 = vmatprep.subr.bf16.mxu1 %v16908_v5  ;;  %v16945_v3 = vld [vmem:[%s17750_s6 + $0xf08] sm:$0xff]  }
 0x1db   : > { %15421 = vmatpush3.bf16.msra.mxu0 %v16909_v6  ;;  %11700 = vmatprep.mubr.bf16.mxu0 %v2990_v59  ;;  %v16946_v5 = vld [vmem:[%s17750_s6 + $0xf88] sm:$0xff]   ;;  %v16947_v6 = vld [vmem:[%s17750_s6 + $0xf50] sm:$0xff]   ;;  %v16985_v59 = vld [vmem:[%s17750_s6 + $0x10d8] sm:$0xff]  }
 0x1dc   : > { %11661 = vmatmul.mubr.bf16.vlgmr.msra.gmra.mrb[52].mxu1 %v2950_v8  ;;  %15422 = vmatprep.subr.bf16.mxu0 %v16911_v9  ;;  %v16949_v8 = vld [vmem:[%s17750_s6 + $0xf10] sm:$0xff]  }
 0x1dd   : > { %15443 = vmatpush3.bf16.msra.mxu1 %v16910_v7  ;;  %11740 = vmatprep.mubr.bf16.mxu1 %v3000_v62  ;;  %v16948_v7 = vld [vmem:[%s17750_s6 + $0xfd0] sm:$0xff]   ;;  %v16989_v62 = vld [vmem:[%s17750_s6 + $0x10e0] sm:$0xff]  }
 0x1de   : > { %15444 = vmatprep.subr.bf16.mxu1 %v16912_v10  ;;  %v16950_v9 = vld [vmem:[%s17750_s6 + $0xf90] sm:$0xff]   ;;  %v16951_v10 = vld [vmem:[%s17750_s6 + $0xf58] sm:$0xff]  }
 0x1df   : > { %15423 = vmatpush3.bf16.msra.mxu0 %v16913_v11  ;;  %v16952_v11 = vld [vmem:[%s17750_s6 + $0xfd8] sm:$0xff]  }
 0x1e0   : > { %15424 = vmatprep.subr.bf16.mxu0 %v16915_v13  ;;  %v16954_v13 = vld [vmem:[%s17750_s6 + $0xf98] sm:$0xff]  }
 0x1e1   : > { %15445 = vmatpush3.bf16.msra.mxu1 %v16914_v12  ;;  %v16953_v12 = vld [vmem:[%s17750_s6 + $0xf18] sm:$0xff]  }
 0x1e2   : > { %15446 = vmatprep.subr.bf16.mxu1 %v16916_v14  ;;  %v16955_v14 = vld [vmem:[%s17750_s6 + $0xf60] sm:$0xff]  }
 0x1e3   : > { %15425 = vmatpush3.bf16.msra.mxu0 %v16917_v15  ;;  %v16956_v15 = vld [vmem:[%s17750_s6 + $0xfe0] sm:$0xff]  }
 0x1e4   : > { %15426 = vmatprep.subr.bf16.mxu0 %v16919_v17  ;;  %v16958_v17 = vld [vmem:[%s17750_s6 + $0xfa0] sm:$0xff]  }
 0x1e5   : > { %15447 = vmatpush3.bf16.msra.mxu1 %v16918_v16  ;;  %v16957_v16 = vld [vmem:[%s17750_s6 + $0xf20] sm:$0xff]  }
 0x1e6   : > { %15448 = vmatprep.subr.bf16.mxu1 %v16920_v18  ;;  %v16959_v18 = vld [vmem:[%s17750_s6 + $0xf68] sm:$0xff]  }
 0x1e7   : > { %15427 = vmatpush3.bf16.msra.mxu0 %v16921_v19  ;;  %v16960_v19 = vld [vmem:[%s17750_s6 + $0xfe8] sm:$0xff]  }
 0x1e8   : > { %15428 = vmatprep.subr.bf16.mxu0 %v16923_v21  ;;  %v16962_v21 = vld [vmem:[%s17750_s6 + $0xfa8] sm:$0xff]  }
 0x1e9   : > { %15449 = vmatpush3.bf16.msra.mxu1 %v16922_v20  ;;  %v16961_v20 = vld [vmem:[%s17750_s6 + $0xf28] sm:$0xff]  }
 0x1ea   : > { %15450 = vmatprep.subr.bf16.mxu1 %v16924_v22  ;;  %v16963_v22 = vld [vmem:[%s17750_s6 + $0xf70] sm:$0xff]  }
 0x1eb   : > { %15429 = vmatpush3.bf16.msra.mxu0 %v16925_v23 }
 0x1ec   : > { %15430 = vmatprep.subr.bf16.mxu0 %v16927_v25 }
 0x1ed   : > { %15451 = vmatpush3.bf16.msra.mxu1 %v16926_v24  ;;  %v15128_v30 = vpop.f32.mrb[28].mxu0  ;;  %v16964_v24 = vld [vmem:[%s17750_s6 + $0xff0] sm:$0xff]  }
 0x1ee   : > { %v15129_v32 = vpop.f32.mrb[29].mxu0  ;;  %15452 = vmatprep.subr.bf16.mxu1 %v16928_v26  ;;  %v16965_v26 = vld [vmem:[%s17750_s6 + $0xf30] sm:$0xff]  }
 0x1ef   : > { %v15150_v34 = vpop.f32.mrb[28].mxu1  ;;  %v15130_v35 = vadd.f32 %v15129_v32, %v15128_v30  ;;  %v15131_v36 = vpop.f32.mrb[30].mxu0  ;;  %15431 = vmatpush3.bf16.msra.mxu0 %v16929_v27  ;;  %v16966_v30 = vld [vmem:[%s17750_s6 + $0xfb0] sm:$0xff]  }
 0x1f0   : > { %v15151_v39 = vpop.f32.mrb[29].mxu1  ;;  %v15132_v40 = vpop.f32.mrb[31].mxu0  ;;  %15432 = vmatprep.subr.bf16.mxu0 %v16931_v29 }
 0x1f1   : > { %v11143_v43 = vadd.f32 %v15130_v35, %v18302_v1  ;;  %v15152_v44 = vadd.f32 %v15151_v39, %v15150_v34  ;;  %v15153_v45 = vpop.f32.mrb[30].mxu1  ;;  %15453 = vmatpush3.bf16.msra.mxu1 %v16930_v28  ;;  %v2997_v1 = vrot.slane %v2969_v55, %v17788_v42  ;;  %v16969_v39 = vld [vmem:[%s17750_s6 + $0xf38] sm:$0xff]  }
 0x1f2   : > { %v15154_v47 = vpop.f32.mrb[31].mxu1  ;;  %15454 = vmatprep.subr.bf16.mxu1 %v16932_v31  ;;  %v16967_v31 = vld [vmem:[%s17750_s6 + $0xf78] sm:$0xff]   ;;  %v16973_v45 = vld [vmem:[%s17750_s6 + $0x10c0] sm:$0xff]  }
 0x1f3   : > { %v18341_v51 = vadd.f32 %v15152_v44, %v11143_v43  ;;  %15433 = vmatpush3.bf16.msra.mxu0 %v16933_v33  ;;  %v3001_v4 = vcombine.high %v2997_v1, %v2997_v1  ;;  %v2983_v43 = vrot.slane %v18347_v57, %v17788_v42  ;;  %v16972_v44 = vld [vmem:[%s17750_s6 + $0x1040] sm:$0xff]   ;;  %v16983_v57 = vld [vmem:[%s17750_s6 + $0x1090] sm:$0xff]   ;;  %v16987_v55 = vld [vmem:[%s17750_s6 + $0x1098] sm:$0xff]  }
 0x1f4   : > { %15434 = vmatprep.subr.bf16.mxu0 %v16935_v38  ;;  %v16975_v47 = vld [vmem:[%s17750_s6 + $0x1080] sm:$0xff]  }
 0x1f5   : > { %15455 = vmatpush3.bf16.msra.mxu1 %v16934_v37  ;;  %v16968_v37 = vld [vmem:[%s17750_s6 + $0xff8] sm:$0xff]  }
 0x1f6   : > { %15456 = vmatprep.subr.bf16.mxu1 %v16936_v41  ;;  %v16970_v41 = vld [vmem:[%s17750_s6 + $0xfb8] sm:$0xff]  }
 0x1f7   : > { %15435 = vmatpush3.bf16.msra.mxu0 %v16937_v48  ;;  %v2999_v48 = vcombine.high %v2983_v43, %v2983_v43 }
 0x1f8   : > { %15464 = vmatprep.subr.bf16.mxu0 %v16939_v56  ;;  %v16982_v56 = vld [vmem:[%s17750_s6 + $0x1010] sm:$0xff]  }
 0x1f9   : > { %15457 = vmatpush3.bf16.msra.mxu1 %v16938_v52  ;;  %v16979_v52 = vld [vmem:[%s17750_s6 + $0x1088] sm:$0xff]  }
 0x1fa   : > { %11701 = vmatmul.mubr.bf16.vlgmr.msra.gmra.mrb[56].mxu0 %v2976_v54  ;;  %15486 = vmatprep.subr.bf16.mxu1 %v16940_v58  ;;  %v16981_v54 = vld [vmem:[%s17750_s6 + $0x10d0] sm:$0xff]   ;;  %v16984_v58 = vld [vmem:[%s17750_s6 + $0x1058] sm:$0xff]  }
 0x1fb   : > { %15465 = vmatpush3.bf16.msra.mxu0 %v16941_v60  ;;  %11780 = vmatprep.mubr.bf16.mxu0 %v2997_v1  ;;  %v16986_v60 = vld [vmem:[%s17750_s6 + $0x1018] sm:$0xff]   ;;  %v16992_v1 = vld [vmem:[%s17750_s6 + $0x1068] sm:$0xff]  }
 0x1fc   : > { %11741 = vmatmul.mubr.bf16.vlgmr.msra.gmra.mrb[56].mxu1 %v2998_v63  ;;  %15466 = vmatprep.subr.bf16.mxu0 %v16943_v0  ;;  %v16990_v63 = vld [vmem:[%s17750_s6 + $0x1020] sm:$0xff]  }
 0x1fd   : > { %15487 = vmatpush3.bf16.msra.mxu1 %v16942_v61  ;;  %11820 = vmatprep.mubr.bf16.mxu1 %v3001_v4  ;;  %v16988_v61 = vld [vmem:[%s17750_s6 + $0x1060] sm:$0xff]   ;;  %v16995_v4 = vld [vmem:[%s17750_s6 + $0x10a8] sm:$0xff]  }
 0x1fe   : > { %15488 = vmatprep.subr.bf16.mxu1 %v16944_v2  ;;  %v16991_v0 = vld [vmem:[%s17750_s6 + $0x10a0] sm:$0xff]   ;;  %v16993_v2 = vld [vmem:[%s17750_s6 + $0x10e8] sm:$0xff]  }
 0x1ff   : > { %15467 = vmatpush3.bf16.msra.mxu0 %v16945_v3  ;;  %v16994_v3 = vld [vmem:[%s17750_s6 + $0x1028] sm:$0xff]  }
 0x200   : > { %15468 = vmatprep.subr.bf16.mxu0 %v16947_v6 }
 0x201   : > { %15489 = vmatpush3.bf16.msra.mxu1 %v16946_v5  ;;  %v16996_v5 = vld [vmem:[%s17750_s6 + $0x1070] sm:$0xff]  }
 0x202   : > { %15490 = vmatprep.subr.bf16.mxu1 %v16948_v7  ;;  %v16997_v7 = vld [vmem:[%s17750_s6 + $0x10f0] sm:$0xff]  }
 0x203   : > { %15469 = vmatpush3.bf16.msra.mxu0 %v16949_v8 }
 0x204   : > { %15470 = vmatprep.subr.bf16.mxu0 %v16951_v10 }
 0x205   : > { %15491 = vmatpush3.bf16.msra.mxu1 %v16950_v9  ;;  %v16998_v9 = vld [vmem:[%s17750_s6 + $0x1030] sm:$0xff]  }
 0x206   : > { %15492 = vmatprep.subr.bf16.mxu1 %v16952_v11 }
 0x207   : > { %15471 = vmatpush3.bf16.msra.mxu0 %v16953_v12 }
 0x208   : > { %15472 = vmatprep.subr.bf16.mxu0 %v16955_v14  ;;  %v17000_v14 = vld [vmem:[%s17750_s6 + $0x1078] sm:$0xff]  }
 0x209   : > { %15493 = vmatpush3.bf16.msra.mxu1 %v16954_v13  ;;  %v16999_v13 = vld [vmem:[%s17750_s6 + $0x10b0] sm:$0xff]  }
 0x20a   : > { %15494 = vmatprep.subr.bf16.mxu1 %v16956_v15 }
 0x20b   : > { %15473 = vmatpush3.bf16.msra.mxu0 %v16957_v16 }
 0x20c   : > { %15474 = vmatprep.subr.bf16.mxu0 %v16959_v18 }
 0x20d   : > { %15495 = vmatpush3.bf16.msra.mxu1 %v16958_v17  ;;  %v15172_v23 = vpop.f32.mrb[32].mxu0  ;;  %v17001_v17 = vld [vmem:[%s17750_s6 + $0x10f8] sm:$0xff]  }
 0x20e   : > { %v15173_v25 = vpop.f32.mrb[33].mxu0  ;;  %15496 = vmatprep.subr.bf16.mxu1 %v16960_v19 }
 0x20f   : > { %v15194_v27 = vpop.f32.mrb[32].mxu1  ;;  %v15174_v28 = vadd.f32 %v15173_v25, %v15172_v23  ;;  %v15175_v29 = vpop.f32.mrb[34].mxu0  ;;  %15475 = vmatpush3.bf16.msra.mxu0 %v16961_v20  ;;  %v278_v23 = vld [vmem:[%s17745_s27 + $0x40] sm:$0xff]  ;;  %v17003_v25 = vld [vmem:[%s17750_s6 + $0x10b8] sm:$0xff]  }
 0x210   : > { %v15195_v32 = vpop.f32.mrb[33].mxu1  ;;  %v15176_v33 = vpop.f32.mrb[35].mxu0  ;;  %15476 = vmatprep.subr.bf16.mxu0 %v16963_v22 }
 0x211   : > { %v11223_v34 = vadd.f32 %v15174_v28, %v18341_v51  ;;  %v15196_v35 = vadd.f32 %v15195_v32, %v15194_v27  ;;  %v15197_v36 = vpop.f32.mrb[34].mxu1  ;;  %15497 = vmatpush3.bf16.msra.mxu1 %v16962_v21  ;;  %v16978_v51 = vld [vmem:[%s17750_s6 + $0x1008] sm:$0xff]   ;;  %v17002_v21 = vld [vmem:[%s17750_s6 + $0x1038] sm:$0xff]   ;;  %v3002_v27 = vcombine.high %v278_v23, %v278_v23  ;;  %v17004_v28 = vld [vmem:[%s17750_s6 + $0x1140] sm:$0xff]  }
 0x212   : > { %v15198_v38 = vpop.f32.mrb[35].mxu1  ;;  %15498 = vmatprep.subr.bf16.mxu1 %v16964_v24  ;;  %v17006_v33 = vld [vmem:[%s17750_s6 + $0x1100] sm:$0xff]  }
 0x213   : > { %v18384_v40 = vadd.f32 %v15196_v35, %v11223_v34  ;;  %15477 = vmatpush3.bf16.msra.mxu0 %v16965_v26  ;;  %v3009_v26 = vrot.slane %v278_v23, %v17788_v42  ;;  %v18430_v32 = vrot.slane %v3002_v27, %v17788_v42  ;;  %v17007_v35 = vld [vmem:[%s17750_s6 + $0x1180] sm:$0xff]   ;;  %v17008_v38 = vld [vmem:[%s17750_s6 + $0x1148] sm:$0xff]  }
 0x214   : > { %15478 = vmatprep.subr.bf16.mxu0 %v16967_v31  ;;  %v17005_v31 = vld [vmem:[%s17750_s6 + $0x11c0] sm:$0xff]   ;;  %v17044_v27 = vld [vmem:[%s17750_s6 + $0x1288] sm:$0xff]  }
 0x215   : > { %15499 = vmatpush3.bf16.msra.mxu1 %v16966_v30  ;;  %v3017_v29 = vcombine.high %v3009_v26, %v3009_v26  ;;  %v3025_v30 = vrot.slane %v3009_v26, %v17788_v42  ;;  %v3018_v36 = vcombine.high %v18430_v32, %v18430_v32  ;;  %v17043_v26 = vld [vmem:[%s17750_s6 + $0x1208] sm:$0xff]  }
 0x216   : > { %15500 = vmatprep.subr.bf16.mxu1 %v16968_v37 }
 0x217   : > { %15479 = vmatpush3.bf16.msra.mxu0 %v16969_v39  ;;  %v3039_v34 = vrot.slane %v3017_v29, %v17788_v42  ;;  %v3047_v37 = vcombine.high %v3025_v30, %v3025_v30  ;;  %v17046_v29 = vld [vmem:[%s17750_s6 + $0x12d0] sm:$0xff]  }
 0x218   : > { %15508 = vmatprep.subr.bf16.mxu0 %v16972_v44  ;;  %v17011_v44 = vld [vmem:[%s17750_s6 + $0x1188] sm:$0xff]  }
 0x219   : > { %15501 = vmatpush3.bf16.msra.mxu1 %v16970_v41  ;;  %v3049_v39 = vcombine.high %v3039_v34, %v3039_v34  ;;  %v3046_v41 = vrot.slane %v3018_v36, %v17788_v42  ;;  %v17053_v36 = vld [vmem:[%s17750_s6 + $0x1260] sm:$0xff]  }
 0x21a   : > { %11781 = vmatmul.mubr.bf16.vlgmr.msra.gmra.mrb[60].mxu0 %v2983_v43  ;;  %15530 = vmatprep.subr.bf16.mxu1 %v16973_v45  ;;  %v17010_v43 = vld [vmem:[%s17750_s6 + $0x1108] sm:$0xff]  }
 0x21b   : > { %15509 = vmatpush3.bf16.msra.mxu0 %v16974_v46  ;;  %11860 = vmatprep.mubr.bf16.mxu0 %v3039_v34  ;;  %v3050_v45 = vcombine.high %v3046_v41, %v3046_v41  ;;  %v17012_v46 = vld [vmem:[%s17750_s6 + $0x1150] sm:$0xff]   ;;  %v17051_v34 = vld [vmem:[%s17750_s6 + $0x1218] sm:$0xff]  }
 0x21c   : > { %11821 = vmatmul.mubr.bf16.vlgmr.msra.gmra.mrb[60].mxu1 %v2999_v48  ;;  %15510 = vmatprep.subr.bf16.mxu0 %v16976_v49  ;;  %v17014_v48 = vld [vmem:[%s17750_s6 + $0x1110] sm:$0xff]  }
 0x21d   : > { %15531 = vmatpush3.bf16.msra.mxu1 %v16975_v47  ;;  %11900 = vmatprep.mubr.bf16.mxu1 %v3049_v39  ;;  %v17013_v47 = vld [vmem:[%s17750_s6 + $0x11d0] sm:$0xff]   ;;  %v17056_v39 = vld [vmem:[%s17750_s6 + $0x12a0] sm:$0xff]  }
 0x21e   : > { %15532 = vmatprep.subr.bf16.mxu1 %v16977_v50  ;;  %v17015_v49 = vld [vmem:[%s17750_s6 + $0x1190] sm:$0xff]   ;;  %v17016_v50 = vld [vmem:[%s17750_s6 + $0x1158] sm:$0xff]  }
 0x21f   : > { %15511 = vmatpush3.bf16.msra.mxu0 %v16978_v51  ;;  %v17017_v51 = vld [vmem:[%s17750_s6 + $0x11d8] sm:$0xff]  }
 0x220   : > { %15512 = vmatprep.subr.bf16.mxu0 %v16980_v53  ;;  %v17019_v53 = vld [vmem:[%s17750_s6 + $0x1198] sm:$0xff]  }
 0x221   : > { %15533 = vmatpush3.bf16.msra.mxu1 %v16979_v52  ;;  %v17018_v52 = vld [vmem:[%s17750_s6 + $0x1118] sm:$0xff]  }
 0x222   : > { %15534 = vmatprep.subr.bf16.mxu1 %v16981_v54  ;;  %v17020_v54 = vld [vmem:[%s17750_s6 + $0x1160] sm:$0xff]  }
 0x223   : > { %15513 = vmatpush3.bf16.msra.mxu0 %v16982_v56  ;;  %v17021_v56 = vld [vmem:[%s17750_s6 + $0x11e0] sm:$0xff]  }
 0x224   : > { %15514 = vmatprep.subr.bf16.mxu0 %v16984_v58  ;;  %v17023_v58 = vld [vmem:[%s17750_s6 + $0x11a0] sm:$0xff]  }
 0x225   : > { %15535 = vmatpush3.bf16.msra.mxu1 %v16983_v57  ;;  %v17022_v57 = vld [vmem:[%s17750_s6 + $0x1120] sm:$0xff]  }
 0x226   : > { %15536 = vmatprep.subr.bf16.mxu1 %v16985_v59  ;;  %v17024_v59 = vld [vmem:[%s17750_s6 + $0x1168] sm:$0xff]  }
 0x227   : > { %15515 = vmatpush3.bf16.msra.mxu0 %v16986_v60  ;;  %v17025_v60 = vld [vmem:[%s17750_s6 + $0x11e8] sm:$0xff]  }
 0x228   : > { %15516 = vmatprep.subr.bf16.mxu0 %v16988_v61  ;;  %v17027_v61 = vld [vmem:[%s17750_s6 + $0x11a8] sm:$0xff]  }
 0x229   : > { %15537 = vmatpush3.bf16.msra.mxu1 %v16987_v55  ;;  %v17026_v55 = vld [vmem:[%s17750_s6 + $0x1128] sm:$0xff]  }
 0x22a   : > { %15538 = vmatprep.subr.bf16.mxu1 %v16989_v62  ;;  %v17028_v62 = vld [vmem:[%s17750_s6 + $0x1170] sm:$0xff]  }
 0x22b   : > { %15517 = vmatpush3.bf16.msra.mxu0 %v16990_v63 }
 0x22c   : > { %15518 = vmatprep.subr.bf16.mxu0 %v16992_v1 }
 0x22d   : > { %15539 = vmatpush3.bf16.msra.mxu1 %v16991_v0  ;;  %v15216_v6 = vpop.f32.mrb[36].mxu0  ;;  %v17029_v0 = vld [vmem:[%s17750_s6 + $0x11f0] sm:$0xff]  }
 0x22e   : > { %v15217_v8 = vpop.f32.mrb[37].mxu0  ;;  %15540 = vmatprep.subr.bf16.mxu1 %v16993_v2  ;;  %v17030_v2 = vld [vmem:[%s17750_s6 + $0x1130] sm:$0xff]  }
 0x22f   : > { %v15238_v10 = vpop.f32.mrb[36].mxu1  ;;  %v15218_v11 = vadd.f32 %v15217_v8, %v15216_v6  ;;  %v15219_v12 = vpop.f32.mrb[38].mxu0  ;;  %15519 = vmatpush3.bf16.msra.mxu0 %v16994_v3  ;;  %v17031_v6 = vld [vmem:[%s17750_s6 + $0x11b0] sm:$0xff]  }
 0x230   : > { %v15239_v15 = vpop.f32.mrb[37].mxu1  ;;  %v15220_v16 = vpop.f32.mrb[39].mxu0  ;;  %15520 = vmatprep.subr.bf16.mxu0 %v16996_v5 }
 0x231   : > { %v11303_v18 = vadd.f32 %v15218_v11, %v18384_v40  ;;  %v15240_v19 = vadd.f32 %v15239_v15, %v15238_v10  ;;  %v15241_v20 = vpop.f32.mrb[38].mxu1  ;;  %15541 = vmatpush3.bf16.msra.mxu1 %v16995_v4  ;;  %v17009_v40 = vld [vmem:[%s17750_s6 + $0x11c8] sm:$0xff]   ;;  %v17034_v15 = vld [vmem:[%s17750_s6 + $0x1138] sm:$0xff]  }
 0x232   : > { %v15242_v22 = vpop.f32.mrb[39].mxu1  ;;  %15542 = vmatprep.subr.bf16.mxu1 %v16997_v7  ;;  %v17032_v7 = vld [vmem:[%s17750_s6 + $0x1178] sm:$0xff]   ;;  %v17038_v20 = vld [vmem:[%s17750_s6 + $0x12c0] sm:$0xff]  }
 0x233   : > { %v18422_v24 = vadd.f32 %v15240_v19, %v11303_v18  ;;  %15521 = vmatpush3.bf16.msra.mxu0 %v16998_v9  ;;  %v3032_v18 = vrot.slane %v18430_v32, %v17788_v42  ;;  %v17037_v19 = vld [vmem:[%s17750_s6 + $0x1240] sm:$0xff]   ;;  %v17049_v32 = vld [vmem:[%s17750_s6 + $0x1258] sm:$0xff]  }
 0x234   : > { %15522 = vmatprep.subr.bf16.mxu0 %v17000_v14  ;;  %v17040_v22 = vld [vmem:[%s17750_s6 + $0x1280] sm:$0xff]  }
 0x235   : > { %15543 = vmatpush3.bf16.msra.mxu1 %v16999_v13  ;;  %v17033_v13 = vld [vmem:[%s17750_s6 + $0x11f8] sm:$0xff]   ;;  %v3048_v23 = vcombine.high %v3032_v18, %v3032_v18 }
 0x236   : > { %15544 = vmatprep.subr.bf16.mxu1 %v17001_v17  ;;  %v17035_v17 = vld [vmem:[%s17750_s6 + $0x11b8] sm:$0xff]  }
 0x237   : > { %15523 = vmatpush3.bf16.msra.mxu0 %v17002_v21  ;;  %v17039_v21 = vld [vmem:[%s17750_s6 + $0x1200] sm:$0xff]  }
 0x238   : > { %15552 = vmatprep.subr.bf16.mxu0 %v17004_v28  ;;  %v17045_v28 = vld [vmem:[%s17750_s6 + $0x1250] sm:$0xff]  }
 0x239   : > { %15545 = vmatpush3.bf16.msra.mxu1 %v17003_v25  ;;  %v17042_v25 = vld [vmem:[%s17750_s6 + $0x12c8] sm:$0xff]  }
 0x23a   : > { %11861 = vmatmul.mubr.bf16.vlgmr.msra.gmra.mrb[64].mxu0 %v3025_v30  ;;  %15574 = vmatprep.subr.bf16.mxu1 %v17005_v31  ;;  %v17047_v30 = vld [vmem:[%s17750_s6 + $0x1210] sm:$0xff]  }
 0x23b   : > { %15553 = vmatpush3.bf16.msra.mxu0 %v17006_v33  ;;  %11940 = vmatprep.mubr.bf16.mxu0 %v3046_v41  ;;  %v17048_v31 = vld [vmem:[%s17750_s6 + $0x1290] sm:$0xff]   ;;  %v17050_v33 = vld [vmem:[%s17750_s6 + $0x12d8] sm:$0xff]   ;;  %v17058_v41 = vld [vmem:[%s17750_s6 + $0x12e8] sm:$0xff]  }
 0x23c   : > { %11901 = vmatmul.mubr.bf16.vlgmr.msra.gmra.mrb[64].mxu1 %v3047_v37  ;;  %15554 = vmatprep.subr.bf16.mxu0 %v17008_v38  ;;  %v17054_v37 = vld [vmem:[%s17750_s6 + $0x12e0] sm:$0xff]  }
 0x23d   : > { %15575 = vmatpush3.bf16.msra.mxu1 %v17007_v35  ;;  %11980 = vmatprep.mubr.bf16.mxu1 %v3050_v45  ;;  %v17052_v35 = vld [vmem:[%s17750_s6 + $0x1298] sm:$0xff]   ;;  %v17055_v38 = vld [vmem:[%s17750_s6 + $0x1220] sm:$0xff]   ;;  %v17061_v45 = vld [vmem:[%s17750_s6 + $0x1270] sm:$0xff]  }
 0x23e   : > { %15576 = vmatprep.subr.bf16.mxu1 %v17009_v40  ;;  %v17057_v40 = vld [vmem:[%s17750_s6 + $0x1268] sm:$0xff]  }
 0x23f   : > { %15555 = vmatpush3.bf16.msra.mxu0 %v17010_v43  ;;  %v17059_v43 = vld [vmem:[%s17750_s6 + $0x1228] sm:$0xff]  }
 0x240   : > { %15556 = vmatprep.subr.bf16.mxu0 %v17012_v46 }
 0x241   : > { %15577 = vmatpush3.bf16.msra.mxu1 %v17011_v44  ;;  %v17060_v44 = vld [vmem:[%s17750_s6 + $0x12a8] sm:$0xff]  }
 0x242   : > { %15578 = vmatprep.subr.bf16.mxu1 %v17013_v47  ;;  %v17062_v47 = vld [vmem:[%s17750_s6 + $0x12f0] sm:$0xff]  }
 0x243   : > { %15557 = vmatpush3.bf16.msra.mxu0 %v17014_v48 }
 0x244   : > { %15558 = vmatprep.subr.bf16.mxu0 %v17016_v50 }
 0x245   : > { %15579 = vmatpush3.bf16.msra.mxu1 %v17015_v49  ;;  %v17063_v49 = vld [vmem:[%s17750_s6 + $0x1230] sm:$0xff]  }
 0x246   : > { %15580 = vmatprep.subr.bf16.mxu1 %v17017_v51 }
 0x247   : > { %15559 = vmatpush3.bf16.msra.mxu0 %v17018_v52 }
 0x248   : > { %15560 = vmatprep.subr.bf16.mxu0 %v17020_v54  ;;  %v17065_v54 = vld [vmem:[%s17750_s6 + $0x1278] sm:$0xff]  }
 0x249   : > { %15581 = vmatpush3.bf16.msra.mxu1 %v17019_v53  ;;  %v17064_v53 = vld [vmem:[%s17750_s6 + $0x12b0] sm:$0xff]  }
 0x24a   : > { %15582 = vmatprep.subr.bf16.mxu1 %v17021_v56 }
 0x24b   : > { %15561 = vmatpush3.bf16.msra.mxu0 %v17022_v57 }
 0x24c   : > { %15562 = vmatprep.subr.bf16.mxu0 %v17024_v59 }
 0x24d   : > { %15583 = vmatpush3.bf16.msra.mxu1 %v17023_v58  ;;  %v15260_v63 = vpop.f32.mrb[40].mxu0 }
 0x24e   : > { %v15261_v1 = vpop.f32.mrb[41].mxu0  ;;  %15584 = vmatprep.subr.bf16.mxu1 %v17025_v60 }
 0x24f   : > { %v15282_v3 = vpop.f32.mrb[40].mxu1  ;;  %v15262_v4 = vadd.f32 %v15261_v1, %v15260_v63  ;;  %v15263_v5 = vpop.f32.mrb[42].mxu0  ;;  %15563 = vmatpush3.bf16.msra.mxu0 %v17026_v55  ;;  %v17066_v55 = vld [vmem:[%s17750_s6 + $0x12f8] sm:$0xff]  }
 0x250   : > { %v15283_v8 = vpop.f32.mrb[41].mxu1  ;;  %v15264_v9 = vpop.f32.mrb[43].mxu0  ;;  %15564 = vmatprep.subr.bf16.mxu0 %v17028_v62  ;;  %v17067_v62 = vld [vmem:[%s17750_s6 + $0x1238] sm:$0xff]  }
 0x251   : > { %v11383_v10 = vadd.f32 %v15262_v4, %v18422_v24  ;;  %v15284_v11 = vadd.f32 %v15283_v8, %v15282_v3  ;;  %v15285_v12 = vpop.f32.mrb[42].mxu1  ;;  %15585 = vmatpush3.bf16.msra.mxu1 %v17027_v61  ;;  %v17041_v24 = vld [vmem:[%s17750_s6 + $0x1248] sm:$0xff]   ;;  %v17068_v4 = vld [vmem:[%s17750_s6 + $0x12b8] sm:$0xff]  }
 0x252   : > { %v15286_v14 = vpop.f32.mrb[43].mxu1  ;;  %15586 = vmatprep.subr.bf16.mxu1 %v17029_v0  ;;  %v279_v0 = vld [vmem:[%s17745_s27 + $0x48] sm:$0xff] }
 0x253   : > { %v18466_v16 = vadd.f32 %v15284_v11, %v11383_v10  ;;  %15565 = vmatpush3.bf16.msra.mxu0 %v17030_v2  ;;  %v3058_v1 = vrot.slane %v279_v0, %v17788_v42  ;;  %v17069_v2 = vld [vmem:[%s17750_s6 + $0x1340] sm:$0xff]   ;;  %v3051_v3 = vcombine.high %v279_v0, %v279_v0 }
 0x254   : > { %15566 = vmatprep.subr.bf16.mxu0 %v17032_v7  ;;  %v17070_v7 = vld [vmem:[%s17750_s6 + $0x13c0] sm:$0xff]  }
 0x255   : > { %15587 = vmatpush3.bf16.msra.mxu1 %v17031_v6  ;;  %v3066_v5 = vcombine.high %v3058_v1, %v3058_v1  ;;  %v3074_v6 = vrot.slane %v3058_v1, %v17788_v42  ;;  %v18512_v8 = vrot.slane %v3051_v3, %v17788_v42  ;;  %v17071_v10 = vld [vmem:[%s17750_s6 + $0x1300] sm:$0xff]   ;;  %v17107_v1 = vld [vmem:[%s17750_s6 + $0x14c8] sm:$0xff]   ;;  %v17110_v3 = vld [vmem:[%s17750_s6 + $0x1450] sm:$0xff]  }
 0x256   : > { %15588 = vmatprep.subr.bf16.mxu1 %v17033_v13  ;;  %v17073_v13 = vld [vmem:[%s17750_s6 + $0x1348] sm:$0xff]   ;;  %v17105_v0 = vld [vmem:[%s17750_s6 + $0x1480] sm:$0xff]  }
 0x257   : > { %15567 = vmatpush3.bf16.msra.mxu0 %v17034_v15  ;;  %v3088_v9 = vrot.slane %v3066_v5, %v17788_v42  ;;  %v3067_v11 = vcombine.high %v18512_v8, %v18512_v8  ;;  %v3096_v12 = vcombine.high %v3074_v6, %v3074_v6  ;;  %v17072_v15 = vld [vmem:[%s17750_s6 + $0x1380] sm:$0xff]   ;;  %v17111_v5 = vld [vmem:[%s17750_s6 + $0x14d0] sm:$0xff]  }
 0x258   : > { %15596 = vmatprep.subr.bf16.mxu0 %v17037_v19 }
 0x259   : > { %15589 = vmatpush3.bf16.msra.mxu1 %v17035_v17  ;;  %v3098_v14 = vcombine.high %v3088_v9, %v3088_v9  ;;  %v17074_v17 = vld [vmem:[%s17750_s6 + $0x13c8] sm:$0xff]  }
 0x25a   : > { %11941 = vmatmul.mubr.bf16.vlgmr.msra.gmra.mrb[68].mxu0 %v3032_v18  ;;  %15618 = vmatprep.subr.bf16.mxu1 %v17038_v20  ;;  %v17075_v18 = vld [vmem:[%s17750_s6 + $0x1308] sm:$0xff]   ;;  %v17077_v20 = vld [vmem:[%s17750_s6 + $0x1350] sm:$0xff]  }
 0x25b   : > { %15597 = vmatpush3.bf16.msra.mxu0 %v17039_v21  ;;  %12020 = vmatprep.mubr.bf16.mxu0 %v3088_v9  ;;  %v17076_v21 = vld [vmem:[%s17750_s6 + $0x1388] sm:$0xff]   ;;  %v17115_v9 = vld [vmem:[%s17750_s6 + $0x14d8] sm:$0xff]  }
 0x25c   : > { %11981 = vmatmul.mubr.bf16.vlgmr.msra.gmra.mrb[68].mxu1 %v3048_v23  ;;  %15598 = vmatprep.subr.bf16.mxu0 %v17041_v24  ;;  %v17079_v23 = vld [vmem:[%s17750_s6 + $0x1310] sm:$0xff]   ;;  %v17081_v24 = vld [vmem:[%s17750_s6 + $0x1358] sm:$0xff]  }
 0x25d   : > { %15619 = vmatpush3.bf16.msra.mxu1 %v17040_v22  ;;  %12060 = vmatprep.mubr.bf16.mxu1 %v3098_v14  ;;  %v17078_v22 = vld [vmem:[%s17750_s6 + $0x13d0] sm:$0xff]   ;;  %v17120_v14 = vld [vmem:[%s17750_s6 + $0x1420] sm:$0xff]  }
 0x25e   : > { %15620 = vmatprep.subr.bf16.mxu1 %v17042_v25  ;;  %v17080_v25 = vld [vmem:[%s17750_s6 + $0x1390] sm:$0xff]  }
 0x25f   : > { %15599 = vmatpush3.bf16.msra.mxu0 %v17043_v26  ;;  %v17082_v26 = vld [vmem:[%s17750_s6 + $0x13d8] sm:$0xff]  }
 0x260   : > { %15600 = vmatprep.subr.bf16.mxu0 %v17045_v28  ;;  %v17085_v28 = vld [vmem:[%s17750_s6 + $0x1360] sm:$0xff]  }
 0x261   : > { %15621 = vmatpush3.bf16.msra.mxu1 %v17044_v27  ;;  %v17083_v27 = vld [vmem:[%s17750_s6 + $0x1318] sm:$0xff]  }
 0x262   : > { %15622 = vmatprep.subr.bf16.mxu1 %v17046_v29  ;;  %v17084_v29 = vld [vmem:[%s17750_s6 + $0x1398] sm:$0xff]  }
 0x263   : > { %15601 = vmatpush3.bf16.msra.mxu0 %v17047_v30  ;;  %v17086_v30 = vld [vmem:[%s17750_s6 + $0x13e0] sm:$0xff]  }
 0x264   : > { %15602 = vmatprep.subr.bf16.mxu0 %v17049_v32  ;;  %v17089_v32 = vld [vmem:[%s17750_s6 + $0x1368] sm:$0xff]  }
 0x265   : > { %15623 = vmatpush3.bf16.msra.mxu1 %v17048_v31  ;;  %v17087_v31 = vld [vmem:[%s17750_s6 + $0x1320] sm:$0xff]  }
 0x266   : > { %15624 = vmatprep.subr.bf16.mxu1 %v17050_v33  ;;  %v17088_v33 = vld [vmem:[%s17750_s6 + $0x13a0] sm:$0xff]  }
 0x267   : > { %15603 = vmatpush3.bf16.msra.mxu0 %v17051_v34  ;;  %v17090_v34 = vld [vmem:[%s17750_s6 + $0x13e8] sm:$0xff]  }
 0x268   : > { %15604 = vmatprep.subr.bf16.mxu0 %v17053_v36 }
 0x269   : > { %15625 = vmatpush3.bf16.msra.mxu1 %v17052_v35  ;;  %v17091_v35 = vld [vmem:[%s17750_s6 + $0x1328] sm:$0xff]  }
 0x26a   : > { %15626 = vmatprep.subr.bf16.mxu1 %v17054_v37  ;;  %v17093_v37 = vld [vmem:[%s17750_s6 + $0x1370] sm:$0xff]  }
 0x26b   : > { %15605 = vmatpush3.bf16.msra.mxu0 %v17055_v38 }
 0x26c   : > { %15606 = vmatprep.subr.bf16.mxu0 %v17057_v40 }
 0x26d   : > { %15627 = vmatpush3.bf16.msra.mxu1 %v17056_v39  ;;  %v15304_v46 = vpop.f32.mrb[44].mxu0  ;;  %v17092_v39 = vld [vmem:[%s17750_s6 + $0x13a8] sm:$0xff]  }
 0x26e   : > { %v15305_v48 = vpop.f32.mrb[45].mxu0  ;;  %15628 = vmatprep.subr.bf16.mxu1 %v17058_v41 }
 0x26f   : > { %v15326_v50 = vpop.f32.mrb[44].mxu1  ;;  %v15306_v51 = vadd.f32 %v15305_v48, %v15304_v46  ;;  %v15307_v52 = vpop.f32.mrb[46].mxu0  ;;  %15607 = vmatpush3.bf16.msra.mxu0 %v17059_v43 }
 0x270   : > { %v15327_v56 = vpop.f32.mrb[45].mxu1  ;;  %v15308_v57 = vpop.f32.mrb[47].mxu0  ;;  %15608 = vmatprep.subr.bf16.mxu0 %v17061_v45  ;;  %v17095_v45 = vld [vmem:[%s17750_s6 + $0x1330] sm:$0xff]  }
 0x271   : > { %v11463_v58 = vadd.f32 %v15306_v51, %v18466_v16  ;;  %v15328_v59 = vadd.f32 %v15327_v56, %v15326_v50  ;;  %v15329_v60 = vpop.f32.mrb[46].mxu1  ;;  %15629 = vmatpush3.bf16.msra.mxu1 %v17060_v44  ;;  %v3095_v16 = vrot.slane %v3067_v11, %v17788_v42  ;;  %v17094_v44 = vld [vmem:[%s17750_s6 + $0x13f0] sm:$0xff]   ;;  %v17097_v51 = vld [vmem:[%s17750_s6 + $0x1378] sm:$0xff]   ;;  %v17118_v11 = vld [vmem:[%s17750_s6 + $0x1460] sm:$0xff]  }
 0x272   : > { %v15330_v61 = vpop.f32.mrb[47].mxu1  ;;  %15630 = vmatprep.subr.bf16.mxu1 %v17062_v47  ;;  %v17098_v56 = vld [vmem:[%s17750_s6 + $0x13f8] sm:$0xff]  }
 0x273   : > { %v18503_v63 = vadd.f32 %v15328_v59, %v11463_v58  ;;  %15609 = vmatpush3.bf16.msra.mxu0 %v17063_v49  ;;  %v3099_v19 = vcombine.high %v3095_v16, %v3095_v16  ;;  %v17099_v57 = vld [vmem:[%s17750_s6 + $0x1338] sm:$0xff]   ;;  %v3081_v58 = vrot.slane %v18512_v8, %v17788_v42  ;;  %v17102_v59 = vld [vmem:[%s17750_s6 + $0x1440] sm:$0xff]   ;;  %v17113_v8 = vld [vmem:[%s17750_s6 + $0x1490] sm:$0xff]  }
 0x274   : > { %15610 = vmatprep.subr.bf16.mxu0 %v17065_v54  ;;  %v17100_v60 = vld [vmem:[%s17750_s6 + $0x13b8] sm:$0xff]   ;;  %v17104_v61 = vld [vmem:[%s17750_s6 + $0x1400] sm:$0xff]  }
 0x275   : > { %15631 = vmatpush3.bf16.msra.mxu1 %v17064_v53  ;;  %v17096_v53 = vld [vmem:[%s17750_s6 + $0x13b0] sm:$0xff]  }
 0x276   : > { %15632 = vmatprep.subr.bf16.mxu1 %v17066_v55  ;;  %v17103_v55 = vld [vmem:[%s17750_s6 + $0x14c0] sm:$0xff]  }
 0x277   : > { %15611 = vmatpush3.bf16.msra.mxu0 %v17067_v62  ;;  %v3097_v62 = vcombine.high %v3081_v58, %v3081_v58 }
 0x278   : > { %15640 = vmatprep.subr.bf16.mxu0 %v17069_v2  ;;  %v17108_v2 = vld [vmem:[%s17750_s6 + $0x1408] sm:$0xff]  }
 0x279   : > { %15633 = vmatpush3.bf16.msra.mxu1 %v17068_v4  ;;  %v17109_v4 = vld [vmem:[%s17750_s6 + $0x1488] sm:$0xff]  }
 0x27a   : > { %15662 = vmatprep.subr.bf16.mxu1 %v17070_v7  ;;  %12021 = vmatmul.mubr.bf16.vlgmr.msra.gmra.mrb[72].mxu0 %v3074_v6  ;;  %v17112_v6 = vld [vmem:[%s17750_s6 + $0x1410] sm:$0xff]   ;;  %v17114_v7 = vld [vmem:[%s17750_s6 + $0x1458] sm:$0xff]  }
 0x27b   : > { %15641 = vmatpush3.bf16.msra.mxu0 %v17071_v10  ;;  %12100 = vmatprep.mubr.bf16.mxu0 %v3095_v16  ;;  %v17116_v10 = vld [vmem:[%s17750_s6 + $0x1418] sm:$0xff]   ;;  %v17121_v16 = vld [vmem:[%s17750_s6 + $0x14a0] sm:$0xff]  }
 0x27c   : > { %12061 = vmatmul.mubr.bf16.vlgmr.msra.gmra.mrb[72].mxu1 %v3096_v12  ;;  %15642 = vmatprep.subr.bf16.mxu0 %v17073_v13  ;;  %v17117_v12 = vld [vmem:[%s17750_s6 + $0x1498] sm:$0xff]   ;;  %v17119_v13 = vld [vmem:[%s17750_s6 + $0x14e0] sm:$0xff]  }
 0x27d   : > { %15663 = vmatpush3.bf16.msra.mxu1 %v17072_v15  ;;  %12140 = vmatprep.mubr.bf16.mxu1 %v3099_v19  ;;  %v17122_v15 = vld [vmem:[%s17750_s6 + $0x1468] sm:$0xff]  }
 0x27e   : > { %15664 = vmatprep.subr.bf16.mxu1 %v17074_v17  ;;  %v17123_v17 = vld [vmem:[%s17750_s6 + $0x14e8] sm:$0xff]  }
 0x27f   : > { %15643 = vmatpush3.bf16.msra.mxu0 %v17075_v18  ;;  %v17124_v18 = vld [vmem:[%s17750_s6 + $0x1428] sm:$0xff]  }
 0x280   : > { %15644 = vmatprep.subr.bf16.mxu0 %v17077_v20  ;;  %v17126_v20 = vld [vmem:[%s17750_s6 + $0x1470] sm:$0xff]  }
 0x281   : > { %15665 = vmatpush3.bf16.msra.mxu1 %v17076_v21 }
 0x282   : > { %15666 = vmatprep.subr.bf16.mxu1 %v17078_v22  ;;  %v17125_v22 = vld [vmem:[%s17750_s6 + $0x14a8] sm:$0xff]  }
 0x283   : > { %15645 = vmatpush3.bf16.msra.mxu0 %v17079_v23 }
 0x284   : > { %15646 = vmatprep.subr.bf16.mxu0 %v17081_v24 }
 0x285   : > { %15667 = vmatpush3.bf16.msra.mxu1 %v17080_v25 }
 0x286   : > { %15668 = vmatprep.subr.bf16.mxu1 %v17082_v26  ;;  %v17127_v26 = vld [vmem:[%s17750_s6 + $0x14f0] sm:$0xff]  }
 0x287   : > { %15647 = vmatpush3.bf16.msra.mxu0 %v17083_v27  ;;  %v17128_v27 = vld [vmem:[%s17750_s6 + $0x1430] sm:$0xff]  }
 0x288   : > { %15648 = vmatprep.subr.bf16.mxu0 %v17085_v28 }
 0x289   : > { %15669 = vmatpush3.bf16.msra.mxu1 %v17084_v29 }
 0x28a   : > { %15670 = vmatprep.subr.bf16.mxu1 %v17086_v30  ;;  %v17129_v30 = vld [vmem:[%s17750_s6 + $0x14b0] sm:$0xff]  }
 0x28b   : > { %15649 = vmatpush3.bf16.msra.mxu0 %v17087_v31 }
 0x28c   : > { %15650 = vmatprep.subr.bf16.mxu0 %v17089_v32 }
 0x28d   : > { %v15348_v36 = vpop.f32.mrb[48].mxu0  ;;  %15671 = vmatpush3.bf16.msra.mxu1 %v17088_v33 }
 0x28e   : > { %v15349_v38 = vpop.f32.mrb[49].mxu0  ;;  %15672 = vmatprep.subr.bf16.mxu1 %v17090_v34  ;;  %v17130_v34 = vld [vmem:[%s17750_s6 + $0x1478] sm:$0xff]  }
 0x28f   : > { %v15370_v40 = vpop.f32.mrb[48].mxu1  ;;  %v15350_v41 = vadd.f32 %v15349_v38, %v15348_v36  ;;  %v15351_v43 = vpop.f32.mrb[50].mxu0  ;;  %15651 = vmatpush3.bf16.msra.mxu0 %v17091_v35  ;;  %v17131_v36 = vld [vmem:[%s17750_s6 + $0x14f8] sm:$0xff]  }
 0x290   : > { %v15371_v46 = vpop.f32.mrb[49].mxu1  ;;  %v15352_v47 = vpop.f32.mrb[51].mxu0  ;;  %15652 = vmatprep.subr.bf16.mxu0 %v17093_v37  ;;  %v17132_v38 = vld [vmem:[%s17750_s6 + $0x1438] sm:$0xff]  }
 0x291   : > { %v11543_v48 = vadd.f32 %v15350_v41, %v18503_v63  ;;  %v15372_v49 = vadd.f32 %v15371_v46, %v15370_v40  ;;  %v15373_v50 = vpop.f32.mrb[50].mxu1  ;;  %15673 = vmatpush3.bf16.msra.mxu1 %v17092_v39  ;;  %v17106_v63 = vld [vmem:[%s17750_s6 + $0x1448] sm:$0xff]   ;;  %v280_v39 = vld [vmem:[%s17745_s27 + $0x50] sm:$0xff]  ;;  %v17134_v41 = vld [vmem:[%s17750_s6 + $0x1540] sm:$0xff]  }
 0x292   : > { %v15374_v52 = vpop.f32.mrb[51].mxu1  ;;  %15674 = vmatprep.subr.bf16.mxu1 %v17094_v44  ;;  %v3107_v40 = vrot.slane %v280_v39, %v17788_v42  ;;  %v3100_v43 = vcombine.high %v280_v39, %v280_v39  ;;  %v17133_v44 = vld [vmem:[%s17750_s6 + $0x14b8] sm:$0xff]   ;;  %v17135_v47 = vld [vmem:[%s17750_s6 + $0x15c0] sm:$0xff]   ;;  %v17171_v39 = vld [vmem:[%s17750_s6 + $0x1648] sm:$0xff]  }
 0x293   : > { %v18546_v54 = vadd.f32 %v15372_v49, %v11543_v48  ;;  %15653 = vmatpush3.bf16.msra.mxu0 %v17095_v45  ;;  %v17136_v49 = vld [vmem:[%s17750_s6 + $0x1500] sm:$0xff]  }
 0x294   : > { %15654 = vmatprep.subr.bf16.mxu0 %v17097_v51  ;;  %v3115_v45 = vcombine.high %v3107_v40, %v3107_v40  ;;  %v3123_v46 = vrot.slane %v3107_v40, %v17788_v42  ;;  %v18594_v48 = vrot.slane %v3100_v43, %v17788_v42  ;;  %v17137_v51 = vld [vmem:[%s17750_s6 + $0x1580] sm:$0xff]   ;;  %v17172_v40 = vld [vmem:[%s17750_s6 + $0x16c8] sm:$0xff]  }
 0x295   : > { %15675 = vmatpush3.bf16.msra.mxu1 %v17096_v53  ;;  %v17174_v43 = vld [vmem:[%s17750_s6 + $0x1688] sm:$0xff]  }
 0x296   : > { %15676 = vmatprep.subr.bf16.mxu1 %v17098_v56  ;;  %v3137_v50 = vrot.slane %v3115_v45, %v17788_v42  ;;  %v3116_v52 = vcombine.high %v18594_v48, %v18594_v48  ;;  %v3145_v53 = vcombine.high %v3123_v46, %v3123_v46  ;;  %v17176_v45 = vld [vmem:[%s17750_s6 + $0x16d0] sm:$0xff]  }
 0x297   : > { %15655 = vmatpush3.bf16.msra.mxu0 %v17099_v57  ;;  %v17139_v57 = vld [vmem:[%s17750_s6 + $0x15c8] sm:$0xff]  }
 0x298   : > { %15684 = vmatprep.subr.bf16.mxu0 %v17102_v59  ;;  %v3147_v56 = vcombine.high %v3137_v50, %v3137_v50  ;;  %v17140_v59 = vld [vmem:[%s17750_s6 + $0x1508] sm:$0xff]  }
 0x299   : > { %15677 = vmatpush3.bf16.msra.mxu1 %v17100_v60  ;;  %v17141_v60 = vld [vmem:[%s17750_s6 + $0x1588] sm:$0xff]  }
 0x29a   : > { %12101 = vmatmul.mubr.bf16.vlgmr.msra.gmra.mrb[76].mxu0 %v3081_v58  ;;  %15706 = vmatprep.subr.bf16.mxu1 %v17103_v55  ;;  %v3144_v58 = vrot.slane %v3116_v52, %v17788_v42  ;;  %v17183_v52 = vld [vmem:[%s17750_s6 + $0x1660] sm:$0xff]  }
 0x29b   : > { %15685 = vmatpush3.bf16.msra.mxu0 %v17104_v61  ;;  %12180 = vmatprep.mubr.bf16.mxu0 %v3137_v50  ;;  %v17142_v61 = vld [vmem:[%s17750_s6 + $0x1550] sm:$0xff]   ;;  %v17181_v50 = vld [vmem:[%s17750_s6 + $0x1618] sm:$0xff]  }
 0x29c   : > { %12141 = vmatmul.mubr.bf16.vlgmr.msra.gmra.mrb[76].mxu1 %v3097_v62  ;;  %15686 = vmatprep.subr.bf16.mxu0 %v17106_v63  ;;  %v3148_v55 = vcombine.high %v3144_v58, %v3144_v58  ;;  %v17143_v62 = vld [vmem:[%s17750_s6 + $0x15d0] sm:$0xff]  }
 0x29d   : > { %15707 = vmatpush3.bf16.msra.mxu1 %v17105_v0  ;;  %12220 = vmatprep.mubr.bf16.mxu1 %v3147_v56  ;;  %v17144_v63 = vld [vmem:[%s17750_s6 + $0x1510] sm:$0xff]   ;;  %v17186_v56 = vld [vmem:[%s17750_s6 + $0x16a0] sm:$0xff]  }
 0x29e   : > { %15708 = vmatprep.subr.bf16.mxu1 %v17107_v1  ;;  %v17145_v0 = vld [vmem:[%s17750_s6 + $0x1590] sm:$0xff]   ;;  %v17146_v1 = vld [vmem:[%s17750_s6 + $0x1558] sm:$0xff]  }
 0x29f   : > { %15687 = vmatpush3.bf16.msra.mxu0 %v17108_v2  ;;  %v17147_v2 = vld [vmem:[%s17750_s6 + $0x15d8] sm:$0xff]  }
 0x2a0   : > { %15688 = vmatprep.subr.bf16.mxu0 %v17110_v3  ;;  %v17148_v3 = vld [vmem:[%s17750_s6 + $0x1518] sm:$0xff]  }
 0x2a1   : > { %15709 = vmatpush3.bf16.msra.mxu1 %v17109_v4  ;;  %v17149_v4 = vld [vmem:[%s17750_s6 + $0x1598] sm:$0xff]  }
 0x2a2   : > { %15710 = vmatprep.subr.bf16.mxu1 %v17111_v5  ;;  %v17150_v5 = vld [vmem:[%s17750_s6 + $0x1560] sm:$0xff]  }
 0x2a3   : > { %15689 = vmatpush3.bf16.msra.mxu0 %v17112_v6  ;;  %v17151_v6 = vld [vmem:[%s17750_s6 + $0x15e0] sm:$0xff]  }
 0x2a4   : > { %15690 = vmatprep.subr.bf16.mxu0 %v17114_v7  ;;  %v17152_v7 = vld [vmem:[%s17750_s6 + $0x1520] sm:$0xff]  }
 0x2a5   : > { %15711 = vmatpush3.bf16.msra.mxu1 %v17113_v8  ;;  %v17153_v8 = vld [vmem:[%s17750_s6 + $0x15a0] sm:$0xff]  }
 0x2a6   : > { %15712 = vmatprep.subr.bf16.mxu1 %v17115_v9  ;;  %v17154_v9 = vld [vmem:[%s17750_s6 + $0x1568] sm:$0xff]  }
 0x2a7   : > { %15691 = vmatpush3.bf16.msra.mxu0 %v17116_v10  ;;  %v17155_v10 = vld [vmem:[%s17750_s6 + $0x15e8] sm:$0xff]  }
 0x2a8   : > { %15692 = vmatprep.subr.bf16.mxu0 %v17118_v11  ;;  %v17156_v11 = vld [vmem:[%s17750_s6 + $0x1528] sm:$0xff]  }
 0x2a9   : > { %15713 = vmatpush3.bf16.msra.mxu1 %v17117_v12 }
 0x2aa   : > { %15714 = vmatprep.subr.bf16.mxu1 %v17119_v13  ;;  %v17157_v13 = vld [vmem:[%s17750_s6 + $0x15a8] sm:$0xff]  }
 0x2ab   : > { %15693 = vmatpush3.bf16.msra.mxu0 %v17120_v14 }
 0x2ac   : > { %15694 = vmatprep.subr.bf16.mxu0 %v17122_v15  ;;  %v17158_v15 = vld [vmem:[%s17750_s6 + $0x1570] sm:$0xff]  }
 0x2ad   : > { %v15392_v19 = vpop.f32.mrb[52].mxu0  ;;  %15715 = vmatpush3.bf16.msra.mxu1 %v17121_v16 }
 0x2ae   : > { %v15393_v21 = vpop.f32.mrb[53].mxu0  ;;  %15716 = vmatprep.subr.bf16.mxu1 %v17123_v17 }
 0x2af   : > { %v15414_v23 = vpop.f32.mrb[52].mxu1  ;;  %v15394_v24 = vadd.f32 %v15393_v21, %v15392_v19  ;;  %v15395_v25 = vpop.f32.mrb[54].mxu0  ;;  %15695 = vmatpush3.bf16.msra.mxu0 %v17124_v18  ;;  %v17159_v19 = vld [vmem:[%s17750_s6 + $0x15f0] sm:$0xff]  }
 0x2b0   : > { %v15415_v28 = vpop.f32.mrb[53].mxu1  ;;  %v15396_v29 = vpop.f32.mrb[55].mxu0  ;;  %15696 = vmatprep.subr.bf16.mxu0 %v17126_v20  ;;  %v17160_v20 = vld [vmem:[%s17750_s6 + $0x1530] sm:$0xff]  }
 0x2b1   : > { %v11623_v31 = vadd.f32 %v15394_v24, %v18546_v54  ;;  %v15416_v32 = vadd.f32 %v15415_v28, %v15414_v23  ;;  %v15417_v33 = vpop.f32.mrb[54].mxu1  ;;  %15717 = vmatpush3.bf16.msra.mxu1 %v17125_v22  ;;  %v17138_v54 = vld [vmem:[%s17750_s6 + $0x1548] sm:$0xff]   ;;  %v17162_v28 = vld [vmem:[%s17750_s6 + $0x1578] sm:$0xff]  }
 0x2b2   : > { %v15418_v35 = vpop.f32.mrb[55].mxu1  ;;  %15718 = vmatprep.subr.bf16.mxu1 %v17127_v26  ;;  %v17161_v26 = vld [vmem:[%s17750_s6 + $0x15b0] sm:$0xff]   ;;  %v3130_v33 = vrot.slane %v18594_v48, %v17788_v42  ;;  %v17179_v48 = vld [vmem:[%s17750_s6 + $0x1658] sm:$0xff]  }
 0x2b3   : > { %v18584_v37 = vadd.f32 %v15416_v32, %v11623_v31  ;;  %15697 = vmatpush3.bf16.msra.mxu0 %v17128_v27  ;;  %v17164_v31 = vld [vmem:[%s17750_s6 + $0x1538] sm:$0xff]   ;;  %v17168_v35 = vld [vmem:[%s17750_s6 + $0x16c0] sm:$0xff]  }
 0x2b4   : > { %15698 = vmatprep.subr.bf16.mxu0 %v17130_v34  ;;  %v17165_v32 = vld [vmem:[%s17750_s6 + $0x15b8] sm:$0xff]   ;;  %v17167_v34 = vld [vmem:[%s17750_s6 + $0x1640] sm:$0xff]  }
 0x2b5   : > { %15719 = vmatpush3.bf16.msra.mxu1 %v17129_v30  ;;  %v17163_v30 = vld [vmem:[%s17750_s6 + $0x15f8] sm:$0xff]  }
 0x2b6   : > { %15720 = vmatprep.subr.bf16.mxu1 %v17131_v36  ;;  %v17169_v36 = vld [vmem:[%s17750_s6 + $0x1600] sm:$0xff]  }
 0x2b7   : > { %15699 = vmatpush3.bf16.msra.mxu0 %v17132_v38  ;;  %v3146_v38 = vcombine.high %v3130_v33, %v3130_v33 }
 0x2b8   : > { %15728 = vmatprep.subr.bf16.mxu0 %v17134_v41  ;;  %v17173_v41 = vld [vmem:[%s17750_s6 + $0x1608] sm:$0xff]  }
 0x2b9   : > { %15721 = vmatpush3.bf16.msra.mxu1 %v17133_v44  ;;  %v17175_v44 = vld [vmem:[%s17750_s6 + $0x1650] sm:$0xff]  }
 0x2ba   : > { %15750 = vmatprep.subr.bf16.mxu1 %v17135_v47  ;;  %12181 = vmatmul.mubr.bf16.vlgmr.msra.gmra.mrb[80].mxu0 %v3123_v46  ;;  %v17177_v46 = vld [vmem:[%s17750_s6 + $0x1610] sm:$0xff]  }
 0x2bb   : > { %15729 = vmatpush3.bf16.msra.mxu0 %v17136_v49  ;;  %12260 = vmatprep.mubr.bf16.mxu0 %v3144_v58  ;;  %v17178_v47 = vld [vmem:[%s17750_s6 + $0x1690] sm:$0xff]   ;;  %v17180_v49 = vld [vmem:[%s17750_s6 + $0x16d8] sm:$0xff]   ;;  %v17188_v58 = vld [vmem:[%s17750_s6 + $0x16e8] sm:$0xff]  }
 0x2bc   : > { %12221 = vmatmul.mubr.bf16.vlgmr.msra.gmra.mrb[80].mxu1 %v3145_v53  ;;  %15730 = vmatprep.subr.bf16.mxu0 %v17138_v54  ;;  %v17184_v53 = vld [vmem:[%s17750_s6 + $0x16e0] sm:$0xff]  }
 0x2bd   : > { %15751 = vmatpush3.bf16.msra.mxu1 %v17137_v51  ;;  %12300 = vmatprep.mubr.bf16.mxu1 %v3148_v55  ;;  %v17182_v51 = vld [vmem:[%s17750_s6 + $0x1698] sm:$0xff]   ;;  %v17185_v54 = vld [vmem:[%s17750_s6 + $0x1620] sm:$0xff]   ;;  %v17190_v55 = vld [vmem:[%s17750_s6 + $0x16a8] sm:$0xff]  }
 0x2be   : > { %15752 = vmatprep.subr.bf16.mxu1 %v17139_v57  ;;  %v17187_v57 = vld [vmem:[%s17750_s6 + $0x1668] sm:$0xff]  }
 0x2bf   : > { %15731 = vmatpush3.bf16.msra.mxu0 %v17140_v59  ;;  %v17189_v59 = vld [vmem:[%s17750_s6 + $0x1628] sm:$0xff]  }
 0x2c0   : > { %15732 = vmatprep.subr.bf16.mxu0 %v17142_v61 }
 0x2c1   : > { %15753 = vmatpush3.bf16.msra.mxu1 %v17141_v60 }
 0x2c2   : > { %15754 = vmatprep.subr.bf16.mxu1 %v17143_v62  ;;  %v17191_v62 = vld [vmem:[%s17750_s6 + $0x1670] sm:$0xff]  }
 0x2c3   : > { %15733 = vmatpush3.bf16.msra.mxu0 %v17144_v63 }
 0x2c4   : > { %15734 = vmatprep.subr.bf16.mxu0 %v17146_v1 }
 0x2c5   : > { %15755 = vmatpush3.bf16.msra.mxu1 %v17145_v0 }
 0x2c6   : > { %15756 = vmatprep.subr.bf16.mxu1 %v17147_v2  ;;  %v17192_v2 = vld [vmem:[%s17750_s6 + $0x16f0] sm:$0xff]  }
 0x2c7   : > { %15735 = vmatpush3.bf16.msra.mxu0 %v17148_v3  ;;  %v17193_v3 = vld [vmem:[%s17750_s6 + $0x1630] sm:$0xff]  }
 0x2c8   : > { %15736 = vmatprep.subr.bf16.mxu0 %v17150_v5 }
 0x2c9   : > { %15757 = vmatpush3.bf16.msra.mxu1 %v17149_v4 }
 0x2ca   : > { %15758 = vmatprep.subr.bf16.mxu1 %v17151_v6 }
 0x2cb   : > { %15737 = vmatpush3.bf16.msra.mxu0 %v17152_v7 }
 0x2cc   : > { %15738 = vmatprep.subr.bf16.mxu0 %v17154_v9  ;;  %v17194_v9 = vld [vmem:[%s17750_s6 + $0x16b0] sm:$0xff]  }
 0x2cd   : > { %v15436_v12 = vpop.f32.mrb[56].mxu0  ;;  %15759 = vmatpush3.bf16.msra.mxu1 %v17153_v8 }
 0x2ce   : > { %v15437_v14 = vpop.f32.mrb[57].mxu0  ;;  %15760 = vmatprep.subr.bf16.mxu1 %v17155_v10 }
 0x2cf   : > { %v15458_v16 = vpop.f32.mrb[56].mxu1  ;;  %v15438_v17 = vadd.f32 %v15437_v14, %v15436_v12  ;;  %v15439_v18 = vpop.f32.mrb[58].mxu0  ;;  %15739 = vmatpush3.bf16.msra.mxu0 %v17156_v11  ;;  %v17195_v11 = vld [vmem:[%s17750_s6 + $0x1678] sm:$0xff]  }
 0x2d0   : > { %v15459_v21 = vpop.f32.mrb[57].mxu1  ;;  %v15440_v22 = vpop.f32.mrb[59].mxu0  ;;  %15740 = vmatprep.subr.bf16.mxu0 %v17158_v15  ;;  %v17197_v14 = vld [vmem:[%s17750_s6 + $0x1638] sm:$0xff]  }
 0x2d1   : > { %v11703_v23 = vadd.f32 %v15438_v17, %v18584_v37  ;;  %v15460_v24 = vadd.f32 %v15459_v21, %v15458_v16  ;;  %v15461_v25 = vpop.f32.mrb[58].mxu1  ;;  %15761 = vmatpush3.bf16.msra.mxu1 %v17157_v13  ;;  %v17170_v37 = vld [vmem:[%s17750_s6 + $0x1680] sm:$0xff]   ;;  %v17196_v13 = vld [vmem:[%s17750_s6 + $0x16f8] sm:$0xff]  }
 0x2d2   : > { %v15462_v27 = vpop.f32.mrb[59].mxu1  ;;  %15762 = vmatprep.subr.bf16.mxu1 %v17159_v19  ;;  %v281_v15 = vld [vmem:[%s17745_s27 + $0x58] sm:$0xff]  ;;  %v17199_v17 = vld [vmem:[%s17750_s6 + $0x1740] sm:$0xff]  }
 0x2d3   : > { %v18628_v29 = vadd.f32 %v15460_v24, %v11703_v23  ;;  %15741 = vmatpush3.bf16.msra.mxu0 %v17160_v20  ;;  %v3156_v16 = vrot.slane %v281_v15, %v17788_v42  ;;  %v3149_v18 = vcombine.high %v281_v15, %v281_v15  ;;  %v17198_v19 = vld [vmem:[%s17750_s6 + $0x16b8] sm:$0xff]   ;;  %v17200_v22 = vld [vmem:[%s17750_s6 + $0x17c0] sm:$0xff]   ;;  %v17236_v15 = vld [vmem:[%s17750_s6 + $0x1848] sm:$0xff]  }
 0x2d4   : > { %15742 = vmatprep.subr.bf16.mxu0 %v17162_v28  ;;  %v17201_v24 = vld [vmem:[%s17750_s6 + $0x1700] sm:$0xff]  }
 0x2d5   : > { %15763 = vmatpush3.bf16.msra.mxu1 %v17161_v26  ;;  %v3164_v20 = vcombine.high %v3156_v16, %v3156_v16  ;;  %v3172_v21 = vrot.slane %v3156_v16, %v17788_v42  ;;  %v18676_v23 = vrot.slane %v3149_v18, %v17788_v42  ;;  %v17202_v26 = vld [vmem:[%s17750_s6 + $0x1780] sm:$0xff]   ;;  %v17237_v16 = vld [vmem:[%s17750_s6 + $0x18c8] sm:$0xff]  }
 0x2d6   : > { %15764 = vmatprep.subr.bf16.mxu1 %v17163_v30  ;;  %v17239_v18 = vld [vmem:[%s17750_s6 + $0x1888] sm:$0xff]  }
 0x2d7   : > { %15743 = vmatpush3.bf16.msra.mxu0 %v17164_v31  ;;  %v3186_v25 = vrot.slane %v3164_v20, %v17788_v42  ;;  %v3165_v27 = vcombine.high %v18676_v23, %v18676_v23  ;;  %v3194_v28 = vcombine.high %v3172_v21, %v3172_v21  ;;  %v17204_v31 = vld [vmem:[%s17750_s6 + $0x17c8] sm:$0xff]   ;;  %v17241_v20 = vld [vmem:[%s17750_s6 + $0x18d0] sm:$0xff]  }
 0x2d8   : > { %15772 = vmatprep.subr.bf16.mxu0 %v17167_v34  ;;  %v17206_v34 = vld [vmem:[%s17750_s6 + $0x1788] sm:$0xff]  }
 0x2d9   : > { %15765 = vmatpush3.bf16.msra.mxu1 %v17165_v32  ;;  %v3196_v30 = vcombine.high %v3186_v25, %v3186_v25  ;;  %v3193_v32 = vrot.slane %v3165_v27, %v17788_v42  ;;  %v17248_v27 = vld [vmem:[%s17750_s6 + $0x1860] sm:$0xff]  }
 0x2da   : > { %12261 = vmatmul.mubr.bf16.vlgmr.msra.gmra.mrb[84].mxu0 %v3130_v33  ;;  %15794 = vmatprep.subr.bf16.mxu1 %v17168_v35  ;;  %v17205_v33 = vld [vmem:[%s17750_s6 + $0x1708] sm:$0xff]  }
 0x2db   : > { %15773 = vmatpush3.bf16.msra.mxu0 %v17169_v36  ;;  %12340 = vmatprep.mubr.bf16.mxu0 %v3186_v25  ;;  %v3197_v35 = vcombine.high %v3193_v32, %v3193_v32  ;;  %v17207_v36 = vld [vmem:[%s17750_s6 + $0x1750] sm:$0xff]   ;;  %v17246_v25 = vld [vmem:[%s17750_s6 + $0x1818] sm:$0xff]  }
 0x2dc   : > { %12301 = vmatmul.mubr.bf16.vlgmr.msra.gmra.mrb[84].mxu1 %v3146_v38  ;;  %15774 = vmatprep.subr.bf16.mxu0 %v17171_v39  ;;  %v17209_v38 = vld [vmem:[%s17750_s6 + $0x1710] sm:$0xff]  }
 0x2dd   : > { %15795 = vmatpush3.bf16.msra.mxu1 %v17170_v37  ;;  %12380 = vmatprep.mubr.bf16.mxu1 %v3196_v30  ;;  %v17208_v37 = vld [vmem:[%s17750_s6 + $0x17d0] sm:$0xff]   ;;  %v17251_v30 = vld [vmem:[%s17750_s6 + $0x18a0] sm:$0xff]  }
 0x2de   : > { %15796 = vmatprep.subr.bf16.mxu1 %v17172_v40  ;;  %v17210_v39 = vld [vmem:[%s17750_s6 + $0x1790] sm:$0xff]   ;;  %v17211_v40 = vld [vmem:[%s17750_s6 + $0x1758] sm:$0xff]  }
 0x2df   : > { %15775 = vmatpush3.bf16.msra.mxu0 %v17173_v41  ;;  %v17212_v41 = vld [vmem:[%s17750_s6 + $0x17d8] sm:$0xff]  }
 0x2e0   : > { %15776 = vmatprep.subr.bf16.mxu0 %v17175_v44  ;;  %v17214_v44 = vld [vmem:[%s17750_s6 + $0x1798] sm:$0xff]  }
 0x2e1   : > { %15797 = vmatpush3.bf16.msra.mxu1 %v17174_v43  ;;  %v17213_v43 = vld [vmem:[%s17750_s6 + $0x1718] sm:$0xff]  }
 0x2e2   : > { %15798 = vmatprep.subr.bf16.mxu1 %v17176_v45  ;;  %v17215_v45 = vld [vmem:[%s17750_s6 + $0x1760] sm:$0xff]  }
 0x2e3   : > { %15777 = vmatpush3.bf16.msra.mxu0 %v17177_v46  ;;  %v17216_v46 = vld [vmem:[%s17750_s6 + $0x17e0] sm:$0xff]  }
 0x2e4   : > { %15778 = vmatprep.subr.bf16.mxu0 %v17179_v48  ;;  %v17218_v48 = vld [vmem:[%s17750_s6 + $0x17a0] sm:$0xff]  }
 0x2e5   : > { %15799 = vmatpush3.bf16.msra.mxu1 %v17178_v47  ;;  %v17217_v47 = vld [vmem:[%s17750_s6 + $0x1720] sm:$0xff]  }
 0x2e6   : > { %15800 = vmatprep.subr.bf16.mxu1 %v17180_v49  ;;  %v17219_v49 = vld [vmem:[%s17750_s6 + $0x1768] sm:$0xff]  }
 0x2e7   : > { %15779 = vmatpush3.bf16.msra.mxu0 %v17181_v50  ;;  %v17220_v50 = vld [vmem:[%s17750_s6 + $0x17e8] sm:$0xff]  }
 0x2e8   : > { %15780 = vmatprep.subr.bf16.mxu0 %v17183_v52  ;;  %v17221_v52 = vld [vmem:[%s17750_s6 + $0x1728] sm:$0xff]  }
 0x2e9   : > { %15801 = vmatpush3.bf16.msra.mxu1 %v17182_v51 }
 0x2ea   : > { %15802 = vmatprep.subr.bf16.mxu1 %v17184_v53 }
 0x2eb   : > { %15781 = vmatpush3.bf16.msra.mxu0 %v17185_v54  ;;  %v17222_v54 = vld [vmem:[%s17750_s6 + $0x17a8] sm:$0xff]  }
 0x2ec   : > { %15782 = vmatprep.subr.bf16.mxu0 %v17187_v57 }
 0x2ed   : > { %v15480_v60 = vpop.f32.mrb[60].mxu0  ;;  %15803 = vmatpush3.bf16.msra.mxu1 %v17186_v56 }
 0x2ee   : > { %v15481_v61 = vpop.f32.mrb[61].mxu0  ;;  %15804 = vmatprep.subr.bf16.mxu1 %v17188_v58 }
 0x2ef   : > { %v15502_v63 = vpop.f32.mrb[60].mxu1  ;;  %v15482_v0 = vadd.f32 %v15481_v61, %v15480_v60  ;;  %v15483_v1 = vpop.f32.mrb[62].mxu0  ;;  %15783 = vmatpush3.bf16.msra.mxu0 %v17189_v59  ;;  %v17223_v59 = vld [vmem:[%s17750_s6 + $0x1770] sm:$0xff]  }
 0x2f0   : > { %v15503_v4 = vpop.f32.mrb[61].mxu1  ;;  %v15484_v5 = vpop.f32.mrb[63].mxu0  ;;  %15784 = vmatprep.subr.bf16.mxu0 %v17191_v62  ;;  %v17224_v60 = vld [vmem:[%s17750_s6 + $0x17f0] sm:$0xff]  }
 0x2f1   : > { %v11783_v6 = vadd.f32 %v15482_v0, %v18628_v29  ;;  %v15504_v7 = vadd.f32 %v15503_v4, %v15502_v63  ;;  %v15505_v8 = vpop.f32.mrb[62].mxu1  ;;  %15805 = vmatpush3.bf16.msra.mxu1 %v17190_v55  ;;  %v17203_v29 = vld [vmem:[%s17750_s6 + $0x1748] sm:$0xff]   ;;  %v17225_v1 = vld [vmem:[%s17750_s6 + $0x1730] sm:$0xff]   ;;  %v17227_v5 = vld [vmem:[%s17750_s6 + $0x1778] sm:$0xff]  }
 0x2f2   : > { %v15506_v10 = vpop.f32.mrb[63].mxu1  ;;  %15806 = vmatprep.subr.bf16.mxu1 %v17192_v2  ;;  %v17230_v8 = vld [vmem:[%s17750_s6 + $0x17b8] sm:$0xff]  }
 0x2f3   : > { %v18665_v12 = vadd.f32 %v15504_v7, %v11783_v6  ;;  %15785 = vmatpush3.bf16.msra.mxu0 %v17193_v3  ;;  %v17226_v3 = vld [vmem:[%s17750_s6 + $0x17b0] sm:$0xff]   ;;  %v17228_v6 = vld [vmem:[%s17750_s6 + $0x17f8] sm:$0xff]   ;;  %v17232_v10 = vld [vmem:[%s17750_s6 + $0x1840] sm:$0xff]  }
 0x2f4   : > { %15786 = vmatprep.subr.bf16.mxu0 %v17195_v11  ;;  %v17229_v7 = vld [vmem:[%s17750_s6 + $0x1738] sm:$0xff]   ;;  %v17233_v11 = vld [vmem:[%s17750_s6 + $0x18c0] sm:$0xff]  }
 0x2f5   : > { %15807 = vmatpush3.bf16.msra.mxu1 %v17194_v9  ;;  %v3179_v9 = vrot.slane %v18676_v23, %v17788_v42  ;;  %v17244_v23 = vld [vmem:[%s17750_s6 + $0x1858] sm:$0xff]  }
 0x2f6   : > { %15808 = vmatprep.subr.bf16.mxu1 %v17196_v13  ;;  %v17235_v13 = vld [vmem:[%s17750_s6 + $0x1880] sm:$0xff]  }
 0x2f7   : > { %15787 = vmatpush3.bf16.msra.mxu0 %v17197_v14  ;;  %v3195_v14 = vcombine.high %v3179_v9, %v3179_v9 }
 0x2f8   : > { %15816 = vmatprep.subr.bf16.mxu0 %v17199_v17  ;;  %v17238_v17 = vld [vmem:[%s17750_s6 + $0x1808] sm:$0xff]  }
 0x2f9   : > { %15809 = vmatpush3.bf16.msra.mxu1 %v17198_v19  ;;  %v17240_v19 = vld [vmem:[%s17750_s6 + $0x1850] sm:$0xff]  }
 0x2fa   : > { %15838 = vmatprep.subr.bf16.mxu1 %v17200_v22  ;;  %12341 = vmatmul.mubr.bf16.vlgmr.msra.gmra.mrb[88].mxu0 %v3172_v21  ;;  %v17242_v21 = vld [vmem:[%s17750_s6 + $0x1810] sm:$0xff]  }
 0x2fb   : > { %15817 = vmatpush3.bf16.msra.mxu0 %v17201_v24  ;;  %12420 = vmatprep.mubr.bf16.mxu0 %v3193_v32  ;;  %v17243_v22 = vld [vmem:[%s17750_s6 + $0x1890] sm:$0xff]   ;;  %v17245_v24 = vld [vmem:[%s17750_s6 + $0x18d8] sm:$0xff]   ;;  %v17253_v32 = vld [vmem:[%s17750_s6 + $0x18e8] sm:$0xff]  }
 0x2fc   : > { %12381 = vmatmul.mubr.bf16.vlgmr.msra.gmra.mrb[88].mxu1 %v3194_v28  ;;  %15818 = vmatprep.subr.bf16.mxu0 %v17203_v29  ;;  %v17249_v28 = vld [vmem:[%s17750_s6 + $0x18e0] sm:$0xff]  }
 0x2fd   : > { %15839 = vmatpush3.bf16.msra.mxu1 %v17202_v26  ;;  %12460 = vmatprep.mubr.bf16.mxu1 %v3197_v35  ;;  %v17247_v26 = vld [vmem:[%s17750_s6 + $0x1898] sm:$0xff]   ;;  %v17250_v29 = vld [vmem:[%s17750_s6 + $0x1820] sm:$0xff]  }
 0x2fe   : > { %15840 = vmatprep.subr.bf16.mxu1 %v17204_v31  ;;  %v17252_v31 = vld [vmem:[%s17750_s6 + $0x1868] sm:$0xff]  }
 0x2ff   : > { %15819 = vmatpush3.bf16.msra.mxu0 %v17205_v33 }
 0x300   : > { %15820 = vmatprep.subr.bf16.mxu0 %v17207_v36  ;;  %v17255_v36 = vld [vmem:[%s17750_s6 + $0x18a8] sm:$0xff]  }
 0x301   : > { %15841 = vmatpush3.bf16.msra.mxu1 %v17206_v34  ;;  %v17254_v34 = vld [vmem:[%s17750_s6 + $0x1828] sm:$0xff]  }
 0x302   : > { %15842 = vmatprep.subr.bf16.mxu1 %v17208_v37 }
 0x303   : > { %15821 = vmatpush3.bf16.msra.mxu0 %v17209_v38 }
 0x304   : > { %15822 = vmatprep.subr.bf16.mxu0 %v17211_v40  ;;  %v17256_v40 = vld [vmem:[%s17750_s6 + $0x1870] sm:$0xff]  }
 0x305   : > { %15843 = vmatpush3.bf16.msra.mxu1 %v17210_v39 }
 0x306   : > { %15844 = vmatprep.subr.bf16.mxu1 %v17212_v41  ;;  %v17257_v41 = vld [vmem:[%s17750_s6 + $0x18f0] sm:$0xff]  }
 0x307   : > { %15823 = vmatpush3.bf16.msra.mxu0 %v17213_v43 }
 0x308   : > { %15824 = vmatprep.subr.bf16.mxu0 %v17215_v45 }
 0x309   : > { %15845 = vmatpush3.bf16.msra.mxu1 %v17214_v44 }
 0x30a   : > { %15846 = vmatprep.subr.bf16.mxu1 %v17216_v46 }
 0x30b   : > { %15825 = vmatpush3.bf16.msra.mxu0 %v17217_v47 }
 0x30c   : > { %15826 = vmatprep.subr.bf16.mxu0 %v17219_v49 }
 0x30d   : > { %v15524_v51 = vpop.f32.mrb[64].mxu0  ;;  %15847 = vmatpush3.bf16.msra.mxu1 %v17218_v48  ;;  %v17258_v48 = vld [vmem:[%s17750_s6 + $0x1830] sm:$0xff]  }
 0x30e   : > { %v15525_v53 = vpop.f32.mrb[65].mxu0  ;;  %15848 = vmatprep.subr.bf16.mxu1 %v17220_v50  ;;  %v17259_v50 = vld [vmem:[%s17750_s6 + $0x18b0] sm:$0xff]  }
 0x30f   : > { %v15546_v56 = vpop.f32.mrb[64].mxu1  ;;  %v15526_v57 = vadd.f32 %v15525_v53, %v15524_v51  ;;  %v15527_v58 = vpop.f32.mrb[66].mxu0  ;;  %15827 = vmatpush3.bf16.msra.mxu0 %v17221_v52  ;;  %v17260_v52 = vld [vmem:[%s17750_s6 + $0x1878] sm:$0xff]  }
 0x310   : > { %v15547_v55 = vpop.f32.mrb[65].mxu1  ;;  %v15528_v61 = vpop.f32.mrb[67].mxu0  ;;  %15828 = vmatprep.subr.bf16.mxu0 %v17223_v59  ;;  %v17261_v53 = vld [vmem:[%s17750_s6 + $0x18f8] sm:$0xff]   ;;  %v17264_v58 = vld [vmem:[%s17750_s6 + $0x1940] sm:$0xff]  }
 0x311   : > { %v11863_v62 = vadd.f32 %v15526_v57, %v18665_v12  ;;  %v15548_v63 = vadd.f32 %v15547_v55, %v15546_v56  ;;  %v15549_v0 = vpop.f32.mrb[66].mxu1  ;;  %15849 = vmatpush3.bf16.msra.mxu1 %v17222_v54  ;;  %v17234_v12 = vld [vmem:[%s17750_s6 + $0x1800] sm:$0xff]   ;;  %v17262_v54 = vld [vmem:[%s17750_s6 + $0x1838] sm:$0xff]  }
 0x312   : > { %v15550_v2 = vpop.f32.mrb[67].mxu1  ;;  %15850 = vmatprep.subr.bf16.mxu1 %v17224_v60  ;;  %v282_v56 = vld [vmem:[%s17745_s27 + $0x60] sm:$0xff]  ;;  %v17263_v60 = vld [vmem:[%s17750_s6 + $0x18b8] sm:$0xff]  }
 0x313   : > { %v18709_v4 = vadd.f32 %v15548_v63, %v11863_v62  ;;  %15829 = vmatpush3.bf16.msra.mxu0 %v17225_v1  ;;  %v3205_v57 = vrot.slane %v282_v56, %v17788_v42  ;;  %v3198_v59 = vcombine.high %v282_v56, %v282_v56  ;;  %v17265_v62 = vld [vmem:[%s17750_s6 + $0x19c0] sm:$0xff]   ;;  %v17301_v56 = vld [vmem:[%s17750_s6 + $0x1a48] sm:$0xff]  }
 0x314   : > { %15830 = vmatprep.subr.bf16.mxu0 %v17227_v5  ;;  %v17266_v0 = vld [vmem:[%s17750_s6 + $0x1900] sm:$0xff]   ;;  %v17268_v5 = vld [vmem:[%s17750_s6 + $0x1948] sm:$0xff]  }
 0x315   : > { %15851 = vmatpush3.bf16.msra.mxu1 %v17226_v3  ;;  %v3213_v55 = vcombine.high %v3205_v57, %v3205_v57  ;;  %v3221_v61 = vrot.slane %v3205_v57, %v17788_v42  ;;  %v18758_v63 = vrot.slane %v3198_v59, %v17788_v42  ;;  %v17267_v2 = vld [vmem:[%s17750_s6 + $0x1980] sm:$0xff]   ;;  %v17302_v57 = vld [vmem:[%s17750_s6 + $0x1ac8] sm:$0xff]  }
 0x316   : > { %15852 = vmatprep.subr.bf16.mxu1 %v17228_v6  ;;  %v17304_v59 = vld [vmem:[%s17750_s6 + $0x1a88] sm:$0xff]  }
 0x317   : > { %15831 = vmatpush3.bf16.msra.mxu0 %v17229_v7  ;;  %v3235_v1 = vrot.slane %v3213_v55, %v17788_v42  ;;  %v3214_v3 = vcombine.high %v18758_v63, %v18758_v63  ;;  %v17269_v7 = vld [vmem:[%s17750_s6 + $0x19c8] sm:$0xff]   ;;  %v17306_v55 = vld [vmem:[%s17750_s6 + $0x1ad0] sm:$0xff]  }
 0x318   : > { %15860 = vmatprep.subr.bf16.mxu0 %v17232_v10  ;;  %v17271_v10 = vld [vmem:[%s17750_s6 + $0x1988] sm:$0xff]  }
 0x319   : > { %15853 = vmatpush3.bf16.msra.mxu1 %v17230_v8  ;;  %v3245_v6 = vcombine.high %v3235_v1, %v3235_v1  ;;  %v3242_v8 = vrot.slane %v3214_v3, %v17788_v42  ;;  %v17313_v3 = vld [vmem:[%s17750_s6 + $0x1a60] sm:$0xff]  }
 0x31a   : > { %12421 = vmatmul.mubr.bf16.vlgmr.msra.gmra.mrb[92].mxu0 %v3179_v9  ;;  %15882 = vmatprep.subr.bf16.mxu1 %v17233_v11  ;;  %v17270_v9 = vld [vmem:[%s17750_s6 + $0x1908] sm:$0xff]  }
 0x31b   : > { %15861 = vmatpush3.bf16.msra.mxu0 %v17234_v12  ;;  %12500 = vmatprep.mubr.bf16.mxu0 %v3235_v1  ;;  %v3246_v11 = vcombine.high %v3242_v8, %v3242_v8  ;;  %v17272_v12 = vld [vmem:[%s17750_s6 + $0x1950] sm:$0xff]   ;;  %v17311_v1 = vld [vmem:[%s17750_s6 + $0x1a18] sm:$0xff]  }
 0x31c   : > { %12461 = vmatmul.mubr.bf16.vlgmr.msra.gmra.mrb[92].mxu1 %v3195_v14  ;;  %15862 = vmatprep.subr.bf16.mxu0 %v17236_v15  ;;  %v17274_v14 = vld [vmem:[%s17750_s6 + $0x1910] sm:$0xff]  }
 0x31d   : > { %15883 = vmatpush3.bf16.msra.mxu1 %v17235_v13  ;;  %12540 = vmatprep.mubr.bf16.mxu1 %v3245_v6  ;;  %v17273_v13 = vld [vmem:[%s17750_s6 + $0x19d0] sm:$0xff]   ;;  %v17316_v6 = vld [vmem:[%s17750_s6 + $0x1aa0] sm:$0xff]  }
 0x31e   : > { %15884 = vmatprep.subr.bf16.mxu1 %v17237_v16  ;;  %v17275_v15 = vld [vmem:[%s17750_s6 + $0x1990] sm:$0xff]   ;;  %v17276_v16 = vld [vmem:[%s17750_s6 + $0x1958] sm:$0xff]  }
 0x31f   : > { %15863 = vmatpush3.bf16.msra.mxu0 %v17238_v17  ;;  %v17277_v17 = vld [vmem:[%s17750_s6 + $0x19d8] sm:$0xff]  }
 0x320   : > { %15864 = vmatprep.subr.bf16.mxu0 %v17240_v19  ;;  %v17279_v19 = vld [vmem:[%s17750_s6 + $0x1998] sm:$0xff]  }
 0x321   : > { %15885 = vmatpush3.bf16.msra.mxu1 %v17239_v18  ;;  %v17278_v18 = vld [vmem:[%s17750_s6 + $0x1918] sm:$0xff]  }
 0x322   : > { %15886 = vmatprep.subr.bf16.mxu1 %v17241_v20  ;;  %v17280_v20 = vld [vmem:[%s17750_s6 + $0x1960] sm:$0xff]  }
 0x323   : > { %15865 = vmatpush3.bf16.msra.mxu0 %v17242_v21  ;;  %v17281_v21 = vld [vmem:[%s17750_s6 + $0x19e0] sm:$0xff]  }
 0x324   : > { %15866 = vmatprep.subr.bf16.mxu0 %v17244_v23  ;;  %v17283_v23 = vld [vmem:[%s17750_s6 + $0x19a0] sm:$0xff]  }
 0x325   : > { %15887 = vmatpush3.bf16.msra.mxu1 %v17243_v22  ;;  %v17282_v22 = vld [vmem:[%s17750_s6 + $0x1920] sm:$0xff]  }
 0x326   : > { %15888 = vmatprep.subr.bf16.mxu1 %v17245_v24  ;;  %v17284_v24 = vld [vmem:[%s17750_s6 + $0x1968] sm:$0xff]  }
 0x327   : > { %15867 = vmatpush3.bf16.msra.mxu0 %v17246_v25  ;;  %v17285_v25 = vld [vmem:[%s17750_s6 + $0x19e8] sm:$0xff]  }
 0x328   : > { %15868 = vmatprep.subr.bf16.mxu0 %v17248_v27  ;;  %v17286_v27 = vld [vmem:[%s17750_s6 + $0x1928] sm:$0xff]  }
 0x329   : > { %15889 = vmatpush3.bf16.msra.mxu1 %v17247_v26 }
 0x32a   : > { %15890 = vmatprep.subr.bf16.mxu1 %v17249_v28 }
 0x32b   : > { %15869 = vmatpush3.bf16.msra.mxu0 %v17250_v29  ;;  %v17287_v29 = vld [vmem:[%s17750_s6 + $0x19a8] sm:$0xff]  }
 0x32c   : > { %15870 = vmatprep.subr.bf16.mxu0 %v17252_v31 }
 0x32d   : > { %v15568_v33 = vpop.f32.mrb[68].mxu0  ;;  %15891 = vmatpush3.bf16.msra.mxu1 %v17251_v30 }
 0x32e   : > { %v15569_v35 = vpop.f32.mrb[69].mxu0  ;;  %15892 = vmatprep.subr.bf16.mxu1 %v17253_v32 }
 0x32f   : > { %v15590_v37 = vpop.f32.mrb[68].mxu1  ;;  %v15570_v38 = vadd.f32 %v15569_v35, %v15568_v33  ;;  %v15571_v39 = vpop.f32.mrb[70].mxu0  ;;  %15871 = vmatpush3.bf16.msra.mxu0 %v17254_v34  ;;  %v17288_v33 = vld [vmem:[%s17750_s6 + $0x1970] sm:$0xff]  }
 0x330   : > { %v15591_v43 = vpop.f32.mrb[69].mxu1  ;;  %v15572_v44 = vpop.f32.mrb[71].mxu0  ;;  %15872 = vmatprep.subr.bf16.mxu0 %v17256_v40  ;;  %v17289_v34 = vld [vmem:[%s17750_s6 + $0x19f0] sm:$0xff]  }
 0x331   : > { %v11943_v45 = vadd.f32 %v15570_v38, %v18709_v4  ;;  %v15592_v46 = vadd.f32 %v15591_v43, %v15590_v37  ;;  %v15593_v47 = vpop.f32.mrb[70].mxu1  ;;  %15893 = vmatpush3.bf16.msra.mxu1 %v17255_v36  ;;  %v3243_v4 = vcombine.high %v3221_v61, %v3221_v61  ;;  %v17290_v40 = vld [vmem:[%s17750_s6 + $0x1930] sm:$0xff]  }
 0x332   : > { %v15594_v49 = vpop.f32.mrb[71].mxu1  ;;  %15894 = vmatprep.subr.bf16.mxu1 %v17257_v41  ;;  %v17291_v43 = vld [vmem:[%s17750_s6 + $0x19b0] sm:$0xff]   ;;  %v17294_v47 = vld [vmem:[%s17750_s6 + $0x1938] sm:$0xff]  }
 0x333   : > { %v18746_v51 = vadd.f32 %v15592_v46, %v11943_v45  ;;  %15873 = vmatpush3.bf16.msra.mxu0 %v17258_v48  ;;  %v17292_v45 = vld [vmem:[%s17750_s6 + $0x1978] sm:$0xff]   ;;  %v3228_v49 = vrot.slane %v18758_v63, %v17788_v42 }
 0x334   : > { %15874 = vmatprep.subr.bf16.mxu0 %v17260_v52  ;;  %v17293_v46 = vld [vmem:[%s17750_s6 + $0x19f8] sm:$0xff]   ;;  %v17299_v52 = vld [vmem:[%s17750_s6 + $0x1a00] sm:$0xff]  }
 0x335   : > { %15895 = vmatpush3.bf16.msra.mxu1 %v17259_v50  ;;  %v17295_v48 = vld [vmem:[%s17750_s6 + $0x19b8] sm:$0xff]   ;;  %v17297_v50 = vld [vmem:[%s17750_s6 + $0x1a40] sm:$0xff]  }
 0x336   : > { %15896 = vmatprep.subr.bf16.mxu1 %v17261_v53  ;;  %v17300_v53 = vld [vmem:[%s17750_s6 + $0x1a80] sm:$0xff]   ;;  %v17309_v63 = vld [vmem:[%s17750_s6 + $0x1a58] sm:$0xff]  }
 0x337   : > { %15875 = vmatpush3.bf16.msra.mxu0 %v17262_v54  ;;  %v3244_v54 = vcombine.high %v3228_v49, %v3228_v49 }
 0x338   : > { %15904 = vmatprep.subr.bf16.mxu0 %v17264_v58  ;;  %v17303_v58 = vld [vmem:[%s17750_s6 + $0x1a08] sm:$0xff]  }
 0x339   : > { %15897 = vmatpush3.bf16.msra.mxu1 %v17263_v60  ;;  %v17305_v60 = vld [vmem:[%s17750_s6 + $0x1a50] sm:$0xff]  }
 0x33a   : > { %15926 = vmatprep.subr.bf16.mxu1 %v17265_v62  ;;  %12501 = vmatmul.mubr.bf16.vlgmr.msra.gmra.mrb[96].mxu0 %v3221_v61  ;;  %v17307_v61 = vld [vmem:[%s17750_s6 + $0x1a10] sm:$0xff]  }
 0x33b   : > { %15905 = vmatpush3.bf16.msra.mxu0 %v17266_v0  ;;  %12580 = vmatprep.mubr.bf16.mxu0 %v3242_v8  ;;  %v17308_v62 = vld [vmem:[%s17750_s6 + $0x1a90] sm:$0xff]   ;;  %v17310_v0 = vld [vmem:[%s17750_s6 + $0x1ad8] sm:$0xff]   ;;  %v17318_v8 = vld [vmem:[%s17750_s6 + $0x1ae8] sm:$0xff]  }
 0x33c   : > { %12541 = vmatmul.mubr.bf16.vlgmr.msra.gmra.mrb[96].mxu1 %v3243_v4  ;;  %15906 = vmatprep.subr.bf16.mxu0 %v17268_v5  ;;  %v17314_v4 = vld [vmem:[%s17750_s6 + $0x1ae0] sm:$0xff]  }
 0x33d   : > { %15927 = vmatpush3.bf16.msra.mxu1 %v17267_v2  ;;  %12620 = vmatprep.mubr.bf16.mxu1 %v3246_v11  ;;  %v17312_v2 = vld [vmem:[%s17750_s6 + $0x1a98] sm:$0xff]   ;;  %v17315_v5 = vld [vmem:[%s17750_s6 + $0x1a20] sm:$0xff]  }
 0x33e   : > { %15928 = vmatprep.subr.bf16.mxu1 %v17269_v7  ;;  %v17317_v7 = vld [vmem:[%s17750_s6 + $0x1a68] sm:$0xff]  }
 0x33f   : > { %15907 = vmatpush3.bf16.msra.mxu0 %v17270_v9 }
 0x340   : > { %15908 = vmatprep.subr.bf16.mxu0 %v17272_v12  ;;  %v17320_v12 = vld [vmem:[%s17750_s6 + $0x1aa8] sm:$0xff]  }
 0x341   : > { %15929 = vmatpush3.bf16.msra.mxu1 %v17271_v10  ;;  %v17319_v10 = vld [vmem:[%s17750_s6 + $0x1a28] sm:$0xff]  }
 0x342   : > { %15930 = vmatprep.subr.bf16.mxu1 %v17273_v13 }
 0x343   : > { %15909 = vmatpush3.bf16.msra.mxu0 %v17274_v14 }
 0x344   : > { %15910 = vmatprep.subr.bf16.mxu0 %v17276_v16  ;;  %v17321_v16 = vld [vmem:[%s17750_s6 + $0x1a70] sm:$0xff]  }
 0x345   : > { %15931 = vmatpush3.bf16.msra.mxu1 %v17275_v15 }
 0x346   : > { %15932 = vmatprep.subr.bf16.mxu1 %v17277_v17  ;;  %v17322_v17 = vld [vmem:[%s17750_s6 + $0x1af0] sm:$0xff]  }
 0x347   : > { %15911 = vmatpush3.bf16.msra.mxu0 %v17278_v18 }
 0x348   : > { %15912 = vmatprep.subr.bf16.mxu0 %v17280_v20 }
 0x349   : > { %15933 = vmatpush3.bf16.msra.mxu1 %v17279_v19 }
 0x34a   : > { %15934 = vmatprep.subr.bf16.mxu1 %v17281_v21 }
 0x34b   : > { %15913 = vmatpush3.bf16.msra.mxu0 %v17282_v22 }
 0x34c   : > { %15914 = vmatprep.subr.bf16.mxu0 %v17284_v24 }
 0x34d   : > { %v15612_v26 = vpop.f32.mrb[72].mxu0  ;;  %15935 = vmatpush3.bf16.msra.mxu1 %v17283_v23  ;;  %v17323_v23 = vld [vmem:[%s17750_s6 + $0x1a30] sm:$0xff]  }
 0x34e   : > { %v15613_v28 = vpop.f32.mrb[73].mxu0  ;;  %15936 = vmatprep.subr.bf16.mxu1 %v17285_v25  ;;  %v17324_v25 = vld [vmem:[%s17750_s6 + $0x1ab0] sm:$0xff]  }
 0x34f   : > { %v15634_v30 = vpop.f32.mrb[72].mxu1  ;;  %v15614_v31 = vadd.f32 %v15613_v28, %v15612_v26  ;;  %v15615_v32 = vpop.f32.mrb[74].mxu0  ;;  %15915 = vmatpush3.bf16.msra.mxu0 %v17286_v27  ;;  %v17325_v27 = vld [vmem:[%s17750_s6 + $0x1a78] sm:$0xff]  }
 0x350   : > { %v15635_v35 = vpop.f32.mrb[73].mxu1  ;;  %v15616_v36 = vpop.f32.mrb[75].mxu0  ;;  %15916 = vmatprep.subr.bf16.mxu0 %v17288_v33  ;;  %v17326_v28 = vld [vmem:[%s17750_s6 + $0x1af8] sm:$0xff]   ;;  %v17329_v32 = vld [vmem:[%s17750_s6 + $0x1b40] sm:$0xff]  }
 0x351   : > { %v12023_v37 = vadd.f32 %v15614_v31, %v18746_v51  ;;  %v15636_v38 = vadd.f32 %v15635_v35, %v15634_v30  ;;  %v15637_v39 = vpop.f32.mrb[74].mxu1  ;;  %15937 = vmatpush3.bf16.msra.mxu1 %v17287_v29  ;;  %v17298_v51 = vld [vmem:[%s17750_s6 + $0x1ac0] sm:$0xff]   ;;  %v17327_v29 = vld [vmem:[%s17750_s6 + $0x1a38] sm:$0xff]   ;;  %v283_v30 = vld [vmem:[%s17745_s27 + $0x68] sm:$0xff] }
 0x352   : > { %v15638_v41 = vpop.f32.mrb[75].mxu1  ;;  %15938 = vmatprep.subr.bf16.mxu1 %v17289_v34  ;;  %v3254_v31 = vrot.slane %v283_v30, %v17788_v42  ;;  %v3247_v33 = vcombine.high %v283_v30, %v283_v30  ;;  %v17328_v34 = vld [vmem:[%s17750_s6 + $0x1ab8] sm:$0xff]   ;;  %v17331_v39 = vld [vmem:[%s17750_s6 + $0x1b00] sm:$0xff]   ;;  %v17366_v30 = vld [vmem:[%s17750_s6 + $0x1c48] sm:$0xff]  }
 0x353   : > { %v18791_v44 = vadd.f32 %v15636_v38, %v12023_v37  ;;  %15917 = vmatpush3.bf16.msra.mxu0 %v17290_v40  ;;  %v17330_v37 = vld [vmem:[%s17750_s6 + $0x1bc0] sm:$0xff]  }
 0x354   : > { %15918 = vmatprep.subr.bf16.mxu0 %v17292_v45  ;;  %v3262_v35 = vcombine.high %v3254_v31, %v3254_v31  ;;  %v3270_v36 = vrot.slane %v3254_v31, %v17788_v42  ;;  %v18840_v38 = vrot.slane %v3247_v33, %v17788_v42  ;;  %v17332_v41 = vld [vmem:[%s17750_s6 + $0x1b80] sm:$0xff]   ;;  %v17333_v45 = vld [vmem:[%s17750_s6 + $0x1b48] sm:$0xff]  }
 0x355   : > { %15939 = vmatpush3.bf16.msra.mxu1 %v17291_v43  ;;  %v17367_v31 = vld [vmem:[%s17750_s6 + $0x1cc8] sm:$0xff]  }
 0x356   : > { %15940 = vmatprep.subr.bf16.mxu1 %v17293_v46  ;;  %v3284_v40 = vrot.slane %v3262_v35, %v17788_v42  ;;  %v3263_v43 = vcombine.high %v18840_v38, %v18840_v38  ;;  %v17369_v33 = vld [vmem:[%s17750_s6 + $0x1c88] sm:$0xff]   ;;  %v17371_v35 = vld [vmem:[%s17750_s6 + $0x1cd0] sm:$0xff]  }
 0x357   : > { %15919 = vmatpush3.bf16.msra.mxu0 %v17294_v47  ;;  %v17334_v47 = vld [vmem:[%s17750_s6 + $0x1bc8] sm:$0xff]  }
 0x358   : > { %15948 = vmatprep.subr.bf16.mxu0 %v17297_v50  ;;  %v3294_v46 = vcombine.high %v3284_v40, %v3284_v40  ;;  %v17336_v50 = vld [vmem:[%s17750_s6 + $0x1b88] sm:$0xff]  }
 0x359   : > { %15941 = vmatpush3.bf16.msra.mxu1 %v17295_v48  ;;  %v3291_v48 = vrot.slane %v3263_v43, %v17788_v42  ;;  %v17378_v43 = vld [vmem:[%s17750_s6 + $0x1c60] sm:$0xff]  }
 0x35a   : > { %12581 = vmatmul.mubr.bf16.vlgmr.msra.gmra.mrb[100].mxu0 %v3228_v49  ;;  %15970 = vmatprep.subr.bf16.mxu1 %v17298_v51  ;;  %v17335_v49 = vld [vmem:[%s17750_s6 + $0x1b08] sm:$0xff]  }
 0x35b   : > { %15949 = vmatpush3.bf16.msra.mxu0 %v17299_v52  ;;  %12660 = vmatprep.mubr.bf16.mxu0 %v3284_v40  ;;  %v3295_v51 = vcombine.high %v3291_v48, %v3291_v48  ;;  %v17337_v52 = vld [vmem:[%s17750_s6 + $0x1b50] sm:$0xff]   ;;  %v17376_v40 = vld [vmem:[%s17750_s6 + $0x1c18] sm:$0xff]  }
 0x35c   : > { %12621 = vmatmul.mubr.bf16.vlgmr.msra.gmra.mrb[100].mxu1 %v3244_v54  ;;  %15950 = vmatprep.subr.bf16.mxu0 %v17301_v56  ;;  %v17339_v54 = vld [vmem:[%s17750_s6 + $0x1b10] sm:$0xff]  }
 0x35d   : > { %15971 = vmatpush3.bf16.msra.mxu1 %v17300_v53  ;;  %12700 = vmatprep.mubr.bf16.mxu1 %v3294_v46  ;;  %v17338_v53 = vld [vmem:[%s17750_s6 + $0x1bd0] sm:$0xff]   ;;  %v17381_v46 = vld [vmem:[%s17750_s6 + $0x1ca0] sm:$0xff]  }
 0x35e   : > { %15972 = vmatprep.subr.bf16.mxu1 %v17302_v57  ;;  %v17340_v56 = vld [vmem:[%s17750_s6 + $0x1b90] sm:$0xff]   ;;  %v17341_v57 = vld [vmem:[%s17750_s6 + $0x1b58] sm:$0xff]  }
 0x35f   : > { %15951 = vmatpush3.bf16.msra.mxu0 %v17303_v58  ;;  %v17342_v58 = vld [vmem:[%s17750_s6 + $0x1bd8] sm:$0xff]  }
 0x360   : > { %15952 = vmatprep.subr.bf16.mxu0 %v17305_v60  ;;  %v17344_v60 = vld [vmem:[%s17750_s6 + $0x1b98] sm:$0xff]  }
 0x361   : > { %15973 = vmatpush3.bf16.msra.mxu1 %v17304_v59  ;;  %v17343_v59 = vld [vmem:[%s17750_s6 + $0x1b18] sm:$0xff]  }
 0x362   : > { %15974 = vmatprep.subr.bf16.mxu1 %v17306_v55  ;;  %v17345_v55 = vld [vmem:[%s17750_s6 + $0x1b60] sm:$0xff]  }
 0x363   : > { %15953 = vmatpush3.bf16.msra.mxu0 %v17307_v61  ;;  %v17346_v61 = vld [vmem:[%s17750_s6 + $0x1be0] sm:$0xff]  }
 0x364   : > { %15954 = vmatprep.subr.bf16.mxu0 %v17309_v63  ;;  %v17348_v63 = vld [vmem:[%s17750_s6 + $0x1ba0] sm:$0xff]  }
 0x365   : > { %15975 = vmatpush3.bf16.msra.mxu1 %v17308_v62  ;;  %v17347_v62 = vld [vmem:[%s17750_s6 + $0x1b20] sm:$0xff]  }
 0x366   : > { %15976 = vmatprep.subr.bf16.mxu1 %v17310_v0  ;;  %v17349_v0 = vld [vmem:[%s17750_s6 + $0x1b68] sm:$0xff]  }
 0x367   : > { %15955 = vmatpush3.bf16.msra.mxu0 %v17311_v1  ;;  %v17350_v1 = vld [vmem:[%s17750_s6 + $0x1be8] sm:$0xff]  }
 0x368   : > { %15956 = vmatprep.subr.bf16.mxu0 %v17313_v3  ;;  %v17351_v3 = vld [vmem:[%s17750_s6 + $0x1b28] sm:$0xff]  }
 0x369   : > { %15977 = vmatpush3.bf16.msra.mxu1 %v17312_v2 }
 0x36a   : > { %15978 = vmatprep.subr.bf16.mxu1 %v17314_v4 }
 0x36b   : > { %15957 = vmatpush3.bf16.msra.mxu0 %v17315_v5  ;;  %v17352_v5 = vld [vmem:[%s17750_s6 + $0x1ba8] sm:$0xff]  }
 0x36c   : > { %15958 = vmatprep.subr.bf16.mxu0 %v17317_v7 }
 0x36d   : > { %v15656_v9 = vpop.f32.mrb[76].mxu0  ;;  %15979 = vmatpush3.bf16.msra.mxu1 %v17316_v6 }
 0x36e   : > { %v15657_v11 = vpop.f32.mrb[77].mxu0  ;;  %15980 = vmatprep.subr.bf16.mxu1 %v17318_v8 }
 0x36f   : > { %v15678_v13 = vpop.f32.mrb[76].mxu1  ;;  %v15658_v14 = vadd.f32 %v15657_v11, %v15656_v9  ;;  %v15659_v15 = vpop.f32.mrb[78].mxu0  ;;  %15959 = vmatpush3.bf16.msra.mxu0 %v17319_v10  ;;  %v17353_v9 = vld [vmem:[%s17750_s6 + $0x1b70] sm:$0xff]  }
 0x370   : > { %v15679_v18 = vpop.f32.mrb[77].mxu1  ;;  %v15660_v19 = vpop.f32.mrb[79].mxu0  ;;  %15960 = vmatprep.subr.bf16.mxu0 %v17321_v16  ;;  %v17354_v10 = vld [vmem:[%s17750_s6 + $0x1bf0] sm:$0xff]  }
 0x371   : > { %v12103_v20 = vadd.f32 %v15658_v14, %v18791_v44  ;;  %v15680_v21 = vadd.f32 %v15679_v18, %v15678_v13  ;;  %v15681_v22 = vpop.f32.mrb[78].mxu1  ;;  %15981 = vmatpush3.bf16.msra.mxu1 %v17320_v12  ;;  %v3292_v44 = vcombine.high %v3270_v36, %v3270_v36  ;;  %v17355_v16 = vld [vmem:[%s17750_s6 + $0x1b30] sm:$0xff]  }
 0x372   : > { %v15682_v24 = vpop.f32.mrb[79].mxu1  ;;  %15982 = vmatprep.subr.bf16.mxu1 %v17322_v17  ;;  %v17356_v18 = vld [vmem:[%s17750_s6 + $0x1bb0] sm:$0xff]   ;;  %v17359_v22 = vld [vmem:[%s17750_s6 + $0x1b38] sm:$0xff]  }
 0x373   : > { %v18828_v26 = vadd.f32 %v15680_v21, %v12103_v20  ;;  %15961 = vmatpush3.bf16.msra.mxu0 %v17323_v23  ;;  %v17357_v20 = vld [vmem:[%s17750_s6 + $0x1b78] sm:$0xff]   ;;  %v3277_v24 = vrot.slane %v18840_v38, %v17788_v42 }
 0x374   : > { %15962 = vmatprep.subr.bf16.mxu0 %v17325_v27  ;;  %v17358_v21 = vld [vmem:[%s17750_s6 + $0x1bf8] sm:$0xff]   ;;  %v17364_v27 = vld [vmem:[%s17750_s6 + $0x1c00] sm:$0xff]  }
 0x375   : > { %15983 = vmatpush3.bf16.msra.mxu1 %v17324_v25  ;;  %v17360_v23 = vld [vmem:[%s17750_s6 + $0x1bb8] sm:$0xff]   ;;  %v17362_v25 = vld [vmem:[%s17750_s6 + $0x1c40] sm:$0xff]  }
 0x376   : > { %15984 = vmatprep.subr.bf16.mxu1 %v17326_v28  ;;  %v17365_v28 = vld [vmem:[%s17750_s6 + $0x1c80] sm:$0xff]   ;;  %v17374_v38 = vld [vmem:[%s17750_s6 + $0x1c58] sm:$0xff]  }
 0x377   : > { %15963 = vmatpush3.bf16.msra.mxu0 %v17327_v29  ;;  %v3293_v29 = vcombine.high %v3277_v24, %v3277_v24 }
 0x378   : > { %15992 = vmatprep.subr.bf16.mxu0 %v17329_v32  ;;  %v17368_v32 = vld [vmem:[%s17750_s6 + $0x1c08] sm:$0xff]  }
 0x379   : > { %15985 = vmatpush3.bf16.msra.mxu1 %v17328_v34  ;;  %v17370_v34 = vld [vmem:[%s17750_s6 + $0x1c50] sm:$0xff]  }
 0x37a   : > { %16014 = vmatprep.subr.bf16.mxu1 %v17330_v37  ;;  %12661 = vmatmul.mubr.bf16.vlgmr.msra.gmra.mrb[104].mxu0 %v3270_v36  ;;  %v17372_v36 = vld [vmem:[%s17750_s6 + $0x1c10] sm:$0xff]  }
 0x37b   : > { %15993 = vmatpush3.bf16.msra.mxu0 %v17331_v39  ;;  %12740 = vmatprep.mubr.bf16.mxu0 %v3291_v48  ;;  %v17373_v37 = vld [vmem:[%s17750_s6 + $0x1c90] sm:$0xff]   ;;  %v17375_v39 = vld [vmem:[%s17750_s6 + $0x1cd8] sm:$0xff]   ;;  %v17383_v48 = vld [vmem:[%s17750_s6 + $0x1ce8] sm:$0xff]  }
 0x37c   : > { %12701 = vmatmul.mubr.bf16.vlgmr.msra.gmra.mrb[104].mxu1 %v3292_v44  ;;  %15994 = vmatprep.subr.bf16.mxu0 %v17333_v45  ;;  %v17379_v44 = vld [vmem:[%s17750_s6 + $0x1ce0] sm:$0xff]  }
 0x37d   : > { %16015 = vmatpush3.bf16.msra.mxu1 %v17332_v41  ;;  %12780 = vmatprep.mubr.bf16.mxu1 %v3295_v51  ;;  %v17377_v41 = vld [vmem:[%s17750_s6 + $0x1c98] sm:$0xff]   ;;  %v17380_v45 = vld [vmem:[%s17750_s6 + $0x1c20] sm:$0xff]  }
 0x37e   : > { %16016 = vmatprep.subr.bf16.mxu1 %v17334_v47  ;;  %v17382_v47 = vld [vmem:[%s17750_s6 + $0x1c68] sm:$0xff]  }
 0x37f   : > { %15995 = vmatpush3.bf16.msra.mxu0 %v17335_v49 }
 0x380   : > { %15996 = vmatprep.subr.bf16.mxu0 %v17337_v52  ;;  %v17385_v52 = vld [vmem:[%s17750_s6 + $0x1ca8] sm:$0xff]  }
 0x381   : > { %16017 = vmatpush3.bf16.msra.mxu1 %v17336_v50  ;;  %v17384_v50 = vld [vmem:[%s17750_s6 + $0x1c28] sm:$0xff]  }
 0x382   : > { %16018 = vmatprep.subr.bf16.mxu1 %v17338_v53 }
 0x383   : > { %15997 = vmatpush3.bf16.msra.mxu0 %v17339_v54 }
 0x384   : > { %15998 = vmatprep.subr.bf16.mxu0 %v17341_v57  ;;  %v17386_v57 = vld [vmem:[%s17750_s6 + $0x1c70] sm:$0xff]  }
 0x385   : > { %16019 = vmatpush3.bf16.msra.mxu1 %v17340_v56 }
 0x386   : > { %16020 = vmatprep.subr.bf16.mxu1 %v17342_v58  ;;  %v17387_v58 = vld [vmem:[%s17750_s6 + $0x1cf0] sm:$0xff]  }
 0x387   : > { %15999 = vmatpush3.bf16.msra.mxu0 %v17343_v59 }
 0x388   : > { %16000 = vmatprep.subr.bf16.mxu0 %v17345_v55 }
 0x389   : > { %16021 = vmatpush3.bf16.msra.mxu1 %v17344_v60 }
 0x38a   : > { %16022 = vmatprep.subr.bf16.mxu1 %v17346_v61 }
 0x38b   : > { %16001 = vmatpush3.bf16.msra.mxu0 %v17347_v62 }
 0x38c   : > { %16002 = vmatprep.subr.bf16.mxu0 %v17349_v0 }
 0x38d   : > { %v15700_v2 = vpop.f32.mrb[80].mxu0  ;;  %16023 = vmatpush3.bf16.msra.mxu1 %v17348_v63  ;;  %v17388_v63 = vld [vmem:[%s17750_s6 + $0x1c30] sm:$0xff]  }
 0x38e   : > { %v15701_v4 = vpop.f32.mrb[81].mxu0  ;;  %16024 = vmatprep.subr.bf16.mxu1 %v17350_v1  ;;  %v17389_v1 = vld [vmem:[%s17750_s6 + $0x1cb0] sm:$0xff]  }
 0x38f   : > { %v15722_v6 = vpop.f32.mrb[80].mxu1  ;;  %v15702_v7 = vadd.f32 %v15701_v4, %v15700_v2  ;;  %v15703_v8 = vpop.f32.mrb[82].mxu0  ;;  %16003 = vmatpush3.bf16.msra.mxu0 %v17351_v3  ;;  %v17390_v3 = vld [vmem:[%s17750_s6 + $0x1c78] sm:$0xff]  }
 0x390   : > { %v15723_v11 = vpop.f32.mrb[81].mxu1  ;;  %v15704_v12 = vpop.f32.mrb[83].mxu0  ;;  %16004 = vmatprep.subr.bf16.mxu0 %v17353_v9  ;;  %v17391_v4 = vld [vmem:[%s17750_s6 + $0x1cf8] sm:$0xff]   ;;  %v17394_v8 = vld [vmem:[%s17750_s6 + $0x1d40] sm:$0xff]  }
 0x391   : > { %v12183_v13 = vadd.f32 %v15702_v7, %v18828_v26  ;;  %v15724_v14 = vadd.f32 %v15723_v11, %v15722_v6  ;;  %v15725_v15 = vpop.f32.mrb[82].mxu1  ;;  %16025 = vmatpush3.bf16.msra.mxu1 %v17352_v5  ;;  %v17363_v26 = vld [vmem:[%s17750_s6 + $0x1cc0] sm:$0xff]   ;;  %v17392_v5 = vld [vmem:[%s17750_s6 + $0x1c38] sm:$0xff]   ;;  %v284_v6 = vld [vmem:[%s17745_s27 + $0x70] sm:$0xff] }
 0x392   : > { %v15726_v17 = vpop.f32.mrb[83].mxu1  ;;  %16026 = vmatprep.subr.bf16.mxu1 %v17354_v10  ;;  %v3303_v7 = vrot.slane %v284_v6, %v17788_v42  ;;  %v3296_v9 = vcombine.high %v284_v6, %v284_v6  ;;  %v17393_v10 = vld [vmem:[%s17750_s6 + $0x1cb8] sm:$0xff]   ;;  %v17396_v15 = vld [vmem:[%s17750_s6 + $0x1d00] sm:$0xff]   ;;  %v17431_v6 = vld [vmem:[%s17750_s6 + $0x1e48] sm:$0xff]  }
 0x393   : > { %v18873_v19 = vadd.f32 %v15724_v14, %v12183_v13  ;;  %16005 = vmatpush3.bf16.msra.mxu0 %v17355_v16  ;;  %v17395_v13 = vld [vmem:[%s17750_s6 + $0x1dc0] sm:$0xff]  }
 0x394   : > { %16006 = vmatprep.subr.bf16.mxu0 %v17357_v20  ;;  %v3311_v11 = vcombine.high %v3303_v7, %v3303_v7  ;;  %v3319_v12 = vrot.slane %v3303_v7, %v17788_v42  ;;  %v18922_v14 = vrot.slane %v3296_v9, %v17788_v42  ;;  %v17397_v17 = vld [vmem:[%s17750_s6 + $0x1d80] sm:$0xff]   ;;  %v17398_v20 = vld [vmem:[%s17750_s6 + $0x1d48] sm:$0xff]  }
 0x395   : > { %16027 = vmatpush3.bf16.msra.mxu1 %v17356_v18  ;;  %v17432_v7 = vld [vmem:[%s17750_s6 + $0x1ec8] sm:$0xff]  }
 0x396   : > { %16028 = vmatprep.subr.bf16.mxu1 %v17358_v21  ;;  %v3333_v16 = vrot.slane %v3311_v11, %v17788_v42  ;;  %v3312_v18 = vcombine.high %v18922_v14, %v18922_v14  ;;  %v17434_v9 = vld [vmem:[%s17750_s6 + $0x1e88] sm:$0xff]   ;;  %v17436_v11 = vld [vmem:[%s17750_s6 + $0x1ed0] sm:$0xff]  }
 0x397   : > { %16007 = vmatpush3.bf16.msra.mxu0 %v17359_v22  ;;  %v17399_v22 = vld [vmem:[%s17750_s6 + $0x1dc8] sm:$0xff]  }
 0x398   : > { %16036 = vmatprep.subr.bf16.mxu0 %v17362_v25  ;;  %v3343_v21 = vcombine.high %v3333_v16, %v3333_v16  ;;  %v17401_v25 = vld [vmem:[%s17750_s6 + $0x1d88] sm:$0xff]  }
 0x399   : > { %16029 = vmatpush3.bf16.msra.mxu1 %v17360_v23  ;;  %v3340_v23 = vrot.slane %v3312_v18, %v17788_v42  ;;  %v17443_v18 = vld [vmem:[%s17750_s6 + $0x1e60] sm:$0xff]  }
 0x39a   : > { %12741 = vmatmul.mubr.bf16.vlgmr.msra.gmra.mrb[108].mxu0 %v3277_v24  ;;  %16058 = vmatprep.subr.bf16.mxu1 %v17363_v26  ;;  %v17400_v24 = vld [vmem:[%s17750_s6 + $0x1d08] sm:$0xff]  }
 0x39b   : > { %16037 = vmatpush3.bf16.msra.mxu0 %v17364_v27  ;;  %12820 = vmatprep.mubr.bf16.mxu0 %v3333_v16  ;;  %v3344_v26 = vcombine.high %v3340_v23, %v3340_v23  ;;  %v17402_v27 = vld [vmem:[%s17750_s6 + $0x1d50] sm:$0xff]   ;;  %v17441_v16 = vld [vmem:[%s17750_s6 + $0x1e18] sm:$0xff]  }
 0x39c   : > { %12781 = vmatmul.mubr.bf16.vlgmr.msra.gmra.mrb[108].mxu1 %v3293_v29  ;;  %16038 = vmatprep.subr.bf16.mxu0 %v17366_v30  ;;  %v17404_v29 = vld [vmem:[%s17750_s6 + $0x1d10] sm:$0xff]  }
 0x39d   : > { %16059 = vmatpush3.bf16.msra.mxu1 %v17365_v28  ;;  %12860 = vmatprep.mubr.bf16.mxu1 %v3343_v21  ;;  %v17403_v28 = vld [vmem:[%s17750_s6 + $0x1dd0] sm:$0xff]   ;;  %v17446_v21 = vld [vmem:[%s17750_s6 + $0x1ea0] sm:$0xff]  }
 0x39e   : > { %16060 = vmatprep.subr.bf16.mxu1 %v17367_v31  ;;  %v17405_v30 = vld [vmem:[%s17750_s6 + $0x1d90] sm:$0xff]   ;;  %v17406_v31 = vld [vmem:[%s17750_s6 + $0x1d58] sm:$0xff]  }
 0x39f   : > { %16039 = vmatpush3.bf16.msra.mxu0 %v17368_v32  ;;  %v17407_v32 = vld [vmem:[%s17750_s6 + $0x1dd8] sm:$0xff]  }
 0x3a0   : > { %16040 = vmatprep.subr.bf16.mxu0 %v17370_v34  ;;  %v17409_v34 = vld [vmem:[%s17750_s6 + $0x1d98] sm:$0xff]  }
 0x3a1   : > { %16061 = vmatpush3.bf16.msra.mxu1 %v17369_v33  ;;  %v17408_v33 = vld [vmem:[%s17750_s6 + $0x1d18] sm:$0xff]  }
 0x3a2   : > { %16062 = vmatprep.subr.bf16.mxu1 %v17371_v35  ;;  %v17410_v35 = vld [vmem:[%s17750_s6 + $0x1d60] sm:$0xff]  }
 0x3a3   : > { %16041 = vmatpush3.bf16.msra.mxu0 %v17372_v36  ;;  %v17411_v36 = vld [vmem:[%s17750_s6 + $0x1de0] sm:$0xff]  }
 0x3a4   : > { %16042 = vmatprep.subr.bf16.mxu0 %v17374_v38  ;;  %v17413_v38 = vld [vmem:[%s17750_s6 + $0x1da0] sm:$0xff]  }
 0x3a5   : > { %16063 = vmatpush3.bf16.msra.mxu1 %v17373_v37  ;;  %v17412_v37 = vld [vmem:[%s17750_s6 + $0x1d20] sm:$0xff]  }
 0x3a6   : > { %16064 = vmatprep.subr.bf16.mxu1 %v17375_v39  ;;  %v17414_v39 = vld [vmem:[%s17750_s6 + $0x1d68] sm:$0xff]  }
 0x3a7   : > { %16043 = vmatpush3.bf16.msra.mxu0 %v17376_v40  ;;  %v17415_v40 = vld [vmem:[%s17750_s6 + $0x1de8] sm:$0xff]  }
 0x3a8   : > { %16044 = vmatprep.subr.bf16.mxu0 %v17378_v43  ;;  %v17416_v43 = vld [vmem:[%s17750_s6 + $0x1d28] sm:$0xff]  }
 0x3a9   : > { %16065 = vmatpush3.bf16.msra.mxu1 %v17377_v41 }
 0x3aa   : > { %16066 = vmatprep.subr.bf16.mxu1 %v17379_v44 }
 0x3ab   : > { %16045 = vmatpush3.bf16.msra.mxu0 %v17380_v45  ;;  %v17417_v45 = vld [vmem:[%s17750_s6 + $0x1da8] sm:$0xff]  }
 0x3ac   : > { %16046 = vmatprep.subr.bf16.mxu0 %v17382_v47 }
 0x3ad   : > { %v15744_v49 = vpop.f32.mrb[84].mxu0  ;;  %16067 = vmatpush3.bf16.msra.mxu1 %v17381_v46 }
 0x3ae   : > { %v15745_v51 = vpop.f32.mrb[85].mxu0  ;;  %16068 = vmatprep.subr.bf16.mxu1 %v17383_v48 }
 0x3af   : > { %v15766_v53 = vpop.f32.mrb[84].mxu1  ;;  %v15746_v54 = vadd.f32 %v15745_v51, %v15744_v49  ;;  %v15747_v56 = vpop.f32.mrb[86].mxu0  ;;  %16047 = vmatpush3.bf16.msra.mxu0 %v17384_v50  ;;  %v17418_v49 = vld [vmem:[%s17750_s6 + $0x1d70] sm:$0xff]  }
 0x3b0   : > { %v15767_v59 = vpop.f32.mrb[85].mxu1  ;;  %v15748_v60 = vpop.f32.mrb[87].mxu0  ;;  %16048 = vmatprep.subr.bf16.mxu0 %v17386_v57  ;;  %v17419_v50 = vld [vmem:[%s17750_s6 + $0x1df0] sm:$0xff]  }
 0x3b1   : > { %v12263_v55 = vadd.f32 %v15746_v54, %v18873_v19  ;;  %v15768_v61 = vadd.f32 %v15767_v59, %v15766_v53  ;;  %v15769_v62 = vpop.f32.mrb[86].mxu1  ;;  %16069 = vmatpush3.bf16.msra.mxu1 %v17385_v52  ;;  %v3341_v19 = vcombine.high %v3319_v12, %v3319_v12  ;;  %v17420_v57 = vld [vmem:[%s17750_s6 + $0x1d30] sm:$0xff]  }
 0x3b2   : > { %v15770_v0 = vpop.f32.mrb[87].mxu1  ;;  %16070 = vmatprep.subr.bf16.mxu1 %v17387_v58  ;;  %v17421_v59 = vld [vmem:[%s17750_s6 + $0x1db0] sm:$0xff]   ;;  %v17424_v62 = vld [vmem:[%s17750_s6 + $0x1d38] sm:$0xff]  }
 0x3b3   : > { %v18910_v2 = vadd.f32 %v15768_v61, %v12263_v55  ;;  %16049 = vmatpush3.bf16.msra.mxu0 %v17388_v63  ;;  %v17422_v55 = vld [vmem:[%s17750_s6 + $0x1d78] sm:$0xff]   ;;  %v3326_v0 = vrot.slane %v18922_v14, %v17788_v42 }
 0x3b4   : > { %16050 = vmatprep.subr.bf16.mxu0 %v17390_v3  ;;  %v17423_v61 = vld [vmem:[%s17750_s6 + $0x1df8] sm:$0xff]   ;;  %v17429_v3 = vld [vmem:[%s17750_s6 + $0x1e00] sm:$0xff]  }
 0x3b5   : > { %16071 = vmatpush3.bf16.msra.mxu1 %v17389_v1  ;;  %v17425_v63 = vld [vmem:[%s17750_s6 + $0x1db8] sm:$0xff]   ;;  %v17427_v1 = vld [vmem:[%s17750_s6 + $0x1e40] sm:$0xff]  }
 0x3b6   : > { %16072 = vmatprep.subr.bf16.mxu1 %v17391_v4  ;;  %v17430_v4 = vld [vmem:[%s17750_s6 + $0x1e80] sm:$0xff]   ;;  %v17439_v14 = vld [vmem:[%s17750_s6 + $0x1e58] sm:$0xff]  }
 0x3b7   : > { %16051 = vmatpush3.bf16.msra.mxu0 %v17392_v5  ;;  %v3342_v5 = vcombine.high %v3326_v0, %v3326_v0 }
 0x3b8   : > { %16080 = vmatprep.subr.bf16.mxu0 %v17394_v8  ;;  %v17433_v8 = vld [vmem:[%s17750_s6 + $0x1e08] sm:$0xff]  }
 0x3b9   : > { %16073 = vmatpush3.bf16.msra.mxu1 %v17393_v10  ;;  %v17435_v10 = vld [vmem:[%s17750_s6 + $0x1e50] sm:$0xff]  }
 0x3ba   : > { %16102 = vmatprep.subr.bf16.mxu1 %v17395_v13  ;;  %12821 = vmatmul.mubr.bf16.vlgmr.msra.gmra.mrb[112].mxu0 %v3319_v12  ;;  %v17437_v12 = vld [vmem:[%s17750_s6 + $0x1e10] sm:$0xff]  }
 0x3bb   : > { %16081 = vmatpush3.bf16.msra.mxu0 %v17396_v15  ;;  %12900 = vmatprep.mubr.bf16.mxu0 %v3340_v23  ;;  %v17438_v13 = vld [vmem:[%s17750_s6 + $0x1e90] sm:$0xff]   ;;  %v17440_v15 = vld [vmem:[%s17750_s6 + $0x1ed8] sm:$0xff]   ;;  %v17448_v23 = vld [vmem:[%s17750_s6 + $0x1ee8] sm:$0xff]  }
 0x3bc   : > { %12861 = vmatmul.mubr.bf16.vlgmr.msra.gmra.mrb[112].mxu1 %v3341_v19  ;;  %16082 = vmatprep.subr.bf16.mxu0 %v17398_v20  ;;  %v17444_v19 = vld [vmem:[%s17750_s6 + $0x1ee0] sm:$0xff]  }
 0x3bd   : > { %16103 = vmatpush3.bf16.msra.mxu1 %v17397_v17  ;;  %12940 = vmatprep.mubr.bf16.mxu1 %v3344_v26  ;;  %v17442_v17 = vld [vmem:[%s17750_s6 + $0x1e98] sm:$0xff]   ;;  %v17445_v20 = vld [vmem:[%s17750_s6 + $0x1e20] sm:$0xff]  }
 0x3be   : > { %16104 = vmatprep.subr.bf16.mxu1 %v17399_v22  ;;  %v17447_v22 = vld [vmem:[%s17750_s6 + $0x1e68] sm:$0xff]  }
 0x3bf   : > { %16083 = vmatpush3.bf16.msra.mxu0 %v17400_v24 }
 0x3c0   : > { %16084 = vmatprep.subr.bf16.mxu0 %v17402_v27  ;;  %v17450_v27 = vld [vmem:[%s17750_s6 + $0x1ea8] sm:$0xff]  }
 0x3c1   : > { %16105 = vmatpush3.bf16.msra.mxu1 %v17401_v25  ;;  %v17449_v25 = vld [vmem:[%s17750_s6 + $0x1e28] sm:$0xff]  }
 0x3c2   : > { %16106 = vmatprep.subr.bf16.mxu1 %v17403_v28 }
 0x3c3   : > { %16085 = vmatpush3.bf16.msra.mxu0 %v17404_v29 }
 0x3c4   : > { %16086 = vmatprep.subr.bf16.mxu0 %v17406_v31  ;;  %v17451_v31 = vld [vmem:[%s17750_s6 + $0x1e70] sm:$0xff]  }
 0x3c5   : > { %16107 = vmatpush3.bf16.msra.mxu1 %v17405_v30 }
 0x3c6   : > { %16108 = vmatprep.subr.bf16.mxu1 %v17407_v32  ;;  %v17452_v32 = vld [vmem:[%s17750_s6 + $0x1ef0] sm:$0xff]  }
 0x3c7   : > { %16087 = vmatpush3.bf16.msra.mxu0 %v17408_v33 }
 0x3c8   : > { %16088 = vmatprep.subr.bf16.mxu0 %v17410_v35 }
 0x3c9   : > { %16109 = vmatpush3.bf16.msra.mxu1 %v17409_v34 }
 0x3ca   : > { %16110 = vmatprep.subr.bf16.mxu1 %v17411_v36 }
 0x3cb   : > { %16089 = vmatpush3.bf16.msra.mxu0 %v17412_v37 }
 0x3cc   : > { %16090 = vmatprep.subr.bf16.mxu0 %v17414_v39 }
 0x3cd   : > { %v15788_v41 = vpop.f32.mrb[88].mxu0  ;;  %16111 = vmatpush3.bf16.msra.mxu1 %v17413_v38  ;;  %v17453_v38 = vld [vmem:[%s17750_s6 + $0x1e30] sm:$0xff]  }
 0x3ce   : > { %v15789_v44 = vpop.f32.mrb[89].mxu0  ;;  %16112 = vmatprep.subr.bf16.mxu1 %v17415_v40  ;;  %v17454_v40 = vld [vmem:[%s17750_s6 + $0x1eb0] sm:$0xff]  }
 0x3cf   : > { %v15810_v46 = vpop.f32.mrb[88].mxu1  ;;  %v15790_v47 = vadd.f32 %v15789_v44, %v15788_v41  ;;  %v15791_v48 = vpop.f32.mrb[90].mxu0  ;;  %16091 = vmatpush3.bf16.msra.mxu0 %v17416_v43  ;;  %v17455_v43 = vld [vmem:[%s17750_s6 + $0x1e78] sm:$0xff]  }
 0x3d0   : > { %v15811_v51 = vpop.f32.mrb[89].mxu1  ;;  %v15792_v52 = vpop.f32.mrb[91].mxu0  ;;  %16092 = vmatprep.subr.bf16.mxu0 %v17418_v49  ;;  %v17456_v44 = vld [vmem:[%s17750_s6 + $0x1ef8] sm:$0xff]   ;;  %v17459_v48 = vld [vmem:[%s17750_s6 + $0x1f40] sm:$0xff]  }
 0x3d1   : > { %v12343_v53 = vadd.f32 %v15790_v47, %v18910_v2  ;;  %v15812_v54 = vadd.f32 %v15811_v51, %v15810_v46  ;;  %v15813_v56 = vpop.f32.mrb[90].mxu1  ;;  %16113 = vmatpush3.bf16.msra.mxu1 %v17417_v45  ;;  %v17428_v2 = vld [vmem:[%s17750_s6 + $0x1ec0] sm:$0xff]   ;;  %v17457_v45 = vld [vmem:[%s17750_s6 + $0x1e38] sm:$0xff]  }
 0x3d2   : > { %v15814_v58 = vpop.f32.mrb[91].mxu1  ;;  %16114 = vmatprep.subr.bf16.mxu1 %v17419_v50  ;;  %v285_v46 = vld [vmem:[%s17745_s27 + $0x78] sm:$0xff]  ;;  %v17461_v56 = vld [vmem:[%s17750_s6 + $0x1f00] sm:$0xff]  }
 0x3d3   : > { %v18955_v60 = vadd.f32 %v15812_v54, %v12343_v53  ;;  %16093 = vmatpush3.bf16.msra.mxu0 %v17420_v57  ;;  %v3352_v47 = vrot.slane %v285_v46, %v17788_v42  ;;  %v3345_v49 = vcombine.high %v285_v46, %v285_v46  ;;  %v17458_v50 = vld [vmem:[%s17750_s6 + $0x1eb8] sm:$0xff]   ;;  %v17460_v53 = vld [vmem:[%s17750_s6 + $0x1fc0] sm:$0xff]   ;;  %v17496_v46 = vld [vmem:[%s17750_s6 + $0x2048] sm:$0xff]  }
 0x3d4   : > { %16094 = vmatprep.subr.bf16.mxu0 %v17422_v55  ;;  %v17462_v58 = vld [vmem:[%s17750_s6 + $0x1f80] sm:$0xff]   ;;  %v17463_v55 = vld [vmem:[%s17750_s6 + $0x1f48] sm:$0xff]  }
 0x3d5   : > { %16115 = vmatpush3.bf16.msra.mxu1 %v17421_v59  ;;  %v3360_v51 = vcombine.high %v3352_v47, %v3352_v47  ;;  %v3368_v52 = vrot.slane %v3352_v47, %v17788_v42  ;;  %v19004_v54 = vrot.slane %v3345_v49, %v17788_v42  ;;  %v17497_v47 = vld [vmem:[%s17750_s6 + $0x20c8] sm:$0xff]  }
 0x3d6   : > { %16116 = vmatprep.subr.bf16.mxu1 %v17423_v61  ;;  %v17499_v49 = vld [vmem:[%s17750_s6 + $0x2088] sm:$0xff]  }
 0x3d7   : > { %16095 = vmatpush3.bf16.msra.mxu0 %v17424_v62  ;;  %v3382_v57 = vrot.slane %v3360_v51, %v17788_v42  ;;  %v3361_v59 = vcombine.high %v19004_v54, %v19004_v54  ;;  %v17464_v62 = vld [vmem:[%s17750_s6 + $0x1fc8] sm:$0xff]   ;;  %v17501_v51 = vld [vmem:[%s17750_s6 + $0x20d0] sm:$0xff]  }
 0x3d8   : > { %16124 = vmatprep.subr.bf16.mxu0 %v17427_v1  ;;  %v17466_v1 = vld [vmem:[%s17750_s6 + $0x1f88] sm:$0xff]  }
 0x3d9   : > { %16117 = vmatpush3.bf16.msra.mxu1 %v17425_v63  ;;  %v3392_v61 = vcombine.high %v3382_v57, %v3382_v57  ;;  %v3389_v63 = vrot.slane %v3361_v59, %v17788_v42  ;;  %v17508_v59 = vld [vmem:[%s17750_s6 + $0x2060] sm:$0xff]  }
 0x3da   : > { %12901 = vmatmul.mubr.bf16.vlgmr.msra.gmra.mrb[116].mxu0 %v3326_v0  ;;  %16146 = vmatprep.subr.bf16.mxu1 %v17428_v2  ;;  %v17465_v0 = vld [vmem:[%s17750_s6 + $0x1f08] sm:$0xff]  }
 0x3db   : > { %16125 = vmatpush3.bf16.msra.mxu0 %v17429_v3  ;;  %12980 = vmatprep.mubr.bf16.mxu0 %v3382_v57  ;;  %v3393_v2 = vcombine.high %v3389_v63, %v3389_v63  ;;  %v17467_v3 = vld [vmem:[%s17750_s6 + $0x1f50] sm:$0xff]   ;;  %v17506_v57 = vld [vmem:[%s17750_s6 + $0x2018] sm:$0xff]  }
 0x3dc   : > { %12941 = vmatmul.mubr.bf16.vlgmr.msra.gmra.mrb[116].mxu1 %v3342_v5  ;;  %16126 = vmatprep.subr.bf16.mxu0 %v17431_v6  ;;  %v17469_v5 = vld [vmem:[%s17750_s6 + $0x1f10] sm:$0xff]  }
 0x3dd   : > { %16147 = vmatpush3.bf16.msra.mxu1 %v17430_v4  ;;  %13020 = vmatprep.mubr.bf16.mxu1 %v3392_v61  ;;  %v17468_v4 = vld [vmem:[%s17750_s6 + $0x1fd0] sm:$0xff]   ;;  %v17511_v61 = vld [vmem:[%s17750_s6 + $0x20a0] sm:$0xff]  }
 0x3de   : > { %16148 = vmatprep.subr.bf16.mxu1 %v17432_v7  ;;  %v17470_v6 = vld [vmem:[%s17750_s6 + $0x1f90] sm:$0xff]   ;;  %v17471_v7 = vld [vmem:[%s17750_s6 + $0x1f58] sm:$0xff]  }
 0x3df   : > { %16127 = vmatpush3.bf16.msra.mxu0 %v17433_v8  ;;  %v17472_v8 = vld [vmem:[%s17750_s6 + $0x1fd8] sm:$0xff]  }
 0x3e0   : > { %16128 = vmatprep.subr.bf16.mxu0 %v17435_v10  ;;  %v17474_v10 = vld [vmem:[%s17750_s6 + $0x1f98] sm:$0xff]  }
 0x3e1   : > { %16149 = vmatpush3.bf16.msra.mxu1 %v17434_v9  ;;  %v17473_v9 = vld [vmem:[%s17750_s6 + $0x1f18] sm:$0xff]  }
 0x3e2   : > { %16150 = vmatprep.subr.bf16.mxu1 %v17436_v11  ;;  %v17475_v11 = vld [vmem:[%s17750_s6 + $0x1f60] sm:$0xff]  }
 0x3e3   : > { %16129 = vmatpush3.bf16.msra.mxu0 %v17437_v12  ;;  %v17476_v12 = vld [vmem:[%s17750_s6 + $0x1fe0] sm:$0xff]  }
 0x3e4   : > { %16130 = vmatprep.subr.bf16.mxu0 %v17439_v14  ;;  %v17478_v14 = vld [vmem:[%s17750_s6 + $0x1fa0] sm:$0xff]  }
 0x3e5   : > { %16151 = vmatpush3.bf16.msra.mxu1 %v17438_v13  ;;  %v17477_v13 = vld [vmem:[%s17750_s6 + $0x1f20] sm:$0xff]  }
 0x3e6   : > { %16152 = vmatprep.subr.bf16.mxu1 %v17440_v15  ;;  %v17479_v15 = vld [vmem:[%s17750_s6 + $0x1f68] sm:$0xff]  }
 0x3e7   : > { %16131 = vmatpush3.bf16.msra.mxu0 %v17441_v16  ;;  %v17480_v16 = vld [vmem:[%s17750_s6 + $0x1fe8] sm:$0xff]  }
 0x3e8   : > { %16132 = vmatprep.subr.bf16.mxu0 %v17443_v18  ;;  %v17481_v18 = vld [vmem:[%s17750_s6 + $0x1f28] sm:$0xff]  }
 0x3e9   : > { %16153 = vmatpush3.bf16.msra.mxu1 %v17442_v17 }
 0x3ea   : > { %16154 = vmatprep.subr.bf16.mxu1 %v17444_v19 }
 0x3eb   : > { %16133 = vmatpush3.bf16.msra.mxu0 %v17445_v20  ;;  %v17482_v20 = vld [vmem:[%s17750_s6 + $0x1fa8] sm:$0xff]  }
 0x3ec   : > { %16134 = vmatprep.subr.bf16.mxu0 %v17447_v22 }
 0x3ed   : > { %v15832_v24 = vpop.f32.mrb[92].mxu0  ;;  %16155 = vmatpush3.bf16.msra.mxu1 %v17446_v21 }
 0x3ee   : > { %v15833_v26 = vpop.f32.mrb[93].mxu0  ;;  %16156 = vmatprep.subr.bf16.mxu1 %v17448_v23 }
 0x3ef   : > { %v15854_v28 = vpop.f32.mrb[92].mxu1  ;;  %v15834_v29 = vadd.f32 %v15833_v26, %v15832_v24  ;;  %v15835_v30 = vpop.f32.mrb[94].mxu0  ;;  %16135 = vmatpush3.bf16.msra.mxu0 %v17449_v25  ;;  %v17483_v24 = vld [vmem:[%s17750_s6 + $0x1f70] sm:$0xff]  }
 0x3f0   : > { %v15855_v33 = vpop.f32.mrb[93].mxu1  ;;  %v15836_v34 = vpop.f32.mrb[95].mxu0  ;;  %16136 = vmatprep.subr.bf16.mxu0 %v17451_v31  ;;  %v17484_v25 = vld [vmem:[%s17750_s6 + $0x1ff0] sm:$0xff]  }
 0x3f1   : > { %v12423_v35 = vadd.f32 %v15834_v29, %v18955_v60  ;;  %v15856_v36 = vadd.f32 %v15855_v33, %v15854_v28  ;;  %v15857_v37 = vpop.f32.mrb[94].mxu1  ;;  %16157 = vmatpush3.bf16.msra.mxu1 %v17450_v27  ;;  %v3390_v60 = vcombine.high %v3368_v52, %v3368_v52  ;;  %v17485_v31 = vld [vmem:[%s17750_s6 + $0x1f30] sm:$0xff]  }
 0x3f2   : > { %v15858_v39 = vpop.f32.mrb[95].mxu1  ;;  %16158 = vmatprep.subr.bf16.mxu1 %v17452_v32  ;;  %v17486_v33 = vld [vmem:[%s17750_s6 + $0x1fb0] sm:$0xff]   ;;  %v17489_v37 = vld [vmem:[%s17750_s6 + $0x1f38] sm:$0xff]  }
 0x3f3   : > { %v18992_v41 = vadd.f32 %v15856_v36, %v12423_v35  ;;  %16137 = vmatpush3.bf16.msra.mxu0 %v17453_v38  ;;  %v17487_v35 = vld [vmem:[%s17750_s6 + $0x1f78] sm:$0xff]   ;;  %v3375_v39 = vrot.slane %v19004_v54, %v17788_v42 }
 0x3f4   : > { %16138 = vmatprep.subr.bf16.mxu0 %v17455_v43  ;;  %v17488_v36 = vld [vmem:[%s17750_s6 + $0x1ff8] sm:$0xff]   ;;  %v17494_v43 = vld [vmem:[%s17750_s6 + $0x2000] sm:$0xff]  }
 0x3f5   : > { %16159 = vmatpush3.bf16.msra.mxu1 %v17454_v40  ;;  %v17490_v38 = vld [vmem:[%s17750_s6 + $0x1fb8] sm:$0xff]   ;;  %v17492_v40 = vld [vmem:[%s17750_s6 + $0x2040] sm:$0xff]  }
 0x3f6   : > { %16160 = vmatprep.subr.bf16.mxu1 %v17456_v44  ;;  %v17495_v44 = vld [vmem:[%s17750_s6 + $0x2080] sm:$0xff]   ;;  %v17504_v54 = vld [vmem:[%s17750_s6 + $0x2058] sm:$0xff]  }
 0x3f7   : > { %16139 = vmatpush3.bf16.msra.mxu0 %v17457_v45  ;;  %v3391_v45 = vcombine.high %v3375_v39, %v3375_v39 }
 0x3f8   : > { %16168 = vmatprep.subr.bf16.mxu0 %v17459_v48  ;;  %v17498_v48 = vld [vmem:[%s17750_s6 + $0x2008] sm:$0xff]  }
 0x3f9   : > { %16161 = vmatpush3.bf16.msra.mxu1 %v17458_v50  ;;  %v17500_v50 = vld [vmem:[%s17750_s6 + $0x2050] sm:$0xff]  }
 0x3fa   : > { %16190 = vmatprep.subr.bf16.mxu1 %v17460_v53  ;;  %12981 = vmatmul.mubr.bf16.vlgmr.msra.gmra.mrb[120].mxu0 %v3368_v52  ;;  %v17502_v52 = vld [vmem:[%s17750_s6 + $0x2010] sm:$0xff]  }
 0x3fb   : > { %16169 = vmatpush3.bf16.msra.mxu0 %v17461_v56  ;;  %13060 = vmatprep.mubr.bf16.mxu0 %v3389_v63  ;;  %v17503_v53 = vld [vmem:[%s17750_s6 + $0x2090] sm:$0xff]   ;;  %v17505_v56 = vld [vmem:[%s17750_s6 + $0x20d8] sm:$0xff]   ;;  %v17513_v63 = vld [vmem:[%s17750_s6 + $0x20e8] sm:$0xff]  }
 0x3fc   : > { %13021 = vmatmul.mubr.bf16.vlgmr.msra.gmra.mrb[120].mxu1 %v3390_v60  ;;  %16170 = vmatprep.subr.bf16.mxu0 %v17463_v55  ;;  %v17509_v60 = vld [vmem:[%s17750_s6 + $0x20e0] sm:$0xff]  }
 0x3fd   : > { %16191 = vmatpush3.bf16.msra.mxu1 %v17462_v58  ;;  %13100 = vmatprep.mubr.bf16.mxu1 %v3393_v2  ;;  %v17507_v58 = vld [vmem:[%s17750_s6 + $0x2098] sm:$0xff]   ;;  %v17510_v55 = vld [vmem:[%s17750_s6 + $0x2020] sm:$0xff]  }
 0x3fe   : > { %16192 = vmatprep.subr.bf16.mxu1 %v17464_v62  ;;  %v17512_v62 = vld [vmem:[%s17750_s6 + $0x2068] sm:$0xff]  }
 0x3ff   : > { %16171 = vmatpush3.bf16.msra.mxu0 %v17465_v0 }
 0x400   : > { %16172 = vmatprep.subr.bf16.mxu0 %v17467_v3  ;;  %v17515_v3 = vld [vmem:[%s17750_s6 + $0x20a8] sm:$0xff]  }
 0x401   : > { %16193 = vmatpush3.bf16.msra.mxu1 %v17466_v1  ;;  %v17514_v1 = vld [vmem:[%s17750_s6 + $0x2028] sm:$0xff]  }
 0x402   : > { %16194 = vmatprep.subr.bf16.mxu1 %v17468_v4 }
 0x403   : > { %16173 = vmatpush3.bf16.msra.mxu0 %v17469_v5 }
 0x404   : > { %16174 = vmatprep.subr.bf16.mxu0 %v17471_v7  ;;  %v17516_v7 = vld [vmem:[%s17750_s6 + $0x2070] sm:$0xff]  }
 0x405   : > { %16195 = vmatpush3.bf16.msra.mxu1 %v17470_v6 }
 0x406   : > { %16196 = vmatprep.subr.bf16.mxu1 %v17472_v8  ;;  %v17517_v8 = vld [vmem:[%s17750_s6 + $0x20f0] sm:$0xff]  }
 0x407   : > { %16175 = vmatpush3.bf16.msra.mxu0 %v17473_v9 }
 0x408   : > { %16176 = vmatprep.subr.bf16.mxu0 %v17475_v11 }
 0x409   : > { %16197 = vmatpush3.bf16.msra.mxu1 %v17474_v10 }
 0x40a   : > { %16198 = vmatprep.subr.bf16.mxu1 %v17476_v12 }
 0x40b   : > { %16177 = vmatpush3.bf16.msra.mxu0 %v17477_v13 }
 0x40c   : > { %16178 = vmatprep.subr.bf16.mxu0 %v17479_v15 }
 0x40d   : > { %v15876_v17 = vpop.f32.mrb[96].mxu0  ;;  %16199 = vmatpush3.bf16.msra.mxu1 %v17478_v14  ;;  %v17518_v14 = vld [vmem:[%s17750_s6 + $0x2030] sm:$0xff]  }
 0x40e   : > { %v15877_v19 = vpop.f32.mrb[97].mxu0  ;;  %16200 = vmatprep.subr.bf16.mxu1 %v17480_v16  ;;  %v17519_v16 = vld [vmem:[%s17750_s6 + $0x20b0] sm:$0xff]  }
 0x40f   : > { %v15898_v21 = vpop.f32.mrb[96].mxu1  ;;  %v15878_v22 = vadd.f32 %v15877_v19, %v15876_v17  ;;  %v15879_v23 = vpop.f32.mrb[98].mxu0  ;;  %16179 = vmatpush3.bf16.msra.mxu0 %v17481_v18  ;;  %v17520_v18 = vld [vmem:[%s17750_s6 + $0x2078] sm:$0xff]  }
 0x410   : > { %v15899_v26 = vpop.f32.mrb[97].mxu1  ;;  %v15880_v27 = vpop.f32.mrb[99].mxu0  ;;  %16180 = vmatprep.subr.bf16.mxu0 %v17483_v24  ;;  %v17521_v19 = vld [vmem:[%s17750_s6 + $0x20f8] sm:$0xff]   ;;  %v17524_v23 = vld [vmem:[%s17750_s6 + $0x2140] sm:$0xff]  }
 0x411   : > { %v12503_v28 = vadd.f32 %v15878_v22, %v18992_v41  ;;  %v15900_v29 = vadd.f32 %v15899_v26, %v15898_v21  ;;  %v15901_v30 = vpop.f32.mrb[98].mxu1  ;;  %16201 = vmatpush3.bf16.msra.mxu1 %v17482_v20  ;;  %v17493_v41 = vld [vmem:[%s17750_s6 + $0x20c0] sm:$0xff]   ;;  %v17522_v20 = vld [vmem:[%s17750_s6 + $0x2038] sm:$0xff]  }
 0x412   : > { %v15902_v32 = vpop.f32.mrb[99].mxu1  ;;  %16202 = vmatprep.subr.bf16.mxu1 %v17484_v25  ;;  %v286_v21 = vld [vmem:[%s17745_s27 + $0x80] sm:$0xff]  ;;  %v17523_v25 = vld [vmem:[%s17750_s6 + $0x20b8] sm:$0xff]  }
 0x413   : > { %v19037_v34 = vadd.f32 %v15900_v29, %v12503_v28  ;;  %16181 = vmatpush3.bf16.msra.mxu0 %v17485_v31  ;;  %v3401_v22 = vrot.slane %v286_v21, %v17788_v42  ;;  %v3394_v24 = vcombine.high %v286_v21, %v286_v21  ;;  %v17525_v28 = vld [vmem:[%s17750_s6 + $0x21c0] sm:$0xff]   ;;  %v17561_v21 = vld [vmem:[%s17750_s6 + $0x2248] sm:$0xff]  }
 0x414   : > { %16182 = vmatprep.subr.bf16.mxu0 %v17487_v35  ;;  %v17526_v30 = vld [vmem:[%s17750_s6 + $0x2100] sm:$0xff]   ;;  %v17528_v35 = vld [vmem:[%s17750_s6 + $0x2148] sm:$0xff]  }
 0x415   : > { %16203 = vmatpush3.bf16.msra.mxu1 %v17486_v33  ;;  %v3409_v26 = vcombine.high %v3401_v22, %v3401_v22  ;;  %v3417_v27 = vrot.slane %v3401_v22, %v17788_v42  ;;  %v19086_v29 = vrot.slane %v3394_v24, %v17788_v42  ;;  %v17527_v32 = vld [vmem:[%s17750_s6 + $0x2180] sm:$0xff]   ;;  %v17562_v22 = vld [vmem:[%s17750_s6 + $0x22c8] sm:$0xff]  }
 0x416   : > { %16204 = vmatprep.subr.bf16.mxu1 %v17488_v36  ;;  %v17564_v24 = vld [vmem:[%s17750_s6 + $0x2288] sm:$0xff]  }
 0x417   : > { %16183 = vmatpush3.bf16.msra.mxu0 %v17489_v37  ;;  %v3431_v31 = vrot.slane %v3409_v26, %v17788_v42  ;;  %v3410_v33 = vcombine.high %v19086_v29, %v19086_v29  ;;  %v17529_v37 = vld [vmem:[%s17750_s6 + $0x21c8] sm:$0xff]   ;;  %v17566_v26 = vld [vmem:[%s17750_s6 + $0x22d0] sm:$0xff]  }
 0x418   : > { %16212 = vmatprep.subr.bf16.mxu0 %v17492_v40  ;;  %v17531_v40 = vld [vmem:[%s17750_s6 + $0x2188] sm:$0xff]  }
 0x419   : > { %16205 = vmatpush3.bf16.msra.mxu1 %v17490_v38  ;;  %v3441_v36 = vcombine.high %v3431_v31, %v3431_v31  ;;  %v3438_v38 = vrot.slane %v3410_v33, %v17788_v42  ;;  %v17573_v33 = vld [vmem:[%s17750_s6 + $0x2260] sm:$0xff]  }
 0x41a   : > { %13061 = vmatmul.mubr.bf16.vlgmr.msra.gmra.mrb[124].mxu0 %v3375_v39  ;;  %16234 = vmatprep.subr.bf16.mxu1 %v17493_v41  ;;  %v17530_v39 = vld [vmem:[%s17750_s6 + $0x2108] sm:$0xff]  }
 0x41b   : > { %16213 = vmatpush3.bf16.msra.mxu0 %v17494_v43  ;;  %13140 = vmatprep.mubr.bf16.mxu0 %v3431_v31  ;;  %v3442_v41 = vcombine.high %v3438_v38, %v3438_v38  ;;  %v17532_v43 = vld [vmem:[%s17750_s6 + $0x2150] sm:$0xff]   ;;  %v17571_v31 = vld [vmem:[%s17750_s6 + $0x2218] sm:$0xff]  }
 0x41c   : > { %13101 = vmatmul.mubr.bf16.vlgmr.msra.gmra.mrb[124].mxu1 %v3391_v45  ;;  %16214 = vmatprep.subr.bf16.mxu0 %v17496_v46  ;;  %v17534_v45 = vld [vmem:[%s17750_s6 + $0x2110] sm:$0xff]  }
 0x41d   : > { %16235 = vmatpush3.bf16.msra.mxu1 %v17495_v44  ;;  %13180 = vmatprep.mubr.bf16.mxu1 %v3441_v36  ;;  %v17533_v44 = vld [vmem:[%s17750_s6 + $0x21d0] sm:$0xff]   ;;  %v17576_v36 = vld [vmem:[%s17750_s6 + $0x22a0] sm:$0xff]  }
 0x41e   : > { %16236 = vmatprep.subr.bf16.mxu1 %v17497_v47  ;;  %v17535_v46 = vld [vmem:[%s17750_s6 + $0x2190] sm:$0xff]   ;;  %v17536_v47 = vld [vmem:[%s17750_s6 + $0x2158] sm:$0xff]  }
 0x41f   : > { %16215 = vmatpush3.bf16.msra.mxu0 %v17498_v48  ;;  %v17537_v48 = vld [vmem:[%s17750_s6 + $0x21d8] sm:$0xff]  }
 0x420   : > { %16216 = vmatprep.subr.bf16.mxu0 %v17500_v50  ;;  %v17539_v50 = vld [vmem:[%s17750_s6 + $0x2198] sm:$0xff]  }
 0x421   : > { %16237 = vmatpush3.bf16.msra.mxu1 %v17499_v49  ;;  %v17538_v49 = vld [vmem:[%s17750_s6 + $0x2118] sm:$0xff]  }
 0x422   : > { %16238 = vmatprep.subr.bf16.mxu1 %v17501_v51  ;;  %v17540_v51 = vld [vmem:[%s17750_s6 + $0x2160] sm:$0xff]  }
 0x423   : > { %16217 = vmatpush3.bf16.msra.mxu0 %v17502_v52  ;;  %v17541_v52 = vld [vmem:[%s17750_s6 + $0x21e0] sm:$0xff]  }
 0x424   : > { %16218 = vmatprep.subr.bf16.mxu0 %v17504_v54  ;;  %v17543_v54 = vld [vmem:[%s17750_s6 + $0x21a0] sm:$0xff]  }
 0x425   : > { %16239 = vmatpush3.bf16.msra.mxu1 %v17503_v53  ;;  %v17542_v53 = vld [vmem:[%s17750_s6 + $0x2120] sm:$0xff]  }
 0x426   : > { %16240 = vmatprep.subr.bf16.mxu1 %v17505_v56  ;;  %v17544_v56 = vld [vmem:[%s17750_s6 + $0x2168] sm:$0xff]  }
 0x427   : > { %16219 = vmatpush3.bf16.msra.mxu0 %v17506_v57  ;;  %v17545_v57 = vld [vmem:[%s17750_s6 + $0x21e8] sm:$0xff]  }
 0x428   : > { %16220 = vmatprep.subr.bf16.mxu0 %v17508_v59  ;;  %v17546_v59 = vld [vmem:[%s17750_s6 + $0x2128] sm:$0xff]  }
 0x429   : > { %16241 = vmatpush3.bf16.msra.mxu1 %v17507_v58 }
 0x42a   : > { %16242 = vmatprep.subr.bf16.mxu1 %v17509_v60 }
 0x42b   : > { %16221 = vmatpush3.bf16.msra.mxu0 %v17510_v55  ;;  %v17547_v55 = vld [vmem:[%s17750_s6 + $0x21a8] sm:$0xff]  }
 0x42c   : > { %16222 = vmatprep.subr.bf16.mxu0 %v17512_v62 }
 0x42d   : > { %v15920_v0 = vpop.f32.mrb[100].mxu0  ;;  %16243 = vmatpush3.bf16.msra.mxu1 %v17511_v61 }
 0x42e   : > { %v15921_v2 = vpop.f32.mrb[101].mxu0  ;;  %16244 = vmatprep.subr.bf16.mxu1 %v17513_v63 }
 0x42f   : > { %v15942_v4 = vpop.f32.mrb[100].mxu1  ;;  %v15922_v5 = vadd.f32 %v15921_v2, %v15920_v0  ;;  %v15923_v6 = vpop.f32.mrb[102].mxu0  ;;  %16223 = vmatpush3.bf16.msra.mxu0 %v17514_v1  ;;  %v17548_v0 = vld [vmem:[%s17750_s6 + $0x2170] sm:$0xff]  }
 0x430   : > { %v15943_v9 = vpop.f32.mrb[101].mxu1  ;;  %v15924_v10 = vpop.f32.mrb[103].mxu0  ;;  %16224 = vmatprep.subr.bf16.mxu0 %v17516_v7  ;;  %v17549_v1 = vld [vmem:[%s17750_s6 + $0x21f0] sm:$0xff]  }
 0x431   : > { %v12583_v11 = vadd.f32 %v15922_v5, %v19037_v34  ;;  %v15944_v12 = vadd.f32 %v15943_v9, %v15942_v4  ;;  %v15945_v13 = vpop.f32.mrb[102].mxu1  ;;  %16245 = vmatpush3.bf16.msra.mxu1 %v17515_v3  ;;  %v3439_v34 = vcombine.high %v3417_v27, %v3417_v27  ;;  %v17550_v7 = vld [vmem:[%s17750_s6 + $0x2130] sm:$0xff]  }
 0x432   : > { %v15946_v15 = vpop.f32.mrb[103].mxu1  ;;  %16246 = vmatprep.subr.bf16.mxu1 %v17517_v8  ;;  %v17551_v9 = vld [vmem:[%s17750_s6 + $0x21b0] sm:$0xff]   ;;  %v17554_v13 = vld [vmem:[%s17750_s6 + $0x2138] sm:$0xff]  }
 0x433   : > { %v19074_v17 = vadd.f32 %v15944_v12, %v12583_v11  ;;  %16225 = vmatpush3.bf16.msra.mxu0 %v17518_v14  ;;  %v17552_v11 = vld [vmem:[%s17750_s6 + $0x2178] sm:$0xff]   ;;  %v3424_v15 = vrot.slane %v19086_v29, %v17788_v42 }
 0x434   : > { %16226 = vmatprep.subr.bf16.mxu0 %v17520_v18  ;;  %v17553_v12 = vld [vmem:[%s17750_s6 + $0x21f8] sm:$0xff]   ;;  %v17559_v18 = vld [vmem:[%s17750_s6 + $0x2200] sm:$0xff]  }
 0x435   : > { %16247 = vmatpush3.bf16.msra.mxu1 %v17519_v16  ;;  %v17555_v14 = vld [vmem:[%s17750_s6 + $0x21b8] sm:$0xff]   ;;  %v17557_v16 = vld [vmem:[%s17750_s6 + $0x2240] sm:$0xff]  }
 0x436   : > { %16248 = vmatprep.subr.bf16.mxu1 %v17521_v19  ;;  %v17560_v19 = vld [vmem:[%s17750_s6 + $0x2280] sm:$0xff]   ;;  %v17569_v29 = vld [vmem:[%s17750_s6 + $0x2258] sm:$0xff]  }
 0x437   : > { %16227 = vmatpush3.bf16.msra.mxu0 %v17522_v20  ;;  %v3440_v20 = vcombine.high %v3424_v15, %v3424_v15 }
 0x438   : > { %16256 = vmatprep.subr.bf16.mxu0 %v17524_v23  ;;  %v17563_v23 = vld [vmem:[%s17750_s6 + $0x2208] sm:$0xff]  }
 0x439   : > { %16249 = vmatpush3.bf16.msra.mxu1 %v17523_v25  ;;  %v17565_v25 = vld [vmem:[%s17750_s6 + $0x2250] sm:$0xff]  }
 0x43a   : > { %16278 = vmatprep.subr.bf16.mxu1 %v17525_v28  ;;  %13141 = vmatmul.mubr.bf16.vlgmr.msra.gmra.mrb[128].mxu0 %v3417_v27  ;;  %v17567_v27 = vld [vmem:[%s17750_s6 + $0x2210] sm:$0xff]  }
 0x43b   : > { %16257 = vmatpush3.bf16.msra.mxu0 %v17526_v30  ;;  %13220 = vmatprep.mubr.bf16.mxu0 %v3438_v38  ;;  %v17568_v28 = vld [vmem:[%s17750_s6 + $0x2290] sm:$0xff]   ;;  %v17570_v30 = vld [vmem:[%s17750_s6 + $0x22d8] sm:$0xff]   ;;  %v17578_v38 = vld [vmem:[%s17750_s6 + $0x22e8] sm:$0xff]  }
 0x43c   : > { %13181 = vmatmul.mubr.bf16.vlgmr.msra.gmra.mrb[128].mxu1 %v3439_v34  ;;  %16258 = vmatprep.subr.bf16.mxu0 %v17528_v35  ;;  %v17574_v34 = vld [vmem:[%s17750_s6 + $0x22e0] sm:$0xff]  }
 0x43d   : > { %16279 = vmatpush3.bf16.msra.mxu1 %v17527_v32  ;;  %13260 = vmatprep.mubr.bf16.mxu1 %v3442_v41  ;;  %v17572_v32 = vld [vmem:[%s17750_s6 + $0x2298] sm:$0xff]   ;;  %v17575_v35 = vld [vmem:[%s17750_s6 + $0x2220] sm:$0xff]  }
 0x43e   : > { %16280 = vmatprep.subr.bf16.mxu1 %v17529_v37  ;;  %v17577_v37 = vld [vmem:[%s17750_s6 + $0x2268] sm:$0xff]  }
 0x43f   : > { %16259 = vmatpush3.bf16.msra.mxu0 %v17530_v39 }
 0x440   : > { %16260 = vmatprep.subr.bf16.mxu0 %v17532_v43  ;;  %v17580_v43 = vld [vmem:[%s17750_s6 + $0x22a8] sm:$0xff]  }
 0x441   : > { %16281 = vmatpush3.bf16.msra.mxu1 %v17531_v40  ;;  %v17579_v40 = vld [vmem:[%s17750_s6 + $0x2228] sm:$0xff]  }
 0x442   : > { %16282 = vmatprep.subr.bf16.mxu1 %v17533_v44 }
 0x443   : > { %16261 = vmatpush3.bf16.msra.mxu0 %v17534_v45 }
 0x444   : > { %16262 = vmatprep.subr.bf16.mxu0 %v17536_v47  ;;  %v17581_v47 = vld [vmem:[%s17750_s6 + $0x2270] sm:$0xff]  }
 0x445   : > { %16283 = vmatpush3.bf16.msra.mxu1 %v17535_v46 }
 0x446   : > { %16284 = vmatprep.subr.bf16.mxu1 %v17537_v48  ;;  %v17582_v48 = vld [vmem:[%s17750_s6 + $0x22f0] sm:$0xff]  }
 0x447   : > { %16263 = vmatpush3.bf16.msra.mxu0 %v17538_v49 }
 0x448   : > { %16264 = vmatprep.subr.bf16.mxu0 %v17540_v51 }
 0x449   : > { %16285 = vmatpush3.bf16.msra.mxu1 %v17539_v50 }
 0x44a   : > { %16286 = vmatprep.subr.bf16.mxu1 %v17541_v52 }
 0x44b   : > { %16265 = vmatpush3.bf16.msra.mxu0 %v17542_v53 }
 0x44c   : > { %16266 = vmatprep.subr.bf16.mxu0 %v17544_v56 }
 0x44d   : > { %v15964_v58 = vpop.f32.mrb[104].mxu0  ;;  %16287 = vmatpush3.bf16.msra.mxu1 %v17543_v54  ;;  %v17583_v54 = vld [vmem:[%s17750_s6 + $0x2230] sm:$0xff]  }
 0x44e   : > { %v15965_v60 = vpop.f32.mrb[105].mxu0  ;;  %16288 = vmatprep.subr.bf16.mxu1 %v17545_v57  ;;  %v17584_v57 = vld [vmem:[%s17750_s6 + $0x22b0] sm:$0xff]  }
 0x44f   : > { %v15986_v61 = vpop.f32.mrb[104].mxu1  ;;  %v15966_v62 = vadd.f32 %v15965_v60, %v15964_v58  ;;  %v15967_v63 = vpop.f32.mrb[106].mxu0  ;;  %16267 = vmatpush3.bf16.msra.mxu0 %v17546_v59  ;;  %v17585_v59 = vld [vmem:[%s17750_s6 + $0x2278] sm:$0xff]  }
 0x450   : > { %v15987_v2 = vpop.f32.mrb[105].mxu1  ;;  %v15968_v3 = vpop.f32.mrb[107].mxu0  ;;  %16268 = vmatprep.subr.bf16.mxu0 %v17548_v0  ;;  %v17586_v60 = vld [vmem:[%s17750_s6 + $0x22f8] sm:$0xff]   ;;  %v17589_v63 = vld [vmem:[%s17750_s6 + $0x2340] sm:$0xff]  }
 0x451   : > { %v12663_v4 = vadd.f32 %v15966_v62, %v19074_v17  ;;  %v15988_v5 = vadd.f32 %v15987_v2, %v15986_v61  ;;  %v15989_v6 = vpop.f32.mrb[106].mxu1  ;;  %16289 = vmatpush3.bf16.msra.mxu1 %v17547_v55  ;;  %v17558_v17 = vld [vmem:[%s17750_s6 + $0x22c0] sm:$0xff]   ;;  %v17587_v55 = vld [vmem:[%s17750_s6 + $0x2238] sm:$0xff]   ;;  %v287_v61 = vld [vmem:[%s17745_s27 + $0x88] sm:$0xff] }
 0x452   : > { %v15990_v8 = vpop.f32.mrb[107].mxu1  ;;  %16290 = vmatprep.subr.bf16.mxu1 %v17549_v1  ;;  %v3450_v62 = vrot.slane %v287_v61, %v17788_v42  ;;  %v3443_v0 = vcombine.high %v287_v61, %v287_v61  ;;  %v17588_v1 = vld [vmem:[%s17750_s6 + $0x22b8] sm:$0xff]  }
 0x453   : > { %v19119_v10 = vadd.f32 %v15988_v5, %v12663_v4  ;;  %16269 = vmatpush3.bf16.msra.mxu0 %v17550_v7  ;;  %v17590_v4 = vld [vmem:[%s17750_s6 + $0x23c0] sm:$0xff]  }
 0x454   : > { %16270 = vmatprep.subr.bf16.mxu0 %v17552_v11  ;;  %v3458_v2 = vcombine.high %v3450_v62, %v3450_v62  ;;  %v3466_v3 = vrot.slane %v3450_v62, %v17788_v42  ;;  %v19168_v5 = vrot.slane %v3443_v0, %v17788_v42  ;;  %v17591_v7 = vld [vmem:[%s17750_s6 + $0x2300] sm:$0xff]  }
 0x455   : > { %16291 = vmatpush3.bf16.msra.mxu1 %v17551_v9 }
 0x456   : > { %16292 = vmatprep.subr.bf16.mxu1 %v17553_v12  ;;  %v3480_v6 = vrot.slane %v3458_v2, %v17788_v42  ;;  %v3459_v8 = vcombine.high %v19168_v5, %v19168_v5  ;;  %v3488_v9 = vcombine.high %v3466_v3, %v3466_v3  ;;  %v17592_v12 = vld [vmem:[%s17750_s6 + $0x2380] sm:$0xff]  }
 0x457   : > { %16271 = vmatpush3.bf16.msra.mxu0 %v17554_v13 }
 0x458   : > { %16300 = vmatprep.subr.bf16.mxu0 %v17557_v16  ;;  %v3490_v11 = vcombine.high %v3480_v6, %v3480_v6  ;;  %v3487_v13 = vrot.slane %v3459_v8, %v17788_v42 }
 0x459   : > { %16293 = vmatpush3.bf16.msra.mxu1 %v17555_v14  ;;  %v17594_v14 = vld [vmem:[%s17750_s6 + $0x23c8] sm:$0xff]  }
 0x45a   : > { %13221 = vmatmul.mubr.bf16.vlgmr.msra.gmra.mrb[132].mxu0 %v3424_v15  ;;  %16322 = vmatprep.subr.bf16.mxu1 %v17558_v17  ;;  %v17595_v15 = vld [vmem:[%s17750_s6 + $0x2308] sm:$0xff]   ;;  %v3491_v16 = vcombine.high %v3487_v13, %v3487_v13  ;;  %v17597_v17 = vld [vmem:[%s17750_s6 + $0x2350] sm:$0xff]  }
 0x45b   : > { %16301 = vmatpush3.bf16.msra.mxu0 %v17559_v18  ;;  %13300 = vmatprep.mubr.bf16.mxu0 %v3480_v6  ;;  %v17596_v18 = vld [vmem:[%s17750_s6 + $0x2388] sm:$0xff]  }
 0x45c   : > { %13261 = vmatmul.mubr.bf16.vlgmr.msra.gmra.mrb[132].mxu1 %v3440_v20  ;;  %16302 = vmatprep.subr.bf16.mxu0 %v17561_v21  ;;  %v17599_v20 = vld [vmem:[%s17750_s6 + $0x2310] sm:$0xff]   ;;  %v17601_v21 = vld [vmem:[%s17750_s6 + $0x2358] sm:$0xff]  }
 0x45d   : > { %16323 = vmatpush3.bf16.msra.mxu1 %v17560_v19  ;;  %13340 = vmatprep.mubr.bf16.mxu1 %v3490_v11  ;;  %v17598_v19 = vld [vmem:[%s17750_s6 + $0x23d0] sm:$0xff]  }
 0x45e   : > { %16324 = vmatprep.subr.bf16.mxu1 %v17562_v22  ;;  %v17600_v22 = vld [vmem:[%s17750_s6 + $0x2390] sm:$0xff]  }
 0x45f   : > { %16303 = vmatpush3.bf16.msra.mxu0 %v17563_v23  ;;  %v17602_v23 = vld [vmem:[%s17750_s6 + $0x23d8] sm:$0xff]  }
 0x460   : > { %16304 = vmatprep.subr.bf16.mxu0 %v17565_v25  ;;  %v17605_v25 = vld [vmem:[%s17750_s6 + $0x2360] sm:$0xff]  }
 0x461   : > { %16325 = vmatpush3.bf16.msra.mxu1 %v17564_v24  ;;  %v17603_v24 = vld [vmem:[%s17750_s6 + $0x2318] sm:$0xff]  }
 0x462   : > { %16326 = vmatprep.subr.bf16.mxu1 %v17566_v26  ;;  %v17604_v26 = vld [vmem:[%s17750_s6 + $0x2398] sm:$0xff]  }
 0x463   : > { %16305 = vmatpush3.bf16.msra.mxu0 %v17567_v27  ;;  %v17606_v27 = vld [vmem:[%s17750_s6 + $0x23e0] sm:$0xff]  }
 0x464   : > { %16306 = vmatprep.subr.bf16.mxu0 %v17569_v29  ;;  %v17609_v29 = vld [vmem:[%s17750_s6 + $0x2368] sm:$0xff]  }
 0x465   : > { %16327 = vmatpush3.bf16.msra.mxu1 %v17568_v28  ;;  %v17607_v28 = vld [vmem:[%s17750_s6 + $0x2320] sm:$0xff]  }
 0x466   : > { %16328 = vmatprep.subr.bf16.mxu1 %v17570_v30  ;;  %v17608_v30 = vld [vmem:[%s17750_s6 + $0x23a0] sm:$0xff]  }
 0x467   : > { %16307 = vmatpush3.bf16.msra.mxu0 %v17571_v31 }
 0x468   : > { %16308 = vmatprep.subr.bf16.mxu0 %v17573_v33 }
 0x469   : > { %16329 = vmatpush3.bf16.msra.mxu1 %v17572_v32  ;;  %v17610_v32 = vld [vmem:[%s17750_s6 + $0x23e8] sm:$0xff]  }
 0x46a   : > { %16330 = vmatprep.subr.bf16.mxu1 %v17574_v34  ;;  %v17611_v34 = vld [vmem:[%s17750_s6 + $0x2328] sm:$0xff]  }
 0x46b   : > { %16309 = vmatpush3.bf16.msra.mxu0 %v17575_v35 }
 0x46c   : > { %16310 = vmatprep.subr.bf16.mxu0 %v17577_v37 }
 0x46d   : > { %v16008_v39 = vpop.f32.mrb[108].mxu0  ;;  %16331 = vmatpush3.bf16.msra.mxu1 %v17576_v36 }
 0x46e   : > { %v16009_v41 = vpop.f32.mrb[109].mxu0  ;;  %16332 = vmatprep.subr.bf16.mxu1 %v17578_v38  ;;  %v17612_v38 = vld [vmem:[%s17750_s6 + $0x23a8] sm:$0xff]  }
 0x46f   : > { %v16030_v44 = vpop.f32.mrb[108].mxu1  ;;  %v16010_v45 = vadd.f32 %v16009_v41, %v16008_v39  ;;  %v16011_v46 = vpop.f32.mrb[110].mxu0  ;;  %16311 = vmatpush3.bf16.msra.mxu0 %v17579_v40  ;;  %v17613_v39 = vld [vmem:[%s17750_s6 + $0x2370] sm:$0xff]  }
 0x470   : > { %v16031_v49 = vpop.f32.mrb[109].mxu1  ;;  %v16012_v50 = vpop.f32.mrb[111].mxu0  ;;  %16312 = vmatprep.subr.bf16.mxu0 %v17581_v47  ;;  %v17614_v46 = vld [vmem:[%s17750_s6 + $0x23f0] sm:$0xff]  }
 0x471   : > { %v12743_v51 = vadd.f32 %v16010_v45, %v19119_v10  ;;  %v16032_v52 = vadd.f32 %v16031_v49, %v16030_v44  ;;  %v16033_v53 = vpop.f32.mrb[110].mxu1  ;;  %16333 = vmatpush3.bf16.msra.mxu1 %v17580_v43  ;;  %v17593_v10 = vld [vmem:[%s17750_s6 + $0x2348] sm:$0xff]   ;;  %v17617_v50 = vld [vmem:[%s17750_s6 + $0x2378] sm:$0xff]  }
 0x472   : > { %v16034_v56 = vpop.f32.mrb[111].mxu1  ;;  %16334 = vmatprep.subr.bf16.mxu1 %v17582_v48  ;;  %v17615_v48 = vld [vmem:[%s17750_s6 + $0x2330] sm:$0xff]   ;;  %v17619_v53 = vld [vmem:[%s17750_s6 + $0x2338] sm:$0xff]  }
 0x473   : > { %v19156_v58 = vadd.f32 %v16032_v52, %v12743_v51  ;;  %16313 = vmatpush3.bf16.msra.mxu0 %v17583_v54  ;;  %v17616_v51 = vld [vmem:[%s17750_s6 + $0x23b0] sm:$0xff]   ;;  %v17618_v52 = vld [vmem:[%s17750_s6 + $0x23f8] sm:$0xff]   ;;  %v3473_v54 = vrot.slane %v19168_v5, %v17788_v42 }
 0x474   : > { %16314 = vmatprep.subr.bf16.mxu0 %v17585_v59  ;;  %v17620_v56 = vld [vmem:[%s17750_s6 + $0x23b8] sm:$0xff]  }
 0x475   : > { %16335 = vmatpush3.bf16.msra.mxu1 %v17584_v57  ;;  %v3489_v57 = vcombine.high %v3473_v54, %v3473_v54 }
 0x476   : > { %16336 = vmatprep.subr.bf16.mxu1 %v17586_v60 }
 0x477   : > { %16315 = vmatpush3.bf16.msra.mxu0 %v17587_v55 }
 0x478   : > { %16344 = vmatprep.subr.bf16.mxu0 %v17589_v63 }
 0x479   : > { %16337 = vmatpush3.bf16.msra.mxu1 %v17588_v1 }
 0x47a   : > { %16366 = vmatprep.subr.bf16.mxu1 %v17590_v4  ;;  %13301 = vmatmul.mubr.bf16.vlgmr.msra.gmra.mrb[136].mxu0 %v3466_v3 }
 0x47b   : > { %16345 = vmatpush3.bf16.msra.mxu0 %v17591_v7  ;;  %13380 = vmatprep.mubr.bf16.mxu0 %v3487_v13 }
 0x47c   : > { %13341 = vmatmul.mubr.bf16.vlgmr.msra.gmra.mrb[136].mxu1 %v3488_v9  ;;  %16346 = vmatprep.subr.bf16.mxu0 %v17593_v10 }
 0x47d   : > { %16367 = vmatpush3.bf16.msra.mxu1 %v17592_v12  ;;  %13420 = vmatprep.mubr.bf16.mxu1 %v3491_v16 }
 0x47e   : > { %16368 = vmatprep.subr.bf16.mxu1 %v17594_v14 }
 0x47f   : > { %16347 = vmatpush3.bf16.msra.mxu0 %v17595_v15 }
 0x480   : > { %16348 = vmatprep.subr.bf16.mxu0 %v17597_v17 }
 0x481   : > { %16369 = vmatpush3.bf16.msra.mxu1 %v17596_v18 }
 0x482   : > { %16370 = vmatprep.subr.bf16.mxu1 %v17598_v19 }
 0x483   : > { %16349 = vmatpush3.bf16.msra.mxu0 %v17599_v20 }
 0x484   : > { %16350 = vmatprep.subr.bf16.mxu0 %v17601_v21 }
 0x485   : > { %16371 = vmatpush3.bf16.msra.mxu1 %v17600_v22 }
 0x486   : > { %16372 = vmatprep.subr.bf16.mxu1 %v17602_v23 }
 0x487   : > { %16351 = vmatpush3.bf16.msra.mxu0 %v17603_v24 }
 0x488   : > { %16352 = vmatprep.subr.bf16.mxu0 %v17605_v25 }
 0x489   : > { %16373 = vmatpush3.bf16.msra.mxu1 %v17604_v26 }
 0x48a   : > { %16374 = vmatprep.subr.bf16.mxu1 %v17606_v27 }
 0x48b   : > { %16353 = vmatpush3.bf16.msra.mxu0 %v17607_v28 }
 0x48c   : > { %16354 = vmatprep.subr.bf16.mxu0 %v17609_v29 }
 0x48d   : > { %v16052_v31 = vpop.f32.mrb[112].mxu0  ;;  %16375 = vmatpush3.bf16.msra.mxu1 %v17608_v30 }
 0x48e   : > { %v16053_v33 = vpop.f32.mrb[113].mxu0  ;;  %16376 = vmatprep.subr.bf16.mxu1 %v17610_v32 }
 0x48f   : > { %v16074_v35 = vpop.f32.mrb[112].mxu1  ;;  %v16054_v36 = vadd.f32 %v16053_v33, %v16052_v31  ;;  %v16055_v37 = vpop.f32.mrb[114].mxu0  ;;  %16355 = vmatpush3.bf16.msra.mxu0 %v17611_v34 }
 0x490   : > { %v16075_v40 = vpop.f32.mrb[113].mxu1  ;;  %v16056_v41 = vpop.f32.mrb[115].mxu0  ;;  %16356 = vmatprep.subr.bf16.mxu0 %v17613_v39 }
 0x491   : > { %v12823_v43 = vadd.f32 %v16054_v36, %v19156_v58  ;;  %v16076_v44 = vadd.f32 %v16075_v40, %v16074_v35  ;;  %v16077_v45 = vpop.f32.mrb[114].mxu1  ;;  %16377 = vmatpush3.bf16.msra.mxu1 %v17612_v38 }
 0x492   : > { %v16078_v47 = vpop.f32.mrb[115].mxu1  ;;  %16378 = vmatprep.subr.bf16.mxu1 %v17614_v46 }
 0x493   : > { %v12863_v49 = vadd.f32 %v16076_v44, %v12823_v43  ;;  %16357 = vmatpush3.bf16.msra.mxu0 %v17615_v48 }
 0x494   : > { %16358 = vmatprep.subr.bf16.mxu0 %v17617_v50 }
 0x495   : > { %16379 = vmatpush3.bf16.msra.mxu1 %v17616_v51 }
 0x496   : > { %16380 = vmatprep.subr.bf16.mxu1 %v17618_v52 }
 0x497   : > { %16359 = vmatpush3.bf16.msra.mxu0 %v17619_v53 }
 0x499   : > { %16381 = vmatpush3.bf16.msra.mxu1 %v17620_v56 }
 0x49a   : > { %13381 = vmatmul.mubr.bf16.vlgmr.msra.gmra.mrb[140].mxu0 %v3473_v54 }
 0x49c   : > { %13421 = vmatmul.mubr.bf16.vlgmr.msra.gmra.mrb[140].mxu1 %v3489_v57 }
 0x4ad   : > { %v16096_v58 = vpop.f32.mrb[116].mxu0 }
 0x4ae   : > { %v16097_v59 = vpop.f32.mrb[117].mxu0 }
 0x4af   : > { %v16118_v60 = vpop.f32.mrb[116].mxu1  ;;  %v16098_v55 = vadd.f32 %v16097_v59, %v16096_v58  ;;  %v16099_v61 = vpop.f32.mrb[118].mxu0 }
 0x4b0   : > { %v16119_v62 = vpop.f32.mrb[117].mxu1  ;;  %v16100_v63 = vpop.f32.mrb[119].mxu0 }
 0x4b1   : > { %v12903_v0 = vadd.f32 %v16098_v55, %v12863_v49  ;;  %v16120_v1 = vadd.f32 %v16119_v62, %v16118_v60  ;;  %v16121_v2 = vpop.f32.mrb[118].mxu1 }
 0x4b2   : > { %v16122_v3 = vpop.f32.mrb[119].mxu1 }
 0x4b3   : > { %v12943_v42 = vadd.f32 %v16120_v1, %v12903_v0 }
 0x4cd   : > { %v16140_v4 = vpop.f32.mrb[120].mxu0 }
 0x4ce   : > { %v16141_v5 = vpop.f32.mrb[121].mxu0 }
 0x4cf   : > { %v16162_v6 = vpop.f32.mrb[120].mxu1  ;;  %v16142_v7 = vadd.f32 %v16141_v5, %v16140_v4  ;;  %v16143_v8 = vpop.f32.mrb[122].mxu0 }
 0x4d0   : > { %v16163_v9 = vpop.f32.mrb[121].mxu1  ;;  %v16144_v10 = vpop.f32.mrb[123].mxu0 }
 0x4d1   : > { %v12983_v11 = vadd.f32 %v16142_v7, %v12943_v42  ;;  %v16164_v12 = vadd.f32 %v16163_v9, %v16162_v6  ;;  %v16165_v13 = vpop.f32.mrb[122].mxu1  ;;  %v269_v10 = vld [vmem:[#allocation2] sm:$0x3] }
 0x4d2   : > { %v16166_v14 = vpop.f32.mrb[123].mxu1 }
 0x4d3   : > { %v13023_v15 = vadd.f32 %v16164_v12, %v12983_v11  ;;  %v17622_v14 = vld [vmem:[%s19278_s3] sm:$0xff] (!%p14789_p7)  }
 0x4ed   : > { %v16184_v16 = vpop.f32.mrb[124].mxu0 }
 0x4ee   : > { %v16185_v17 = vpop.f32.mrb[125].mxu0 }
 0x4ef   : > { %v16206_v18 = vpop.f32.mrb[124].mxu1  ;;  %v16186_v19 = vadd.f32 %v16185_v17, %v16184_v16  ;;  %v16187_v20 = vpop.f32.mrb[126].mxu0  ;;  %v17623_v16 = vld [vmem:[%s19278_s3 + $0x8] sm:$0xff] (!%p14789_p7)   ;;  %v17624_v17 = vld [vmem:[%s19278_s3 + $0x10] sm:$0xff] (!%p14789_p7)  }
 0x4f0   : > { %v16207_v21 = vpop.f32.mrb[125].mxu1  ;;  %v16188_v22 = vpop.f32.mrb[127].mxu0  ;;  %v17627_v20 = vld [vmem:[%s19278_s3 + $0x28] sm:$0xff] (!%p14789_p7)  }
 0x4f1   : > { %v13063_v23 = vadd.f32 %v16186_v19, %v13023_v15  ;;  %v16208_v24 = vadd.f32 %v16207_v21, %v16206_v18  ;;  %v16209_v25 = vpop.f32.mrb[126].mxu1  ;;  %v17686_v15 = vmov (!%p14789_p7), 0.0   ;;  %v17625_v18 = vld [vmem:[%s19278_s3 + $0x18] sm:$0xff] (!%p14789_p7)   ;;  %v17626_v19 = vld [vmem:[%s19278_s3 + $0x20] sm:$0xff] (!%p14789_p7)  }
 0x4f2   : > { %v16210_v26 = vpop.f32.mrb[127].mxu1  ;;  %16397 = vmatprep.subr.bf16.mxu0 (!%p14789_p7), %v17686_v15  ;;  %16413 = vmatprep.mubr.msk.bf16.mxu0 (!%p14789_p7), %vm17687_vm0, %v17686_v15  ;;  %v14790_v22 = vld [vmem:[%s19277_s2] ss:$0 sm:$0xff] (!%p14789_p7) }
 0x4f3   : > { %v13103_v27 = vadd.f32 %v16208_v24, %v13063_v23  ;;  %16398 = vmatpush3.bf16.msra.mxu0 (!%p14789_p7), %v17622_v14  ;;  %v17628_v24 = vld [vmem:[%s19278_s3 + $0x30] sm:$0xff] (!%p14789_p7)   ;;  %v17629_v26 = vld [vmem:[%s19278_s3 + $0x38] sm:$0xff] (!%p14789_p7)  }
 0x4f4   : > { %16399 = vmatprep.subr.bf16.mxu0 (!%p14789_p7), %v17686_v15 }
 0x4f7   : > { %16400 = vmatpush3.bf16.msra.mxu0 (!%p14789_p7), %v17623_v16 }
 0x4f8   : > { %16401 = vmatprep.subr.bf16.mxu0 (!%p14789_p7), %v17686_v15 }
 0x4fb   : > { %16402 = vmatpush3.bf16.msra.mxu0 (!%p14789_p7), %v17624_v17 }
 0x4fc   : > { %16403 = vmatprep.subr.bf16.mxu0 (!%p14789_p7), %v17686_v15 }
 0x4ff   : > { %16404 = vmatpush3.bf16.msra.mxu0 (!%p14789_p7), %v17625_v18 }
 0x500   : > { %16405 = vmatprep.subr.bf16.mxu0 (!%p14789_p7), %v17686_v15 }
 0x503   : > { %16406 = vmatpush3.bf16.msra.mxu0 (!%p14789_p7), %v17626_v19 }
 0x504   : > { %16407 = vmatprep.subr.bf16.mxu0 (!%p14789_p7), %v17686_v15 }
 0x507   : > { %16408 = vmatpush3.bf16.msra.mxu0 (!%p14789_p7), %v17627_v20 }
 0x508   : > { %16409 = vmatprep.subr.bf16.mxu0 (!%p14789_p7), %v17686_v15 }
 0x50b   : > { %16410 = vmatpush3.bf16.msra.mxu0 (!%p14789_p7), %v17628_v24 }
 0x50c   : > { %16411 = vmatprep.subr.bf16.mxu0 (!%p14789_p7), %v17686_v15 }
 0x50d   : > { %v16228_v28 = vpop.f32.mrb[128].mxu0 }
 0x50e   : > { %v16229_v29 = vpop.f32.mrb[129].mxu0 }
 0x50f   : > { %v16250_v30 = vpop.f32.mrb[128].mxu1  ;;  %v16230_v31 = vadd.f32 %v16229_v29, %v16228_v28  ;;  %v16231_v32 = vpop.f32.mrb[130].mxu0  ;;  %16412 = vmatpush3.bf16.msra.mxu0 (!%p14789_p7), %v17629_v26  ;;  %v14791_v28 = vld [vmem:[%s19279_s4] ss:$0 sm:$0xff] (!%p14789_p7) }
 0x510   : > { %v16251_v33 = vpop.f32.mrb[129].mxu1  ;;  %v16232_v34 = vpop.f32.mrb[131].mxu0 }
 0x511   : > { %v13143_v35 = vadd.f32 %v16230_v31, %v13103_v27  ;;  %v16252_v36 = vadd.f32 %v16251_v33, %v16250_v30  ;;  %v16253_v37 = vpop.f32.mrb[130].mxu1 }
 0x512   : > { %v16254_v38 = vpop.f32.mrb[131].mxu1 }
 0x513   : > { %v13183_v39 = vadd.f32 %v16252_v36, %v13143_v35 }
 0x52d   : > { %v16272_v40 = vpop.f32.mrb[132].mxu0 }
 0x52e   : > { %v16273_v41 = vpop.f32.mrb[133].mxu0 }
 0x52f   : > { %v16294_v43 = vpop.f32.mrb[132].mxu1  ;;  %v16274_v44 = vadd.f32 %v16273_v41, %v16272_v40  ;;  %v16275_v45 = vpop.f32.mrb[134].mxu0 }
 0x530   : > { %v16295_v46 = vpop.f32.mrb[133].mxu1  ;;  %v16276_v47 = vpop.f32.mrb[135].mxu0 }
 0x531   : > { %v13223_v48 = vadd.f32 %v16274_v44, %v13183_v39  ;;  %v16296_v49 = vadd.f32 %v16295_v46, %v16294_v43  ;;  %v16297_v50 = vpop.f32.mrb[134].mxu1 }
 0x532   : > { %v16298_v51 = vpop.f32.mrb[135].mxu1 }
 0x533   : > { %v13263_v52 = vadd.f32 %v16296_v49, %v13223_v48 }
 0x54d   : > { %v16316_v53 = vpop.f32.mrb[136].mxu0 }
 0x54e   : > { %v16317_v54 = vpop.f32.mrb[137].mxu0 }
 0x54f   : > { %v16338_v56 = vpop.f32.mrb[136].mxu1  ;;  %v16318_v57 = vadd.f32 %v16317_v54, %v16316_v53  ;;  %v16319_v58 = vpop.f32.mrb[138].mxu0 }
 0x550   : > { %v16339_v59 = vpop.f32.mrb[137].mxu1  ;;  %v16320_v60 = vpop.f32.mrb[139].mxu0 }
 0x551   : > { %v13303_v55 = vadd.f32 %v16318_v57, %v13263_v52  ;;  %v16340_v61 = vadd.f32 %v16339_v59, %v16338_v56  ;;  %v16341_v62 = vpop.f32.mrb[138].mxu1 }
 0x552   : > { %v16342_v63 = vpop.f32.mrb[139].mxu1 }
 0x553   : > { %v13343_v0 = vadd.f32 %v16340_v61, %v13303_v55 }
 0x56d   : > { %v16360_v1 = vpop.f32.mrb[140].mxu0 }
 0x56e   : > { %v16361_v2 = vpop.f32.mrb[141].mxu0 }
 0x56f   : > { %v16382_v3 = vpop.f32.mrb[140].mxu1  ;;  %v16362_v42 = vadd.f32 %v16361_v2, %v16360_v1  ;;  %v16363_v4 = vpop.f32.mrb[142].mxu0 }
 0x570   : > { %v16383_v5 = vpop.f32.mrb[141].mxu1  ;;  %v16364_v6 = vpop.f32.mrb[143].mxu0 }
 0x571   : > { %v13383_v7 = vadd.f32 %v16362_v42, %v13343_v0  ;;  %v16384_v8 = vadd.f32 %v16383_v5, %v16382_v3  ;;  %v16385_v9 = vpop.f32.mrb[142].mxu1  ;;  %13433 = sbr.rel (%p14789_p7) target bundleno = 1628 (0x65c), region = 48 }
 0x572   : > { %v16386_v11 = vpop.f32.mrb[143].mxu1 }
 0x573   : > { %v13423_v12 = vadd.f32 %v16384_v8, %v13383_v7 }
 0x575   : > { %v13428_v13 = vadd.f32 %v13423_v12, %v269_v10 }
 0x577   : > { %13429 = vst [vmem:[#allocation2] sm:$0x3] %v13428_v13 }
 0x57e   : > { %v13434_v21 = vld [vmem:[#allocation2] sm:$0x3] }
 0x57f   : > { %v13442_v23 = vadd.f32 %v14790_v22, %v13434_v21 }
 0x581   : > { %v13443_v25 = vmax.f32 %v13442_v23, 0.0 }
 0x583   : > { %v13444_v27 = vpack.c.bf16 %v13443_v25, %v13443_v25 }
 0x585   : > { %16414 = vmatmul.mubr.bf16.vlgmr.msra.gmra.mrb[0].mxu0 %v13444_v27 }
 0x658   : > { %v13550_v29 = vpop.f32.mrb[0].mxu0 }
 0x659   : > { %v13551_v30 = vadd.f32 %v14791_v28, %v13550_v29  ;;  %v16415_v31 = vpop.f32.mrb[1].mxu0 }
 0x65a   : > { %v13553_v32 = vpop.f32.mrb[2].mxu0 }
 0x65b   : > { %13556 = vst [vmem:[#allocation3] sm:$0x3] %v13551_v30  ;;  %v16416_v33 = vpop.f32.mrb[3].mxu0 }
 0x65c PF: > { %p19240_p8 = scmp.eq.s32.totalorder %s13631_s21, 1  ;;  %s17688_s7 = smov [#allocation3]  }
 0x65d   : > { %s13566_s8 = sshll.u32 %s17688_s7, 4  ;;  %s13567_s8 = int_to_ptr.vmem [resolvable:$true] %s13566_s8 }
 0x65e   : > { %s17630_s9 = scalar_lea.vmem %s13567_s8, 32  ;;  %p17637_p12 = scmp.lt.s32.totalorder %s13567_s8, %s13567_s8 }
 0x65f   : > { %p17631_p9 = scmp.ne.s32.totalorder %s13567_s8, %s17630_s9  ;;  %p17638_p13 = scmp.lt.s32.totalorder %s17630_s9, %s17630_s9 }
 0x661   : > { %p17632_p10 = pnand %p17631_p9, %p19240_p8  ;;  %p17639_p0 = por %p17638_p13, %p17637_p12 }
 0x663   : > { %p17633_p11 = pneg %p17632_p10 }
 0x665   : > { %p17640_p1 = pnand %p17639_p0, %p17633_p11 }
 0x667   : > { %17643 = shalt.err (!%p17640_p1)
}
 0x668   : > { %s17644_s21 = scalar_lea.hbm %s19280_s5, 32 }
 0x669   : > { %p17645_p2 = scmp.ne.s32.totalorder %s19280_s5, %s17644_s21  ;;  %p17650_p5 = scmp.lt.u32.totalorder %s17644_s21, %s19280_s5 }
 0x66b   : > { %p17646_p3 = pnand %p17645_p2, %p19240_p8 }
 0x66d   : > { %p17647_p4 = pneg %p17646_p3 }
 0x66f   : > { %p17652_p6 = pnand %p17650_p5, %p17647_p4 }
 0x671   : > { %17655 = shalt.err (!%p17652_p6)
}
 0x672   : > { %16418 = dma.vmem_to_hbm [thread:$0]  (%p19240_p8), %s13567_s8, 32, %s19280_s5, [#allocation4]  }
 0x673   : > { %17669 = dma.done.wait (%p19240_p8), [#allocation4], 32  }
 0x674   : > { %17671 = vsyncadd (%p19240_p8), [#allocation4], 4294967264 }
 0x675 PF: > { %s16_s20 = sadd.s32 1, %s17682_s20   ;;  %s19282_s18 = smov %s17678_s19 }
 0x676   : > { %p13_p7 = scmp.ge.s32.totalorder %s16_s20, 4   ;;  %s19283_s19 = smov %s19285_s22 }
 0x678   :  { %15 = sbr.rel (!%p13_p7) target bundleno = 2 (0x2), region = 79 }
 0x67f   :  { %13579 = vsyncpa [#allocation4], 1 }
 0x680   :  { %13581 = vsyncpa [#allocation4 + $0x1], 1 }

</bundles_post_ra>
